<compile_context>
chip_gen: v6e
topology: v6e:2x2x1
jax: 0.10.0
libtpu: 0.0.40
codegen_flags: <defaults>
</compile_context>

<pallas_src>
import functools

import numpy as np
import jax
import jax.numpy as jnp
from jax.experimental import pallas as pl
from jax.experimental.pallas import tpu as pltpu


# ------------------------------ fused kernel ------------------------------- #
def _convnet_kernel(xl_ref, m1_ref, b1_ref, m2_ref, b2_ref, wf1_ref, s_ref,
                    fb1_ref, w2_ref, fb2_ref, w3_ref, fb3_ref, o_ref,
                    *, bt, c1, c2, l1):
    f32 = jnp.float32
    bf16 = jnp.bfloat16
    n7 = bt * 7

    # ---- conv1 (5x5, pad=2): ONE bf16 MXU matmul.  The LHS was prebuilt
    # outside the kernel; its 4*n7 rows are ordered (conv1-row mod 4, image, k)
    # so the 2x2 pool pairs below are static row slices.
    z1 = jnp.dot(xl_ref[...], m1_ref[...], preferred_element_type=f32)  # (4*n7, 28*c1)
    b1 = b1_ref[...]
    # pool1 H-max: conv1 rows (4k, 4k+1) -> pool1 row 2k ; (4k+2, 4k+3) -> 2k+1.
    he = jnp.maximum(z1[0 * n7:1 * n7], z1[1 * n7:2 * n7]) + b1
    ho = jnp.maximum(z1[2 * n7:3 * n7], z1[3 * n7:4 * n7]) + b1
    he = jnp.maximum(he, 0.0)                     # ReLU (commutes with max-pool)
    ho = jnp.maximum(ho, 0.0)
    # pool1 W-max via shifted lane slice (only even-w columns feed conv2).
    p1e = jnp.maximum(he[:, :27 * c1], he[:, c1:])        # pool1 rows 2m   (n7, 27*c1)
    p1o = jnp.maximum(ho[:, :27 * c1], ho[:, c1:])        # pool1 rows 2m+1

    # ---- conv2 (3x3, pad=1): build the 3-tap LHS with two sublane rolls, then
    # ONE bf16 MXU matmul covering even and odd output rows (stacked along M).
    row = jax.lax.broadcasted_iota(jnp.int32, (n7, 1), 0) % 7    # k within image
    p1o_dn = jnp.where(row != 0, pltpu.roll(p1o, 1, 0), 0.0)      # pool1 row 2m-1
    p1e_up = jnp.where(row != 6, pltpu.roll(p1e, n7 - 1, 0), 0.0)  # pool1 row 2m+2
    lhs_e = jnp.concatenate([p1o_dn, p1e, p1o], axis=1)   # conv2 rows 2m
    lhs_o = jnp.concatenate([p1e, p1o, p1e_up], axis=1)   # conv2 rows 2m+1
    lhs2 = jnp.concatenate([lhs_e, lhs_o], axis=0).astype(bf16)   # (2*n7, 3*27*c1)

    z2 = jnp.dot(lhs2, m2_ref[...], preferred_element_type=f32)   # (2*n7, 14*c2)
    # pool2 H-max (even/odd conv2 rows) + bias + ReLU fused, then W-max.
    ph = jnp.maximum(jnp.maximum(z2[:n7], z2[n7:]) + b2_ref[...], 0.0)
    p2 = jnp.maximum(ph[:, :13 * c2], ph[:, c2:])                 # (n7, 13*c2)

    # ---- fc1 (torch NCHW flatten folded into wbig columns): one wide matmul,
    # then block-diagonal extraction with 7 VPU selects + a tiny summing matmul.
    g = jnp.dot(p2.astype(bf16), wf1_ref[...], preferred_element_type=f32)  # (n7, 7*l1)
    r = jnp.zeros((n7, l1), f32)
    for h in range(7):
        r = r + jnp.where(row == h, g[:, h * l1:(h + 1) * l1], 0.0)
    a1 = jnp.dot(s_ref[...], r, preferred_element_type=f32) + fb1_ref[...]  # (bt, l1)
    a1 = jnp.maximum(a1, 0.0)
    # TODO(synk): dropout is identity (eval mode); training-mode masking not implemented.

    # ---- fc2 + ReLU + fc3 (tiny, f32); output padded to 128 lanes.
    h2 = jnp.maximum(jnp.dot(a1, w2_ref[...], preferred_element_type=f32)
                     + fb2_ref[...], 0.0)
    o_ref[...] = jnp.dot(h2, w3_ref[...], preferred_element_type=f32) + fb3_ref[...]


# -------------------- one-time parameter preparation ----------------------- #
def prepare_params(params, num_class_pad=128):
    """Torch-layout params -> MXU-friendly stacked banded matrices (done once)."""
    w1, b1, w2, b2, fw1, fb1, fw2, fb2, fw3, fb3 = [
        np.asarray(p, np.float32) for p in params]
    C1, C2 = w1.shape[0], w2.shape[0]
    L1, L2, NC = fw1.shape[0], fw2.shape[0], fw3.shape[0]
    NCP = num_class_pad

    # conv1: stacked banded matrix, rows = (ky, xi), cols = (xo, co); W pad folded in.
    m1s = np.zeros((5 * 28, 28 * C1), np.float32)
    for ky in range(5):
        for kx in range(5):
            for xo in range(28):
                xi = xo + kx - 2
                if 0 <= xi < 28:
                    m1s[ky * 28 + xi, xo * C1:(xo + 1) * C1] = w1[:, 0, ky, kx]
    b1r = np.tile(b1, 28).reshape(1, 28 * C1)

    # conv2: stacked banded matrix reading the un-compacted pool1 columns
    # (even conv1-w only); pool1 W-downsample and conv2 W-padding folded in.
    m2s = np.zeros((3 * 27 * C1, 14 * C2), np.float32)
    for ky in range(3):
        for kx in range(3):
            for xo in range(14):
                xi = xo + kx - 1
                if 0 <= xi < 14:
                    w = 2 * xi
                    m2s[ky * 27 * C1 + w * C1: ky * 27 * C1 + (w + 1) * C1,
                        xo * C2:(xo + 1) * C2] = w2[:, :, ky, kx].T
    b2r = np.tile(b2, 14).reshape(1, 14 * C2)

    # fc1 with torch NCHW flatten order + pool2 W-compaction folded in.
    f4 = fw1.reshape(L1, C2, 7, 7)
    wbig = np.zeros((13 * C2, 7 * L1), np.float32)
    for h in range(7):
        for w in range(7):
            wbig[2 * w * C2:(2 * w + 1) * C2, h * L1:(h + 1) * L1] = f4[:, :, h, w].T

    # fc3 padded to a lane-dense 128-wide output.
    wfc3p = np.zeros((L2, NCP), np.float32); wfc3p[:, :NC] = fw3.T
    fb3p = np.zeros((1, NCP), np.float32);   fb3p[0, :NC] = fb3

    return (jnp.asarray(m1s, jnp.bfloat16), jnp.asarray(b1r),
            jnp.asarray(m2s, jnp.bfloat16), jnp.asarray(b2r),
            jnp.asarray(wbig, jnp.bfloat16), jnp.asarray(fb1.reshape(1, L1)),
            jnp.asarray(np.ascontiguousarray(fw2.T)), jnp.asarray(fb2.reshape(1, L2)),
            jnp.asarray(wfc3p), jnp.asarray(fb3p))


# ------------------------------ full forward ------------------------------- #
@functools.partial(jax.jit, static_argnames=("bt", "nc"))
def convnet_forward(x_nchw, prep, *, bt=8, nc=10):
    (m1s, b1r, m2s, b2r, wbig, fb1r, wfc2, fb2r, wfc3p, fb3p) = prep
    B = x_nchw.shape[0]
    assert x_nchw.shape[1:] == (1, 28, 28), x_nchw.shape
    C1 = b1r.shape[1] // 28
    C2 = b2r.shape[1] // 14
    L1 = fb1r.shape[1]
    NCP = fb3p.shape[1]
    n7 = bt * 7

    nt = -(-B // bt)
    Bp = nt * bt
    x = x_nchw.reshape(B, 28, 28).astype(jnp.float32)
    if Bp != B:
        x = jnp.pad(x, ((0, Bp - B), (0, 0), (0, 0)))

    # Prebuild conv1's shifted-row LHS outside the kernel (pure XLA slicing on a
    # few hundred KB).  Rows are ordered (tile, conv1-row mod 4, image, k) so
    # the in-kernel pooling pairs are static, aligned row slices.
    xp = jnp.pad(x, ((0, 0), (2, 2), (0, 0)))                 # (Bp, 32, 28)
    blocks = []
    for r in range(4):
        per_ky = [xp[:, (r + ky):(r + ky) + 25:4, :] for ky in range(5)]  # (Bp,7,28)
        blocks.append(jnp.concatenate(per_ky, axis=-1))                   # (Bp,7,140)
    lhs = jnp.stack(blocks, axis=1)                                        # (Bp,4,7,140)
    lhs = lhs.reshape(nt, bt, 4, 7, 140).transpose(0, 2, 1, 3, 4)
    lhs = lhs.reshape(nt * 4 * n7, 140).astype(jnp.bfloat16)

    # Per-image row-group summing matrix for the fc1 extraction.
    S = jnp.repeat(jnp.eye(bt, dtype=jnp.float32), 7, axis=1)              # (bt, 7*bt)

    cmap = lambda i: (0, 0)
    out = pl.pallas_call(
        functools.partial(_convnet_kernel, bt=bt, c1=C1, c2=C2, l1=L1),
        out_shape=jax.ShapeDtypeStruct((Bp, NCP), jnp.float32),
        grid_spec=pltpu.PrefetchScalarGridSpec(
            num_scalar_prefetch=0,
            grid=(nt,),
            in_specs=[
                pl.BlockSpec((4 * n7, 140), lambda i: (i, 0)),   # prebuilt conv1 LHS
                pl.BlockSpec(m1s.shape, cmap),                   # conv1 banded W (bf16)
                pl.BlockSpec(b1r.shape, cmap),                   # conv1 bias row
                pl.BlockSpec(m2s.shape, cmap),                   # conv2 banded W (bf16)
                pl.BlockSpec(b2r.shape, cmap),                   # conv2 bias row
                pl.BlockSpec(wbig.shape, cmap),                  # fc1 (flatten folded, bf16)
                pl.BlockSpec(S.shape, cmap),                     # fc1 row-group sum
                pl.BlockSpec(fb1r.shape, cmap),
                pl.BlockSpec(wfc2.shape, cmap),
                pl.BlockSpec(fb2r.shape, cmap),
                pl.BlockSpec(wfc3p.shape, cmap),
                pl.BlockSpec(fb3p.shape, cmap),
            ],
            out_specs=pl.BlockSpec((bt, NCP), lambda i: (i, 0)),
        ),
        compiler_params=pltpu.CompilerParams(
            dimension_semantics=("parallel",)),
    )(lhs, m1s, b1r, m2s, b2r, wbig, S, fb1r, wfc2, fb2r, wfc3p, fb3p)
    return out[:B, :nc]


# ----------------------------- pure-JAX reference -------------------------- #
def reference_forward(x_nchw, params):
    (w1, b1, w2, b2, fw1, fb1, fw2, fb2, fw3, fb3) = params

    def conv(x, w, b, pad):
        y = jax.lax.conv_general_dilated(
            x, w, window_strides=(1, 1), padding=[(pad, pad), (pad, pad)],
            dimension_numbers=("NCHW", "OIHW", "NCHW"))
        return jax.nn.relu(y + b.reshape(1, -1, 1, 1))

    def pool(x):
        return jax.lax.reduce_window(x, -jnp.inf, jax.lax.max,
                                     (1, 1, 2, 2), (1, 1, 2, 2), "VALID")

    y = pool(conv(x_nchw, w1, b1, 2))
    y = pool(conv(y, w2, b2, 1))
    y = y.reshape(y.shape[0], -1)
    y = jax.nn.relu(y @ fw1.T + fb1)
    y = jax.nn.relu(y @ fw2.T + fb2)
    return y @ fw3.T + fb3


if __name__ == "__main__":
    # Small config consistent with the module: input must be 28x28 so that two
    # 2x2 pools yield 7x7 (fc1 in_features = conv2_channels * 7 * 7).
    B, C1, C2, L1, L2, NCLS = 16, 16, 32, 128, 64, 10

    key = jax.random.PRNGKey(0)
    ks = jax.random.split(key, 11)
    x = jax.random.normal(ks[0], (B, 1, 28, 28), jnp.float32)

    params = (
        jax.random.normal(ks[1], (C1, 1, 5, 5), jnp.float32) * 0.1,        # conv1.weight (OIHW)
        jax.random.normal(ks[2], (C1,), jnp.float32) * 0.1,                # conv1.bias
        jax.random.normal(ks[3], (C2, C1, 3, 3), jnp.float32) * 0.1,       # conv2.weight
        jax.random.normal(ks[4], (C2,), jnp.float32) * 0.1,                # conv2.bias
        jax.random.normal(ks[5], (L1, C2 * 7 * 7), jnp.float32) * 0.05,    # fc1.weight (out,in)
        jax.random.normal(ks[6], (L1,), jnp.float32) * 0.05,               # fc1.bias
        jax.random.normal(ks[7], (L2, L1), jnp.float32) * 0.05,            # fc2.weight
        jax.random.normal(ks[8], (L2,), jnp.float32) * 0.05,               # fc2.bias
        jax.random.normal(ks[9], (NCLS, L2), jnp.float32) * 0.05,          # fc3.weight
        jax.random.normal(ks[10], (NCLS,), jnp.float32) * 0.05,            # fc3.bias
    )

    prep = prepare_params(params)   # one-time weight lowering (outside the forward)

    out = jax.block_until_ready(convnet_forward(x, prep, bt=8, nc=NCLS))
    ref = jax.block_until_ready(reference_forward(x, params))

    assert out.shape == (B, NCLS), out.shape
    # bf16 weights/LHS on the big matmuls -> loosened tolerance vs. f32 reference.
    assert jnp.allclose(out, ref, rtol=2e-2, atol=2e-2), float(jnp.max(jnp.abs(out - ref)))
    print("KERNEL_OK")
</pallas_src>

<mosaic_0001>
module attributes {stable_mosaic.version = 11 : i64} {
  func.func @_convnet_kernel(%arg0: i32, %arg1: memref<224x140xbf16, #tpu.memory_space<vmem>>, %arg2: memref<140x448xbf16, #tpu.memory_space<vmem>>, %arg3: memref<1x448xf32, #tpu.memory_space<vmem>>, %arg4: memref<1296x448xbf16, #tpu.memory_space<vmem>>, %arg5: memref<1x448xf32, #tpu.memory_space<vmem>>, %arg6: memref<416x896xbf16, #tpu.memory_space<vmem>>, %arg7: memref<8x56xf32, #tpu.memory_space<vmem>>, %arg8: memref<1x128xf32, #tpu.memory_space<vmem>>, %arg9: memref<128x64xf32, #tpu.memory_space<vmem>>, %arg10: memref<1x64xf32, #tpu.memory_space<vmem>>, %arg11: memref<64x128xf32, #tpu.memory_space<vmem>>, %arg12: memref<1x128xf32, #tpu.memory_space<vmem>>, %arg13: memref<8x128xf32, #tpu.memory_space<vmem>>) attributes {dimension_semantics = [#tpu.dimension_semantics<parallel>], iteration_bounds = array<i64: 2>, scalar_prefetch = 0 : i64, scratch_operands = 0 : i64, tpu.core_type = #tpu.core_type<tc>, window_params = [{transform_indices = @transform_0, window_bounds = array<i64: 224, 140>}, {pipeline_mode = #tpu.pipeline_mode<synchronous>, transform_indices = @transform_1, window_bounds = array<i64: 140, 448>}, {pipeline_mode = #tpu.pipeline_mode<synchronous>, transform_indices = @transform_2, window_bounds = array<i64: 1, 448>}, {pipeline_mode = #tpu.pipeline_mode<synchronous>, transform_indices = @transform_3, window_bounds = array<i64: 1296, 448>}, {pipeline_mode = #tpu.pipeline_mode<synchronous>, transform_indices = @transform_4, window_bounds = array<i64: 1, 448>}, {pipeline_mode = #tpu.pipeline_mode<synchronous>, transform_indices = @transform_5, window_bounds = array<i64: 416, 896>}, {pipeline_mode = #tpu.pipeline_mode<synchronous>, transform_indices = @transform_6, window_bounds = array<i64: 8, 56>}, {pipeline_mode = #tpu.pipeline_mode<synchronous>, transform_indices = @transform_7, window_bounds = array<i64: 1, 128>}, {pipeline_mode = #tpu.pipeline_mode<synchronous>, transform_indices = @transform_8, window_bounds = array<i64: 128, 64>}, {pipeline_mode = #tpu.pipeline_mode<synchronous>, transform_indices = @transform_9, window_bounds = array<i64: 1, 64>}, {pipeline_mode = #tpu.pipeline_mode<synchronous>, transform_indices = @transform_10, window_bounds = array<i64: 64, 128>}, {pipeline_mode = #tpu.pipeline_mode<synchronous>, transform_indices = @transform_11, window_bounds = array<i64: 1, 128>}, {transform_indices = @transform_12, window_bounds = array<i64: 8, 128>}]} {
    %c0 = arith.constant 0 : index
    %c0_0 = arith.constant 0 : index
    %0 = vector.load %arg1[%c0, %c0_0] : memref<224x140xbf16, #tpu.memory_space<vmem>>, vector<224x140xbf16>
    %c0_1 = arith.constant 0 : index
    %c0_2 = arith.constant 0 : index
    %1 = vector.load %arg2[%c0_1, %c0_2] : memref<140x448xbf16, #tpu.memory_space<vmem>>, vector<140x448xbf16>
    %cst = arith.constant dense<0.000000e+00> : vector<224x448xf32>
    %2 = tpu.matmul %0, %1, %cst {dimension_numbers = #tpu.dot_dimension_numbers<[1], [0], [0], [1], [0, 0, 1, 1], [], []>} : vector<224x140xbf16>, vector<140x448xbf16>, vector<224x448xf32> -> vector<224x448xf32>
    %c0_3 = arith.constant 0 : index
    %c0_4 = arith.constant 0 : index
    %3 = vector.load %arg3[%c0_3, %c0_4] : memref<1x448xf32, #tpu.memory_space<vmem>>, vector<1x448xf32>
    %4 = vector.extract_strided_slice %2 {offsets = [0, 0], sizes = [56, 448], strides = [1, 1]} : vector<224x448xf32> to vector<56x448xf32>
    %5 = vector.extract_strided_slice %2 {offsets = [56, 0], sizes = [56, 448], strides = [1, 1]} : vector<224x448xf32> to vector<56x448xf32>
    %6 = arith.maximumf %4, %5 : vector<56x448xf32>
    %7 = vector.broadcast %3 : vector<1x448xf32> to vector<56x448xf32>
    %8 = arith.addf %6, %7 : vector<56x448xf32>
    %9 = vector.extract_strided_slice %2 {offsets = [112, 0], sizes = [56, 448], strides = [1, 1]} : vector<224x448xf32> to vector<56x448xf32>
    %10 = vector.extract_strided_slice %2 {offsets = [168, 0], sizes = [56, 448], strides = [1, 1]} : vector<224x448xf32> to vector<56x448xf32>
    %11 = arith.maximumf %9, %10 : vector<56x448xf32>
    %12 = vector.broadcast %3 : vector<1x448xf32> to vector<56x448xf32>
    %13 = arith.addf %11, %12 : vector<56x448xf32>
    %cst_5 = arith.constant 0.000000e+00 : f32
    %14 = vector.broadcast %cst_5 : f32 to vector<56x448xf32>
    %15 = arith.maximumf %8, %14 : vector<56x448xf32>
    %cst_6 = arith.constant 0.000000e+00 : f32
    %16 = vector.broadcast %cst_6 : f32 to vector<56x448xf32>
    %17 = arith.maximumf %13, %16 : vector<56x448xf32>
    %18 = vector.extract_strided_slice %15 {offsets = [0, 0], sizes = [56, 432], strides = [1, 1]} : vector<56x448xf32> to vector<56x432xf32>
    %19 = vector.extract_strided_slice %15 {offsets = [0, 16], sizes = [56, 432], strides = [1, 1]} : vector<56x448xf32> to vector<56x432xf32>
    %20 = arith.maximumf %18, %19 : vector<56x432xf32>
    %21 = vector.extract_strided_slice %17 {offsets = [0, 0], sizes = [56, 432], strides = [1, 1]} : vector<56x448xf32> to vector<56x432xf32>
    %22 = vector.extract_strided_slice %17 {offsets = [0, 16], sizes = [56, 432], strides = [1, 1]} : vector<56x448xf32> to vector<56x432xf32>
    %23 = arith.maximumf %21, %22 : vector<56x432xf32>
    %24 = tpu.iota {dimensions = array<i32: 0>} : vector<56x1xi32>
    %c7_i32 = arith.constant 7 : i32
    %c0_i32 = arith.constant 0 : i32
    %25 = arith.cmpi eq, %c7_i32, %c0_i32 : i32
    %c1_i32 = arith.constant 1 : i32
    %26 = arith.select %25, %c1_i32, %c7_i32 : i32
    %27 = vector.broadcast %26 : i32 to vector<56x1xi32>
    %28 = arith.remsi %24, %27 : vector<56x1xi32>
    %c0_i32_7 = arith.constant 0 : i32
    %29 = vector.broadcast %c0_i32_7 : i32 to vector<56x1xi32>
    %30 = arith.cmpi ne, %28, %29 : vector<56x1xi32>
    %c0_i32_8 = arith.constant 0 : i32
    %31 = vector.broadcast %c0_i32_8 : i32 to vector<56x1xi32>
    %32 = arith.cmpi slt, %28, %31 : vector<56x1xi32>
    %c0_i32_9 = arith.constant 0 : i32
    %33 = arith.cmpi slt, %26, %c0_i32_9 : i32
    %34 = vector.broadcast %33 : i1 to vector<56x1xi1>
    %35 = vector.broadcast %34 : vector<56x1xi1> to vector<56x1xi1>
    %36 = arith.xori %32, %35 : vector<56x1xi1>
    %37 = arith.andi %36, %30 : vector<56x1xi1>
    %38 = vector.broadcast %26 : i32 to vector<56x1xi32>
    %39 = arith.addi %28, %38 : vector<56x1xi32>
    %40 = arith.select %37, %39, %28 : vector<56x1xi1>, vector<56x1xi32>
    %c0_i32_10 = arith.constant 0 : i32
    %41 = vector.broadcast %c0_i32_10 : i32 to vector<56x1xi32>
    %42 = arith.cmpi ne, %40, %41 : vector<56x1xi32>
    %c1_i32_11 = arith.constant 1 : i32
    %43 = tpu.dynamic_rotate %23 by %c1_i32_11 dim 0 : vector<56x432xf32>, i32 -> vector<56x432xf32>
    %cst_12 = arith.constant 0.000000e+00 : f32
    %44 = vector.shape_cast %42 : vector<56x1xi1> to vector<56x1xi1>
    %45 = vector.broadcast %44 : vector<56x1xi1> to vector<56x432xi1>
    %46 = vector.broadcast %cst_12 : f32 to vector<56x432xf32>
    %47 = arith.select %45, %43, %46 : vector<56x432xi1>, vector<56x432xf32>
    %c6_i32 = arith.constant 6 : i32
    %48 = vector.broadcast %c6_i32 : i32 to vector<56x1xi32>
    %49 = arith.cmpi ne, %40, %48 : vector<56x1xi32>
    %c55_i32 = arith.constant 55 : i32
    %50 = tpu.dynamic_rotate %20 by %c55_i32 dim 0 : vector<56x432xf32>, i32 -> vector<56x432xf32>
    %cst_13 = arith.constant 0.000000e+00 : f32
    %51 = vector.shape_cast %49 : vector<56x1xi1> to vector<56x1xi1>
    %52 = vector.broadcast %51 : vector<56x1xi1> to vector<56x432xi1>
    %53 = vector.broadcast %cst_13 : f32 to vector<56x432xf32>
    %54 = arith.select %52, %50, %53 : vector<56x432xi1>, vector<56x432xf32>
    %55 = tpu.concatenate %47, %20, %23 in 1 : vector<56x432xf32>, vector<56x432xf32>, vector<56x432xf32> -> vector<56x1296xf32>
    %56 = tpu.concatenate %20, %23, %54 in 1 : vector<56x432xf32>, vector<56x432xf32>, vector<56x432xf32> -> vector<56x1296xf32>
    %57 = tpu.concatenate %55, %56 in 0 : vector<56x1296xf32>, vector<56x1296xf32> -> vector<112x1296xf32>
    %58 = arith.truncf %57 : vector<112x1296xf32> to vector<112x1296xbf16>
    %c0_14 = arith.constant 0 : index
    %c0_15 = arith.constant 0 : index
    %59 = vector.load %arg4[%c0_14, %c0_15] : memref<1296x448xbf16, #tpu.memory_space<vmem>>, vector<1296x448xbf16>
    %cst_16 = arith.constant dense<0.000000e+00> : vector<112x448xf32>
    %60 = tpu.matmul %58, %59, %cst_16 {dimension_numbers = #tpu.dot_dimension_numbers<[1], [0], [0], [1], [0, 0, 1, 1], [], []>} : vector<112x1296xbf16>, vector<1296x448xbf16>, vector<112x448xf32> -> vector<112x448xf32>
    %61 = vector.extract_strided_slice %60 {offsets = [0, 0], sizes = [56, 448], strides = [1, 1]} : vector<112x448xf32> to vector<56x448xf32>
    %62 = vector.extract_strided_slice %60 {offsets = [56, 0], sizes = [56, 448], strides = [1, 1]} : vector<112x448xf32> to vector<56x448xf32>
    %63 = arith.maximumf %61, %62 : vector<56x448xf32>
    %c0_17 = arith.constant 0 : index
    %c0_18 = arith.constant 0 : index
    %64 = vector.load %arg5[%c0_17, %c0_18] : memref<1x448xf32, #tpu.memory_space<vmem>>, vector<1x448xf32>
    %65 = vector.broadcast %64 : vector<1x448xf32> to vector<56x448xf32>
    %66 = arith.addf %63, %65 : vector<56x448xf32>
    %cst_19 = arith.constant 0.000000e+00 : f32
    %67 = vector.broadcast %cst_19 : f32 to vector<56x448xf32>
    %68 = arith.maximumf %66, %67 : vector<56x448xf32>
    %69 = vector.extract_strided_slice %68 {offsets = [0, 0], sizes = [56, 416], strides = [1, 1]} : vector<56x448xf32> to vector<56x416xf32>
    %70 = vector.extract_strided_slice %68 {offsets = [0, 32], sizes = [56, 416], strides = [1, 1]} : vector<56x448xf32> to vector<56x416xf32>
    %71 = arith.maximumf %69, %70 : vector<56x416xf32>
    %72 = arith.truncf %71 : vector<56x416xf32> to vector<56x416xbf16>
    %c0_20 = arith.constant 0 : index
    %c0_21 = arith.constant 0 : index
    %73 = vector.load %arg6[%c0_20, %c0_21] : memref<416x896xbf16, #tpu.memory_space<vmem>>, vector<416x896xbf16>
    %cst_22 = arith.constant dense<0.000000e+00> : vector<56x896xf32>
    %74 = tpu.matmul %72, %73, %cst_22 {dimension_numbers = #tpu.dot_dimension_numbers<[1], [0], [0], [1], [0, 0, 1, 1], [], []>} : vector<56x416xbf16>, vector<416x896xbf16>, vector<56x896xf32> -> vector<56x896xf32>
    %cst_23 = arith.constant 0.000000e+00 : f32
    %75 = vector.broadcast %cst_23 : f32 to vector<56x128xf32>
    %c0_i32_24 = arith.constant 0 : i32
    %76 = vector.broadcast %c0_i32_24 : i32 to vector<56x1xi32>
    %77 = arith.cmpi eq, %40, %76 : vector<56x1xi32>
    %78 = vector.extract_strided_slice %74 {offsets = [0, 0], sizes = [56, 128], strides = [1, 1]} : vector<56x896xf32> to vector<56x128xf32>
    %cst_25 = arith.constant 0.000000e+00 : f32
    %79 = vector.shape_cast %77 : vector<56x1xi1> to vector<56x1xi1>
    %80 = vector.broadcast %79 : vector<56x1xi1> to vector<56x128xi1>
    %81 = vector.broadcast %cst_25 : f32 to vector<56x128xf32>
    %82 = arith.select %80, %78, %81 : vector<56x128xi1>, vector<56x128xf32>
    %83 = arith.addf %75, %82 : vector<56x128xf32>
    %c1_i32_26 = arith.constant 1 : i32
    %84 = vector.broadcast %c1_i32_26 : i32 to vector<56x1xi32>
    %85 = arith.cmpi eq, %40, %84 : vector<56x1xi32>
    %86 = vector.extract_strided_slice %74 {offsets = [0, 128], sizes = [56, 128], strides = [1, 1]} : vector<56x896xf32> to vector<56x128xf32>
    %cst_27 = arith.constant 0.000000e+00 : f32
    %87 = vector.shape_cast %85 : vector<56x1xi1> to vector<56x1xi1>
    %88 = vector.broadcast %87 : vector<56x1xi1> to vector<56x128xi1>
    %89 = vector.broadcast %cst_27 : f32 to vector<56x128xf32>
    %90 = arith.select %88, %86, %89 : vector<56x128xi1>, vector<56x128xf32>
    %91 = arith.addf %83, %90 : vector<56x128xf32>
    %c2_i32 = arith.constant 2 : i32
    %92 = vector.broadcast %c2_i32 : i32 to vector<56x1xi32>
    %93 = arith.cmpi eq, %40, %92 : vector<56x1xi32>
    %94 = vector.extract_strided_slice %74 {offsets = [0, 256], sizes = [56, 128], strides = [1, 1]} : vector<56x896xf32> to vector<56x128xf32>
    %cst_28 = arith.constant 0.000000e+00 : f32
    %95 = vector.shape_cast %93 : vector<56x1xi1> to vector<56x1xi1>
    %96 = vector.broadcast %95 : vector<56x1xi1> to vector<56x128xi1>
    %97 = vector.broadcast %cst_28 : f32 to vector<56x128xf32>
    %98 = arith.select %96, %94, %97 : vector<56x128xi1>, vector<56x128xf32>
    %99 = arith.addf %91, %98 : vector<56x128xf32>
    %c3_i32 = arith.constant 3 : i32
    %100 = vector.broadcast %c3_i32 : i32 to vector<56x1xi32>
    %101 = arith.cmpi eq, %40, %100 : vector<56x1xi32>
    %102 = vector.extract_strided_slice %74 {offsets = [0, 384], sizes = [56, 128], strides = [1, 1]} : vector<56x896xf32> to vector<56x128xf32>
    %cst_29 = arith.constant 0.000000e+00 : f32
    %103 = vector.shape_cast %101 : vector<56x1xi1> to vector<56x1xi1>
    %104 = vector.broadcast %103 : vector<56x1xi1> to vector<56x128xi1>
    %105 = vector.broadcast %cst_29 : f32 to vector<56x128xf32>
    %106 = arith.select %104, %102, %105 : vector<56x128xi1>, vector<56x128xf32>
    %107 = arith.addf %99, %106 : vector<56x128xf32>
    %c4_i32 = arith.constant 4 : i32
    %108 = vector.broadcast %c4_i32 : i32 to vector<56x1xi32>
    %109 = arith.cmpi eq, %40, %108 : vector<56x1xi32>
    %110 = vector.extract_strided_slice %74 {offsets = [0, 512], sizes = [56, 128], strides = [1, 1]} : vector<56x896xf32> to vector<56x128xf32>
    %cst_30 = arith.constant 0.000000e+00 : f32
    %111 = vector.shape_cast %109 : vector<56x1xi1> to vector<56x1xi1>
    %112 = vector.broadcast %111 : vector<56x1xi1> to vector<56x128xi1>
    %113 = vector.broadcast %cst_30 : f32 to vector<56x128xf32>
    %114 = arith.select %112, %110, %113 : vector<56x128xi1>, vector<56x128xf32>
    %115 = arith.addf %107, %114 : vector<56x128xf32>
    %c5_i32 = arith.constant 5 : i32
    %116 = vector.broadcast %c5_i32 : i32 to vector<56x1xi32>
    %117 = arith.cmpi eq, %40, %116 : vector<56x1xi32>
    %118 = vector.extract_strided_slice %74 {offsets = [0, 640], sizes = [56, 128], strides = [1, 1]} : vector<56x896xf32> to vector<56x128xf32>
    %cst_31 = arith.constant 0.000000e+00 : f32
    %119 = vector.shape_cast %117 : vector<56x1xi1> to vector<56x1xi1>
    %120 = vector.broadcast %119 : vector<56x1xi1> to vector<56x128xi1>
    %121 = vector.broadcast %cst_31 : f32 to vector<56x128xf32>
    %122 = arith.select %120, %118, %121 : vector<56x128xi1>, vector<56x128xf32>
    %123 = arith.addf %115, %122 : vector<56x128xf32>
    %c6_i32_32 = arith.constant 6 : i32
    %124 = vector.broadcast %c6_i32_32 : i32 to vector<56x1xi32>
    %125 = arith.cmpi eq, %40, %124 : vector<56x1xi32>
    %126 = vector.extract_strided_slice %74 {offsets = [0, 768], sizes = [56, 128], strides = [1, 1]} : vector<56x896xf32> to vector<56x128xf32>
    %cst_33 = arith.constant 0.000000e+00 : f32
    %127 = vector.shape_cast %125 : vector<56x1xi1> to vector<56x1xi1>
    %128 = vector.broadcast %127 : vector<56x1xi1> to vector<56x128xi1>
    %129 = vector.broadcast %cst_33 : f32 to vector<56x128xf32>
    %130 = arith.select %128, %126, %129 : vector<56x128xi1>, vector<56x128xf32>
    %131 = arith.addf %123, %130 : vector<56x128xf32>
    %c0_34 = arith.constant 0 : index
    %c0_35 = arith.constant 0 : index
    %132 = vector.load %arg7[%c0_34, %c0_35] : memref<8x56xf32, #tpu.memory_space<vmem>>, vector<8x56xf32>
    %cst_36 = arith.constant dense<0.000000e+00> : vector<8x128xf32>
    %133 = tpu.matmul %132, %131, %cst_36 {dimension_numbers = #tpu.dot_dimension_numbers<[1], [0], [0], [1], [0, 0, 1, 1], [], []>} : vector<8x56xf32>, vector<56x128xf32>, vector<8x128xf32> -> vector<8x128xf32>
    %c0_37 = arith.constant 0 : index
    %c0_38 = arith.constant 0 : index
    %134 = vector.load %arg8[%c0_37, %c0_38] : memref<1x128xf32, #tpu.memory_space<vmem>>, vector<1x128xf32>
    %135 = vector.broadcast %134 : vector<1x128xf32> to vector<8x128xf32>
    %136 = arith.addf %133, %135 : vector<8x128xf32>
    %cst_39 = arith.constant 0.000000e+00 : f32
    %137 = vector.broadcast %cst_39 : f32 to vector<8x128xf32>
    %138 = arith.maximumf %136, %137 : vector<8x128xf32>
    %c0_40 = arith.constant 0 : index
    %c0_41 = arith.constant 0 : index
    %139 = vector.load %arg9[%c0_40, %c0_41] : memref<128x64xf32, #tpu.memory_space<vmem>>, vector<128x64xf32>
    %cst_42 = arith.constant dense<0.000000e+00> : vector<8x64xf32>
    %140 = tpu.matmul %138, %139, %cst_42 {dimension_numbers = #tpu.dot_dimension_numbers<[1], [0], [0], [1], [0, 0, 1, 1], [], []>} : vector<8x128xf32>, vector<128x64xf32>, vector<8x64xf32> -> vector<8x64xf32>
    %c0_43 = arith.constant 0 : index
    %c0_44 = arith.constant 0 : index
    %141 = vector.load %arg10[%c0_43, %c0_44] : memref<1x64xf32, #tpu.memory_space<vmem>>, vector<1x64xf32>
    %142 = vector.broadcast %141 : vector<1x64xf32> to vector<8x64xf32>
    %143 = arith.addf %140, %142 : vector<8x64xf32>
    %cst_45 = arith.constant 0.000000e+00 : f32
    %144 = vector.broadcast %cst_45 : f32 to vector<8x64xf32>
    %145 = arith.maximumf %143, %144 : vector<8x64xf32>
    %c0_46 = arith.constant 0 : index
    %c0_47 = arith.constant 0 : index
    %146 = vector.load %arg11[%c0_46, %c0_47] : memref<64x128xf32, #tpu.memory_space<vmem>>, vector<64x128xf32>
    %cst_48 = arith.constant dense<0.000000e+00> : vector<8x128xf32>
    %147 = tpu.matmul %145, %146, %cst_48 {dimension_numbers = #tpu.dot_dimension_numbers<[1], [0], [0], [1], [0, 0, 1, 1], [], []>} : vector<8x64xf32>, vector<64x128xf32>, vector<8x128xf32> -> vector<8x128xf32>
    %c0_49 = arith.constant 0 : index
    %c0_50 = arith.constant 0 : index
    %148 = vector.load %arg12[%c0_49, %c0_50] : memref<1x128xf32, #tpu.memory_space<vmem>>, vector<1x128xf32>
    %149 = vector.broadcast %148 : vector<1x128xf32> to vector<8x128xf32>
    %150 = arith.addf %147, %149 : vector<8x128xf32>
    %c0_51 = arith.constant 0 : index
    %c0_52 = arith.constant 0 : index
    %151 = vector.load %arg13[%c0_51, %c0_52] : memref<8x128xf32, #tpu.memory_space<vmem>>, vector<8x128xf32>
    tpu.vector_store %arg13[%c0_51, %c0_52], %150 {strides = array<i32>} : memref<8x128xf32, #tpu.memory_space<vmem>>, vector<8x128xf32>,
    return
  }
  func.func @transform_0(%arg0: i32) -> (i32, i32) {
    %c0_i32 = arith.constant 0 : i32
    %c0_i32_0 = arith.constant 0 : i32
    return %arg0, %c0_i32 : i32, i32
  }
  func.func @transform_1(%arg0: i32) -> (i32, i32) {
    %c0_i32 = arith.constant 0 : i32
    %c0_i32_0 = arith.constant 0 : i32
    %c0_i32_1 = arith.constant 0 : i32
    return %c0_i32, %c0_i32_0 : i32, i32
  }
  func.func @transform_2(%arg0: i32) -> (i32, i32) {
    %c0_i32 = arith.constant 0 : i32
    %c0_i32_0 = arith.constant 0 : i32
    %c0_i32_1 = arith.constant 0 : i32
    return %c0_i32, %c0_i32_0 : i32, i32
  }
  func.func @transform_3(%arg0: i32) -> (i32, i32) {
    %c0_i32 = arith.constant 0 : i32
    %c0_i32_0 = arith.constant 0 : i32
    %c0_i32_1 = arith.constant 0 : i32
    return %c0_i32, %c0_i32_0 : i32, i32
  }
  func.func @transform_4(%arg0: i32) -> (i32, i32) {
    %c0_i32 = arith.constant 0 : i32
    %c0_i32_0 = arith.constant 0 : i32
    %c0_i32_1 = arith.constant 0 : i32
    return %c0_i32, %c0_i32_0 : i32, i32
  }
  func.func @transform_5(%arg0: i32) -> (i32, i32) {
    %c0_i32 = arith.constant 0 : i32
    %c0_i32_0 = arith.constant 0 : i32
    %c0_i32_1 = arith.constant 0 : i32
    return %c0_i32, %c0_i32_0 : i32, i32
  }
  func.func @transform_6(%arg0: i32) -> (i32, i32) {
    %c0_i32 = arith.constant 0 : i32
    %c0_i32_0 = arith.constant 0 : i32
    %c0_i32_1 = arith.constant 0 : i32
    return %c0_i32, %c0_i32_0 : i32, i32
  }
  func.func @transform_7(%arg0: i32) -> (i32, i32) {
    %c0_i32 = arith.constant 0 : i32
    %c0_i32_0 = arith.constant 0 : i32
    %c0_i32_1 = arith.constant 0 : i32
    return %c0_i32, %c0_i32_0 : i32, i32
  }
  func.func @transform_8(%arg0: i32) -> (i32, i32) {
    %c0_i32 = arith.constant 0 : i32
    %c0_i32_0 = arith.constant 0 : i32
    %c0_i32_1 = arith.constant 0 : i32
    return %c0_i32, %c0_i32_0 : i32, i32
  }
  func.func @transform_9(%arg0: i32) -> (i32, i32) {
    %c0_i32 = arith.constant 0 : i32
    %c0_i32_0 = arith.constant 0 : i32
    %c0_i32_1 = arith.constant 0 : i32
    return %c0_i32, %c0_i32_0 : i32, i32
  }
  func.func @transform_10(%arg0: i32) -> (i32, i32) {
    %c0_i32 = arith.constant 0 : i32
    %c0_i32_0 = arith.constant 0 : i32
    %c0_i32_1 = arith.constant 0 : i32
    return %c0_i32, %c0_i32_0 : i32, i32
  }
  func.func @transform_11(%arg0: i32) -> (i32, i32) {
    %c0_i32 = arith.constant 0 : i32
    %c0_i32_0 = arith.constant 0 : i32
    %c0_i32_1 = arith.constant 0 : i32
    return %c0_i32, %c0_i32_0 : i32, i32
  }
  func.func @transform_12(%arg0: i32) -> (i32, i32) {
    %c0_i32 = arith.constant 0 : i32
    %c0_i32_0 = arith.constant 0 : i32
    return %arg0, %c0_i32 : i32, i32
  }
}

</mosaic_0001>

<bundles_post_ra>
// kernel: convnet_forward.1
= control target key start
LH: loop header
LB: loop body
LE: loop exit
PB: predicated region body
PF: predicated region fallthrough
CT: control target
= control target key end

     0   :  { %17 = vsyncpa [#allocation3], 0  ;;  %s16784_s0 = inlined_call_operand.vmem [shape: bf16[448,140], index: 0, kind: input, shape index: {}]   ;;  %s16785_s1 = inlined_call_operand.vmem [shape: bf16[140,448], index: 1, kind: input, shape index: {}]   ;;  %s16786_s2 = inlined_call_operand.vmem [shape: f32[1,448], index: 2, kind: input, shape index: {}]   ;;  %s16787_s3 = inlined_call_operand.vmem [shape: bf16[1296,448], index: 3, kind: input, shape index: {}]   ;;  %s16788_s4 = inlined_call_operand.vmem [shape: f32[1,448], index: 4, kind: input, shape index: {}]   ;;  %s16789_s5 = inlined_call_operand.vmem [shape: bf16[416,896], index: 5, kind: input, shape index: {}]   ;;  %s16790_s6 = inlined_call_operand.vmem [shape: f32[8,56], index: 6, kind: input, shape index: {}]   ;;  %s16791_s7 = inlined_call_operand.vmem [shape: f32[1,128], index: 7, kind: input, shape index: {}]   ;;  %s16792_s8 = inlined_call_operand.vmem [shape: f32[128,64], index: 8, kind: input, shape index: {}]   ;;  %s16793_s9 = inlined_call_operand.vmem [shape: f32[1,64], index: 9, kind: input, shape index: {}]   ;;  %s16794_s10 = inlined_call_operand.vmem [shape: f32[64,128], index: 10, kind: input, shape index: {}]   ;;  %s16795_s11 = inlined_call_operand.vmem [shape: f32[1,128], index: 11, kind: input, shape index: {}]   ;;  %s16796_s12 = inlined_call_operand.hbm [shape: f32[16,128], index: 12, kind: output, shape index: {}]  }
   0x1   :  { %19 = vsyncpa [#allocation3 + $0x1], 0  ;;  %s10844_s21 = smov 0   ;;  %s10846_s22 = smov 0  }
   0x2   :  { %s10848_s23 = smov 0   ;;  %s10850_s24 = smov 0  }
   0x3 LB: > { %17093 = sst [smem:[#allocation5_spill]] %s10765_s23  ;;  %s10865_s25 = sadd.s32 4294967295, %s10769_s24   ;;  %s10769_s24 = sphi %s10850_s24, %s17854_s24   ;;  %s10765_s23 = sphi %s10848_s23, %s17856_s23   ;;  %s10761_s22 = sphi %s10846_s22, %s17858_s22   ;;  %s10757_s21 = sphi %s10844_s21, %s17857_s21  }
   0x4   : > { %s8458_s26 = sadd.s32 4294967294, %s10769_s24   ;;  %s10869_s27 = sadd.s32 1, %s10769_s24  }
   0x5   : > { %17094 = sst [smem:[#allocation6_spill]] %s10869_s27  ;;  %s289_s28 = sadd.s32 1, %s10765_s23 }
   0x6   : > { %s286_s29 = ssub.s32 %s10769_s24, %s10869_s27  ;;  %p299_p0 = scmp.ne.s32.totalorder %s10765_s23, %s10761_s22 }
   0x7   : > { %p287_p1 = scmp.eq.s32.totalorder %s286_s29, 0  ;;  %p300_p2 = scmp.eq.s32.totalorder %s10865_s25, 1 }
   0x8   : > { %p305_p3 = scmp.ne.s32.totalorder %s10761_s22, %s10757_s21  ;;  %p306_p4 = scmp.eq.s32.totalorder %s8458_s26, 1 }
   0x9   : > { %s10880_s30 = scalar_select %p287_p1, %s10765_s23, %s289_s28  }
   0xa   : > { %p10882_p5 = por %p300_p2, %p299_p0  ;;  %p10886_p6 = por %p306_p4, %p305_p3 }
   0xb   : > { %17095 = sst [smem:[#allocation7_spill]] %s10880_s30  ;;  %p8461_p7 = scmp.ge.s32.totalorder %s10769_s24, 1 }
   0xc   : > { %p367_p8 = scmp.lt.s32.totalorder %s10769_s24, 3 }
   0xe   : > { %p368_p9 = pnand %p8461_p7, %p367_p8 }
  0x10   : > { %371 = sbr.rel (%p368_p9) target bundleno = 2293 (0x8f5), region = 68 }
  0x15   : > { %v9867_v0 = vld [vmem:[%s16785_s1 + $0xe4] ss:$16 sps:$4 sm:$0xff]   ;;  %v9869_v1 = vld [vmem:[%s16785_s1 + $0xec] ss:$16 sps:$4 sm:$0xff]   ;;  %v9871_v2 = vld [vmem:[%s16785_s1 + $0xe0] ss:$16 sps:$4 sm:$0xff]  }
  0x16   : > { %840 = vmatprep.subr.bf16.mxu0 %v9867_v0  ;;  %v9872_v3 = vld [vmem:[%s16785_s1 + $0xe8] ss:$16 sps:$4 sm:$0xff]   ;;  %1013 = vmatprep.subr.bf16.mxu1 %v9869_v1  ;;  %v9873_v4 = vld [vmem:[%s16785_s1 + $0xc4] ss:$16 sps:$4 sm:$0xff]   ;;  %v9875_v5 = vld [vmem:[%s16785_s1 + $0xcc] ss:$16 sps:$4 sm:$0xff]  }
  0x17   : > { %841 = vmatpush1.bf16.msra.mxu0 %v9871_v2  ;;  %1014 = vmatpush1.bf16.msra.mxu1 %v9872_v3  ;;  %v9877_v6 = vld [vmem:[%s16785_s1 + $0xc0] ss:$16 sps:$4 sm:$0xff]   ;;  %v9878_v7 = vld [vmem:[%s16785_s1 + $0xc8] ss:$16 sps:$4 sm:$0xff]   ;;  %v9879_v8 = vld [vmem:[%s16785_s1 + $0xa4] ss:$16 sps:$4 sm:$0xff]  }
  0x18   : > { %842 = vmatprep.subr.bf16.mxu0 %v9873_v4  ;;  %1015 = vmatprep.subr.bf16.mxu1 %v9875_v5  ;;  %s410_s30 = smul.u32 28, %s10865_s25  ;;  %v9881_v9 = vld [vmem:[%s16785_s1 + $0xac] ss:$16 sps:$4 sm:$0xff]   ;;  %v9883_v10 = vld [vmem:[%s16785_s1 + $0xa0] ss:$16 sps:$4 sm:$0xff]   ;;  %vm784_vm0 = vcmask 97280  }
  0x19   : > { %v9884_v11 = vld [vmem:[%s16785_s1 + $0xa8] ss:$16 sps:$4 sm:$0xff]   ;;  %v9885_v12 = vld [vmem:[%s16785_s1 + $0x84] ss:$16 sps:$4 sm:$0xff]   ;;  %v9887_v13 = vld [vmem:[%s16785_s1 + $0x8c] ss:$16 sps:$4 sm:$0xff]  }
  0x1a   : > { %v9889_v14 = vld [vmem:[%s16785_s1 + $0x80] ss:$16 sps:$4 sm:$0xff]   ;;  %p411_p10 = scmp.lt.s32.totalorder %s410_s30, 55  ;;  %v9890_v15 = vld [vmem:[%s16785_s1 + $0x88] ss:$16 sps:$4 sm:$0xff]   ;;  %vm827_vm1 = vcmask 1045504  }
  0x1b   : > { %843 = vmatpush1.bf16.msra.mxu0 %v9877_v6  ;;  %1016 = vmatpush1.bf16.msra.mxu1 %v9878_v7  ;;  %v9891_v16 = vld [vmem:[%s16785_s1 + $0x64] ss:$16 sps:$4 sm:$0xff]   ;;  %v9893_v17 = vld [vmem:[%s16785_s1 + $0x6c] ss:$16 sps:$4 sm:$0xff]   ;;  %v9895_v18 = vld [vmem:[%s16785_s1 + $0x60] ss:$16 sps:$4 sm:$0xff]  }
  0x1c   : > { %844 = vmatprep.subr.bf16.mxu0 %v9879_v8  ;;  %1017 = vmatprep.subr.bf16.mxu1 %v9881_v9  ;;  %v9896_v19 = vld [vmem:[%s16785_s1 + $0x68] ss:$16 sps:$4 sm:$0xff]   ;;  %s17860_s30 = smov (!%p411_p10, %s410_s30), 55  ;;  %v9897_v20 = vld [vmem:[%s16785_s1 + $0x44] ss:$16 sps:$4 sm:$0xff]   ;;  %s10771_s18 = smov 112  }
  0x1d   : > { %v9899_v21 = vld [vmem:[%s16785_s1 + $0x4c] ss:$16 sps:$4 sm:$0xff]   ;;  %v9901_v22 = vld [vmem:[%s16785_s1 + $0x40] ss:$16 sps:$4 sm:$0xff]   ;;  %s9176_s26 = sshll.u32 %s17860_s30, 3  ;;  %vm1460_vm2 = vcmask 916480  }
  0x1e   : > { %v9902_v23 = vld [vmem:[%s16785_s1 + $0x48] ss:$16 sps:$4 sm:$0xff]   ;;  %v9903_v24 = vld [vmem:[%s16785_s1 + $0x24] ss:$16 sps:$4 sm:$0xff]   ;;  %v9905_v25 = vld [vmem:[%s16785_s1 + $0x2c] ss:$16 sps:$4 sm:$0xff]   ;;  %s10974_s30 = scalar_lea.vmem %s16784_s0, %s9176_s26 }
  0x1f   : > { %845 = vmatpush1.bf16.msra.mxu0 %v9883_v10  ;;  %1018 = vmatpush1.bf16.msra.mxu1 %v9884_v11  ;;  %v9907_v26 = vld [vmem:[%s16785_s1 + $0x20] ss:$16 sps:$4 sm:$0xff]   ;;  %v9908_v27 = vld [vmem:[%s16785_s1 + $0x28] ss:$16 sps:$4 sm:$0xff]   ;;  %v9909_v28 = vld [vmem:[%s16785_s1 + $0x4] ss:$16 sps:$4 sm:$0xff]  }
  0x20   : > { %846 = vmatprep.subr.bf16.mxu0 %v9885_v12  ;;  %1019 = vmatprep.subr.bf16.mxu1 %v9887_v13  ;;  %v9911_v29 = vld [vmem:[%s16785_s1 + $0xc] ss:$16 sps:$4 sm:$0xff]   ;;  %v9913_v31 = vld [vmem:[%s16785_s1] ss:$16 sps:$4 sm:$0xff]   ;;  %v9914_v32 = vld [vmem:[%s16785_s1 + $0x8] ss:$16 sps:$4 sm:$0xff]  }
  0x21   : > { %v9923_v30 = vld [vmem:[%s10974_s30 + $0x4] ss:$8 sps:$4 sm:$0xff]   ;;  %v9919_v35 = vld [vmem:[%s16785_s1 + $0x100] ss:$16 sps:$4 sm:$0x3f]   ;;  %s10772_s16 = smov 48  }
  0x22   : > { %v9915_v33 = vld [vmem:[%s16785_s1 + $0x104] ss:$16 sps:$4 sm:$0x3f]   ;;  %v9917_v34 = vld [vmem:[%s16785_s1 + $0x10c] ss:$16 sps:$4 sm:$0x3f]   ;;  %8530 = vmatprep.mubr.msk.bf16.mxu0 %vm784_vm0, %v9923_v30  ;;  %8545 = vmatprep.mubr.msk.bf16.mxu1 %vm784_vm0, %v9923_v30 }
  0x23   : > { %847 = vmatpush1.bf16.msra.mxu0 %v9889_v14  ;;  %1020 = vmatpush1.bf16.msra.mxu1 %v9890_v15  ;;  %v9920_v36 = vld [vmem:[%s16785_s1 + $0x108] ss:$16 sps:$4 sm:$0x3f]   ;;  %v829_v37 = vsel %vm827_vm1, %v9919_v35, 0  ;;  %v9924_v40 = vld [vmem:[%s10974_s30 + $0x14] ss:$8 sps:$4 sm:$0xff]  }
  0x24   : > { %848 = vmatprep.subr.bf16.mxu0 %v9891_v16  ;;  %1021 = vmatprep.subr.bf16.mxu1 %v9893_v17  ;;  %v835_v38 = vsel %vm827_vm1, %v9920_v36, 0  ;;  %v9921_v39 = vld [vmem:[%s10974_s30] ss:$8 sps:$4 sm:$0xff]   ;;  %v9926_v41 = vld [vmem:[%s10974_s30 + $0x10] ss:$8 sps:$4 sm:$0xff]   ;;  %s10774_s20 = smov 96  }
  0x25   : > { %v9927_v42 = vld [vmem:[%s10974_s30 + $0x24] ss:$8 sps:$4 sm:$0xff]   ;;  %v9929_v43 = vld [vmem:[%s10974_s30 + $0x20] ss:$8 sps:$4 sm:$0xff]   ;;  %v9930_v44 = vld [vmem:[%s10974_s30 + $0x34] ss:$8 sps:$4 sm:$0xff]  }
  0x26   : > { %v9932_v45 = vld [vmem:[%s10974_s30 + $0x30] ss:$8 sps:$4 sm:$0xff]   ;;  %v9933_v46 = vld [vmem:[%s10974_s30 + $0x44] ss:$8 sps:$4 sm:$0xff]   ;;  %v9935_v47 = vld [vmem:[%s10974_s30 + $0x40] ss:$8 sps:$4 sm:$0xff]  }
  0x27   : > { %849 = vmatpush1.bf16.msra.mxu0 %v9895_v18  ;;  %1022 = vmatpush1.bf16.msra.mxu1 %v9896_v19  ;;  %v9936_v48 = vld [vmem:[%s10974_s30 + $0x54] ss:$8 sps:$4 sm:$0xff]   ;;  %v9938_v49 = vld [vmem:[%s10974_s30 + $0x50] ss:$8 sps:$4 sm:$0xff]   ;;  %v9939_v50 = vld [vmem:[%s10974_s30 + $0x64] ss:$8 sps:$4 sm:$0xff]  }
  0x28   : > { %850 = vmatprep.subr.bf16.mxu0 %v9897_v20  ;;  %1023 = vmatprep.subr.bf16.mxu1 %v9899_v21  ;;  %v9941_v51 = vld [vmem:[%s10974_s30 + $0x60] ss:$8 sps:$4 sm:$0xff]   ;;  %v9942_v52 = vld [vmem:[%s10974_s30 + $0x74] ss:$8 sps:$4 sm:$0xff]   ;;  %v9944_v53 = vld [vmem:[%s10974_s30 + $0x70] ss:$8 sps:$4 sm:$0xff]   ;;  %v1216_v20 = vlaneseq }
  0x29   : > { %v9945_v54 = vld [vmem:[%s10974_s30 + $0x84] ss:$8 sps:$4 sm:$0xff]   ;;  %v9947_v55 = vld [vmem:[%s10974_s30 + $0x80] ss:$8 sps:$4 sm:$0xff]   ;;  %v9948_v56 = vld [vmem:[%s10974_s30 + $0x94] ss:$8 sps:$4 sm:$0xff]  }
  0x2a   : > { %v9950_v57 = vld [vmem:[%s10974_s30 + $0x90] ss:$8 sps:$4 sm:$0xff]   ;;  %v9951_v58 = vld [vmem:[%s10974_s30 + $0xa4] ss:$8 sps:$4 sm:$0xff]   ;;  %v9953_v59 = vld [vmem:[%s10974_s30 + $0xa0] ss:$8 sps:$4 sm:$0xff]  }
  0x2b   : > { %851 = vmatpush1.bf16.msra.mxu0 %v9901_v22  ;;  %1024 = vmatpush1.bf16.msra.mxu1 %v9902_v23  ;;  %v9954_v60 = vld [vmem:[%s10974_s30 + $0xb4] ss:$8 sps:$4 sm:$0xff]   ;;  %v9956_v61 = vld [vmem:[%s10974_s30 + $0xb0] ss:$8 sps:$4 sm:$0xff]   ;;  %v9957_v62 = vld [vmem:[%s10974_s30 + $0xc4] ss:$8 sps:$4 sm:$0xff]  }
  0x2c   : > { %852 = vmatprep.subr.bf16.mxu0 %v9903_v24  ;;  %1025 = vmatprep.subr.bf16.mxu1 %v9905_v25  ;;  %v9959_v63 = vld [vmem:[%s10974_s30 + $0xc0] ss:$8 sps:$4 sm:$0xff]   ;;  %v9960_v0 = vld [vmem:[%s10974_s30 + $0xd4] ss:$8 sps:$4 sm:$0xff]   ;;  %v9962_v1 = vld [vmem:[%s10974_s30 + $0xd0] ss:$8 sps:$4 sm:$0xff]  }
  0x2d   : > { %v11096_v25 = vshrl.u32 %v1216_v20, 7  ;;  %s407_s27 = sand.u32 1, %s10761_s22   ;;  %s9173_s19 = sshll.u32 %s10865_s25, 7 }
  0x2e   : > { %s8462_s30 = sshll.u32 %s407_s27, 3  ;;  %s16749_s26 = scalar_lea.hbm %s16796_s12, %s9173_s19 }
  0x2f   : > { %853 = vmatpush1.bf16.msra.mxu0 %v9907_v26  ;;  %1026 = vmatpush1.bf16.msra.mxu1 %v9908_v27  ;;  %17099 = vst [vmem:[#allocation9_spill] sm:$0xff] %v11096_v25  ;;  %v16801_v30 = vsub.s32 0, %v11096_v25  ;;  %vm16923_vm3 = vcmp.lt.s32.totalorder %v11096_v25, 7  ;;  %vm1875_vm12 = vcmp.lt.s32.totalorder %v11096_v25, 1  ;;  %s409_s28 = scalar_lea.vmem [#allocation2], %s8462_s30 }
  0x30   : > { %854 = vmatprep.subr.bf16.mxu0 %v9909_v28  ;;  %1027 = vmatprep.subr.bf16.mxu1 %v9911_v29  ;;  %s8399_s23 = sshll.u32 %s409_s28, 4  ;;  %s8400_s23 = int_to_ptr.vmem [resolvable:$true] %s8399_s23 }
  0x33   : > { %855 = vmatpush1.bf16.msra.mxu0 %v9913_v31  ;;  %1028 = vmatpush1.bf16.msra.mxu1 %v9914_v32  ;;  %v11110_v31 = vld [vmem:[%s16786_s2] sm:$0xf]  ;;  %v16800_v32 = vsub.s32 1, %v11096_v25 }
  0x34   : > { %8529 = vmatprep.subr.msk.bf16.mxu0 %vm827_vm1, %v9915_v33  ;;  %8544 = vmatprep.subr.msk.bf16.mxu1 %vm827_vm1, %v9917_v34  ;;  %v11120_v36 = vrot.slane %v11110_v31, %v16801_v30 }
  0x37   : > { %871 = vmatpush2.bf16.msra.mxu0 %v829_v37  ;;  %1044 = vmatpush2.bf16.msra.mxu1 %v835_v38 }
  0x3a   : > { %873 = vmatmul.mubr.bf16.vlgmr.msra.gmra.mxu0 %v9921_v39  ;;  %1046 = vmatmul.mubr.bf16.vlgmr.msra.gmra.mxu1 %v9921_v39 }
  0x3b   : > { %8531 = vmatprep.mubr.msk.bf16.mxu0 %vm784_vm0, %v9924_v40  ;;  %8546 = vmatprep.mubr.msk.bf16.mxu1 %vm784_vm0, %v9924_v40  ;;  %v11129_v40 = vrot.slane %v11110_v31, %v16800_v32 }
  0x42   : > { %883 = vmatmul.mubr.bf16.gmra.mxu0 %v9926_v41  ;;  %1056 = vmatmul.mubr.bf16.gmra.mxu1 %v9926_v41 }
  0x43   : > { %8532 = vmatprep.mubr.msk.bf16.mxu0 %vm784_vm0, %v9927_v42  ;;  %8547 = vmatprep.mubr.msk.bf16.mxu1 %vm784_vm0, %v9927_v42 }
  0x4a   : > { %893 = vmatmul.mubr.bf16.gmra.mxu0 %v9929_v43  ;;  %1066 = vmatmul.mubr.bf16.gmra.mxu1 %v9929_v43 }
  0x4b   : > { %8533 = vmatprep.mubr.msk.bf16.mxu0 %vm784_vm0, %v9930_v44  ;;  %8548 = vmatprep.mubr.msk.bf16.mxu1 %vm784_vm0, %v9930_v44 }
  0x52   : > { %903 = vmatmul.mubr.bf16.gmra.mxu0 %v9932_v45  ;;  %1076 = vmatmul.mubr.bf16.gmra.mxu1 %v9932_v45 }
  0x53   : > { %8534 = vmatprep.mubr.msk.bf16.mxu0 %vm784_vm0, %v9933_v46  ;;  %8549 = vmatprep.mubr.msk.bf16.mxu1 %vm784_vm0, %v9933_v46 }
  0x5a   : > { %913 = vmatmul.mubr.bf16.gmra.mxu0 %v9935_v47  ;;  %1086 = vmatmul.mubr.bf16.gmra.mxu1 %v9935_v47 }
  0x5b   : > { %8535 = vmatprep.mubr.msk.bf16.mxu0 %vm784_vm0, %v9936_v48  ;;  %8550 = vmatprep.mubr.msk.bf16.mxu1 %vm784_vm0, %v9936_v48 }
  0x62   : > { %923 = vmatmul.mubr.bf16.gmra.mxu0 %v9938_v49  ;;  %1096 = vmatmul.mubr.bf16.gmra.mxu1 %v9938_v49  ;;  %v9969_v49 = vld [vmem:[%s16787_s3 + $0xa0] ss:$16 sps:$4 sm:$0xff]  }
  0x63   : > { %8536 = vmatprep.mubr.msk.bf16.mxu0 %vm784_vm0, %v9939_v50  ;;  %8551 = vmatprep.mubr.msk.bf16.mxu1 %vm784_vm0, %v9939_v50 }
  0x6a   : > { %933 = vmatmul.mubr.bf16.gmra.mxu0 %v9941_v51  ;;  %1106 = vmatmul.mubr.bf16.gmra.mxu1 %v9941_v51 }
  0x6b   : > { %8537 = vmatprep.mubr.msk.bf16.mxu0 %vm784_vm0, %v9942_v52  ;;  %8552 = vmatprep.mubr.msk.bf16.mxu1 %vm784_vm0, %v9942_v52 }
  0x72   : > { %943 = vmatmul.mubr.bf16.gmra.mxu0 %v9944_v53  ;;  %1116 = vmatmul.mubr.bf16.gmra.mxu1 %v9944_v53 }
  0x73   : > { %8538 = vmatprep.mubr.msk.bf16.mxu0 %vm784_vm0, %v9945_v54  ;;  %8553 = vmatprep.mubr.msk.bf16.mxu1 %vm784_vm0, %v9945_v54 }
  0x7a   : > { %953 = vmatmul.mubr.bf16.gmra.mxu0 %v9947_v55  ;;  %1126 = vmatmul.mubr.bf16.gmra.mxu1 %v9947_v55 }
  0x7b   : > { %8539 = vmatprep.mubr.msk.bf16.mxu0 %vm784_vm0, %v9948_v56  ;;  %8554 = vmatprep.mubr.msk.bf16.mxu1 %vm784_vm0, %v9948_v56 }
  0x82   : > { %963 = vmatmul.mubr.bf16.gmra.mxu0 %v9950_v57  ;;  %1136 = vmatmul.mubr.bf16.gmra.mxu1 %v9950_v57 }
  0x83   : > { %8540 = vmatprep.mubr.msk.bf16.mxu0 %vm784_vm0, %v9951_v58  ;;  %8555 = vmatprep.mubr.msk.bf16.mxu1 %vm784_vm0, %v9951_v58 }
  0x8a   : > { %973 = vmatmul.mubr.bf16.gmra.mxu0 %v9953_v59  ;;  %1146 = vmatmul.mubr.bf16.gmra.mxu1 %v9953_v59 }
  0x8b   : > { %8541 = vmatprep.mubr.msk.bf16.mxu0 %vm784_vm0, %v9954_v60  ;;  %8556 = vmatprep.mubr.msk.bf16.mxu1 %vm784_vm0, %v9954_v60 }
  0x92   : > { %983 = vmatmul.mubr.bf16.gmra.mxu0 %v9956_v61  ;;  %1156 = vmatmul.mubr.bf16.gmra.mxu1 %v9956_v61 }
  0x93   : > { %8542 = vmatprep.mubr.msk.bf16.mxu0 %vm784_vm0, %v9957_v62  ;;  %8557 = vmatprep.mubr.msk.bf16.mxu1 %vm784_vm0, %v9957_v62 }
  0x9a   : > { %993 = vmatmul.mubr.bf16.gmra.mxu0 %v9959_v63  ;;  %1166 = vmatmul.mubr.bf16.gmra.mxu1 %v9959_v63 }
  0x9b   : > { %8543 = vmatprep.mubr.msk.bf16.mxu0 %vm784_vm0, %v9960_v0  ;;  %8558 = vmatprep.mubr.msk.bf16.mxu1 %vm784_vm0, %v9960_v0 }
  0xa2   : > { %1003 = vmatmul.mubr.bf16.gmra.mxu0 %v9962_v1  ;;  %1176 = vmatmul.mubr.bf16.gmra.mxu1 %v9962_v1 }
  0xfa   : > { %v874_v2 = vpop.f32.mrf.mxu0  ;;  %v11062_v3 = vpop.f32.mrf.mxu1 }
  0xfc   : > { %v876_v4 = vpop.f32.mrf.mxu0  ;;  %v11064_v5 = vpop.f32.mrf.mxu1 }
  0xfe   : > { %v878_v6 = vpop.f32.mrf.mxu0  ;;  %v11066_v7 = vpop.f32.mrf.mxu1 }
 0x100   : > { %v880_v8 = vpop.f32.mrf.mxu0  ;;  %v11068_v9 = vpop.f32.mrf.mxu1 }
 0x102   : > { %v884_v10 = vpop.f32.mrf.mxu0  ;;  %v11070_v11 = vpop.f32.mrf.mxu1 }
 0x104   : > { %v11072_v12 = vpop.f32.mrf.mxu0  ;;  %v11074_v13 = vpop.f32.mrf.mxu1 }
 0x106   : > { %v11076_v14 = vpop.f32.mrf.mxu0  ;;  %v11078_v15 = vpop.f32.mrf.mxu1 }
 0x108   : > { %v11080_v16 = vpop.f32.mrf.mxu0  ;;  %v11082_v17 = vpop.f32.mrf.mxu1 }
 0x10a   : > { %v11084_v18 = vpop.f32.mrf.mxu0  ;;  %v11086_v19 = vpop.f32.mrf.mxu1 }
 0x10c   : > { %v11088_v21 = vpop.f32.mrf.mxu0  ;;  %v11090_v22 = vpop.f32.mrf.mxu1 }
 0x10e   : > { %v11092_v23 = vpop.f32.mrf.mxu0  ;;  %v11094_v24 = vpop.f32.mrf.mxu1 }
 0x10f   : > { %17098 = vst [vmem:[#allocation8_spill] sm:$0xff] %v11094_v24 }
 0x110   : > { %v11098_v26 = vpop.f32.mrf.mxu0  ;;  %v11100_v27 = vpop.f32.mrf.mxu1 }
 0x111   : > { %17100 = vst [vmem:[#allocation10_spill] sm:$0xff] %v11100_v27 }
 0x112   : > { %v11102_v28 = vpop.f32.mrf.mxu0  ;;  %v11104_v29 = vpop.f32.mrf.mxu1 }
 0x113   : > { %17101 = vst [vmem:[#allocation11_spill] sm:$0xff] %v11104_v29 }
 0x114   : > { %v11113_v33 = vpop.f32.mrf.mxu0  ;;  %v11115_v34 = vpop.f32.mrf.mxu1 }
 0x115   : > { %17102 = vst [vmem:[#allocation12_spill] sm:$0xff] %v11115_v34  ;;  %v9989_v34 = vld [vmem:[%s16787_s3 + $0x1e4] ss:$16 sps:$4 sm:$0xff]  }
 0x116   : > { %v908_v35 = vpop.f32.mrf.mxu0  ;;  %v11122_v37 = vpop.f32.mrf.mxu1 }
 0x117   : > { %v1187_v38 = vmax.f32 %v874_v2, %v908_v35 }
 0x118   : > { %v910_v41 = vpop.f32.mrf.mxu0  ;;  %v11131_v42 = vpop.f32.mrf.mxu1 }
 0x119   : > { %v1188_v43 = vmax.f32 %v876_v4, %v910_v41  ;;  %v11134_v44 = vadd.f32 %v11120_v36, %v1187_v38 }
 0x11a   : > { %v914_v45 = vpop.f32.mrf.mxu0  ;;  %v11136_v46 = vpop.f32.mrf.mxu1 }
 0x11b   : > { %17103 = vst [vmem:[#allocation13_spill] sm:$0xff] %v11134_v44  ;;  %v11139_v47 = vadd.f32 %v11129_v40, %v1188_v43  ;;  %v1191_v48 = vmax.f32 %v878_v6, %v914_v45  ;;  %v16810_v54 = vmax.f32 %v11134_v44, 0.0 }
 0x11c   : > { %v916_v50 = vpop.f32.mrf.mxu0  ;;  %v11143_v51 = vpop.f32.mrf.mxu1 }
 0x11d   : > { %17104 = vst [vmem:[#allocation14_spill] sm:$0xff] %v11139_v47  ;;  %v1192_v52 = vmax.f32 %v880_v8, %v916_v50  ;;  %v16804_v53 = vmax.f32 %v11139_v47, 0.0  ;;  %v11148_v55 = vadd.f32 %v11120_v36, %v1191_v48 }
 0x11e   : > { %v918_v56 = vpop.f32.mrf.mxu0  ;;  %v11150_v57 = vpop.f32.mrf.mxu1 }
 0x11f   : > { %17105 = vst [vmem:[#allocation15_spill] sm:$0xff] %v11148_v55  ;;  %17106 = vst [vmem:[#allocation16_spill] sm:$0xff] %v11150_v57  ;;  %v11153_v58 = vadd.f32 %v11129_v40, %v1192_v52  ;;  %v1195_v59 = vmax.f32 %v884_v10, %v918_v56  ;;  %v9382_v63 = vpack.i.bf16 %v16804_v53, %v16810_v54  ;;  %v16811_v1 = vmax.f32 %v11148_v55, 0.0 }
 0x120   : > { %v920_v61 = vpop.f32.mrf.mxu0  ;;  %v11157_v62 = vpop.f32.mrf.mxu1 }
 0x121   : > { %17107 = vst [vmem:[#allocation17_spill] sm:$0xff] %v11153_v58  ;;  %v16803_v0 = vmax.f32 %v11153_v58, 0.0  ;;  %v11166_v2 = vadd.f32 %v11120_v36, %v1195_v59  ;;  %v1196_v4 = vmax.f32 %v11072_v12, %v920_v61  ;;  %9383 = vrot.lane.b32.xlu0 %v9382_v63, %s10771_s18 }
 0x122   : > { %v924_v6 = vpop.f32.mrf.mxu0  ;;  %v11170_v8 = vpop.f32.mrf.mxu1 }
 0x123   : > { %17108 = vst [vmem:[#allocation18_spill] sm:$0xff] %v11166_v2  ;;  %v1199_v10 = vmax.f32 %v11076_v14, %v924_v6  ;;  %v11176_v35 = vadd.f32 %v11129_v40, %v1196_v4  ;;  %v9387_v12 = vpack.i.bf16 %v16803_v0, %v16811_v1  ;;  %v16807_v45 = vmax.f32 %v11166_v2, 0.0 }
 0x124   : > { %v926_v38 = vpop.f32.mrf.mxu0  ;;  %v11178_v41 = vpop.f32.mrf.mxu1 }
 0x125   : > { %17109 = vst [vmem:[#allocation19_spill] sm:$0xff] %v11176_v35  ;;  %v1200_v43 = vmax.f32 %v11080_v16, %v926_v38  ;;  %v11187_v14 = vadd.f32 %v11120_v36, %v1199_v10  ;;  %9388 = vrot.lane.b32.xlu0 %v9387_v12, %s10771_s18  ;;  %v16802_v52 = vmax.f32 %v11176_v35, 0.0 }
 0x126   : > { %v928_v48 = vpop.f32.mrf.mxu0  ;;  %v11190_v50 = vpop.f32.mrf.mxu1 }
 0x127   : > { %17110 = vst [vmem:[#allocation20_spill] sm:$0xff] %v11187_v14  ;;  %v11194_v56 = vadd.f32 %v11129_v40, %v1200_v43  ;;  %v1203_v59 = vmax.f32 %v11084_v18, %v928_v48  ;;  %v9392_v4 = vpack.i.bf16 %v16802_v52, %v16807_v45  ;;  %v16806_v38 = vmax.f32 %v11187_v14, 0.0 }
 0x128   : > { %v930_v61 = vpop.f32.mrf.mxu0  ;;  %v11199_v63 = vpop.f32.mrf.mxu1 }
 0x129   : > { %17111 = vst [vmem:[#allocation21_spill] sm:$0xff] %v11194_v56  ;;  %v16805_v6 = vmax.f32 %v11194_v56, 0.0  ;;  %v1204_v10 = vmax.f32 %v11088_v21, %v930_v61  ;;  %v11209_v12 = vadd.f32 %v11120_v36, %v1203_v59  ;;  %9393 = vrot.lane.b32.xlu1 %v9392_v4, %s10771_s18 }
 0x12a   : > { %v934_v18 = vpop.f32.mrf.mxu0  ;;  %v11212_v43 = vpop.f32.mrf.mxu1 }
 0x12b   : > { %17112 = vst [vmem:[#allocation22_spill] sm:$0xff] %v11209_v12  ;;  %17113 = vst [vmem:[#allocation23_spill] sm:$0xff] %v11212_v43  ;;  %v11215_v48 = vadd.f32 %v11129_v40, %v1204_v10  ;;  %v1207_v32 = vmax.f32 %v11092_v23, %v934_v18  ;;  %v9397_v59 = vpack.i.bf16 %v16805_v6, %v16806_v38  ;;  %v16809_v4 = vmax.f32 %v11209_v12, 0.0 }
 0x12c   : > { %v936_v52 = vpop.f32.mrf.mxu0  ;;  %v11220_v21 = vpop.f32.mrf.mxu1 }
 0x12d   : > { %17114 = vst [vmem:[#allocation24_spill] sm:$0xff] %v11215_v48  ;;  %17115 = vst [vmem:[#allocation25_spill] sm:$0xff] %v11220_v21  ;;  %v16808_v61 = vmax.f32 %v11215_v48, 0.0  ;;  %v11229_v10 = vadd.f32 %v11120_v36, %v1207_v32  ;;  %v1208_v23 = vmax.f32 %v11098_v26, %v936_v52  ;;  %9398 = vrot.lane.b32.xlu1 %v9397_v59, %s10771_s18  ;;  %v9963_v32 = vld [vmem:[%s16787_s3 + $0xe0] ss:$16 sps:$4 sm:$0xff]   ;;  %v17126_v21 = vsub.s32 3, %v11096_v25 }
 0x12e   : > { %v938_v18 = vpop.f32.mrf.mxu0  ;;  %v11233_v0 = vpop.f32.mrf.mxu1 }
 0x12f   : > { %17116 = vst [vmem:[#allocation26_spill] sm:$0xff] %v11229_v10  ;;  %17117 = vst [vmem:[#allocation27_spill] sm:$0xff] %v11233_v0  ;;  %v1211_v53 = vmax.f32 %v11102_v28, %v938_v18  ;;  %v11239_v6 = vadd.f32 %v11129_v40, %v1208_v23  ;;  %v9402_v26 = vpack.i.bf16 %v16808_v61, %v16809_v4  ;;  %v9965_v28 = vld [vmem:[%s16787_s3 + $0xe4] ss:$16 sps:$4 sm:$0xff]   ;;  %v16813_v23 = vmax.f32 %v11229_v10, 0.0 }
 0x130   : > { %v940_v38 = vpop.f32.mrf.mxu0  ;;  %v11241_v45 = vpop.f32.mrf.mxu1  ;;  %4643 = vmatprep.subr.bf16.mxu0 %v9965_v28  ;;  %v9984_v0 = vld [vmem:[%s16787_s3] ss:$16 sps:$4 sm:$0xff]  }
 0x131   : > { %17118 = vst [vmem:[#allocation28_spill] sm:$0xff] %v11239_v6  ;;  %17119 = vst [vmem:[#allocation29_spill] sm:$0xff] %v11241_v45  ;;  %v11254_v52 = vadd.f32 %v11120_v36, %v1211_v53  ;;  %v1212_v59 = vmax.f32 %v11113_v33, %v940_v38  ;;  %v16812_v18 = vmax.f32 %v11239_v6, 0.0  ;;  %9403 = vrot.lane.b32.xlu0 %v9402_v26, %s10771_s18  ;;  %4644 = vmatpush1.bf16.msra.mxu0 %v9963_v32  ;;  %v9966_v38 = vld [vmem:[%s16787_s3 + $0xc0] ss:$16 sps:$4 sm:$0xff]  }
 0x132   : > { %v11260_v61 = vpop.f32.mrf.mxu0  ;;  %v11262_v4 = vpop.f32.mrf.mxu1  ;;  %v9968_v26 = vld [vmem:[%s16787_s3 + $0xc4] ss:$16 sps:$4 sm:$0xff]  }
 0x133   : > { %17120 = vst [vmem:[#allocation30_spill] sm:$0xff] %v11254_v52  ;;  %v11265_v30 = vadd.f32 %v11129_v40, %v1212_v59  ;;  %v9407_v33 = vpack.i.bf16 %v16812_v18, %v16813_v23  ;;  %v16815_v28 = vmax.f32 %v11254_v52, 0.0  ;;  %4645 = vmatprep.subr.bf16.mxu0 %v9968_v26  ;;  %v9974_v26 = vld [vmem:[%s16787_s3 + $0x84] ss:$16 sps:$4 sm:$0xff]  }
 0x134   : > { %v11267_v54 = vpop.f32.mrf.mxu0  ;;  %v11269_v53 = vpop.f32.mrf.mxu1 }
 0x135   : > { %17121 = vst [vmem:[#allocation31_spill] sm:$0xff] %v11265_v30  ;;  %v16814_v32 = vmax.f32 %v11265_v30, 0.0  ;;  %9408 = vrot.lane.b32.xlu1 %v9407_v33, %s10771_s18  ;;  %4646 = vmatpush1.bf16.msra.mxu0 %v9966_v38  ;;  %v9971_v33 = vld [vmem:[%s16787_s3 + $0xa4] ss:$16 sps:$4 sm:$0xff]  }
 0x136   : > { %v11284_v59 = vpop.f32.mrf.mxu0  ;;  %v11286_v1 = vpop.f32.mrf.mxu1  ;;  %4647 = vmatprep.subr.bf16.mxu0 %v9971_v33 }
 0x137   : > { %v9412_v18 = vpack.i.bf16 %v16814_v32, %v16815_v28  ;;  %v9972_v28 = vld [vmem:[%s16787_s3 + $0x80] ss:$16 sps:$4 sm:$0xff]  }
 0x138   : > { %v11292_v23 = vpop.f32.mrf.mxu0  ;;  %v11294_v60 = vpop.f32.mrf.mxu1 }
 0x139   : > { %9413 = vrot.lane.b32.xlu0 %v9412_v18, %s10771_s18  ;;  %4648 = vmatpush1.bf16.msra.mxu0 %v9969_v49  ;;  %v9977_v18 = vld [vmem:[%s16787_s3 + $0x64] ss:$16 sps:$4 sm:$0xff]   ;;  %v9975_v49 = vld [vmem:[%s16787_s3 + $0x60] ss:$16 sps:$4 sm:$0xff]  }
 0x13a   : > { %v11306_v32 = vpop.f32.mrf.mxu0  ;;  %v11308_v38 = vpop.f32.mrf.mxu1  ;;  %4649 = vmatprep.subr.bf16.mxu0 %v9974_v26  ;;  %v9980_v26 = vld [vmem:[%s16787_s3 + $0x44] ss:$16 sps:$4 sm:$0xff]  }
 0x13c   : > { %v11313_v16 = vpop.f32.mrf.mxu0  ;;  %v11315_v20 = vpop.f32.mrf.mxu1 }
 0x13d   : > { %4650 = vmatpush1.bf16.msra.mxu0 %v9972_v28  ;;  %v9978_v28 = vld [vmem:[%s16787_s3 + $0x40] ss:$16 sps:$4 sm:$0xff]  }
 0x13e   : > { %v11320_v39 = vpop.f32.mrf.mxu0  ;;  %v11322_v30 = vpop.f32.mrf.mxu1  ;;  %4651 = vmatprep.subr.bf16.mxu0 %v9977_v18  ;;  %v9983_v18 = vld [vmem:[%s16787_s3 + $0x24] ss:$16 sps:$4 sm:$0xff]  }
 0x140   : > { %v11327_v33 = vpop.f32.mrf.mxu0  ;;  %v11329_v6 = vpop.f32.mrf.mxu1 }
 0x141   : > { %4652 = vmatpush1.bf16.msra.mxu0 %v9975_v49  ;;  %v9981_v49 = vld [vmem:[%s16787_s3 + $0x20] ss:$16 sps:$4 sm:$0xff]  }
 0x142   : > { %v11334_v48 = vpop.f32.mrf.mxu0  ;;  %v11336_v35 = vpop.f32.mrf.mxu1  ;;  %4653 = vmatprep.subr.bf16.mxu0 %v9980_v26 }
 0x144   : > { %v11341_v56 = vpop.f32.mrf.mxu0  ;;  %v11343_v58 = vpop.f32.mrf.mxu1 }
 0x145   : > { %17122 = vst [vmem:[#allocation32_spill] sm:$0xff] %v11343_v58  ;;  %4654 = vmatpush1.bf16.msra.mxu0 %v9978_v28  ;;  %v9986_v28 = vld [vmem:[%s16787_s3 + $0x4] ss:$16 sps:$4 sm:$0xff]  }
 0x146   : > { %v11348_v47 = vpop.f32.mrf.mxu0  ;;  %v11350_v52 = vpop.f32.mrf.mxu1  ;;  %4655 = vmatprep.subr.bf16.mxu0 %v9983_v18 }
 0x148   : > { %v11355_v10 = vpop.f32.mrf.mxu0  ;;  %v11357_v12 = vpop.f32.mrf.mxu1 }
 0x149   : > { %17123 = vst [vmem:[#allocation33_spill] sm:$0xff] %v11357_v12  ;;  %4656 = vmatpush1.bf16.msra.mxu0 %v9981_v49 }
 0x14a   : > { %v11359_v43 = vpop.f32.mrf.mxu0  ;;  %v11361_v26 = vpop.f32.mrf.mxu1  ;;  %4657 = vmatprep.subr.bf16.mxu0 %v9986_v28  ;;  %v9987_v28 = vld [vmem:[%s16787_s3 + $0x1e0] ss:$16 sps:$4 sm:$0xff]  }
 0x14c   : > { %v11363_v24 = vpop.f32.mrf.mxu0  ;;  %v11365_v14 = vpop.f32.mrf.mxu1 }
 0x14d   : > { %4658 = vmatpush1.bf16.msra.mxu0 %v9984_v0 }
 0x14e   : > { %v978_v29 = vpop.f32.mrf.mxu0  ;;  %v11373_v12 = vpop.f32.mrf.mxu1  ;;  %4659 = vmatprep.subr.bf16.mxu0 %v9989_v34 }
 0x14f   : > { %v1264_v18 = vmax.f32 %v11260_v61, %v978_v29 }
 0x150   : > { %v980_v2 = vpop.f32.mrf.mxu0  ;;  %v1153_v58 = vpop.f32.mrf.mxu1 }
 0x151   : > { %v11381_v45 = vadd.f32 %v1264_v18, %v11120_v36  ;;  %v1265_v27 = vmax.f32 %v11267_v54, %v980_v2  ;;  %v1267_v29 = vmax.f32 %v11269_v53, %v1153_v58  ;;  %4660 = vmatpush2.bf16.msra.mxu0 %v9987_v28  ;;  %v11396_v18 = vrot.slane %v11110_v31, %v17126_v21  ;;  %v9992_v58 = vld [vmem:[%s16787_s3 + $0x1c4] ss:$16 sps:$4 sm:$0xff]   ;;  %v9990_v21 = vld [vmem:[%s16787_s3 + $0x1c0] ss:$16 sps:$4 sm:$0xff]  }
 0x152   : > { %v984_v0 = vpop.f32.mrf.mxu0  ;;  %v11388_v61 = vpop.f32.mrf.mxu1  ;;  %4661 = vmatprep.subr.bf16.mxu0 %v9992_v58 }
 0x153   : > { %17124 = vst [vmem:[#allocation34_spill] sm:$0xff] %v11381_v45  ;;  %v11391_v49 = vadd.f32 %v1265_v27, %v11129_v40  ;;  %v1268_v2 = vmax.f32 %v11284_v59, %v984_v0  ;;  %v11410_v28 = vadd.f32 %v1267_v29, %v11396_v18  ;;  %v9996_v29 = vld [vmem:[%s16787_s3 + $0x1a0] ss:$16 sps:$4 sm:$0xff]  }
 0x154   : > { %v986_v44 = vpop.f32.mrf.mxu0  ;;  %v1159_v55 = vpop.f32.mrf.mxu1 }
 0x155   : > { %17125 = vst [vmem:[#allocation35_spill] sm:$0xff] %v11391_v49  ;;  %v1269_v27 = vmax.f32 %v11292_v23, %v986_v44  ;;  %v1271_v53 = vmax.f32 %v11294_v60, %v1159_v55  ;;  %17127 = vst [vmem:[#allocation36_spill] sm:$0xff] %v11410_v28  ;;  %v11413_v59 = vadd.f32 %v1268_v2, %v11120_v36  ;;  %4662 = vmatpush2.bf16.msra.mxu0 %v9990_v21  ;;  %v9995_v23 = vld [vmem:[%s16787_s3 + $0x2e4] ss:$16 sps:$4 sm:$0xff]  }
 0x156   : > { %v988_v0 = vpop.f32.mrf.mxu0  ;;  %v11415_v54 = vpop.f32.mrf.mxu1  ;;  %v9998_v21 = vld [vmem:[%s16787_s3 + $0x1a4] ss:$16 sps:$4 sm:$0xff]   ;;  %4746 = vmatprep.subr.bf16.mxu1 %v9995_v23  ;;  %v10002_v23 = vld [vmem:[%s16787_s3 + $0x180] ss:$16 sps:$4 sm:$0xff]  }
 0x157   : > { %17128 = vst [vmem:[#allocation37_spill] sm:$0xff] %v11413_v59  ;;  %17129 = vst [vmem:[#allocation38_spill] sm:$0xff] %v11415_v54  ;;  %v11418_v34 = vadd.f32 %v1269_v27, %v11129_v40  ;;  %v11421_v44 = vadd.f32 %v1271_v53, %v11396_v18  ;;  %v1272_v55 = vmax.f32 %v11306_v32, %v988_v0  ;;  %v17131_v27 = vmax.f32 %v11381_v45, 0.0  ;;  %v9993_v32 = vld [vmem:[%s16787_s3 + $0x2e0] ss:$16 sps:$4 sm:$0xff]  }
 0x158   : > { %v990_v2 = vpop.f32.mrf.mxu0  ;;  %v11430_v58 = vpop.f32.mrf.mxu1  ;;  %v17132_v53 = vmax.f32 %v11391_v49, 0.0  ;;  %4663 = vmatprep.subr.bf16.mxu0 %v9998_v21  ;;  %4747 = vmatpush1.bf16.msra.mxu1 %v9993_v32  ;;  %v17134_v21 = vmax.f32 %v11413_v59, 0.0 }
 0x159   : > { %17130 = vst [vmem:[#allocation39_spill] sm:$0xff] %v11418_v34  ;;  %v16838_v0 = vmax.f32 %v11418_v34, 0.0  ;;  %v11444_v60 = vadd.f32 %v1272_v55, %v11120_v36  ;;  %v1273_v49 = vmax.f32 %v11313_v16, %v990_v2  ;;  %4664 = vmatpush2.bf16.msra.mxu0 %v9996_v29  ;;  %v10004_v29 = vld [vmem:[%s16787_s3 + $0x184] ss:$16 sps:$4 sm:$0xff]   ;;  %v17136_v34 = vmax.f32 %v11410_v28, 0.0 }
 0x15a   : > { %v9417_v57 = vpack.i.bf16 %v17132_v53, %v17131_v27  ;;  %v994_v45 = vpop.f32.mrf.mxu0  ;;  %v11453_v54 = vpop.f32.mrf.mxu1  ;;  %v10001_v27 = vld [vmem:[%s16787_s3 + $0x2c4] ss:$16 sps:$4 sm:$0xff]   ;;  %v17137_v59 = vmax.f32 %v11421_v44, 0.0  ;;  %4665 = vmatprep.subr.bf16.mxu0 %v10004_v29  ;;  %v10008_v28 = vld [vmem:[%s16787_s3 + $0x160] ss:$16 sps:$4 sm:$0xff]  }
 0x15b   : > { %v1276_v55 = vmax.f32 %v11320_v39, %v994_v45  ;;  %v11463_v16 = vadd.f32 %v1273_v49, %v11129_v40  ;;  %v9422_v39 = vpack.i.bf16 %v16838_v0, %v17134_v21  ;;  %v9999_v45 = vld [vmem:[%s16787_s3 + $0x2c0] ss:$16 sps:$4 sm:$0xff]   ;;  %4748 = vmatprep.subr.bf16.mxu1 %v10001_v27  ;;  %v17139_v29 = vmax.f32 %v11444_v60, 0.0 }
 0x15c   : > { %9418 = vrot.lane.b32.xlu1 %v9417_v57, %s10771_s18  ;;  %v996_v57 = vpop.f32.mrf.mxu0  ;;  %v11465_v2 = vpop.f32.mrf.mxu1  ;;  %4749 = vmatpush1.bf16.msra.mxu1 %v9999_v45 }
 0x15d   : > { %17133 = vst [vmem:[#allocation40_spill] sm:$0xff] %v11463_v16  ;;  %v11478_v32 = vadd.f32 %v1276_v55, %v11120_v36  ;;  %v1277_v49 = vmax.f32 %v11327_v33, %v996_v57  ;;  %9423 = vrot.lane.b32.xlu0 %v9422_v39, %s10771_s18  ;;  %v9432_v55 = vpack.i.bf16 %v17137_v59, %v17136_v34  ;;  %v10007_v57 = vld [vmem:[%s16787_s3 + $0x2a4] ss:$16 sps:$4 sm:$0xff]  }
 0x15e   : > { %v998_v0 = vpop.f32.mrf.mxu0  ;;  %v11486_v53 = vpop.f32.mrf.mxu1  ;;  %4666 = vmatpush2.bf16.msra.mxu0 %v10002_v23  ;;  %v10005_v23 = vld [vmem:[%s16787_s3 + $0x2a0] ss:$16 sps:$4 sm:$0xff]   ;;  %v10010_v39 = vld [vmem:[%s16787_s3 + $0x164] ss:$16 sps:$4 sm:$0xff]   ;;  %4750 = vmatprep.subr.bf16.mxu1 %v10007_v57 }
 0x15f   : > { %17135 = vst [vmem:[#allocation41_spill] sm:$0xff] %v11478_v32  ;;  %v11494_v27 = vadd.f32 %v1277_v49, %v11129_v40  ;;  %v1280_v21 = vmax.f32 %v11334_v48, %v998_v0  ;;  %v17140_v49 = vmax.f32 %v11463_v16, 0.0  ;;  %4667 = vmatprep.subr.bf16.mxu0 %v10010_v39 }
 0x160   : > { %v1000_v34 = vpop.f32.mrf.mxu0  ;;  %v11503_v59 = vpop.f32.mrf.mxu1  ;;  %4751 = vmatpush1.bf16.msra.mxu1 %v10005_v23 }
 0x161   : > { %17138 = vst [vmem:[#allocation42_spill] sm:$0xff] %v11494_v27  ;;  %v9427_v45 = vpack.i.bf16 %v17140_v49, %v17139_v29  ;;  %v1281_v0 = vmax.f32 %v11341_v56, %v1000_v34  ;;  %v1270_v29 = vmax.f32 %v11286_v1, %v11388_v61  ;;  %v11523_v49 = vadd.f32 %v1280_v21, %v11120_v36 }
 0x162   : > { %9433 = vrot.lane.b32.xlu0 %v9432_v55, %s10771_s18  ;;  %v1004_v33 = vpop.f32.mrf.mxu0  ;;  %v11527_v16 = vpop.f32.mrf.mxu1  ;;  %v17142_v1 = vsub.s32 2, %v11096_v25  ;;  %v1266_v21 = vmax.f32 %v11262_v4, %v11373_v12  ;;  %4668 = vmatpush2.bf16.msra.mxu0 %v10008_v28  ;;  %v10011_v4 = vld [vmem:[%s16787_s3 + $0x280] ss:$16 sps:$4 sm:$0xff]   ;;  %v1190_v34 = vmax.f32 %v11064_v5, %v11131_v42  ;;  %v10019_v42 = vld [vmem:[%s16787_s3 + $0x264] ss:$16 sps:$4 sm:$0xff]  }
 0x163   : > { %9428 = vrot.lane.b32.xlu1 %v9427_v45, %s10771_s18  ;;  %v11530_v56 = vadd.f32 %v1281_v0, %v11129_v40  ;;  %v1284_v57 = vmax.f32 %v11348_v47, %v1004_v33  ;;  %v17143_v0 = vmax.f32 %v11478_v32, 0.0  ;;  %v17144_v47 = vmax.f32 %v11494_v27, 0.0 }
 0x164   : > { %v11538_v61 = vrot.slane %v11110_v31, %v17142_v1  ;;  %v1006_v45 = vpop.f32.mrf.mxu0  ;;  %v11543_v48 = vpop.f32.mrf.mxu1  ;;  %v10013_v31 = vld [vmem:[%s16787_s3 + $0x284] ss:$16 sps:$4 sm:$0xff]  }
 0x165   : > { %17141 = vst [vmem:[#allocation43_spill] sm:$0xff] %v11530_v56  ;;  %v9437_v33 = vpack.i.bf16 %v17144_v47, %v17143_v0  ;;  %v11554_v12 = vadd.f32 %v1284_v57, %v11120_v36  ;;  %v10016_v1 = vld [vmem:[%s16787_s3 + $0x144] ss:$16 sps:$4 sm:$0xff]   ;;  %v1285_v28 = vmax.f32 %v11355_v10, %v1006_v45  ;;  %4752 = vmatprep.subr.bf16.mxu1 %v10013_v31  ;;  %v10014_v57 = vld [vmem:[%s16787_s3 + $0x140] ss:$16 sps:$4 sm:$0xff]   ;;  %v17146_v31 = vmax.f32 %v11523_v49, 0.0 }
 0x166   : > { %v11563_v23 = vadd.f32 %v1270_v29, %v11538_v61  ;;  %v1181_v0 = vpop.f32.mrf.mxu1  ;;  %v1008_v47 = vpop.f32.mrf.mxu0  ;;  %4669 = vmatprep.subr.bf16.mxu0 %v10016_v1  ;;  %v11575_v29 = vadd.f32 %v1266_v21, %v11538_v61  ;;  %v17147_v27 = vmax.f32 %v11530_v56, 0.0  ;;  %4753 = vmatpush1.bf16.msra.mxu1 %v10011_v4  ;;  %v10022_v4 = vld [vmem:[%s16787_s3 + $0x124] ss:$16 sps:$4 sm:$0xff]  }
 0x167   : > { %9438 = vrot.lane.b32.xlu0 %v9437_v33, %s10771_s18  ;;  %v1290_v39 = vmax.f32 %v11361_v26, %v1181_v0  ;;  %v1288_v55 = vmax.f32 %v11359_v43, %v1008_v47  ;;  %v16847_v10 = vmax.f32 %v11554_v12, 0.0  ;;  %v11579_v45 = vadd.f32 %v1285_v28, %v11129_v40  ;;  %4670 = vmatpush2.bf16.msra.mxu0 %v10014_v57 }
 0x168   : > { %v1183_v33 = vpop.f32.mrf.mxu1  ;;  %v9442_v32 = vpack.i.bf16 %v17147_v27, %v17146_v31  ;;  %v1010_v5 = vpop.f32.mrf.mxu0  ;;  %v10017_v27 = vld [vmem:[%s16787_s3 + $0x260] ss:$16 sps:$4 sm:$0xff]   ;;  %v17148_v28 = vmax.f32 %v11062_v3, %v11122_v37  ;;  %4754 = vmatprep.subr.bf16.mxu1 %v10019_v42  ;;  %4671 = vmatprep.subr.bf16.mxu0 %v10022_v4  ;;  %v11623_v47 = vadd.f32 %v11396_v18, %v1190_v34  ;;  %v10028_v42 = vld [vmem:[%s16787_s3 + $0x104] ss:$16 sps:$4 sm:$0xff]  }
 0x169   : > { %17145 = vst [vmem:[#allocation44_spill] sm:$0xff] %v11579_v45  ;;  %v11589_v43 = vadd.f32 %v1290_v39, %v11538_v61  ;;  %v11592_v26 = vadd.f32 %v1288_v55, %v11120_v36  ;;  %v1291_v21 = vmax.f32 %v11365_v14, %v1183_v33  ;;  %v1289_v1 = vmax.f32 %v11363_v24, %v1010_v5  ;;  %v10020_v24 = vld [vmem:[%s16787_s3 + $0x120] ss:$16 sps:$4 sm:$0xff]  }
 0x16a   : > { %v11606_v39 = vadd.f32 %v11538_v61, %v17148_v28  ;;  %v16857_v36 = vmax.f32 %v11563_v23, 0.0  ;;  %v16846_v14 = vmax.f32 %v11579_v45, 0.0  ;;  %9443 = vrot.lane.b32.xlu1 %v9442_v32, %s10771_s18  ;;  %v16861_v32 = vmax.f32 %v11575_v29, 0.0  ;;  %4755 = vmatpush1.bf16.msra.mxu1 %v10017_v27 }
 0x16b   : > { %v16852_v55 = vmax.f32 %v11589_v43, 0.0  ;;  %v16868_v0 = vmax.f32 %v11592_v26, 0.0  ;;  %v11617_v3 = vadd.f32 %v1291_v21, %v11396_v18  ;;  %v11620_v37 = vadd.f32 %v1289_v1, %v11129_v40  ;;  %4672 = vmatpush2.bf16.msra.mxu0 %v10020_v24  ;;  %v10025_v40 = vld [vmem:[%s16787_s3 + $0x244] ss:$16 sps:$4 sm:$0xff]  }
 0x16c   : > { %v1275_v57 = vmax.f32 %v11315_v20, %v11430_v58  ;;  %v9447_v33 = vpack.i.bf16 %v16846_v14, %v16847_v10  ;;  %v1279_v34 = vmax.f32 %v11329_v6, %v11465_v2  ;;  %v10023_v58 = vld [vmem:[%s16787_s3 + $0x240] ss:$16 sps:$4 sm:$0xff]   ;;  %4756 = vmatprep.subr.bf16.mxu1 %v10025_v40  ;;  %4673 = vmatprep.subr.bf16.mxu0 %v10028_v42  ;;  %v16865_v1 = vmax.f32 %v11606_v39, 0.0 }
 0x16d   : > { %v16853_v31 = vmax.f32 %v11617_v3, 0.0  ;;  %v16869_v5 = vmax.f32 %v11620_v37, 0.0  ;;  %v9452_v20 = vpack.i.bf16 %v16852_v55, %v16857_v36  ;;  %v10026_v6 = vld [vmem:[%s16787_s3 + $0x100] ss:$16 sps:$4 sm:$0xff]   ;;  %v16866_v27 = vmax.f32 %v11623_v47, 0.0 }
 0x16e   : > { %9448 = vrot.lane.b32.xlu1 %v9447_v33, %s10771_s18  ;;  %4757 = vmatpush1.bf16.msra.mxu1 %v10023_v58  ;;  %v1202_v4 = vmax.f32 %v11082_v17, %v11178_v41  ;;  %v11667_v28 = vadd.f32 %v1275_v57, %v11396_v18  ;;  %v11670_v24 = vadd.f32 %v1279_v34, %v11396_v18  ;;  %v10031_v33 = vld [vmem:[%s16787_s3 + $0x224] ss:$16 sps:$4 sm:$0xff]   ;;  %v10029_v40 = vld [vmem:[%s16787_s3 + $0x220] ss:$16 sps:$4 sm:$0xff]  }
 0x16f   : > { %9453 = vrot.lane.b32.xlu0 %v9452_v20, %s10771_s18  ;;  %v9467_v2 = vpack.i.bf16 %v16861_v32, %v16853_v31  ;;  %v9457_v21 = vpack.i.bf16 %v16869_v5, %v16868_v0  ;;  %4674 = vmatpush2.bf16.msra.mxu0 %v10026_v6  ;;  %v17149_v17 = vmax.f32 %v11078_v15, %v11170_v8  ;;  %v10034_v15 = vld [vmem:[%s16787_s3 + $0x204] ss:$16 sps:$4 sm:$0xff]   ;;  %v10032_v8 = vld [vmem:[%s16787_s3 + $0x200] ss:$16 sps:$4 sm:$0xff]  }
 0x170   : > { %4758 = vmatprep.subr.bf16.mxu1 %v10031_v33  ;;  %v9462_v57 = vpack.i.bf16 %v16866_v27, %v16865_v1  ;;  %v11691_v34 = vadd.f32 %v11396_v18, %v1202_v4  ;;  %v1206_v20 = vmax.f32 %v11090_v22, %v11199_v63  ;;  %v16850_v58 = vmax.f32 %v11667_v28, 0.0  ;;  %v10037_v33 = vld [vmem:[%s16787_s3 + $0x3e4] ss:$16 sps:$4 sm:$0xff]   ;;  %v17194_v27 = vld [vmem:[#allocation23_spill] sm:$0xff] }
 0x171   : > { %v11684_v41 = vadd.f32 %v11538_v61, %v17149_v17  ;;  %v16851_v42 = vmax.f32 %v11670_v24, 0.0  ;;  %v17150_v63 = vmax.f32 %v11086_v19, %v11190_v50  ;;  %v10040_v19 = vld [vmem:[%s16787_s3 + $0x3c4] ss:$16 sps:$4 sm:$0xff]   ;;  %v10038_v50 = vld [vmem:[%s16787_s3 + $0x3c0] ss:$16 sps:$4 sm:$0xff]  }
 0x172   : > { %9468 = vrot.lane.b32.xlu1 %v9467_v2, %s10771_s18  ;;  %4759 = vmatpush1.bf16.msra.mxu1 %v10029_v40  ;;  %v16848_v22 = vmax.f32 %v11691_v34, 0.0  ;;  %v10035_v40 = vld [vmem:[%s16787_s3 + $0x3e0] ss:$16 sps:$4 sm:$0xff]  }
 0x173   : > { %9458 = vrot.lane.b32.xlu0 %v9457_v21, %s10771_s18  ;;  %4760 = vmatprep.subr.bf16.mxu1 %v10034_v15  ;;  %v16856_v6 = vmax.f32 %v11684_v41, 0.0  ;;  %v11710_v2 = vadd.f32 %v11538_v61, %v17150_v63  ;;  %v11713_v21 = vadd.f32 %v11396_v18, %v1206_v20  ;;  %v9482_v4 = vpack.i.bf16 %v16851_v42, %v16850_v58  ;;  %v10043_v15 = vld [vmem:[%s16787_s3 + $0x3a4] ss:$16 sps:$4 sm:$0xff]  }
 0x174   : > { %v17193_v1 = vld [vmem:[#allocation8_spill] sm:$0xff] }
 0x175   : > { %17151 = vst [vmem:[#allocation45_spill] sm:$0xff] %v11713_v21  ;;  %v16855_v17 = vmax.f32 %v11710_v2, 0.0  ;;  %v9492_v20 = vpack.i.bf16 %v16848_v22, %v16856_v6  ;;  %v17161_v22 = vld [vmem:[#allocation13_spill] sm:$0xff]  ;;  %v17167_v6 = vld [vmem:[#allocation38_spill] sm:$0xff] }
 0x176   : > { %4761 = vmatpush1.bf16.msra.mxu1 %v10032_v8  ;;  %v10041_v8 = vld [vmem:[%s16787_s3 + $0x3a0] ss:$16 sps:$4 sm:$0xff]   ;;  %v17168_v36 = vmax.f32 %v11308_v38, %v17167_v6  ;;  %v17176_v38 = vmax.f32 %v11336_v35, %v11486_v53  ;;  %v17180_v6 = vld [vmem:[#allocation33_spill] sm:$0xff]  ;;  %v17182_v53 = vld [vmem:[#allocation11_spill] sm:$0xff] }
 0x177   : > { %9463 = vrot.lane.b32.xlu0 %v9462_v57, %s10771_s18  ;;  %4762 = vmatprep.subr.bf16.mxu1 %v10037_v33  ;;  %v16845_v57 = vmax.f32 %v11713_v21, 0.0  ;;  %v10044_v33 = vld [vmem:[%s16787_s3 + $0x380] ss:$16 sps:$4 sm:$0xff]  }
 0x179   : > { %v9507_v63 = vpack.i.bf16 %v16845_v57, %v16855_v17  ;;  %v17166_v17 = vld [vmem:[#allocation12_spill] sm:$0xff] }
 0x17a   : > { %4763 = vmatpush2.bf16.msra.mxu1 %v10035_v40  ;;  %v10049_v40 = vld [vmem:[%s16787_s3 + $0x364] ss:$16 sps:$4 sm:$0xff]  }
 0x17b   : > { %9483 = vrot.lane.b32.xlu0 %v9482_v4, %s10771_s18  ;;  %4764 = vmatprep.subr.bf16.mxu1 %v10040_v19  ;;  %v10046_v4 = vld [vmem:[%s16787_s3 + $0x384] ss:$16 sps:$4 sm:$0xff]   ;;  %v10047_v19 = vld [vmem:[%s16787_s3 + $0x360] ss:$16 sps:$4 sm:$0xff]  }
 0x17e   : > { %4765 = vmatpush2.bf16.msra.mxu1 %v10038_v50  ;;  %v10052_v50 = vld [vmem:[%s16787_s3 + $0x344] ss:$16 sps:$4 sm:$0xff]  }
 0x17f   : > { %9493 = vrot.lane.b32.xlu0 %v9492_v20, %s10771_s18  ;;  %4766 = vmatprep.subr.bf16.mxu1 %v10043_v15  ;;  %v10050_v20 = vld [vmem:[%s16787_s3 + $0x340] ss:$16 sps:$4 sm:$0xff]   ;;  %v10055_v15 = vld [vmem:[%s16787_s3 + $0x324] ss:$16 sps:$4 sm:$0xff]  }
 0x182   : > { %4767 = vmatpush2.bf16.msra.mxu1 %v10041_v8  ;;  %v10053_v8 = vld [vmem:[%s16787_s3 + $0x320] ss:$16 sps:$4 sm:$0xff]  }
 0x183   : > { %9508 = vrot.lane.b32.xlu0 %v9507_v63, %s10771_s18  ;;  %4768 = vmatprep.subr.bf16.mxu1 %v10046_v4  ;;  %v1194_v63 = vmax.f32 %v11068_v9, %v11143_v51  ;;  %v1198_v4 = vmax.f32 %v11074_v13, %v11157_v62  ;;  %v17152_v9 = vmax.f32 %v11066_v7, %v11136_v46  ;;  %v17153_v62 = vld [vmem:[#allocation16_spill] sm:$0xff] }
 0x185   : > { %v11792_v13 = vadd.f32 %v11538_v61, %v17152_v9  ;;  %v11795_v51 = vadd.f32 %v11396_v18, %v1194_v63  ;;  %v11804_v57 = vadd.f32 %v11396_v18, %v1198_v4 }
 0x186   : > { %4769 = vmatpush2.bf16.msra.mxu1 %v10044_v33  ;;  %v10058_v33 = vld [vmem:[%s16787_s3 + $0x304] ss:$16 sps:$4 sm:$0xff]  }
 0x187   : > { %4770 = vmatprep.subr.bf16.mxu1 %v10049_v40  ;;  %17156 = vst [vmem:[#allocation46_spill] sm:$0xff] %v11804_v57  ;;  %v16858_v9 = vmax.f32 %v11792_v13, 0.0  ;;  %v16863_v4 = vmax.f32 %v11804_v57, 0.0 }
 0x18a   : > { %4771 = vmatpush2.bf16.msra.mxu1 %v10047_v19  ;;  %v10056_v19 = vld [vmem:[%s16787_s3 + $0x300] ss:$16 sps:$4 sm:$0xff]  }
 0x18b   : > { %4772 = vmatprep.subr.bf16.mxu1 %v10052_v50 }
 0x18e   : > { %4773 = vmatpush2.bf16.msra.mxu1 %v10050_v20 }
 0x18f   : > { %4774 = vmatprep.subr.bf16.mxu1 %v10055_v15  ;;  %v17154_v15 = vmax.f32 %v11070_v11, %v17153_v62  ;;  %v16860_v11 = vmax.f32 %v11795_v51, 0.0 }
 0x192   : > { %4775 = vmatpush2.bf16.msra.mxu1 %v10053_v8  ;;  %v11801_v8 = vadd.f32 %v11538_v61, %v17154_v15  ;;  %v17157_v15 = vld [vmem:[#allocation15_spill] sm:$0xff] }
 0x193   : > { %v11781_v40 = vpop.permute.xlu0 %9383  ;;  %4776 = vmatprep.subr.bf16.mxu1 %v10058_v33  ;;  %v17158_v14 = vmax.f32 %v17157_v15, 0.0 }
 0x194   : > { %v16849_v50 = vunpack.i.h.bf16 %v11781_v40  ;;  %v9385_v20 = vunpack.i.l.bf16 %v11781_v40  ;;  %17155 = vst [vmem:[#allocation16_spill] sm:$0xff] %v11801_v8  ;;  %v16862_v62 = vmax.f32 %v11801_v8, 0.0 }
 0x196   : > { %4777 = vmatpush2.bf16.msra.mxu1 %v10056_v19  ;;  %v1461_v7 = vsel %vm1460_vm2, %v9385_v20, %v16849_v50  ;;  %v17162_v50 = vmax.f32 %v17161_v22, 0.0 }
 0x197   : > { %v11806_v33 = vpop.permute.xlu0 %9388 }
 0x198   : > { %v16854_v46 = vunpack.i.h.bf16 %v11806_v33  ;;  %v9390_v63 = vunpack.i.l.bf16 %v11806_v33  ;;  %v11828_v58 = vmax.f32 %v17162_v50, %v1461_v7  ;;  %v9487_v7 = vpack.i.bf16 %v16863_v4, %v16862_v62 }
 0x19a   : > { %v1464_v19 = vsel %vm1460_vm2, %v9390_v63, %v16854_v46  ;;  %v9477_v63 = vpack.i.bf16 %v16860_v11, %v16858_v9  ;;  %v17165_v46 = vld [vmem:[#allocation29_spill] sm:$0xff]  ;;  %v11853_v9 = vadd.f32 %v17168_v36, %v11538_v61  ;;  %v11872_v36 = vadd.f32 %v17176_v38, %v11538_v61 }
 0x19b   : > { %v11822_v10 = vmax.f32 %v17158_v14, %v1464_v19  ;;  %v11824_v20 = vpop.permute.xlu1 %9393  ;;  %v17163_v14 = vld [vmem:[#allocation25_spill] sm:$0xff]  ;;  %v17164_v19 = vld [vmem:[#allocation10_spill] sm:$0xff]  ;;  %v1214_v22 = vmax.f32 %v17166_v17, %v17165_v46  ;;  %v17172_v46 = vld [vmem:[#allocation32_spill] sm:$0xff] }
 0x19c   : > { %17160 = vst [vmem:[#allocation47_spill] sm:$0xff] %v11824_v20  ;;  %v16859_v42 = vunpack.i.h.bf16 %v11824_v20  ;;  %v9395_v55 = vunpack.i.l.bf16 %v11824_v20  ;;  %v1210_v15 = vmax.f32 %v17164_v19, %v17163_v14  ;;  %17169 = vst [vmem:[#allocation13_spill] sm:$0xff] %v11853_v9  ;;  %v17170_v14 = vmax.f32 %v11322_v30, %v11453_v54  ;;  %v17173_v19 = vld [vmem:[#allocation18_spill] sm:$0xff] }
 0x19d   : > { %17159 = vst [vmem:[#allocation15_spill] sm:$0xff] %v11822_v10  ;;  %v9472_v31 = vpack.i.bf16 %v11822_v10, %v11828_v58  ;;  %17177 = vst [vmem:[#allocation29_spill] sm:$0xff] %v11872_v36  ;;  %v17178_v30 = vmax.f32 %v11350_v52, %v11527_v16  ;;  %v11895_v16 = vadd.f32 %v11396_v18, %v1214_v22 }
 0x19e   : > { %v1467_v50 = vsel %vm1460_vm2, %v9395_v55, %v16859_v42  ;;  %v11859_v17 = vadd.f32 %v17170_v14, %v11538_v61  ;;  %v1283_v55 = vmax.f32 %v17172_v46, %v11503_v59  ;;  %v17174_v42 = vmax.f32 %v17173_v19, 0.0  ;;  %v17183_v46 = vld [vmem:[#allocation27_spill] sm:$0xff] }
 0x19f   : > { %v11865_v32 = vpop.permute.xlu1 %9398  ;;  %9473 = vrot.lane.b32.xlu1 %v9472_v31, %s10772_s16  ;;  %v11878_v54 = vadd.f32 %v17178_v30, %v11538_v61  ;;  %v16867_v31 = vrot.slane %v11822_v10, 1  ;;  %v17184_v19 = vmax.f32 %v17182_v53, %v17183_v46  ;;  %17186 = vst [vmem:[#allocation18_spill] sm:$0xff] %v11895_v16 }
 0x1a0   : > { %17171 = vst [vmem:[#allocation25_spill] sm:$0xff] %v11859_v17  ;;  %v1518_v11 = vmax.f32 %v17174_v42, %v1467_v50  ;;  %17175 = vst [vmem:[#allocation10_spill] sm:$0xff] %v11865_v32  ;;  %v16864_v59 = vunpack.i.h.bf16 %v11865_v32  ;;  %v9400_v42 = vunpack.i.l.bf16 %v11865_v32  ;;  %v1287_v50 = vmax.f32 %v17180_v6, %v11543_v48  ;;  %v17187_v6 = vld [vmem:[#allocation20_spill] sm:$0xff]  ;;  %v17233_v32 = vld [vmem:[#allocation35_spill] sm:$0xff] }
 0x1a1   : > { %17179 = vst [vmem:[#allocation12_spill] sm:$0xff] %v11878_v54  ;;  %v11892_v52 = vadd.f32 %v11538_v61, %v17184_v19  ;;  %v17188_v62 = vmax.f32 %v17187_v6, 0.0  ;;  %v11916_v46 = vadd.f32 %v1283_v55, %v11396_v18  ;;  %v11931_v55 = vadd.f32 %v11396_v18, %v1210_v15 }
 0x1a2   : > { %v11886_v14 = vpack.c.bf16 %v1518_v11, %v11822_v10  ;;  %v1961_v35 = vrot.slane %v1518_v11, 1  ;;  %v1470_v38 = vsel %vm1460_vm2, %v9400_v42, %v16864_v59  ;;  %v17198_v42 = vld [vmem:[#allocation22_spill] sm:$0xff]  ;;  %v17202_v15 = vmax.f32 %v11853_v9, 0.0 }
 0x1a3   : > { %17185 = vst [vmem:[#allocation32_spill] sm:$0xff] %v11892_v52  ;;  %v1522_v4 = vmax.f32 %v17188_v62, %v1470_v38  ;;  %v11905_v53 = vpop.permute.xlu0 %9403  ;;  %9478 = vrot.lane.b32.xlu1 %v9477_v63, %s10771_s18  ;;  %17191 = vst [vmem:[#allocation27_spill] sm:$0xff] %v11916_v46  ;;  %v11922_v38 = vadd.f32 %v1287_v50, %v11396_v18  ;;  %v17208_v62 = vld [vmem:[#allocation26_spill] sm:$0xff]  ;;  %v17234_v21 = vmax.f32 %v17233_v32, 0.0  ;;  %v12125_v32 = vadd.s32 32, %v11096_v25 }
 0x1a4   : > { %17181 = vst [vmem:[#allocation38_spill] sm:$0xff] %v11886_v14  ;;  %17189 = vst [vmem:[#allocation33_spill] sm:$0xff] %v11905_v53  ;;  %v11912_v22 = vsel %vm16923_vm3, %v16867_v31, %v1961_v35  ;;  %v16870_v19 = vunpack.i.h.bf16 %v11905_v53  ;;  %v9405_v6 = vunpack.i.l.bf16 %v11905_v53  ;;  %v17195_v31 = vmax.f32 %v17193_v1, %v17194_v27 }
 0x1a5   : > { %17190 = vst [vmem:[#allocation11_spill] sm:$0xff] %v11912_v22  ;;  %17192 = vst [vmem:[#allocation20_spill] sm:$0xff] %v11922_v38  ;;  %v9517_v63 = vpack.i.bf16 %v1522_v4, %v1518_v11  ;;  %v1965_v59 = vrot.slane %v1522_v4, 1  ;;  %v17199_v11 = vmax.f32 %v17198_v42, 0.0  ;;  %v16874_v42 = vmax.f32 %v11922_v38, 0.0 }
 0x1a6   : > { %v11928_v0 = vadd.f32 %v11538_v61, %v17195_v31  ;;  %17197 = vst [vmem:[#allocation23_spill] sm:$0xff] %v11931_v55  ;;  %v1473_v5 = vsel %vm1460_vm2, %v9405_v6, %v16870_v19  ;;  %v17205_v6 = vmax.f32 %v11878_v54, 0.0  ;;  %v17209_v61 = vmax.f32 %v17208_v62, 0.0 }
 0x1a7   : > { %v1526_v30 = vmax.f32 %v17199_v11, %v1473_v5  ;;  %v11940_v48 = vpop.permute.xlu1 %9408  ;;  %9488 = vrot.lane.b32.xlu1 %v9487_v7, %s10771_s18  ;;  %9518 = vrot.lane.b32.xlu0 %v9517_v63, %s10772_s16  ;;  %v11946_v18 = vsel %vm16923_vm3, %v1961_v35, %v1965_v59  ;;  %v17203_v5 = vmax.f32 %v11859_v17, 0.0  ;;  %v17204_v7 = vmax.f32 %v11872_v36, 0.0 }
 0x1a8   : > { %17196 = vst [vmem:[#allocation8_spill] sm:$0xff] %v11928_v0  ;;  %17200 = vst [vmem:[#allocation22_spill] sm:$0xff] %v11940_v48  ;;  %v16871_v1 = vunpack.i.h.bf16 %v11940_v48  ;;  %v9410_v27 = vunpack.i.l.bf16 %v11940_v48  ;;  %v17211_v62 = vmax.f32 %v11916_v46, 0.0  ;;  %v17229_v53 = vmax.f32 %v11444_v60, 0.0 }
 0x1a9   : > { %17201 = vst [vmem:[#allocation48_spill] sm:$0xff] %v11946_v18  ;;  %v9497_v31 = vpack.i.bf16 %v17203_v5, %v17202_v15  ;;  %v9522_v63 = vpack.i.bf16 %v17205_v6, %v17204_v7  ;;  %v11960_v35 = vpack.c.bf16 %v1526_v30, %v1522_v4  ;;  %v1969_v11 = vrot.slane %v1526_v30, 1 }
 0x1aa   : > { %v1476_v19 = vsel %vm1460_vm2, %v9410_v27, %v16871_v1  ;;  %v16876_v27 = vmax.f32 %v11931_v55, 0.0  ;;  %v17213_v6 = vmax.f32 %v11895_v16, 0.0  ;;  %v17214_v1 = vld [vmem:[#allocation30_spill] sm:$0xff]  ;;  %v12110_v55 = vadd.s32 24, %v11096_v25 }
 0x1ab   : > { %17206 = vst [vmem:[#allocation49_spill] sm:$0xff] %v11960_v35  ;;  %v11965_v50 = vpop.permute.xlu0 %9413  ;;  %v1530_v22 = vmax.f32 %v17209_v61, %v1476_v19  ;;  %9498 = vrot.lane.b32.xlu1 %v9497_v31, %s10771_s18  ;;  %9523 = vrot.lane.b32.xlu0 %v9522_v63, %s10771_s18  ;;  %v11975_v4 = vsel %vm16923_vm3, %v1965_v59, %v1969_v11  ;;  %v17212_v31 = vmax.f32 %v11892_v52, 0.0  ;;  %v17215_v35 = vmax.f32 %v17214_v1, 0.0 }
 0x1ac   : > { %17207 = vst [vmem:[#allocation50_spill] sm:$0xff] %v11965_v50  ;;  %v16873_v15 = vunpack.i.h.bf16 %v11965_v50  ;;  %v9415_v5 = vunpack.i.l.bf16 %v11965_v50  ;;  %17210 = vst [vmem:[#allocation26_spill] sm:$0xff] %v11975_v4  ;;  %v9502_v61 = vpack.i.bf16 %v16874_v42, %v17211_v62  ;;  %v17239_v54 = vmax.f32 %v11620_v37, 0.0 }
 0x1ad   : > { %v9532_v63 = vpack.i.bf16 %v17213_v6, %v17212_v31  ;;  %v1973_v59 = vrot.slane %v1530_v22, 1  ;;  %v17219_v31 = vmax.f32 %v11928_v0, 0.0  ;;  %v12160_v38 = vadd.s32 40, %v11096_v25 }
 0x1ae   : > { %v1479_v19 = vsel %vm1460_vm2, %v9415_v5, %v16873_v15  ;;  %v17266_v17 = vmax.f32 %v11575_v29, 0.0 }
 0x1af   : > { %v11992_v7 = vmax.f32 %v17215_v35, %v1479_v19  ;;  %9503 = vrot.lane.b32.xlu1 %v9502_v61, %s10771_s18  ;;  %9533 = vrot.lane.b32.xlu0 %v9532_v63, %s10771_s18  ;;  %v11998_v5 = vsel %vm16923_vm3, %v1969_v11, %v1973_v59  ;;  %v9512_v1 = vpack.i.bf16 %v16876_v27, %v17219_v31  ;;  %v1701_v19 = vadd.s32 8, %v11096_v25  ;;  %v17221_v27 = vld [vmem:[#allocation34_spill] sm:$0xff] }
 0x1b0   : > { %17217 = vst [vmem:[#allocation51_spill] sm:$0xff] %v11998_v5  ;;  %v9527_v11 = vpack.i.bf16 %v1530_v22, %v1526_v30  ;;  %v12018_v61 = vmul.u32.u64.low 2454267026, %v11096_v25  ;;  %v12019_v6 = vmul.u32.u64.high 2454267026, %v11096_v25, %v12018_v61  ;;  %v16880_v30 = vmov 0  }
 0x1b1   : > { %17216 = vst [vmem:[#allocation30_spill] sm:$0xff] %v11992_v7  ;;  %v12001_v62 = vpack.c.bf16 %v11992_v7, %v1530_v22  ;;  %v16875_v15 = vrot.slane %v11992_v7, 1  ;;  %v12021_v63 = vmul.u32.u64.low 2454267026, %v1701_v19  ;;  %v12022_v42 = vmul.u32.u64.high 2454267026, %v1701_v19, %v12021_v63 }
 0x1b2   : > { %vm1713_vm4 = vc.u32 %v12018_v61, 2454267026 }
 0x1b3   : > { %17218 = vst [vmem:[#allocation52_spill] sm:$0xff] %v12001_v62  ;;  %v12012_v35 = vsel %vm16923_vm3, %v1973_v59, %v16875_v15  ;;  %9513 = vrot.lane.b32.xlu1 %v9512_v1, %s10771_s18  ;;  %vm1727_vm5 = vc.u32 %v12021_v63, 2454267026  ;;  %v1714_v22 = vsel %vm1713_vm4, 1, %v16880_v30  ;;  %s8386_s18 = scalar_lea.sflag [#allocation3], %s407_s27 }
 0x1b4   : > { %17220 = vst [vmem:[#allocation53_spill] sm:$0xff] %v12012_v35  ;;  %v17222_v35 = vmax.f32 %v17221_v27, 0.0  ;;  %v1715_v61 = vadd.s32 %v12019_v6, %v1714_v22  ;;  %v17225_v22 = vld [vmem:[#allocation36_spill] sm:$0xff] }
 0x1b7   : > { %9528 = vrot.lane.b32.xlu1 %v9527_v11, %s10772_s16  ;;  %v1728_v11 = vsel %vm1727_vm5, 1, %v16880_v30 }
 0x1b8   : > { %v1729_v63 = vadd.s32 %v12022_v42, %v1728_v11  ;;  %v17226_v11 = vmax.f32 %v17225_v22, 0.0  ;;  %v10061_v22 = vld [vmem:[%s16787_s3 + $0x4e4] ss:$16 sps:$4 sm:$0xff]  }
 0x1b9   : > { %4849 = vmatprep.subr.bf16.mxu0 %v10061_v22 }
 0x1ba   : > { %v1730_v27 = vshrl.u32 %v1729_v63, 2 }
 0x1ce   : > { %v12024_v31 = vpop.permute.xlu1 %9418 }
 0x1cf   : > { %v9421_v59 = vunpack.i.h.bf16 %v12024_v31  ;;  %v9420_v1 = vunpack.i.l.bf16 %v12024_v31  ;;  %v9424_v5 = vpop.permute.xlu0 %9423 }
 0x1d0   : > { %v9426_v4 = vunpack.i.h.bf16 %v9424_v5  ;;  %v9425_v50 = vunpack.i.l.bf16 %v9424_v5 }
 0x1d1   : > { %v1622_v15 = vsel %vm1460_vm2, %v9420_v1, %v9421_v59 }
 0x1d2   : > { %v12033_v62 = vmax.f32 %v17222_v35, %v1622_v15  ;;  %v1625_v14 = vsel %vm1460_vm2, %v9425_v50, %v9426_v4  ;;  %v1716_v15 = vshrl.u32 %v1715_v61, 2  ;;  %v17223_v50 = vmax.f32 %v11421_v44, 0.0 }
 0x1d4   : > { %v9537_v31 = vpack.i.bf16 %v12033_v62, %v11992_v7  ;;  %v12040_v18 = vpop.permute.xlu0 %9433  ;;  %v1717_v44 = vmul.u32 7, %v1716_v15 }
 0x1d5   : > { %v12042_v30 = vpop.permute.xlu1 %9428  ;;  %v16886_v35 = vunpack.i.h.bf16 %v12040_v18  ;;  %v16888_v6 = vunpack.i.l.bf16 %v12040_v18 }
 0x1d6   : > { %9538 = vrot.lane.b32.xlu1 %v9537_v31, %s10772_s16  ;;  %v16887_v42 = vunpack.i.h.bf16 %v12042_v30  ;;  %v9430_v5 = vunpack.i.l.bf16 %v12042_v30  ;;  %v17227_v31 = vld [vmem:[#allocation37_spill] sm:$0xff]  ;;  %v1718_v60 = vsub.s32 %v11096_v25, %v1717_v44  ;;  %v12093_v44 = vadd.s32 16, %v11096_v25 }
 0x1d7   : > { %v12053_v1 = vmax.f32 %v17223_v50, %v16886_v35  ;;  %v12059_v61 = vmax.f32 %v17226_v11, %v16888_v6  ;;  %v17228_v7 = vmax.f32 %v17227_v31, 0.0  ;;  %v1731_v50 = vmul.u32 7, %v1730_v27 }
 0x1d8   : > { %v1628_v63 = vsel %vm1460_vm2, %v9430_v5, %v16887_v42  ;;  %vm1805_vm6 = vcmp.ne.s32.totalorder %v1718_v60, 0  ;;  %vm1812_vm7 = vcmp.lt.s32.totalorder %v1718_v60, 0  ;;  %v1826_v27 = vadd.s32 7, %v1718_v60 }
 0x1d9   : > { %17224 = vst [vmem:[#allocation34_spill] sm:$0xff] %v12053_v1  ;;  %v12066_v48 = vmax.f32 %v17228_v7, %v1625_v14  ;;  %v12070_v20 = vmax.f32 %v17229_v53, %v1628_v63  ;;  %v12083_v14 = vpop.permute.xlu0 %9438  ;;  %v1732_v53 = vsub.s32 %v1701_v19, %v1731_v50  ;;  %vm1819_vm10 = vmand %vm1812_vm7, %vm1805_vm6 }
 0x1da   : > { %v12096_v42 = vsel %vm1819_vm10, %v1826_v27, %v1718_v60  ;;  %v12113_v60 = vmul.u32.u64.low 2454267026, %v12093_v44  ;;  %v12114_v27 = vmul.u32.u64.high 2454267026, %v12093_v44, %v12113_v60 }
 0x1db   : > { %v9542_v35 = vpack.i.bf16 %v12070_v20, %v12066_v48  ;;  %vm1806_vm8 = vcmp.ne.s32.totalorder %v1732_v53, 0  ;;  %vm1813_vm9 = vcmp.lt.s32.totalorder %v1732_v53, 0  ;;  %v1827_v31 = vadd.s32 7, %v1732_v53  ;;  %17231 = vst [vmem:[#allocation37_spill] sm:$0xff] %v12096_v42 }
 0x1dc   : > { %v12079_v11 = vpop.permute.xlu1 %9443  ;;  %vm1820_vm11 = vmand %vm1813_vm9, %vm1806_vm8  ;;  %vm1840_vm14 = vcmp.ne.s32.totalorder %v12096_v42, 0  ;;  %vm1741_vm0 = vc.u32 %v12113_v60, 2454267026 }
 0x1dd   : > { %17230 = vst [vmem:[#allocation36_spill] sm:$0xff] %v12079_v11  ;;  %9543 = vrot.lane.b32.xlu0 %v9542_v35, %s10772_s16  ;;  %v12103_v16 = vsel %vm1820_vm11, %v1827_v31, %v1732_v53  ;;  %v17236_v31 = vld [vmem:[#allocation39_spill] sm:$0xff] }
 0x1de   : > { %17232 = vst [vmem:[#allocation54_spill] sm:$0xff] %v12103_v16  ;;  %vm1841_vm13 = vcmp.ne.s32.totalorder %v12103_v16, 0 }
 0x1df   : > { %vm12200_vm15 = vmpackc.low %vm1841_vm13, %vm1840_vm14 }
 0x1e0   : > { %v12085_v7 = vpop.permute.xlu1 %9448 }
 0x1e1   : > { %v12087_v15 = vpop.permute.xlu0 %9453 }
 0x1e2   : > { %v16896_v63 = vunpack.i.l.bf16 %v12087_v15  ;;  %v16899_v6 = vunpack.i.h.bf16 %v12087_v15 }
 0x1e4   : > { %v12090_v35 = vpop.permute.xlu1 %9468  ;;  %v1626_v10 = vsel %vm1460_vm2, %v9426_v4, %v16896_v63 }
 0x1e5   : > { %v9471_v19 = vunpack.i.h.bf16 %v12090_v35  ;;  %v9459_v50 = vpop.permute.xlu0 %9458 }
 0x1e6   : > { %v9461_v22 = vunpack.i.h.bf16 %v9459_v50  ;;  %v9460_v5 = vunpack.i.l.bf16 %v9459_v50  ;;  %v17237_v50 = vmax.f32 %v17236_v31, 0.0  ;;  %v9440_v31 = vunpack.i.l.bf16 %v12083_v14 }
 0x1e7   : > { %v1623_v52 = vsel %vm1460_vm2, %v9421_v59, %v9471_v19 }
 0x1e8   : > { %v12107_v0 = vmax.f32 %v17234_v21, %v1623_v52  ;;  %v1641_v4 = vsel %vm1460_vm2, %v9461_v22, %v16899_v6  ;;  %v1640_v59 = vsel %vm1460_vm2, %v9460_v5, %v9461_v22  ;;  %v9445_v52 = vunpack.i.l.bf16 %v12079_v11 }
 0x1e9   : > { %v12122_v53 = vpop.permute.xlu0 %9463  ;;  %v12131_v63 = vmax.f32 %v17237_v50, %v1626_v10  ;;  %v12135_v46 = vmax.f32 %v17239_v54, %v1641_v4  ;;  %v17241_v5 = vmax.f32 %v11592_v26, 0.0  ;;  %v10076_v54 = vld [vmem:[%s16787_s3 + $0x6e4] ss:$16 sps:$4 sm:$0xff]   ;;  %v1847_v26 = vrot.slane %v12033_v62, 7 }
 0x1ea   : > { %17235 = vst [vmem:[#allocation35_spill] sm:$0xff] %v12107_v0  ;;  %v9466_v36 = vunpack.i.h.bf16 %v12122_v53  ;;  %v1848_v10 = vrot.slane %v12107_v0, 7  ;;  %v17245_v6 = vunpack.i.h.bf16 %v12079_v11  ;;  %v17246_v56 = vunpack.i.l.bf16 %v12122_v53  ;;  %4952 = vmatprep.subr.bf16.mxu1 %v10076_v54 }
 0x1eb   : > { %17238 = vst [vmem:[#allocation39_spill] sm:$0xff] %v12131_v63  ;;  %17240 = vst [vmem:[#allocation55_spill] sm:$0xff] %v12135_v46  ;;  %v12140_v22 = vmax.f32 %v17241_v5, %v1640_v59  ;;  %v17243_v59 = vmax.f32 %v11623_v47, 0.0  ;;  %v16907_v21 = vrot.slane %v12131_v63, 7  ;;  %v17247_v47 = vrot.slane %v12066_v48, 7 }
 0x1ec   : > { %v1634_v37 = vsel %vm1460_vm2, %v9445_v52, %v17245_v6  ;;  %v1463_v45 = vsel %vm1460_vm2, %v17246_v56, %v9466_v36  ;;  %v17248_v6 = vmax.f32 %v11606_v39, 0.0  ;;  %v17250_v56 = vunpack.i.h.bf16 %v12083_v14 }
 0x1ed   : > { %17242 = vst [vmem:[#allocation56_spill] sm:$0xff] %v12140_v22  ;;  %v16906_v4 = vrot.slane %v12140_v22, 7  ;;  %v12155_v50 = vmax.f32 %v17243_v59, %v9466_v36  ;;  %v12157_v5 = vpop.permute.xlu0 %9483  ;;  %v1896_v59 = vsel %vm1875_vm12, %v1847_v26, %v17247_v47  ;;  %v1897_v47 = vsel %vm1875_vm12, %v1848_v10, %v16907_v21 }
 0x1ee   : > { %v12180_v52 = vmax.f32 %v17248_v6, %v1463_v45  ;;  %v1631_v36 = vsel %vm1460_vm2, %v9440_v31, %v17250_v56  ;;  %v17252_v57 = vrot.slane %v12135_v46, 7  ;;  %v17253_v45 = vmov 0 }
 0x1ef   : > { %17244 = vst [vmem:[#allocation57_spill] sm:$0xff] %v12155_v50  ;;  %v1900_v8 = vsel %vm1875_vm12, %v16906_v4, %v1847_v26  ;;  %v17254_v45 = vsel %vm12200_vm15, 4294967295, %v17253_v45  ;;  %v17261_v21 = vunpack.i.l.bf16 %v12040_v18  ;;  %v12239_v56 = vadd.s32 48, %v11096_v25 }
 0x1f0   : > { %17249 = vst [vmem:[#allocation58_spill] sm:$0xff] %v12180_v52  ;;  %v12186_v54 = vpack.c.bf16 %v1896_v59, %v1900_v8  ;;  %v1901_v39 = vsel %vm1875_vm12, %v17252_v57, %v1848_v10  ;;  %17255 = vst [vmem:[#allocation60_spill] sm:$0xff] %v17254_v45  ;;  %v17256_v8 = vmax.f32 %v11523_v49, 0.0  ;;  %v9547_v6 = vpack.i.bf16 %v12155_v50, %v12180_v52  ;;  %v10059_v57 = vld [vmem:[%s16787_s3 + $0x4e0] ss:$16 sps:$4 sm:$0xff]  }
 0x1f1   : > { %v12208_v26 = vpack.c.bf16 %v1897_v47, %v1901_v39  ;;  %v12210_v59 = vpop.permute.xlu0 %9493  ;;  %v12220_v4 = vmul.u32.u64.low 2454267026, %v12110_v55  ;;  %v12221_v49 = vmul.u32.u64.high 2454267026, %v12110_v55, %v12220_v4  ;;  %v17259_v47 = vld [vmem:[#allocation41_spill] sm:$0xff]  ;;  %v1624_v50 = vsel %vm1460_vm2, %v9471_v19, %v17261_v21 }
 0x1f2   : > { %17251 = vst [vmem:[#allocation59_spill] sm:$0xff] %v12186_v54  ;;  %v12206_v31 = vmax.f32 %v17256_v8, %v1634_v37  ;;  %v10064_v37 = vld [vmem:[%s16787_s3 + $0x4c4] ss:$16 sps:$4 sm:$0xff]   ;;  %v17260_v39 = vmax.f32 %v17259_v47, 0.0  ;;  %9548 = vrot.lane.b32.xlu1 %v9547_v6, %s10772_s16  ;;  %v12249_v19 = vmul.u32.u64.low 2454267026, %v12160_v38  ;;  %v12250_v21 = vmul.u32.u64.high 2454267026, %v12160_v38, %v12249_v19 }
 0x1f3   : > { %17258 = vst [vmem:[#allocation62_spill] sm:$0xff] %v12208_v26  ;;  %8885 = vmatprep.mubr.msk.bf16.mxu0 %vm12200_vm15, %v12208_v26  ;;  %v17263_v6 = vunpack.i.l.bf16 %v12087_v15  ;;  %v17264_v26 = vunpack.i.h.bf16 %v12210_v59  ;;  %v17265_v52 = vunpack.i.l.bf16 %v12210_v59  ;;  %v12271_v9 = vmax.f32 %v17266_v17, %v1624_v50 }
 0x1f4   : > { %17257 = vst [vmem:[#allocation61_spill] sm:$0xff] %v12206_v31  ;;  %v12228_v8 = vmax.f32 %v17260_v39, %v1631_v36  ;;  %8888 = vmatmul.mubr.msk.bf16.vlgmr.msra.gmra.mxu0 %vm12200_vm15, %v12186_v54  ;;  %v12245_v36 = vmul.u32.u64.low 2454267026, %v12125_v32  ;;  %v12246_v47 = vmul.u32.u64.high 2454267026, %v12125_v32, %v12245_v36  ;;  %v17262_v39 = vunpack.i.h.bf16 %v12040_v18  ;;  %v10062_v18 = vld [vmem:[%s16787_s3 + $0x4c0] ss:$16 sps:$4 sm:$0xff]  }
 0x1f5   : > { %v1472_v54 = vsel %vm1460_vm2, %v17265_v52, %v17264_v26  ;;  %v12262_v46 = vpop.permute.xlu0 %9508  ;;  %4850 = vmatpush1.bf16.msra.mxu0 %v10059_v57  ;;  %v10067_v52 = vld [vmem:[%s16787_s3 + $0x4a4] ss:$16 sps:$4 sm:$0xff]   ;;  %v17267_v26 = vmov 0   ;;  %vm1755_vm1 = vc.u32 %v12220_v4, 2454267026  ;;  %v17268_v50 = vmax.f32 %v11563_v23, 0.0 }
 0x1f6   : > { %v1627_v10 = vsel %vm1460_vm2, %v17263_v6, %v17262_v39  ;;  %v9557_v22 = vpack.i.bf16 %v12206_v31, %v12228_v8  ;;  %4851 = vmatprep.subr.bf16.mxu0 %v10064_v37  ;;  %v1742_v57 = vsel %vm1741_vm0, 1, %v17267_v26  ;;  %v17269_v37 = vmax.f32 %v11684_v41, 0.0  ;;  %v10065_v41 = vld [vmem:[%s16787_s3 + $0x4a0] ss:$16 sps:$4 sm:$0xff]  }
 0x1f7   : > { %v12283_v29 = vmul.u32.u64.low 2454267026, %v12239_v56  ;;  %v12284_v17 = vmul.u32.u64.high 2454267026, %v12239_v56, %v12283_v29  ;;  %v12288_v39 = vmax.f32 %v17268_v50, %v1627_v10  ;;  %v17271_v31 = vunpack.i.h.bf16 %v12262_v46  ;;  %v10068_v50 = vld [vmem:[%s16787_s3 + $0x480] ss:$16 sps:$4 sm:$0xff]  }
 0x1f8   : > { %9558 = vrot.lane.b32.xlu1 %v9557_v22, %s10772_s16  ;;  %v12292_v6 = vmax.f32 %v17269_v37, %v1472_v54  ;;  %v17272_v22 = vunpack.i.l.bf16 %v12262_v46  ;;  %vm1769_vm4 = vc.u32 %v12245_v36, 2454267026  ;;  %v17273_v4 = vmax.f32 %v11710_v2, 0.0  ;;  %v10070_v2 = vld [vmem:[%s16787_s3 + $0x484] ss:$16 sps:$4 sm:$0xff]  }
 0x1f9   : > { %v9562_v23 = vpack.i.bf16 %v12107_v0, %v12033_v62  ;;  %vm1783_vm5 = vc.u32 %v12249_v19, 2454267026  ;;  %4852 = vmatpush1.bf16.msra.mxu0 %v10062_v18  ;;  %v1756_v54 = vsel %vm1755_vm1, 1, %v17267_v26  ;;  %v1743_v62 = vadd.s32 %v12114_v27, %v1742_v57  ;;  %v10073_v57 = vld [vmem:[%s16787_s3 + $0x464] ss:$16 sps:$4 sm:$0xff]  }
 0x1fa   : > { %17270 = vst [vmem:[#allocation41_spill] sm:$0xff] %v12292_v6  ;;  %v1475_v60 = vsel %vm1460_vm2, %v17272_v22, %v17271_v31  ;;  %4853 = vmatprep.subr.bf16.mxu0 %v10067_v52  ;;  %v1770_v10 = vsel %vm1769_vm4, 1, %v17267_v26  ;;  %vm1797_vm6 = vc.u32 %v12283_v29, 2454267026  ;;  %v1784_v36 = vsel %vm1783_vm5, 1, %v17267_v26 }
 0x1fb   : > { %v12301_v11 = vmax.f32 %v17273_v4, %v1475_v60  ;;  %v16926_v19 = vrot.slane %v12292_v6, 1  ;;  %v1757_v52 = vadd.s32 %v12221_v49, %v1756_v54  ;;  %v1771_v37 = vadd.s32 %v12246_v47, %v1770_v10  ;;  %v10071_v4 = vld [vmem:[%s16787_s3 + $0x460] ss:$16 sps:$4 sm:$0xff]  }
 0x1fc   : > { %9563 = vrot.lane.b32.xlu1 %v9562_v23, %s10774_s20  ;;  %v1798_v27 = vsel %vm1797_vm6, 1, %v17267_v26  ;;  %v1744_v29 = vshrl.u32 %v1743_v62, 2  ;;  %v1785_v22 = vadd.s32 %v12250_v21, %v1784_v36  ;;  %v9470_v62 = vunpack.i.l.bf16 %v12090_v35 }
 0x1fd   : > { %v16925_v18 = vrot.slane %v12301_v11, 1  ;;  %4854 = vmatpush1.bf16.msra.mxu0 %v10065_v41  ;;  %v1758_v60 = vshrl.u32 %v1757_v52, 2  ;;  %v1799_v47 = vadd.s32 %v12284_v17, %v1798_v27  ;;  %v1772_v23 = vshrl.u32 %v1771_v37, 2  ;;  %v10079_v41 = vld [vmem:[%s16787_s3 + $0x444] ss:$16 sps:$4 sm:$0xff]  }
 0x1fe   : > { %4855 = vmatprep.subr.bf16.mxu0 %v10070_v2  ;;  %v1745_v54 = vmul.u32 7, %v1744_v29  ;;  %v1786_v2 = vshrl.u32 %v1785_v22, 2  ;;  %v10077_v17 = vld [vmem:[%s16787_s3 + $0x440] ss:$16 sps:$4 sm:$0xff]   ;;  %v10085_v52 = vld [vmem:[%s16787_s3 + $0x424] ss:$16 sps:$4 sm:$0xff]   ;;  %v17275_v27 = vunpack.i.h.bf16 %v12087_v15 }
 0x1ff   : > { %v12335_v49 = vsel %vm16923_vm3, %v16926_v19, %v16925_v18  ;;  %v1759_v10 = vmul.u32 7, %v1758_v60  ;;  %v1800_v21 = vshrl.u32 %v1799_v47, 2  ;;  %v1773_v36 = vmul.u32 7, %v1772_v23  ;;  %v10083_v47 = vld [vmem:[%s16787_s3 + $0x420] ss:$16 sps:$4 sm:$0xff]  }
 0x200   : > { %17274 = vst [vmem:[#allocation63_spill] sm:$0xff] %v12335_v49  ;;  %v1787_v37 = vmul.u32 7, %v1786_v2  ;;  %v1642_v35 = vsel %vm1460_vm2, %v17275_v27, %v9470_v62  ;;  %v10091_v15 = vld [vmem:[%s16787_s3 + $0x404] ss:$16 sps:$4 sm:$0xff]   ;;  %v17278_v23 = vmax.f32 %v11589_v43, 0.0  ;;  %vm2136_vm3 = vcmask 392192  }
 0x201   : > { %4856 = vmatpush1.bf16.msra.mxu0 %v10068_v50  ;;  %v12353_v50 = vsub.s32 %v12093_v44, %v1745_v54  ;;  %v12363_v22 = vsub.s32 %v12110_v55, %v1759_v10  ;;  %v1801_v60 = vmul.u32 7, %v1800_v21  ;;  %v12369_v44 = vsub.s32 %v12125_v32, %v1773_v36  ;;  %v10089_v43 = vld [vmem:[%s16787_s3 + $0x400] ss:$16 sps:$4 sm:$0xff]   ;;  %v10097_v21 = vld [vmem:[%s16787_s3 + $0x5e4] ss:$16 sps:$4 sm:$0xff]  }
 0x202   : > { %4857 = vmatprep.subr.bf16.mxu0 %v10073_v57  ;;  %v17276_v57 = vmax.f32 %v11617_v3, 0.0  ;;  %v16930_v3 = vrot.slane %v12053_v1, 7  ;;  %v12378_v55 = vsub.s32 %v12160_v38, %v1787_v37  ;;  %v16927_v32 = vunpack.i.h.bf16 %v12157_v5 }
 0x203   : > { %vm1807_vm7 = vcmp.ne.s32.totalorder %v12353_v50, 0  ;;  %v16929_v54 = vunpack.i.l.bf16 %v12157_v5  ;;  %vm1814_vm8 = vcmp.lt.s32.totalorder %v12353_v50, 0  ;;  %vm1808_vm9 = vcmp.ne.s32.totalorder %v12363_v22, 0 }
 0x204   : > { %v12360_v29 = vmax.f32 %v17276_v57, %v9470_v62  ;;  %v1828_v62 = vadd.s32 7, %v12353_v50  ;;  %v12391_v10 = vsub.s32 %v12239_v56, %v1801_v60  ;;  %vm1815_vm10 = vcmp.lt.s32.totalorder %v12363_v22, 0  ;;  %vm12433_vm5 = vmand %vm1814_vm8, %vm1807_vm7 }
 0x205   : > { %4858 = vmatpush1.bf16.msra.mxu0 %v10071_v4  ;;  %v1850_v4 = vrot.slane %v12059_v61, 7  ;;  %v1829_v38 = vadd.s32 7, %v12363_v22  ;;  %vm1809_vm11 = vcmp.ne.s32.totalorder %v12369_v44, 0  ;;  %vm1816_vm0 = vcmp.lt.s32.totalorder %v12369_v44, 0  ;;  %vm12450_vm7 = vmand %vm1815_vm10, %vm1808_vm9 }
 0x206   : > { %4859 = vmatprep.subr.bf16.mxu0 %v10079_v41  ;;  %17277 = vst [vmem:[#allocation64_spill] sm:$0xff] %v12360_v29  ;;  %v12382_v41 = vmax.f32 %v17278_v23, %v1642_v35  ;;  %v16924_v2 = vrot.slane %v12360_v29, 7  ;;  %v1849_v56 = vrot.slane %v12271_v9, 7  ;;  %vm1810_vm1 = vcmp.ne.s32.totalorder %v12378_v55, 0 }
 0x207   : > { %v1830_v36 = vadd.s32 7, %v12369_v44  ;;  %v17280_v37 = vmax.f32 %v11670_v24, 0.0  ;;  %v17281_v35 = vmax.f32 %v11667_v28, 0.0  ;;  %vm1817_vm4 = vcmp.lt.s32.totalorder %v12378_v55, 0  ;;  %v10074_v24 = vld [vmem:[%s16787_s3 + $0x6e0] ss:$16 sps:$4 sm:$0xff]  }
 0x208   : > { %17279 = vst [vmem:[#allocation65_spill] sm:$0xff] %v12382_v41  ;;  %v16928_v60 = vrot.slane %v12288_v39, 7  ;;  %v1831_v28 = vadd.s32 7, %v12378_v55  ;;  %vm1811_vm6 = vcmp.ne.s32.totalorder %v12391_v10, 0  ;;  %vm1818_vm8 = vcmp.lt.s32.totalorder %v12391_v10, 0  ;;  %vm12486_vm9 = vmand %vm1817_vm4, %vm1810_vm1 }
 0x209   : > { %4860 = vmatpush1.bf16.msra.mxu0 %v10077_v17  ;;  %v1899_v17 = vsel %vm1875_vm12, %v1850_v4, %v16930_v3  ;;  %v12415_v27 = vmax.f32 %v17280_v37, %v16927_v32  ;;  %v12421_v57 = vmax.f32 %v17281_v35, %v16929_v54  ;;  %v10103_v35 = vld [vmem:[%s16787_s3 + $0x5c4] ss:$16 sps:$4 sm:$0xff]   ;;  %v12504_v26 = vsel %vm12433_vm5, %v1828_v62, %v12353_v50 }
 0x20a   : > { %4861 = vmatprep.subr.bf16.mxu0 %v10085_v52  ;;  %v16931_v52 = vrot.slane %v12382_v41, 7  ;;  %v1898_v31 = vsel %vm1875_vm12, %v1849_v56, %v16928_v60  ;;  %17295 = vst [vmem:[#allocation68_spill] sm:$0xff] %v12504_v26  ;;  %v12523_v50 = vsel %vm12450_vm7, %v1829_v38, %v12363_v22  ;;  %v12541_v22 = vsel %vm12486_vm9, %v1831_v28, %v12378_v55  ;;  %v17303_v38 = vld [vmem:[#allocation14_spill] sm:$0xff]  ;;  %v17349_v41 = vld [vmem:[#allocation20_spill] sm:$0xff] }
 0x20b   : > { %17282 = vst [vmem:[#allocation66_spill] sm:$0xff] %v12421_v57  ;;  %v1858_v60 = vrot.slane %v12421_v57, 7  ;;  %17299 = vst [vmem:[#allocation70_spill] sm:$0xff] %v12523_v50  ;;  %v17308_v28 = vmax.f32 %v11795_v51, 0.0  ;;  %vm1843_vm10 = vcmp.ne.s32.totalorder %v12523_v50, 0  ;;  %v17310_v51 = vld [vmem:[#allocation17_spill] sm:$0xff] }
 0x20c   : > { %v1902_v19 = vsel %vm1875_vm12, %v16931_v52, %v1849_v56  ;;  %17302 = vst [vmem:[#allocation73_spill] sm:$0xff] %v12541_v22  ;;  %vm1845_vm1 = vcmp.ne.s32.totalorder %v12541_v22, 0  ;;  %v17350_v29 = vmax.f32 %v17349_v41, 0.0  ;;  %v17356_v41 = vld [vmem:[#allocation12_spill] sm:$0xff]  ;;  %vm17407_vm7 = vcmp.lt.s32.totalorder %v11096_v25, 7 }
 0x20d   : > { %4862 = vmatpush1.bf16.msra.mxu0 %v10083_v47  ;;  %v1903_v47 = vsel %vm1875_vm12, %v16924_v2, %v1850_v4  ;;  %v1925_v4 = vsel %vm1841_vm13, %v1899_v17, 0.0  ;;  %vm12470_vm13 = vmand %vm1816_vm0, %vm1809_vm11  ;;  %v17292_v17 = vunpack.i.l.bf16 %v12122_v53  ;;  %v17293_v2 = vunpack.i.h.bf16 %v11781_v40  ;;  %v10101_v53 = vld [vmem:[%s16787_s3 + $0x5c0] ss:$16 sps:$4 sm:$0xff]  }
 0x20e   : > { %4863 = vmatprep.subr.bf16.mxu0 %v10091_v15  ;;  %v10095_v15 = vld [vmem:[%s16787_s3 + $0x5e0] ss:$16 sps:$4 sm:$0xff]   ;;  %v1921_v54 = vsel %vm1840_vm14, %v1903_v47, 0.0  ;;  %vm12510_vm14 = vmand %vm1818_vm8, %vm1811_vm6  ;;  %v12528_v62 = vsel %vm12470_vm13, %v1830_v36, %v12369_v44  ;;  %v10082_v44 = vld [vmem:[%s16787_s3 + $0x6c4] ss:$16 sps:$4 sm:$0xff]   ;;  %v17304_v36 = vmax.f32 %v17303_v38, 0.0 }
 0x20f   : > { %v1462_v56 = vsel %vm1460_vm2, %v17293_v2, %v17292_v17  ;;  %17300 = vst [vmem:[#allocation71_spill] sm:$0xff] %v12528_v62  ;;  %v17306_v17 = vrot.slane %v12228_v8, 7  ;;  %vm1842_vm11 = vcmp.ne.s32.totalorder %v12504_v26, 0  ;;  %vm1844_vm0 = vcmp.ne.s32.totalorder %v12528_v62, 0  ;;  %v10194_v25 = vld [vmem:[%s16787_s3 + $0x960] ss:$16 sps:$4 sm:$0xff]  }
 0x210   : > { %vm12817_vm4 = vmpackc.low %vm1843_vm10, %vm1842_vm11  ;;  %vm10775_vm8 = vmmov 1   ;;  %vm16978_vm9 = vcmp.ne.s32.totalorder %v12096_v42, 6 }
 0x211   : > { %4864 = vmatpush1.bf16.msra.mxu0 %v10089_v43  ;;  %v12442_v23 = vpop.permute.xlu1 %9473  ;;  %v1832_v43 = vadd.s32 7, %v12391_v10  ;;  %vm12856_vm5 = vmpackc.low %vm1845_vm1, %vm1844_vm0 }
 0x212   : > { %17285 = vst [vmem:[#allocation67_spill] sm:$0xff] %v12442_v23  ;;  %4865 = vmatprep.subr.bf16.mxu0 %v10097_v21  ;;  %v16933_v18 = vunpack.i.l.bf16 %v12442_v23  ;;  %v17294_v47 = vunpack.i.h.bf16 %v12442_v23 }
 0x213   : > { %v12562_v55 = vsel %vm12510_vm14, %v1832_v43, %v12391_v10  ;;  %v10107_v10 = vld [vmem:[%s16787_s3 + $0x5a0] ss:$16 sps:$4 sm:$0xff]   ;;  %v17311_v43 = vmax.f32 %v17310_v51, 0.0  ;;  %v10088_v51 = vld [vmem:[%s16787_s3 + $0x6a4] ss:$16 sps:$4 sm:$0xff]   ;;  %vm17430_vm14 = vmmov %vm17407_vm7 }
 0x214   : > { %v2327_v52 = vsel %vm2136_vm3, %v1921_v54, %v16933_v18  ;;  %v2328_v32 = vsel %vm2136_vm3, %v1925_v4, %v17294_v47  ;;  %v1855_v54 = vrot.slane %v12070_v20, 7  ;;  %17307 = vst [vmem:[#allocation14_spill] sm:$0xff] %v12562_v55  ;;  %vm1846_vm6 = vcmp.ne.s32.totalorder %v12562_v55, 0 }
 0x215   : > { %4866 = vmatpush2.bf16.msra.mxu0 %v10095_v15  ;;  %v9479_v2 = vpop.permute.xlu1 %9478  ;;  %v12518_v4 = vpack.c.bf16 %v2328_v32, %v2327_v52  ;;  %v10109_v32 = vld [vmem:[%s16787_s3 + $0x5a4] ss:$16 sps:$4 sm:$0xff]   ;;  %v12536_v52 = vpack.c.bf16 %v1898_v31, %v1902_v19  ;;  %v17305_v31 = vrot.slane %v12415_v27, 7  ;;  %vm12998_vm13 = vmpackc.low %vm10775_vm8, %vm1846_vm6 }
 0x216   : > { %4867 = vmatprep.subr.bf16.mxu0 %v10103_v35  ;;  %v9481_v15 = vunpack.i.h.bf16 %v9479_v2  ;;  %v9480_v37 = vunpack.i.l.bf16 %v9479_v2  ;;  %v12548_v35 = vmax.f32 %v17304_v36, %v1462_v56  ;;  %v1888_v3 = vsel %vm1875_vm12, %v1855_v54, %v17306_v17  ;;  %vm17442_vm8 = vmmov %vm17430_vm14 }
 0x217   : > { %17298 = vst [vmem:[#allocation69_spill] sm:$0xff] %v12518_v4  ;;  %17301 = vst [vmem:[#allocation72_spill] sm:$0xff] %v12536_v52  ;;  %4778 = vmatprep.mubr.bf16.mxu1 %v12518_v4  ;;  %v1891_v19 = vsel %vm1875_vm12, %v1858_v60, %v17305_v31  ;;  %v17309_v56 = vunpack.i.h.bf16 %v11806_v33  ;;  %v17312_v33 = vmax.f32 %v11792_v13, 0.0  ;;  %v9451_v31 = vunpack.i.h.bf16 %v12085_v7 }
 0x218   : > { %v12566_v21 = vmax.f32 %v17308_v28, %v9481_v15  ;;  %v1466_v2 = vsel %vm1460_vm2, %v9480_v37, %v9481_v15  ;;  %8909 = vmatmul.mubr.msk.bf16.vlgmr.msra.gmra.mxu1 %vm12200_vm15, %v12536_v52  ;;  %v9450_v17 = vunpack.i.l.bf16 %v12085_v7  ;;  %v17316_v13 = vunpack.i.h.bf16 %v12210_v59 }
 0x219   : > { %v1465_v47 = vsel %vm1460_vm2, %v17309_v56, %v9480_v37  ;;  %4868 = vmatpush2.bf16.msra.mxu0 %v10101_v53  ;;  %v12585_v38 = vmax.f32 %v17312_v33, %v1466_v2  ;;  %v12587_v15 = vpop.permute.xlu1 %9488  ;;  %v12589_v37 = vpop.permute.xlu0 %9518  ;;  %v17315_v53 = vrot.slane %v12053_v1, 7  ;;  %4953 = vmatpush1.bf16.msra.mxu1 %v10074_v24  ;;  %v17317_v28 = vmax.f32 %v11691_v34, 0.0  ;;  %v10080_v2 = vld [vmem:[%s16787_s3 + $0x6c0] ss:$16 sps:$4 sm:$0xff]  }
 0x21a   : > { %v12581_v40 = vmax.f32 %v17311_v43, %v1465_v47  ;;  %17314 = vst [vmem:[#allocation74_spill] sm:$0xff] %v12589_v37  ;;  %4869 = vmatprep.subr.bf16.mxu0 %v10109_v32  ;;  %v16934_v47 = vunpack.i.h.bf16 %v12589_v37  ;;  %4954 = vmatprep.subr.bf16.mxu1 %v10082_v44  ;;  %v16937_v24 = vunpack.i.l.bf16 %v12589_v37  ;;  %v1933_v32 = vsel %vm1843_vm10, %v1891_v19, 0.0  ;;  %v10113_v19 = vld [vmem:[%s16787_s3 + $0x580] ss:$16 sps:$4 sm:$0xff]  }
 0x21b   : > { %17313 = vst [vmem:[#allocation17_spill] sm:$0xff] %v12585_v38  ;;  %v1895_v36 = vsel %vm1875_vm12, %v17315_v53, %v1858_v60  ;;  %v12602_v56 = vmax.f32 %v17317_v28, %v17316_v13  ;;  %v10115_v60 = vld [vmem:[%s16787_s3 + $0x584] ss:$16 sps:$4 sm:$0xff]   ;;  %v9552_v7 = vpack.i.bf16 %v12566_v21, %v12585_v38  ;;  %v17318_v33 = vrot.slane %v12066_v48, 7 }
 0x21c   : > { %v9572_v34 = vpack.i.bf16 %v12581_v40, %v12548_v35  ;;  %v1929_v44 = vsel %vm1842_vm11, %v1895_v36, 0.0  ;;  %v2330_v43 = vsel %vm2136_vm3, %v1933_v32, %v16934_v47  ;;  %v9491_v28 = vunpack.i.h.bf16 %v12587_v15 }
 0x21d   : > { %v1892_v53 = vsel %vm1875_vm12, %v17318_v33, %v1855_v54  ;;  %4870 = vmatpush2.bf16.msra.mxu0 %v10107_v10  ;;  %v9499_v18 = vpop.permute.xlu1 %9498  ;;  %9553 = vrot.lane.b32.xlu0 %v9552_v7, %s10772_s16  ;;  %v9524_v32 = vpop.permute.xlu0 %9523  ;;  %v2329_v54 = vsel %vm2136_vm3, %v1929_v44, %v16937_v24  ;;  %v1637_v10 = vsel %vm1460_vm2, %v9450_v17, %v9451_v31  ;;  %v17321_v17 = vunpack.i.h.bf16 %v12083_v14 }
 0x21e   : > { %9573 = vrot.lane.b32.xlu1 %v9572_v34, %s10772_s16  ;;  %v12641_v33 = vpack.c.bf16 %v1888_v3, %v1892_v53  ;;  %v9501_v47 = vunpack.i.h.bf16 %v9499_v18  ;;  %v9500_v13 = vunpack.i.l.bf16 %v9499_v18  ;;  %v9526_v52 = vunpack.i.h.bf16 %v9524_v32  ;;  %4955 = vmatpush1.bf16.msra.mxu1 %v10080_v2  ;;  %v10086_v3 = vld [vmem:[%s16787_s3 + $0x6a0] ss:$16 sps:$4 sm:$0xff]   ;;  %v10121_v18 = vld [vmem:[%s16787_s3 + $0x564] ss:$16 sps:$4 sm:$0xff]  }
 0x21f   : > { %4871 = vmatprep.subr.bf16.mxu0 %v10115_v60  ;;  %v9525_v36 = vunpack.i.l.bf16 %v9524_v32  ;;  %v12644_v4 = vpack.c.bf16 %v2330_v43, %v2329_v54  ;;  %v9567_v7 = vpack.i.bf16 %v12131_v63, %v12066_v48  ;;  %v9587_v34 = vpack.i.bf16 %v12602_v56, %v12292_v6  ;;  %4956 = vmatprep.subr.bf16.mxu1 %v10088_v51  ;;  %v10094_v32 = vld [vmem:[%s16787_s3 + $0x684] ss:$16 sps:$4 sm:$0xff]  }
 0x220   : > { %17319 = vst [vmem:[#allocation75_spill] sm:$0xff] %v12641_v33  ;;  %v1632_v2 = vsel %vm1460_vm2, %v17321_v17, %v9501_v47  ;;  %v17322_v60 = vunpack.i.h.bf16 %v12042_v30  ;;  %v17323_v44 = vunpack.i.l.bf16 %v12157_v5  ;;  %v17324_v53 = vunpack.i.h.bf16 %v12157_v5  ;;  %v17329_v5 = vld [vmem:[#allocation40_spill] sm:$0xff] }
 0x221   : > { %17320 = vst [vmem:[#allocation76_spill] sm:$0xff] %v12644_v4  ;;  %4872 = vmatpush2.bf16.msra.mxu0 %v10113_v19  ;;  %v17325_v14 = vmax.f32 %v11554_v12, 0.0  ;;  %v17326_v30 = vunpack.i.l.bf16 %v12587_v15  ;;  %4788 = vmatprep.mubr.bf16.mxu1 %v12644_v4  ;;  %v10119_v12 = vld [vmem:[%s16787_s3 + $0x560] ss:$16 sps:$4 sm:$0xff]   ;;  %v1638_v19 = vsel %vm1460_vm2, %v9451_v31, %v9526_v52  ;;  %v17337_v31 = vld [vmem:[#allocation25_spill] sm:$0xff]  ;;  %v12725_v23 = vpop.permute.xlu0 %9533  ;;  %vm1948_vm10 = vcmp.ne.s32.totalorder %v12504_v26, 6 }
 0x222   : > { %v1629_v48 = vsel %vm1460_vm2, %v17322_v60, %v9500_v13  ;;  %v1630_v43 = vsel %vm1460_vm2, %v9500_v13, %v17323_v44  ;;  %v1633_v51 = vsel %vm1460_vm2, %v9501_v47, %v17324_v53  ;;  %v17327_v60 = vld [vmem:[#allocation42_spill] sm:$0xff]  ;;  %v17330_v44 = vmax.f32 %v17329_v5, 0.0  ;;  %v9504_v53 = vpop.permute.xlu1 %9503  ;;  %9568 = vrot.lane.b32.xlu0 %v9567_v7, %s10774_s20  ;;  %9588 = vrot.lane.b32.xlu1 %v9587_v34, %s10772_s16 }
 0x223   : > { %v12673_v54 = vmax.f32 %v17325_v14, %v1637_v10  ;;  %v1469_v17 = vsel %vm1460_vm2, %v17326_v30, %v9491_v28  ;;  %v17328_v24 = vmax.f32 %v17327_v60, 0.0  ;;  %v17331_v10 = vld [vmem:[#allocation36_spill] sm:$0xff]  ;;  %v9506_v60 = vunpack.i.h.bf16 %v9504_v53  ;;  %4957 = vmatpush1.bf16.msra.mxu1 %v10086_v3  ;;  %4873 = vmatprep.subr.bf16.mxu0 %v10121_v18  ;;  %v17340_v34 = vld [vmem:[#allocation46_spill] sm:$0xff] }
 0x224   : > { %v12684_v47 = vmax.f32 %v17330_v44, %v1629_v48  ;;  %v17332_v14 = vunpack.i.h.bf16 %v17331_v10  ;;  %v17333_v48 = vld [vmem:[#allocation61_spill] sm:$0xff]  ;;  %v17338_v10 = vmax.f32 %v17337_v31, 0.0  ;;  %v10092_v7 = vld [vmem:[%s16787_s3 + $0x680] ss:$16 sps:$4 sm:$0xff]   ;;  %4958 = vmatprep.subr.bf16.mxu1 %v10094_v32  ;;  %v10100_v3 = vld [vmem:[%s16787_s3 + $0x664] ss:$16 sps:$4 sm:$0xff]  }
 0x225   : > { %v12680_v13 = vmax.f32 %v17328_v24, %v1632_v2  ;;  %v9505_v24 = vunpack.i.l.bf16 %v9504_v53  ;;  %v10127_v2 = vld [vmem:[%s16787_s3 + $0x544] ss:$16 sps:$4 sm:$0xff]   ;;  %v17334_v44 = vld [vmem:[#allocation13_spill] sm:$0xff]  ;;  %4874 = vmatpush2.bf16.msra.mxu0 %v10119_v12  ;;  %v10125_v32 = vld [vmem:[%s16787_s3 + $0x540] ss:$16 sps:$4 sm:$0xff]   ;;  %vm1947_vm11 = vcmp.ne.s32.totalorder %v12103_v16, 6 }
 0x226   : > { %v1635_v30 = vsel %vm1460_vm2, %v17332_v14, %v9525_v36  ;;  %v17335_v4 = vmax.f32 %v17334_v44, 0.0  ;;  %v12706_v37 = vmax.f32 %v17338_v10, %v1633_v51  ;;  %v17339_v53 = vld [vmem:[#allocation56_spill] sm:$0xff]  ;;  %v1856_v18 = vrot.slane %v12684_v47, 7  ;;  %4875 = vmatprep.subr.bf16.mxu0 %v10127_v2 }
 0x227   : > { %v9577_v14 = vpack.i.bf16 %v17339_v53, %v12673_v54  ;;  %v17342_v44 = vld [vmem:[#allocation16_spill] sm:$0xff]  ;;  %v1636_v5 = vsel %vm1460_vm2, %v9525_v36, %v9505_v24  ;;  %v1639_v10 = vsel %vm1460_vm2, %v9526_v52, %v9506_v60  ;;  %v12740_v36 = vpop.permute.xlu1 %9513  ;;  %4959 = vmatpush1.bf16.msra.mxu1 %v10092_v7  ;;  %v9597_v2 = vpack.i.bf16 %v12680_v13, %v12228_v8 }
 0x228   : > { %v12702_v45 = vmax.f32 %v17335_v4, %v1630_v43  ;;  %v17341_v4 = vmax.f32 %v17340_v34, 0.0  ;;  %v17343_v51 = vmax.f32 %v17342_v44, 0.0  ;;  %v17345_v34 = vld [vmem:[#allocation44_spill] sm:$0xff]  ;;  %v17347_v44 = vld [vmem:[#allocation43_spill] sm:$0xff]  ;;  %4960 = vmatprep.subr.bf16.mxu1 %v10100_v3 }
 0x229   : > { %9578 = vrot.lane.b32.xlu0 %v9577_v14, %s10772_s16  ;;  %v10098_v14 = vld [vmem:[%s16787_s3 + $0x660] ss:$16 sps:$4 sm:$0xff]   ;;  %v10133_v7 = vld [vmem:[%s16787_s3 + $0x524] ss:$16 sps:$4 sm:$0xff]   ;;  %4876 = vmatpush2.bf16.msra.mxu0 %v10125_v32  ;;  %v17363_v32 = vunpack.i.h.bf16 %v12725_v23 }
 0x22a   : > { %17336 = vst [vmem:[#allocation42_spill] sm:$0xff] %v12702_v45  ;;  %v12717_v43 = vmax.f32 %v17341_v4, %v9491_v28  ;;  %v12721_v31 = vmax.f32 %v17343_v51, %v1469_v17  ;;  %v17346_v28 = vmax.f32 %v17345_v34, 0.0  ;;  %v17348_v17 = vmax.f32 %v17347_v44, 0.0  ;;  %v10106_v3 = vld [vmem:[%s16787_s3 + $0x644] ss:$16 sps:$4 sm:$0xff]   ;;  %9598 = vrot.lane.b32.xlu1 %v9597_v2, %s10774_s20  ;;  %4877 = vmatprep.subr.bf16.mxu0 %v10133_v7 }
 0x22b   : > { %v12748_v34 = vmax.f32 %v17350_v29, %v9506_v60  ;;  %v1857_v12 = vrot.slane %v12702_v45, 7  ;;  %v17357_v60 = vmax.f32 %v17356_v41, 0.0  ;;  %v17359_v29 = vld [vmem:[#allocation23_spill] sm:$0xff]  ;;  %v12799_v57 = vpop.permute.xlu1 %9528  ;;  %v17364_v45 = vunpack.i.l.bf16 %v12725_v23  ;;  %4961 = vmatpush1.bf16.msra.mxu1 %v10098_v14 }
 0x22c   : > { %17344 = vst [vmem:[#allocation40_spill] sm:$0xff] %v12721_v31  ;;  %v12733_v4 = vmax.f32 %v17346_v28, %v1638_v19  ;;  %v12737_v51 = vmax.f32 %v17348_v17, %v1635_v30  ;;  %v17351_v19 = vld [vmem:[#allocation29_spill] sm:$0xff]  ;;  %v17354_v30 = vld [vmem:[#allocation27_spill] sm:$0xff]  ;;  %v9582_v41 = vpack.i.bf16 %v12717_v43, %v12721_v31  ;;  %17362 = vst [vmem:[#allocation13_spill] sm:$0xff] %v12799_v57  ;;  %v17366_v31 = vrot.slane %v12131_v63, 7 }
 0x22d   : > { %v17352_v28 = vmax.f32 %v17351_v19, 0.0  ;;  %v17355_v17 = vmax.f32 %v17354_v30, 0.0  ;;  %v9516_v19 = vunpack.i.h.bf16 %v12740_v36  ;;  %v17358_v30 = vrot.slane %v12680_v13, 7  ;;  %4962 = vmatprep.subr.bf16.mxu1 %v10106_v3 }
 0x22e   : > { %v1481_v6 = vsel %vm1460_vm2, %v17364_v45, %v17363_v32  ;;  %v17367_v2 = vmov 0  ;;  %9583 = vrot.lane.b32.xlu0 %v9582_v41, %s10772_s16  ;;  %v17374_v63 = vrot.slane %v12288_v39, 7  ;;  %v9592_v7 = vpack.i.bf16 %v12684_v47, %v12070_v20 }
 0x22f   : > { %v12752_v44 = vmax.f32 %v17352_v28, %v1636_v5  ;;  %v12756_v52 = vmax.f32 %v17355_v17, %v9505_v24  ;;  %v12765_v5 = vmax.f32 %v17357_v60, %v1639_v10  ;;  %v1864_v10 = vrot.slane %v12737_v51, 7  ;;  %v10131_v60 = vld [vmem:[%s16787_s3 + $0x520] ss:$16 sps:$4 sm:$0xff]  }
 0x230   : > { %v1889_v17 = vsel %vm1875_vm12, %v1856_v18, %v17358_v30  ;;  %v17360_v30 = vmax.f32 %v17359_v29, 0.0  ;;  %v17365_v28 = vunpack.i.l.bf16 %v12740_v36  ;;  %v1893_v29 = vsel %vm1875_vm12, %v17366_v31, %v1856_v18  ;;  %4878 = vmatpush2.bf16.msra.mxu0 %v10131_v60 }
 0x231   : > { %17353 = vst [vmem:[#allocation36_spill] sm:$0xff] %v12752_v44  ;;  %v1865_v1 = vrot.slane %v12752_v44, 7  ;;  %v1866_v24 = vrot.slane %v12756_v52, 7  ;;  %v17368_v2 = vsel %vm12817_vm4, 4294967295, %v17367_v2  ;;  %v12831_v18 = vpack.c.bf16 %v1889_v17, %v1893_v29  ;;  %v17383_v29 = vld [vmem:[#allocation45_spill] sm:$0xff] }
 0x232   : > { %v12796_v0 = vmax.f32 %v17360_v30, %v9516_v19  ;;  %v1478_v44 = vsel %vm1460_vm2, %v17365_v28, %v9516_v19  ;;  %17369 = vst [vmem:[#allocation25_spill] sm:$0xff] %v17368_v2  ;;  %v17370_v30 = vrot.slane %v12706_v37, 7  ;;  %v17371_v28 = vld [vmem:[#allocation8_spill] sm:$0xff]  ;;  %v1894_v38 = vsel %vm1875_vm12, %v17374_v63, %v1857_v12  ;;  %9593 = vrot.lane.b32.xlu0 %v9592_v7, %s10774_s20 }
 0x233   : > { %v17372_v32 = vmax.f32 %v17371_v28, 0.0  ;;  %17373 = vst [vmem:[#allocation56_spill] sm:$0xff] %v12831_v18  ;;  %v17376_v19 = vrot.slane %v12733_v4, 7  ;;  %8891 = vmatprep.mubr.msk.bf16.mxu0 %vm12817_vm4, %v12831_v18  ;;  %v17377_v63 = vrot.slane %v12680_v13, 7  ;;  %v17381_v17 = vrot.slane %v12748_v34, 7  ;;  %v17409_v18 = vld [vmem:[#allocation47_spill] sm:$0xff] }
 0x234   : > { %17361 = vst [vmem:[#allocation61_spill] sm:$0xff] %v12796_v0  ;;  %v1890_v45 = vsel %vm1875_vm12, %v1857_v12, %v17370_v30  ;;  %v16967_v30 = vunpack.i.h.bf16 %v12799_v57  ;;  %v17378_v12 = vmov 0  ;;  %v17382_v60 = vunpack.i.h.bf16 %v12262_v46  ;;  %8894 = vmatmul.mubr.msk.bf16.gmra.mxu0 %vm12817_vm4, %v12641_v33 }
 0x235   : > { %v12829_v31 = vmax.f32 %v17372_v32, %v1478_v44  ;;  %v12837_v49 = vpack.c.bf16 %v1890_v45, %v1894_v38  ;;  %v1881_v44 = vsel %vm1875_vm12, %v1864_v10, %v17376_v19  ;;  %v1885_v38 = vsel %vm1875_vm12, %v17377_v63, %v1864_v10  ;;  %v10104_v10 = vld [vmem:[%s16787_s3 + $0x640] ss:$16 sps:$4 sm:$0xff]  }
 0x236   : > { %v17379_v12 = vsel %vm12856_vm5, 4294967295, %v17378_v12  ;;  %v1883_v3 = vsel %vm1875_vm12, %v1866_v24, %v17381_v17  ;;  %v17384_v45 = vmax.f32 %v17383_v29, 0.0  ;;  %v12883_v20 = vpack.c.bf16 %v1881_v44, %v1885_v38  ;;  %v10112_v17 = vld [vmem:[%s16787_s3 + $0x624] ss:$16 sps:$4 sm:$0xff]   ;;  %4963 = vmatpush1.bf16.msra.mxu1 %v10104_v10 }
 0x237   : > { %17375 = vst [vmem:[#allocation46_spill] sm:$0xff] %v12837_v49  ;;  %17380 = vst [vmem:[#allocation16_spill] sm:$0xff] %v17379_v12  ;;  %v9607_v14 = vpack.i.bf16 %v12796_v0, %v12829_v31  ;;  %8912 = vmatmul.mubr.msk.bf16.gmra.mxu1 %vm12817_vm4, %v12837_v49  ;;  %v17386_v28 = vrot.slane %v12415_v27, 7  ;;  %v1941_v63 = vsel %vm1845_vm1, %v1883_v3, 0.0  ;;  %v17387_v38 = vrot.slane %v12673_v54, 7  ;;  %4964 = vmatprep.subr.bf16.mxu1 %v10112_v17 }
 0x238   : > { %v12875_v19 = vmax.f32 %v17384_v45, %v17382_v60  ;;  %17385 = vst [vmem:[#allocation44_spill] sm:$0xff] %v12883_v20  ;;  %v10139_v60 = vld [vmem:[%s16787_s3 + $0x504] ss:$16 sps:$4 sm:$0xff]   ;;  %v17388_v3 = vrot.slane %v17333_v48, 7  ;;  %v17389_v45 = vunpack.i.l.bf16 %v12210_v59  ;;  %v17392_v41 = vunpack.i.h.bf16 %v12725_v23  ;;  %8897 = vmatprep.mubr.msk.bf16.mxu0 %vm12856_vm5, %v12883_v20 }
 0x239   : > { %v1887_v32 = vsel %vm1875_vm12, %v17386_v28, %v1866_v24  ;;  %9608 = vrot.lane.b32.xlu1 %v9607_v14, %s10772_s16  ;;  %v2332_v24 = vsel %vm2136_vm3, %v1941_v63, %v16967_v30  ;;  %v17390_v28 = vld [vmem:[#allocation10_spill] sm:$0xff]  ;;  %v17395_v63 = vld [vmem:[#allocation32_spill] sm:$0xff]  ;;  %v17397_v59 = vunpack.i.l.bf16 %v12799_v57  ;;  %4879 = vmatprep.subr.bf16.mxu0 %v10139_v60  ;;  %v17408_v20 = vunpack.i.l.bf16 %v12587_v15 }
 0x23a   : > { %v1937_v44 = vsel %vm1844_vm0, %v1887_v32, 0.0  ;;  %v1880_v29 = vsel %vm1875_vm12, %v17388_v3, %v17387_v38  ;;  %v17391_v14 = vunpack.i.h.bf16 %v17390_v28  ;;  %v17393_v32 = vld [vmem:[#allocation18_spill] sm:$0xff]  ;;  %v17396_v30 = vmax.f32 %v17395_v63, 0.0 }
 0x23b   : > { %v17394_v49 = vmax.f32 %v17393_v32, 0.0  ;;  %v2331_v38 = vsel %vm2136_vm3, %v1937_v44, %v17397_v59  ;;  %v10137_v3 = vld [vmem:[%s16787_s3 + $0x500] ss:$16 sps:$4 sm:$0xff]   ;;  %v9617_v28 = vpack.i.bf16 %v12733_v4, %v12673_v54  ;;  %v17401_v32 = vld [vmem:[#allocation55_spill] sm:$0xff]  ;;  %v17410_v57 = vunpack.i.h.bf16 %v17409_v18  ;;  %v17415_v18 = vld [vmem:[#allocation21_spill] sm:$0xff] }
 0x23c   : > { %v1471_v7 = vsel %vm1460_vm2, %v17391_v14, %v17389_v45  ;;  %v12923_v2 = vmax.f32 %v17396_v30, %v1481_v6  ;;  %v12934_v45 = vpack.c.bf16 %v2332_v24, %v2331_v38  ;;  %v17400_v30 = vrot.slane %v12706_v37, 7  ;;  %v10110_v44 = vld [vmem:[%s16787_s3 + $0x620] ss:$16 sps:$4 sm:$0xff]   ;;  %v10157_v24 = vld [vmem:[%s16787_s3 + $0x8e4] ss:$16 sps:$4 sm:$0xff]   ;;  %v17404_v59 = vld [vmem:[#allocation15_spill] sm:$0xff]  ;;  %4880 = vmatpush2.bf16.msra.mxu0 %v10137_v3 }
 0x23d   : > { %v12919_v33 = vmax.f32 %v17394_v49, %v17392_v41  ;;  %v17399_v49 = vrot.slane %v12765_v5, 7  ;;  %v9602_v14 = vpack.i.bf16 %v12875_v19, %v12301_v11  ;;  %v17402_v63 = vrot.slane %v17401_v32, 7  ;;  %9618 = vrot.lane.b32.xlu1 %v9617_v28, %s10774_s20  ;;  %4965 = vmatpush1.bf16.msra.mxu1 %v10110_v44  ;;  %v17425_v3 = vld [vmem:[#allocation19_spill] sm:$0xff] }
 0x23e   : > { %17398 = vst [vmem:[#allocation43_spill] sm:$0xff] %v12934_v45  ;;  %v1886_v41 = vsel %vm1875_vm12, %v17400_v30, %v1865_v1  ;;  %v17405_v38 = vrot.slane %v17404_v59, 1  ;;  %v1468_v0 = vsel %vm1460_vm2, %v17410_v57, %v17408_v20  ;;  %4798 = vmatprep.mubr.bf16.mxu1 %v12934_v45  ;;  %v17413_v17 = vrot.slane %v17339_v53, 7  ;;  %5055 = vmatprep.subr.bf16.mxu0 %v10157_v24 }
 0x23f   : > { %v1882_v6 = vsel %vm1875_vm12, %v1865_v1, %v17399_v49  ;;  %v17403_v1 = vrot.slane %v12733_v4, 7  ;;  %v17406_v49 = vrot.slane %v11828_v58, 1  ;;  %v17414_v60 = vrot.slane %v12673_v54, 7  ;;  %9603 = vrot.lane.b32.xlu0 %v9602_v14, %s10772_s16  ;;  %v10364_v54 = vld [vmem:[%s16787_s3 + $0x7ec] ss:$16 sps:$4 sm:$0xff]  }
 0x240   : > { %v16977_v57 = vrot.slane %v12581_v40, 1  ;;  %v17416_v20 = vmax.f32 %v17415_v18, 0.0  ;;  %v12991_v28 = vpack.c.bf16 %v1882_v6, %v1886_v41  ;;  %v16976_v14 = vrot.slane %v12548_v35, 1 }
 0x241   : > { %v1877_v10 = vsel %vm1875_vm12, %v17403_v1, %v17402_v63  ;;  %v2002_v30 = vsel %vm17407_vm7, %v17406_v49, %v17405_v38  ;;  %v17411_v63 = vrot.slane %v17333_v48, 7  ;;  %v17412_v1 = vrot.slane %v12228_v8, 7 }
 0x242   : > { %v1876_v15 = vsel %vm1875_vm12, %v17414_v60, %v17413_v17  ;;  %v12989_v38 = vmax.f32 %v17416_v20, %v1471_v7  ;;  %17417 = vst [vmem:[#allocation20_spill] sm:$0xff] %v12991_v28  ;;  %v17421_v49 = vunpack.i.l.bf16 %v12262_v46  ;;  %v17422_v7 = vld [vmem:[#allocation33_spill] sm:$0xff]  ;;  %v13009_v41 = vpack.c.bf16 %v12548_v35, %v1877_v10  ;;  %v17428_v60 = vld [vmem:[#allocation22_spill] sm:$0xff]  ;;  %8915 = vmatmul.mubr.msk.bf16.gmra.mxu1 %vm12856_vm5, %v12991_v28 }
 0x243   : > { %v1884_v59 = vsel %vm1875_vm12, %v17412_v1, %v17411_v63  ;;  %v17423_v63 = vunpack.i.h.bf16 %v17422_v7  ;;  %v10118_v1 = vld [vmem:[%s16787_s3 + $0x604] ss:$16 sps:$4 sm:$0xff]   ;;  %v17426_v46 = vmax.f32 %v17425_v3, 0.0  ;;  %v17427_v17 = vunpack.i.l.bf16 %v12740_v36 }
 0x244   : > { %v12994_v8 = vpack.c.bf16 %v1880_v29, %v1884_v59  ;;  %17424 = vst [vmem:[#allocation27_spill] sm:$0xff] %v13009_v41  ;;  %v9627_v29 = vpack.i.bf16 %v12919_v33, %v12923_v2  ;;  %v17429_v10 = vunpack.i.h.bf16 %v17428_v60  ;;  %v9612_v44 = vpack.i.bf16 %v12737_v51, %v17333_v48  ;;  %v17431_v7 = vld [vmem:[#allocation24_spill] sm:$0xff]  ;;  %4966 = vmatprep.subr.bf16.mxu1 %v10118_v1 }
 0x245   : > { %v1474_v6 = vsel %vm1460_vm2, %v17423_v63, %v17421_v49  ;;  %v13019_v59 = vmax.f32 %v17426_v46, %v1468_v0  ;;  %v10116_v0 = vld [vmem:[%s16787_s3 + $0x600] ss:$16 sps:$4 sm:$0xff]   ;;  %v2003_v36 = vsel %vm17430_vm14, %v16976_v14, %v16977_v57  ;;  %vm16983_vm0 = vcmp.ne.s32.totalorder %v12523_v50, 6  ;;  %v10124_v49 = vld [vmem:[%s16787_s3 + $0x7e4] ss:$16 sps:$4 sm:$0xff]   ;;  %vm17443_vm14 = vmmov %vm17442_vm8 }
 0x246   : > { %17418 = vst [vmem:[#allocation29_spill] sm:$0xff] %v12994_v8  ;;  %v1477_v18 = vsel %vm1460_vm2, %v17429_v10, %v17427_v17  ;;  %8900 = vmatmul.mubr.msk.bf16.gmra.mxu0 %vm12856_vm5, %v12994_v8  ;;  %9628 = vrot.lane.b32.xlu1 %v9627_v29, %s10772_s16  ;;  %v16979_v48 = vrot.slane %v12602_v56, 1  ;;  %v9632_v24 = vpack.i.bf16 %v12059_v61, %v12271_v9  ;;  %v2024_v20 = vsel %vm16978_vm9, %v2002_v30, 0.0  ;;  %v17433_v46 = vld [vmem:[#allocation28_spill] sm:$0xff] }
 0x247   : > { %8903 = vmatprep.mubr.msk.bf16.mxu0 %vm12998_vm13, %v13009_v41  ;;  %9613 = vrot.lane.b32.xlu0 %v9612_v44, %s10774_s20  ;;  %vm1950_vm1 = vcmp.ne.s32.totalorder %v12528_v62, 6  ;;  %v17432_v63 = vmax.f32 %v17431_v7, 0.0  ;;  %v1964_v3 = vrot.slane %v12717_v43, 1  ;;  %v17434_v17 = vmax.f32 %v17433_v46, 0.0  ;;  %v17437_v46 = vld [vmem:[#allocation63_spill] sm:$0xff]  ;;  %v17441_v57 = vld [vmem:[#allocation40_spill] sm:$0xff] }
 0x248   : > { %v13070_v10 = vpack.c.bf16 %v11828_v58, %v1876_v15  ;;  %v9622_v30 = vpack.i.bf16 %v12989_v38, %v13019_v59  ;;  %v2025_v44 = vsel %vm16978_vm9, %v2003_v36, 0.0  ;;  %v1962_v7 = vrot.slane %v13019_v59, 1  ;;  %4967 = vmatpush1.bf16.msra.mxu1 %v10116_v0  ;;  %v17436_v15 = vld [vmem:[#allocation58_spill] sm:$0xff]  ;;  %v17440_v0 = vld [vmem:[#allocation17_spill] sm:$0xff]  ;;  %vm17445_vm9 = vmmov %vm17442_vm8 }
 0x249   : > { %v13062_v29 = vmax.f32 %v17432_v63, %v1474_v6  ;;  %v13067_v60 = vmax.f32 %v17434_v17, %v1477_v18  ;;  %vm1951_vm7 = vcmp.ne.s32.totalorder %v12541_v22, 6  ;;  %v16981_v18 = vrot.slane %v12566_v21, 1  ;;  %v10122_v1 = vld [vmem:[%s16787_s3 + $0x7e0] ss:$16 sps:$4 sm:$0xff]   ;;  %4968 = vmatprep.subr.bf16.mxu1 %v10124_v49  ;;  %v10130_v14 = vld [vmem:[%s16787_s3 + $0x7c4] ss:$16 sps:$4 sm:$0xff]  }
 0x24a   : > { %17435 = vst [vmem:[#allocation12_spill] sm:$0xff] %v13070_v10  ;;  %9633 = vrot.lane.b32.xlu1 %v9632_v24, %s10772_s16  ;;  %v13087_v36 = vsel %vm16983_vm0, %v17437_v46, 0.0  ;;  %v13092_v17 = vpack.c.bf16 %v13019_v59, %v12581_v40  ;;  %v1963_v24 = vrot.slane %v17441_v57, 1  ;;  %v1975_v63 = vrot.slane %v12829_v31, 1  ;;  %vm17451_vm0 = vmmov %vm17442_vm8  ;;  %v17457_v41 = vld [vmem:[#allocation34_spill] sm:$0xff] }
 0x24b   : > { %17438 = vst [vmem:[#allocation23_spill] sm:$0xff] %v13087_v36  ;;  %9623 = vrot.lane.b32.xlu0 %v9622_v30, %s10772_s16  ;;  %v9642_v46 = vpack.i.bf16 %v13067_v60, %v13062_v29  ;;  %v9637_v6 = vpack.i.bf16 %v2025_v44, %v2024_v20  ;;  %v1997_v59 = vsel %vm17442_vm8, %v1964_v3, %v16979_v48  ;;  %v17444_v20 = vrot.slane %v12989_v38, 1  ;;  %v17446_v44 = vld [vmem:[#allocation41_spill] sm:$0xff] }
 0x24c   : > { %17439 = vst [vmem:[#allocation8_spill] sm:$0xff] %v13092_v17  ;;  %v2001_v30 = vsel %vm17443_vm14, %v16981_v18, %v1964_v3  ;;  %v17447_v48 = vrot.slane %v17446_v44, 1  ;;  %v17448_v3 = vrot.slane %v17440_v0, 1  ;;  %vm17449_vm14 = vmmov %vm17442_vm8  ;;  %v17450_v45 = vrot.slane %v12301_v11, 1  ;;  %4969 = vmatpush2.bf16.msra.mxu1 %v10122_v1  ;;  %v10136_v1 = vld [vmem:[%s16787_s3 + $0x7a4] ss:$16 sps:$4 sm:$0xff]  }
 0x24d   : > { %v1995_v49 = vsel %vm17445_vm9, %v1962_v7, %v17444_v20  ;;  %vm1952_vm9 = vcmp.ne.s32.totalorder %v12562_v55, 6  ;;  %4970 = vmatprep.subr.bf16.mxu1 %v10130_v14  ;;  %v17458_v36 = vrot.slane %v17436_v15, 1  ;;  %v17460_v14 = vld [vmem:[#allocation64_spill] sm:$0xff]  ;;  %v17465_v8 = vrot.slane %v12581_v40, 1 }
 0x24e   : > { %8906 = vmatmul.mubr.msk.bf16.gmra.mxu0 %vm12998_vm13, %v13070_v10  ;;  %v1996_v28 = vsel %vm17442_vm8, %v1963_v24, %v17447_v48  ;;  %v2000_v18 = vsel %vm17449_vm14, %v17448_v3, %v1963_v24  ;;  %v1988_v10 = vsel %vm17451_vm0, %v17450_v45, %v1975_v63  ;;  %9643 = vrot.lane.b32.xlu1 %v9642_v46, %s10772_s16  ;;  %v13148_v3 = vsel %vm1947_vm11, %v2001_v30, 0.0  ;;  %v17455_v30 = vld [vmem:[#allocation42_spill] sm:$0xff]  ;;  %vm17459_vm8 = vmmov %vm17451_vm0 }
 0x24f   : > { %4715 = vmatprep.mubr.bf16.mxu0 %v13092_v17  ;;  %v13136_v20 = vsel %vm1947_vm11, %v2000_v18, 0.0  ;;  %v13140_v48 = vsel %vm1948_vm10, %v1996_v28, 0.0  ;;  %v13144_v24 = vsel %vm1950_vm1, %v1988_v10, 0.0  ;;  %17453 = vst [vmem:[#allocation10_spill] sm:$0xff] %v13148_v3  ;;  %9638 = vrot.lane.b32.xlu0 %v9637_v6, %s10774_s20  ;;  %v13157_v28 = vsel %vm1948_vm10, %v1997_v59, 0.0  ;;  %v17456_v17 = vld [vmem:[#allocation66_spill] sm:$0xff]  ;;  %vm17466_vm14 = vmmov %vm17451_vm0 }
 0x250   : > { %17452 = vst [vmem:[#allocation45_spill] sm:$0xff] %v13144_v24  ;;  %17454 = vst [vmem:[#allocation18_spill] sm:$0xff] %v13157_v28  ;;  %v1979_v46 = vrot.slane %v12923_v2, 1  ;;  %v10128_v10 = vld [vmem:[%s16787_s3 + $0x7c0] ss:$16 sps:$4 sm:$0xff]   ;;  %v9652_v6 = vpack.i.bf16 %v17456_v17, %v17455_v30  ;;  %v9647_v45 = vpack.i.bf16 %v17457_v41, %v12288_v39  ;;  %v2033_v59 = vsel %vm1948_vm10, %v1995_v49, 0.0 }
 0x251   : > { %v17461_v18 = vrot.slane %v17460_v14, 7  ;;  %v17462_v3 = vrot.slane %v12748_v34, 7  ;;  %4971 = vmatpush2.bf16.msra.mxu1 %v10128_v10  ;;  %v10142_v10 = vld [vmem:[%s16787_s3 + $0x784] ss:$16 sps:$4 sm:$0xff]   ;;  %v17471_v40 = vrot.slane %v12765_v5, 7 }
 0x252   : > { %v1984_v12 = vsel %vm17451_vm0, %v1975_v63, %v1979_v46  ;;  %v2008_v24 = vsel %vm17459_vm8, %v1979_v46, %v17458_v36  ;;  %9653 = vrot.lane.b32.xlu1 %v9652_v6, %s10772_s16  ;;  %v13198_v36 = vpop.permute.xlu1 %9538  ;;  %v17464_v46 = vld [vmem:[#allocation48_spill] sm:$0xff]  ;;  %4972 = vmatprep.subr.bf16.mxu1 %v10136_v1  ;;  %v17472_v1 = vrot.slane %v13062_v29, 1  ;;  %vm17500_vm8 = vmmov %vm17451_vm0 }
 0x253   : > { %v1879_v28 = vsel %vm1875_vm12, %v17462_v3, %v17461_v18  ;;  %v13191_v49 = vsel %vm1951_vm7, %v1984_v12, 0.0  ;;  %v13195_v63 = vsel %vm1952_vm9, %v2008_v24, 0.0  ;;  %9648 = vrot.lane.b32.xlu0 %v9647_v45, %s10772_s16  ;;  %v2032_v6 = vsel %vm1948_vm10, %v17464_v46, 0.0  ;;  %v10134_v24 = vld [vmem:[%s16787_s3 + $0x7a0] ss:$16 sps:$4 sm:$0xff]   ;;  %v17469_v12 = vld [vmem:[#allocation65_spill] sm:$0xff]  ;;  %vm17474_vm10 = vmmov %vm17451_vm0 }
 0x254   : > { %17463 = vst [vmem:[#allocation32_spill] sm:$0xff] %v13191_v49  ;;  %v1999_v3 = vsel %vm17466_vm14, %v17465_v8, %v1962_v7  ;;  %v13214_v45 = vpack.c.bf16 %v12923_v2, %v12829_v31  ;;  %v13218_v18 = vpack.c.bf16 %v13062_v29, %v12989_v38  ;;  %v9667_v7 = vpack.i.bf16 %v2033_v59, %v2032_v6  ;;  %v17468_v46 = vld [vmem:[#allocation38_spill] sm:$0xff]  ;;  %vm17506_vm14 = vmmov %vm17451_vm0 }
 0x255   : > { %v9657_v2 = vpack.i.bf16 %v17401_v32, %v17339_v53  ;;  %v1945_v31 = vsel %vm1846_vm6, %v1879_v28, 0.0  ;;  %v17470_v26 = vrot.slane %v17469_v12, 7  ;;  %v17473_v6 = vrot.slane %v12989_v38, 1  ;;  %v17476_v53 = vld [vmem:[#allocation50_spill] sm:$0xff]  ;;  %4973 = vmatpush2.bf16.msra.mxu1 %v10134_v24  ;;  %v17482_v24 = vld [vmem:[#allocation31_spill] sm:$0xff]  ;;  %vm17490_vm6 = vmmov %vm17451_vm0 }
 0x256   : > { %17467 = vst [vmem:[#allocation55_spill] sm:$0xff] %v13214_v45  ;;  %4716 = vmatmul.mubr.bf16.gmra.mxu0 %v17468_v46  ;;  %v17475_v46 = vunpack.i.l.bf16 %v12725_v23  ;;  %v17477_v45 = vunpack.i.h.bf16 %v17476_v53  ;;  %9668 = vrot.lane.b32.xlu1 %v9667_v7, %s10774_s20  ;;  %v17479_v49 = vunpack.i.h.bf16 %v13198_v36  ;;  %v17481_v7 = vld [vmem:[#allocation11_spill] sm:$0xff] }
 0x257   : > { %v1878_v59 = vsel %vm1875_vm12, %v17471_v40, %v17470_v26  ;;  %v1991_v8 = vsel %vm17474_vm10, %v17473_v6, %v17472_v1  ;;  %4725 = vmatprep.mubr.bf16.mxu0 %v13218_v18  ;;  %v2029_v26 = vsel %vm1947_vm11, %v1999_v3, 0.0  ;;  %v17478_v40 = vunpack.i.l.bf16 %v13198_v36  ;;  %v17480_v1 = vld [vmem:[#allocation57_spill] sm:$0xff]  ;;  %9658 = vrot.lane.b32.xlu0 %v9657_v2, %s10774_s20 }
 0x258   : > { %v1480_v28 = vsel %vm1460_vm2, %v17477_v45, %v17475_v46  ;;  %v2586_v23 = vsel %vm2136_vm3, %v17480_v1, %v17479_v49  ;;  %v10140_v45 = vld [vmem:[%s16787_s3 + $0x780] ss:$16 sps:$4 sm:$0xff]   ;;  %v9677_v3 = vpack.i.bf16 %v12415_v27, %v12706_v37  ;;  %v2028_v46 = vsel %vm1947_vm11, %v17481_v7, 0.0  ;;  %4974 = vmatprep.subr.bf16.mxu1 %v10142_v10  ;;  %v10145_v49 = vld [vmem:[%s16787_s3 + $0x764] ss:$16 sps:$4 sm:$0xff]   ;;  %v13285_v10 = vpop.permute.xlu0 %9543  ;;  %vm17494_vm11 = vmmov %vm17451_vm0 }
 0x259   : > { %v2333_v38 = vsel %vm2136_vm3, %v1945_v31, %v17478_v40  ;;  %v13270_v31 = vpack.c.bf16 %v17436_v15, %v1878_v59  ;;  %v17483_v2 = vmax.f32 %v17482_v24, 0.0  ;;  %v9662_v40 = vpack.i.bf16 %v2029_v26, %v2028_v46  ;;  %v17485_v59 = vld [vmem:[#allocation26_spill] sm:$0xff]  ;;  %4975 = vmatpush2.bf16.msra.mxu1 %v10140_v45  ;;  %v17488_v45 = vld [vmem:[#allocation35_spill] sm:$0xff] }
 0x25a   : > { %v13259_v6 = vpack.c.bf16 %v2586_v23, %v2333_v38  ;;  %vm17484_vm2 = vcmp.ne.s32.totalorder %v12523_v50, 6  ;;  %9678 = vrot.lane.b32.xlu1 %v9677_v3, %s10772_s16  ;;  %v1974_v26 = vrot.slane %v13067_v60, 1  ;;  %v17001_v3 = vunpack.i.h.bf16 %v13285_v10  ;;  %4976 = vmatprep.subr.bf16.mxu1 %v10145_v49  ;;  %v10148_v24 = vld [vmem:[%s16787_s3 + $0x744] ss:$16 sps:$4 sm:$0xff]  }
 0x25b   : > { %v1535_v53 = vmax.f32 %v17483_v2, %v1480_v28  ;;  %v2037_v38 = vsel %vm17484_vm2, %v1991_v8, 0.0  ;;  %9663 = vrot.lane.b32.xlu0 %v9662_v40, %s10774_s20  ;;  %vm17486_vm12 = vmmov %vm17484_vm2  ;;  %v10143_v8 = vld [vmem:[%s16787_s3 + $0x760] ss:$16 sps:$4 sm:$0xff]   ;;  %v16998_v7 = vunpack.i.l.bf16 %v13285_v10  ;;  %v17487_v2 = vld [vmem:[#allocation49_spill] sm:$0xff]  ;;  %vm17507_vm10 = vcmp.ne.s32.totalorder %v12096_v42, 6 }
 0x25c   : > { %4808 = vmatprep.mubr.bf16.mxu1 %v13259_v6  ;;  %v2036_v28 = vsel %vm17486_vm12, %v17485_v59, 0.0  ;;  %v2588_v49 = vsel %vm2136_vm3, %v12717_v43, %v17001_v3  ;;  %v13328_v43 = vpack.c.bf16 %v17441_v57, %v17440_v0  ;;  %v17493_v57 = vrot.slane %v12548_v35, 1  ;;  %v17497_v35 = vld [vmem:[#allocation30_spill] sm:$0xff]  ;;  %vm17509_vm2 = vmmov %vm17451_vm0 }
 0x25d   : > { %8918 = vmatmul.mubr.msk.bf16.gmra.mxu1 %vm12998_vm13, %v13270_v31  ;;  %v13295_v23 = vpack.c.bf16 %v1535_v53, %v13067_v60  ;;  %v9687_v46 = vpack.i.bf16 %v2037_v38, %v2036_v28  ;;  %v9672_v40 = vpack.i.bf16 %v17488_v45, %v1535_v53  ;;  %v2587_v60 = vsel %vm2136_vm3, %v12566_v21, %v16998_v7  ;;  %v10146_v45 = vld [vmem:[%s16787_s3 + $0x740] ss:$16 sps:$4 sm:$0xff]   ;;  %v17491_v7 = vld [vmem:[#allocation39_spill] sm:$0xff]  ;;  %vm17510_vm12 = vmmov %vm17507_vm10 }
 0x25e   : > { %4726 = vmatmul.mubr.bf16.gmra.mxu0 %v17487_v2  ;;  %v1978_v38 = vrot.slane %v1535_v53, 1  ;;  %v13315_v59 = vpack.c.bf16 %v2588_v49, %v2587_v60  ;;  %v17489_v28 = vrot.slane %v13062_v29, 1  ;;  %4977 = vmatpush2.bf16.msra.mxu1 %v10143_v8  ;;  %v9697_v16 = vpack.i.bf16 %v12684_v47, %v17491_v7  ;;  %v10151_v29 = vld [vmem:[%s16787_s3 + $0x724] ss:$16 sps:$4 sm:$0xff]   ;;  %v10149_v7 = vld [vmem:[%s16787_s3 + $0x720] ss:$16 sps:$4 sm:$0xff]  }
 0x25f   : > { %4735 = vmatprep.mubr.bf16.mxu0 %v13295_v23  ;;  %9688 = vrot.lane.b32.xlu1 %v9687_v46, %s10774_s20  ;;  %v17492_v53 = vld [vmem:[#allocation36_spill] sm:$0xff]  ;;  %v17496_v49 = vrot.slane %v11828_v58, 1 }
 0x260   : > { %9673 = vrot.lane.b32.xlu0 %v9672_v40, %s10772_s16  ;;  %v1987_v46 = vsel %vm17490_vm6, %v17489_v28, %v1974_v26  ;;  %4978 = vmatprep.subr.bf16.mxu1 %v10148_v24  ;;  %v9682_v40 = vpack.i.bf16 %v12756_v52, %v17492_v53  ;;  %v2007_v8 = vsel %vm17494_vm11, %v1978_v38, %v17493_v57  ;;  %v17495_v24 = vld [vmem:[#allocation51_spill] sm:$0xff]  ;;  %v17498_v28 = vrot.slane %v17497_v35, 1  ;;  %vm17514_vm6 = vmmov %vm17451_vm0 }
 0x261   : > { %4818 = vmatprep.mubr.bf16.mxu1 %v13315_v59  ;;  %v2041_v47 = vsel %vm1950_vm1, %v1987_v46, 0.0  ;;  %v2040_v60 = vsel %vm1950_vm1, %v17495_v24, 0.0  ;;  %v2049_v3 = vsel %vm1952_vm9, %v2007_v8, 0.0  ;;  %v10152_v24 = vld [vmem:[%s16787_s3 + $0x700] ss:$16 sps:$4 sm:$0xff]   ;;  %v9702_v8 = vpack.i.bf16 %v12748_v34, %v12765_v5  ;;  %vm17516_vm11 = vmmov %vm17451_vm0 }
 0x262   : > { %4979 = vmatpush2.bf16.msra.mxu1 %v10146_v45  ;;  %v2006_v46 = vsel %vm17451_vm0, %v17498_v28, %v17496_v49  ;;  %v10154_v45 = vld [vmem:[%s16787_s3 + $0x704] ss:$16 sps:$4 sm:$0xff]   ;;  %v9692_v57 = vpack.i.bf16 %v2041_v47, %v2040_v60  ;;  %v9722_v60 = vpack.i.bf16 %v12737_v51, %v12680_v13  ;;  %v17503_v35 = vpack.i.bf16 %v12288_v39, %v12271_v9 }
 0x263   : > { %9698 = vrot.lane.b32.xlu1 %v9697_v16, %s10772_s16  ;;  %v9712_v16 = vpack.i.bf16 %v17460_v14, %v17469_v12  ;;  %4980 = vmatprep.subr.bf16.mxu1 %v10151_v29  ;;  %v2048_v58 = vsel %vm1952_vm9, %v2006_v46, 0.0  ;;  %v1983_v29 = vsel %vm17500_vm8, %v1974_v26, %v1978_v38  ;;  %v10172_v47 = vld [vmem:[%s16787_s3 + $0xa04] ss:$16 sps:$4 sm:$0xff]   ;;  %v17501_v26 = vld [vmem:[#allocation53_spill] sm:$0xff]  ;;  %v9747_v46 = vpack.i.bf16 %v12706_v37, %v17455_v30 }
 0x264   : > { %9683 = vrot.lane.b32.xlu0 %v9682_v40, %s10772_s16  ;;  %v17499_v40 = vld [vmem:[#allocation52_spill] sm:$0xff]  ;;  %v9717_v49 = vpack.i.bf16 %v2049_v3, %v2048_v58  ;;  %v2044_v3 = vsel %vm1951_vm7, %v17501_v26, 0.0  ;;  %v13397_v28 = vpop.permute.xlu1 %9548  ;;  %v17504_v13 = vrot.slane %v17440_v0, 1  ;;  %v17505_v51 = vrot.slane %v17436_v15, 1  ;;  %v17511_v58 = vld [vmem:[#allocation61_spill] sm:$0xff] }
 0x265   : > { %4819 = vmatmul.mubr.bf16.gmra.mxu1 %v13328_v43  ;;  %v1956_v30 = vrot.slane %v17480_v1, 1  ;;  %vm17523_vm8 = vcmp.ne.s32.totalorder %v12523_v50, 6 }
 0x266   : > { %4736 = vmatmul.mubr.bf16.gmra.mxu0 %v17499_v40  ;;  %4981 = vmatpush2.bf16.msra.mxu1 %v10149_v7  ;;  %v17502_v7 = vpack.i.bf16 %v17457_v41, %v12059_v61  ;;  %v9732_v61 = vpack.i.bf16 %v17401_v32, %v12733_v4  ;;  %v2004_v9 = vsel %vm17506_vm14, %v17505_v51, %v17504_v13  ;;  %vm17524_vm14 = vmmov %vm17451_vm0 }
 0x267   : > { %9713 = vrot.lane.b32.xlu1 %v9712_v16, %s10772_s16  ;;  %4982 = vmatprep.subr.bf16.mxu1 %v10154_v45  ;;  %v2045_v16 = vsel %vm1951_vm7, %v1983_v29, 0.0  ;;  %v9757_v4 = vpack.i.bf16 %v12765_v5, %v17492_v53  ;;  %v9742_v32 = vpack.i.bf16 %v12415_v27, %v17456_v17  ;;  %v2026_v45 = vsel %vm17507_vm10, %v2004_v9, 0.0 }
 0x268   : > { %9693 = vrot.lane.b32.xlu0 %v9692_v57, %s10774_s20  ;;  %v9707_v38 = vpack.i.bf16 %v2045_v16, %v2044_v3  ;;  %v13437_v27 = vpack.c.bf16 %v12301_v11, %v17446_v44  ;;  %v17508_v5 = vrot.slane %v12566_v21, 1  ;;  %v9767_v53 = vpack.i.bf16 %v2026_v45, %v17469_v12 }
 0x269   : > { %v1976_v29 = vrot.slane %v17511_v58, 1  ;;  %v17512_v11 = vpack.i.bf16 %v12748_v34, %v12756_v52  ;;  %v1972_v21 = vrot.slane %v12875_v19, 1  ;;  %v17513_v12 = vpack.i.bf16 %v13140_v48, %v13136_v20  ;;  %v17517_v52 = vld [vmem:[#allocation45_spill] sm:$0xff]  ;;  %v17520_v48 = vld [vmem:[#allocation18_spill] sm:$0xff] }
 0x26a   : > { %4983 = vmatpush2.bf16.msra.mxu1 %v10152_v24  ;;  %v13405_v41 = vpop.permute.xlu1 %9558  ;;  %v2005_v17 = vsel %vm17509_vm2, %v1956_v30, %v17508_v5 }
 0x26b   : > { %9718 = vrot.lane.b32.xlu1 %v9717_v49, %s10774_s20  ;;  %5172 = vmatprep.subr.bf16.mxu1 %v10172_v47  ;;  %v17010_v39 = vunpack.i.h.bf16 %v13405_v41  ;;  %v17011_v37 = vunpack.i.l.bf16 %v13405_v41  ;;  %v2027_v57 = vsel %vm17510_vm12, %v2005_v17, 0.0  ;;  %v1989_v24 = vsel %vm17514_vm6, %v1972_v21, %v1976_v29 }
 0x26c   : > { %9703 = vrot.lane.b32.xlu0 %v9702_v8, %s10772_s16  ;;  %v9762_v44 = vpack.i.bf16 %v2027_v57, %v17460_v14  ;;  %v1980_v49 = vrot.slane %v12919_v33, 1  ;;  %v17515_v47 = vrot.slane %v12602_v56, 1  ;;  %v2043_v20 = vsel %vm1950_vm1, %v1989_v24, 0.0  ;;  %v17521_v8 = vld [vmem:[#allocation10_spill] sm:$0xff] }
 0x26d   : > { %v2589_v15 = vsel %vm2136_vm3, %v12602_v56, %v17011_v37  ;;  %v2590_v0 = vsel %vm2136_vm3, %v12875_v19, %v17010_v39  ;;  %v17518_v19 = vld [vmem:[#allocation23_spill] sm:$0xff]  ;;  %v17522_v16 = vpack.i.bf16 %v17520_v48, %v17521_v8  ;;  %v10163_v8 = vld [vmem:[%s16787_s3 + $0x8a4] ss:$16 sps:$4 sm:$0xff]   ;;  %vm2270_vm1 = vcmask 785408  }
 0x26e   : > { %v13432_v1 = vpack.c.bf16 %v2590_v0, %v2589_v15  ;;  %v1993_v34 = vsel %vm17516_vm11, %v17515_v47, %v1972_v21  ;;  %v17519_v14 = vpack.i.bf16 %v17517_v52, %v17518_v19  ;;  %v1985_v26 = vsel %vm17451_vm0, %v1976_v29, %v1980_v49  ;;  %v13494_v13 = vpop.permute.xlu1 %9563  ;;  %v17527_v15 = vld [vmem:[#allocation67_spill] sm:$0xff]  ;;  %v10158_v52 = vld [vmem:[%s16787_s3 + $0x8c0] ss:$16 sps:$4 sm:$0xff]  }
 0x26f   : > { %9728 = vrot.lane.b32.xlu1 %v17502_v7, %s10774_s20  ;;  %v2039_v56 = vsel %vm17523_vm8, %v1993_v34, 0.0  ;;  %v17525_v7 = vld [vmem:[#allocation32_spill] sm:$0xff]  ;;  %v17528_v0 = vunpack.i.h.bf16 %v17527_v15  ;;  %v17529_v5 = vunpack.i.l.bf16 %v17527_v15  ;;  %v17002_v19 = vunpack.i.h.bf16 %v13494_v13 }
 0x270   : > { %9708 = vrot.lane.b32.xlu0 %v9707_v38, %s10774_s20  ;;  %4828 = vmatprep.mubr.bf16.mxu1 %v13432_v1  ;;  %v9782_v3 = vpack.i.bf16 %v2043_v20, %v2039_v56  ;;  %v2009_v38 = vsel %vm17524_vm14, %v1980_v49, %v1956_v30  ;;  %v9550_v30 = vunpack.i.l.bf16 %v13397_v28 }
 0x271   : > { %4829 = vmatmul.mubr.bf16.gmra.mxu1 %v13437_v27 }
 0x273   : > { %9738 = vrot.lane.b32.xlu1 %v17503_v35, %s10774_s20  ;;  %v2047_v35 = vsel %vm1951_vm7, %v1985_v26, 0.0  ;;  %vm4621_vm7 = vcmask 130048  }
 0x274   : > { %9723 = vrot.lane.b32.xlu0 %v9722_v60, %s10772_s16  ;;  %v17526_v60 = vpack.i.bf16 %v13195_v63, %v17525_v7  ;;  %v10161_v7 = vld [vmem:[%s16787_s3 + $0x8a0] ss:$16 sps:$4 sm:$0xff]  }
 0x277   : > { %9748 = vrot.lane.b32.xlu1 %v9747_v46, %s10774_s20  ;;  %v2051_v46 = vsel %vm1952_vm9, %v2009_v38, 0.0 }
 0x278   : > { %9733 = vrot.lane.b32.xlu0 %v9732_v61, %s10772_s16  ;;  %v9792_v61 = vpack.i.bf16 %v2051_v46, %v2047_v35  ;;  %v9551_v35 = vunpack.i.h.bf16 %v13397_v28  ;;  %s10709_s16 = scalar_lea.vmem %s8400_s23, 128 }
 0x279   : > { %p10710_p11 = scmp.ne.s32.totalorder %s8400_s23, %s10709_s16 }
 0x27b   : > { %9758 = vrot.lane.b32.xlu1 %v9757_v4, %s10774_s20  ;;  %p10711_p12 = pnand %p10710_p11, %p10882_p5 }
 0x27c   : > { %9743 = vrot.lane.b32.xlu0 %v9742_v32, %s10774_s20 }
 0x27d   : > { %p10712_p13 = pneg %p10711_p12 }
 0x27f   : > { %9768 = vrot.lane.b32.xlu1 %v9767_v53, %s10774_s20 }
 0x280   : > { %9753 = vrot.lane.b32.xlu0 %v17512_v11, %s10774_s20 }
 0x283   : > { %9778 = vrot.lane.b32.xlu1 %v17513_v12, %s10774_s20  ;;  %v10160_v12 = vld [vmem:[%s16787_s3 + $0x8c4] ss:$16 sps:$4 sm:$0xff]  }
 0x284   : > { %9763 = vrot.lane.b32.xlu0 %v9762_v44, %s10774_s20  ;;  %v10155_v44 = vld [vmem:[%s16787_s3 + $0x8e0] ss:$16 sps:$4 sm:$0xff]  }
 0x287   : > { %9788 = vrot.lane.b32.xlu1 %v17519_v14, %s10774_s20  ;;  %v9565_v14 = vunpack.i.l.bf16 %v13494_v13 }
 0x288   : > { %9773 = vrot.lane.b32.xlu0 %v17522_v16, %s10774_s20 }
 0x28b   : > { %9798 = vrot.lane.b32.xlu1 %v17526_v60, %s10774_s20 }
 0x28c   : > { %9783 = vrot.lane.b32.xlu0 %v9782_v3, %s10774_s20 }
 0x28f   : > { %v9554_v51 = vpop.permute.xlu0 %9553 }
 0x290   : > { %9793 = vrot.lane.b32.xlu0 %v9792_v61, %s10774_s20  ;;  %v9574_v9 = vpop.permute.xlu1 %9573  ;;  %v9555_v4 = vunpack.i.l.bf16 %v9554_v51  ;;  %v9556_v3 = vunpack.i.h.bf16 %v9554_v51  ;;  %v17530_v51 = vld [vmem:[#allocation55_spill] sm:$0xff] }
 0x291   : > { %v9576_v63 = vunpack.i.h.bf16 %v9574_v9  ;;  %v9575_v32 = vunpack.i.l.bf16 %v9574_v9 }
 0x292   : > { %v2142_v9 = vsel %vm2136_vm3, %v9555_v4, %v9556_v3 }
 0x293   : > { %v2140_v45 = vsel %vm2136_vm3, %v17528_v0, %v9576_v63  ;;  %v2137_v17 = vsel %vm2136_vm3, %v17529_v5, %v9575_v32  ;;  %v2138_v53 = vsel %vm2136_vm3, %v9575_v32, %v9550_v30  ;;  %v2141_v29 = vsel %vm2136_vm3, %v9576_v63, %v9555_v4  ;;  %v10164_v63 = vld [vmem:[%s16787_s3 + $0x880] ss:$16 sps:$4 sm:$0xff]   ;;  %v10169_v0 = vld [vmem:[%s16787_s3 + $0x864] ss:$16 sps:$4 sm:$0xff]  }
 0x294   : > { %v13504_v57 = vpack.c.bf16 %v2140_v45, %v2137_v17  ;;  %v13507_v11 = vpop.permute.xlu0 %9568  ;;  %v13509_v21 = vpack.c.bf16 %v2141_v29, %v2138_v53  ;;  %v13521_v47 = vpop.permute.xlu1 %9588  ;;  %v2139_v4 = vsel %vm2136_vm3, %v9550_v30, %v9551_v35  ;;  %v10178_v35 = vld [vmem:[%s16787_s3 + $0x824] ss:$16 sps:$4 sm:$0xff]  }
 0x295   : > { %v17003_v24 = vunpack.i.h.bf16 %v13507_v11  ;;  %v9570_v49 = vunpack.i.l.bf16 %v13507_v11  ;;  %v2334_v17 = vsel %vm2270_vm1, %v2139_v4, %v9565_v14 }
 0x296   : > { %4881 = vmatprep.mubr.bf16.mxu0 %v13509_v21 }
 0x297   : > { %4882 = vmatmul.mubr.bf16.vlgmr.msra.gmra.mxu0 %v13504_v57  ;;  %v2274_v56 = vsel %vm2270_vm1, %v9570_v49, %v17003_v24  ;;  %v2335_v32 = vsel %vm2270_vm1, %v2142_v9, %v9570_v49 }
 0x298   : > { %5056 = vmatpush1.bf16.msra.mxu0 %v10155_v44  ;;  %v13585_v44 = vpack.c.bf16 %v2335_v32, %v2334_v17 }
 0x299   : > { %5057 = vmatprep.subr.bf16.mxu0 %v10160_v12  ;;  %v10167_v12 = vld [vmem:[%s16787_s3 + $0x860] ss:$16 sps:$4 sm:$0xff]  }
 0x29b   : > { %v13523_v34 = vpop.permute.xlu0 %9578 }
 0x29c   : > { %v17004_v20 = vunpack.i.h.bf16 %v13523_v34  ;;  %v17005_v48 = vunpack.i.l.bf16 %v13523_v34  ;;  %5058 = vmatpush1.bf16.msra.mxu0 %v10158_v52  ;;  %v13560_v46 = vpop.permute.xlu1 %9598 }
 0x29d   : > { %5059 = vmatprep.subr.bf16.mxu0 %v10163_v8  ;;  %v17009_v28 = vunpack.i.h.bf16 %v13560_v46  ;;  %v9600_v15 = vunpack.i.l.bf16 %v13560_v46  ;;  %v10170_v8 = vld [vmem:[%s16787_s3 + $0xa00] ss:$16 sps:$4 sm:$0xff]  }
 0x29e   : > { %v2591_v16 = vsel %vm2136_vm3, %v17511_v58, %v17005_v48  ;;  %v2592_v26 = vsel %vm2136_vm3, %v12919_v33, %v17004_v20  ;;  %v2271_v58 = vsel %vm2270_vm1, %v9565_v14, %v17002_v19  ;;  %v10166_v33 = vld [vmem:[%s16787_s3 + $0x884] ss:$16 sps:$4 sm:$0xff]   ;;  %v10179_v19 = vld [vmem:[%s16787_s3 + $0x800] ss:$16 sps:$4 sm:$0xff]  }
 0x29f   : > { %v13546_v38 = vpack.c.bf16 %v2592_v26, %v2591_v16  ;;  %v13563_v61 = vpack.c.bf16 %v2274_v56, %v2271_v58  ;;  %v2280_v14 = vsel %vm2270_vm1, %v9600_v15, %v17009_v28  ;;  %v10175_v16 = vld [vmem:[%s16787_s3 + $0x844] ss:$16 sps:$4 sm:$0xff]   ;;  %v9591_v26 = vunpack.i.h.bf16 %v13521_v47 }
 0x2a0   : > { %v13551_v60 = vpop.permute.xlu0 %9583  ;;  %5060 = vmatpush1.bf16.msra.mxu0 %v10161_v7  ;;  %v9590_v56 = vunpack.i.l.bf16 %v13521_v47 }
 0x2a1   : > { %4838 = vmatprep.mubr.bf16.mxu1 %v13546_v38  ;;  %5061 = vmatprep.subr.bf16.mxu0 %v10166_v33  ;;  %v9586_v49 = vunpack.i.h.bf16 %v13551_v60  ;;  %v9585_v30 = vunpack.i.l.bf16 %v13551_v60  ;;  %v10202_v60 = vld [vmem:[%s16787_s3 + $0xec] ss:$16 sps:$4 sm:$0xff]   ;;  %v10173_v33 = vld [vmem:[%s16787_s3 + $0x840] ss:$16 sps:$4 sm:$0xff]  }
 0x2a2   : > { %4839 = vmatmul.mubr.bf16.gmra.mxu1 %v17530_v51  ;;  %v2148_v9 = vsel %vm2136_vm3, %v9590_v56, %v9591_v26 }
 0x2a3   : > { %4984 = vmatprep.mubr.bf16.mxu1 %v13563_v61  ;;  %v2145_v47 = vsel %vm2136_vm3, %v9585_v30, %v9586_v49 }
 0x2a4   : > { %v13580_v5 = vpop.permute.xlu0 %9593  ;;  %5062 = vmatpush1.bf16.msra.mxu0 %v10164_v63 }
 0x2a5   : > { %v17008_v53 = vunpack.i.h.bf16 %v13580_v5  ;;  %v9595_v29 = vunpack.i.l.bf16 %v13580_v5  ;;  %5063 = vmatprep.subr.bf16.mxu0 %v10169_v0 }
 0x2a7   : > { %v2277_v52 = vsel %vm2270_vm1, %v9595_v29, %v17008_v53  ;;  %v2336_v4 = vsel %vm2270_vm1, %v2145_v47, %v9595_v29 }
 0x2a8   : > { %v13608_v7 = vpack.c.bf16 %v2280_v14, %v2277_v52  ;;  %5064 = vmatpush1.bf16.msra.mxu0 %v10167_v12  ;;  %v2337_v12 = vsel %vm2270_vm1, %v2148_v9, %v9600_v15  ;;  %v10181_v15 = vld [vmem:[%s16787_s3 + $0x804] ss:$16 sps:$4 sm:$0xff]  }
 0x2a9   : > { %5065 = vmatprep.subr.bf16.mxu0 %v10175_v16  ;;  %v10176_v16 = vld [vmem:[%s16787_s3 + $0x820] ss:$16 sps:$4 sm:$0xff]  }
 0x2aa   : > { %4985 = vmatmul.mubr.bf16.vlgmr.msra.gmra.mxu1 %v13585_v44 }
 0x2ab   : > { %v13578_v45 = vpop.permute.xlu1 %9608  ;;  %4994 = vmatprep.mubr.bf16.mxu1 %v13608_v7  ;;  %5173 = vmatpush1.bf16.msra.mxu1 %v10170_v8 }
 0x2ac   : > { %5261 = vmatprep.subr.bf16.mxu1 %v10202_v60  ;;  %5066 = vmatpush1.bf16.msra.mxu0 %v10173_v33  ;;  %v9611_v26 = vunpack.i.h.bf16 %v13578_v45  ;;  %v9610_v29 = vunpack.i.l.bf16 %v13578_v45  ;;  %v13638_v60 = vpack.c.bf16 %v2337_v12, %v2336_v4 }
 0x2ad   : > { %5067 = vmatprep.subr.bf16.mxu0 %v10178_v35 }
 0x2ae   : > { %17531 = vst [vmem:[#allocation15_spill] sm:$0xff] %v13638_v60  ;;  %v2154_v24 = vsel %vm2136_vm3, %v9610_v29, %v9611_v26 }
 0x2af   : > { %v13606_v3 = vpop.permute.xlu1 %9618 }
 0x2b0   : > { %v17007_v63 = vunpack.i.h.bf16 %v13606_v3  ;;  %v9620_v32 = vunpack.i.l.bf16 %v13606_v3  ;;  %5068 = vmatpush1.bf16.msra.mxu0 %v10176_v16 }
 0x2b1   : > { %v9604_v58 = vpop.permute.xlu0 %9603  ;;  %5069 = vmatprep.subr.bf16.mxu0 %v10181_v15 }
 0x2b2   : > { %v9606_v49 = vunpack.i.h.bf16 %v9604_v58  ;;  %v9605_v52 = vunpack.i.l.bf16 %v9604_v58  ;;  %v2286_v47 = vsel %vm2270_vm1, %v9620_v32, %v17007_v63  ;;  %4995 = vmatmul.mubr.bf16.gmra.mxu1 %v13638_v60 }
 0x2b4   : > { %v2151_v35 = vsel %vm2136_vm3, %v9605_v52, %v9606_v49  ;;  %v17533_v49 = vld [vmem:[#allocation74_spill] sm:$0xff]  ;;  %5070 = vmatpush1.bf16.msra.mxu0 %v10179_v19 }
 0x2b8   : > { %v13625_v0 = vpop.permute.xlu1 %9628 }
 0x2b9   : > { %v13628_v17 = vpop.permute.xlu0 %9613 }
 0x2ba   : > { %v17006_v14 = vunpack.i.h.bf16 %v13628_v17  ;;  %v9615_v8 = vunpack.i.l.bf16 %v13628_v17 }
 0x2bc   : > { %v13643_v58 = vpop.permute.xlu1 %9633  ;;  %v2283_v33 = vsel %vm2270_vm1, %v9615_v8, %v17006_v14  ;;  %v2338_v20 = vsel %vm2270_vm1, %v2151_v35, %v9615_v8  ;;  %v17534_v14 = vunpack.i.l.bf16 %v17533_v49 }
 0x2bd   : > { %v9624_v9 = vpop.permute.xlu0 %9623  ;;  %v13652_v45 = vpack.c.bf16 %v2286_v47, %v2283_v33 }
 0x2be   : > { %v9626_v4 = vunpack.i.h.bf16 %v9624_v9  ;;  %v9625_v12 = vunpack.i.l.bf16 %v9624_v9  ;;  %v17535_v9 = vunpack.i.h.bf16 %v17533_v49  ;;  %v17537_v49 = vld [vmem:[#allocation13_spill] sm:$0xff] }
 0x2bf   : > { %17532 = vst [vmem:[#allocation47_spill] sm:$0xff] %v13652_v45  ;;  %5004 = vmatprep.mubr.bf16.mxu1 %v13652_v45 }
 0x2c0   : > { %v9644_v48 = vpop.permute.xlu1 %9643  ;;  %v2144_v33 = vsel %vm2136_vm3, %v9625_v12, %v9585_v30  ;;  %v2147_v47 = vsel %vm2136_vm3, %v9626_v4, %v9590_v56  ;;  %v2143_v16 = vsel %vm2136_vm3, %v17534_v14, %v9625_v12  ;;  %v2146_v63 = vsel %vm2136_vm3, %v17535_v9, %v9626_v4  ;;  %v10184_v30 = vld [vmem:[%s16787_s3 + $0x9e4] ss:$16 sps:$4 sm:$0xff]   ;;  %v10182_v14 = vld [vmem:[%s16787_s3 + $0x9e0] ss:$16 sps:$4 sm:$0xff]  }
 0x2c1   : > { %v9646_v53 = vunpack.i.h.bf16 %v9644_v48  ;;  %v9645_v26 = vunpack.i.l.bf16 %v9644_v48  ;;  %v13669_v28 = vpop.permute.xlu0 %9638  ;;  %v13671_v39 = vpack.c.bf16 %v2147_v47, %v2144_v33  ;;  %v13673_v8 = vpack.c.bf16 %v2146_v63, %v2143_v16  ;;  %v10187_v63 = vld [vmem:[%s16787_s3 + $0x9c4] ss:$16 sps:$4 sm:$0xff]   ;;  %5071 = vmatprep.subr.bf16.mxu0 %v10184_v30  ;;  %v10185_v12 = vld [vmem:[%s16787_s3 + $0x9c0] ss:$16 sps:$4 sm:$0xff]  }
 0x2c2   : > { %v2339_v56 = vsel %vm2270_vm1, %v2154_v24, %v9620_v32  ;;  %v9635_v4 = vunpack.i.l.bf16 %v13643_v58  ;;  %5072 = vmatpush2.bf16.msra.mxu0 %v10182_v14  ;;  %v9640_v47 = vunpack.i.l.bf16 %v13669_v28  ;;  %v17538_v16 = vunpack.i.l.bf16 %v17537_v49 }
 0x2c3   : > { %4891 = vmatprep.mubr.bf16.mxu0 %v13671_v39  ;;  %v2150_v48 = vsel %vm2136_vm3, %v9645_v26, %v9605_v52  ;;  %v2153_v15 = vsel %vm2136_vm3, %v9646_v53, %v9610_v29  ;;  %v13685_v35 = vpack.c.bf16 %v2339_v56, %v2338_v20  ;;  %v9631_v52 = vunpack.i.h.bf16 %v13625_v0  ;;  %5073 = vmatprep.subr.bf16.mxu0 %v10187_v63 }
 0x2c4   : > { %4892 = vmatmul.mubr.bf16.gmra.mxu0 %v13673_v8  ;;  %v13691_v24 = vpop.permute.xlu1 %9653  ;;  %v13693_v19 = vpack.c.bf16 %v2153_v15, %v2150_v48  ;;  %v17012_v20 = vunpack.i.l.bf16 %v13625_v0  ;;  %v9636_v29 = vunpack.i.h.bf16 %v13643_v58  ;;  %v2149_v9 = vsel %vm2136_vm3, %v17538_v16, %v9645_v26  ;;  %v10190_v58 = vld [vmem:[%s16787_s3 + $0x9a4] ss:$16 sps:$4 sm:$0xff]  }
 0x2c5   : > { %17536 = vst [vmem:[#allocation21_spill] sm:$0xff] %v13685_v35  ;;  %v13695_v32 = vpop.permute.xlu0 %9648  ;;  %5005 = vmatmul.mubr.bf16.gmra.mxu1 %v13685_v35  ;;  %v17539_v30 = vunpack.i.h.bf16 %v17537_v49  ;;  %v17540_v49 = vunpack.i.h.bf16 %v13669_v28 }
 0x2c6   : > { %4901 = vmatprep.mubr.bf16.mxu0 %v13693_v19  ;;  %v2399_v15 = vsel %vm2136_vm3, %v9635_v4, %v9636_v29  ;;  %5074 = vmatpush2.bf16.msra.mxu0 %v10185_v12  ;;  %v2157_v63 = vsel %vm2136_vm3, %v17012_v20, %v9631_v52  ;;  %v9651_v55 = vunpack.i.h.bf16 %v13695_v32  ;;  %v9650_v22 = vunpack.i.l.bf16 %v13695_v32 }
 0x2c7   : > { %v2152_v56 = vsel %vm2136_vm3, %v17539_v30, %v9646_v53  ;;  %v10188_v53 = vld [vmem:[%s16787_s3 + $0x9a0] ss:$16 sps:$4 sm:$0xff]   ;;  %v2530_v16 = vsel %vm2270_vm1, %v9640_v47, %v17540_v49  ;;  %v2593_v29 = vsel %vm2270_vm1, %v2399_v15, %v9640_v47  ;;  %5075 = vmatprep.subr.bf16.mxu0 %v10190_v58  ;;  %v9656_v47 = vunpack.i.h.bf16 %v13691_v24 }
 0x2c8   : > { %v13717_v14 = vpop.permute.xlu1 %9668  ;;  %v13724_v26 = vpack.c.bf16 %v2152_v56, %v2149_v9  ;;  %v10193_v9 = vld [vmem:[%s16787_s3 + $0x984] ss:$16 sps:$4 sm:$0xff]   ;;  %v9655_v58 = vunpack.i.l.bf16 %v13691_v24 }
 0x2c9   : > { %v13719_v48 = vpop.permute.xlu0 %9658  ;;  %v9670_v30 = vunpack.i.l.bf16 %v13717_v14  ;;  %v10196_v24 = vld [vmem:[%s16787_s3 + $0x964] ss:$16 sps:$4 sm:$0xff]  }
 0x2ca   : > { %v17019_v37 = vunpack.i.h.bf16 %v13719_v48  ;;  %v9660_v33 = vunpack.i.l.bf16 %v13719_v48  ;;  %5076 = vmatpush2.bf16.msra.mxu0 %v10188_v53  ;;  %v17543_v53 = vunpack.i.h.bf16 %v13717_v14 }
 0x2cb   : > { %5077 = vmatprep.subr.bf16.mxu0 %v10193_v9  ;;  %v2405_v9 = vsel %vm2136_vm3, %v9655_v58, %v9656_v47 }
 0x2cc   : > { %4902 = vmatmul.mubr.bf16.gmra.mxu0 %v13724_v26  ;;  %v13742_v56 = vpop.permute.xlu1 %9678  ;;  %v2289_v52 = vsel %vm2270_vm1, %v9660_v33, %v17019_v37  ;;  %v2340_v49 = vsel %vm2270_vm1, %v2157_v63, %v9660_v33  ;;  %v10191_v33 = vld [vmem:[%s16787_s3 + $0x980] ss:$16 sps:$4 sm:$0xff]  }
 0x2cd   : > { %v13750_v15 = vpop.permute.xlu0 %9663  ;;  %v13752_v20 = vpack.c.bf16 %v2530_v16, %v2289_v52  ;;  %v13754_v12 = vpack.c.bf16 %v2593_v29, %v2340_v49  ;;  %v2536_v16 = vsel %vm2270_vm1, %v9670_v30, %v17543_v53  ;;  %v2402_v49 = vsel %vm2136_vm3, %v9650_v22, %v9651_v55 }
 0x2ce   : > { %v17026_v62 = vunpack.i.h.bf16 %v13750_v15  ;;  %v9665_v37 = vunpack.i.l.bf16 %v13750_v15  ;;  %5078 = vmatpush2.bf16.msra.mxu0 %v10191_v33  ;;  %v2595_v53 = vsel %vm2270_vm1, %v2405_v9, %v9670_v30  ;;  %v17546_v33 = vunpack.i.l.bf16 %v13198_v36 }
 0x2cf   : > { %17541 = vst [vmem:[#allocation33_spill] sm:$0xff] %v13752_v20  ;;  %17542 = vst [vmem:[#allocation19_spill] sm:$0xff] %v13754_v12  ;;  %5014 = vmatprep.mubr.bf16.mxu1 %v13752_v20  ;;  %5079 = vmatprep.subr.bf16.mxu0 %v10196_v24 }
 0x2d0   : > { %5015 = vmatmul.mubr.bf16.gmra.mxu1 %v13754_v12  ;;  %v2533_v32 = vsel %vm2270_vm1, %v9665_v37, %v17026_v62  ;;  %v2594_v62 = vsel %vm2270_vm1, %v2402_v49, %v9665_v37  ;;  %v17547_v12 = vunpack.i.h.bf16 %v13198_v36 }
 0x2d1   : > { %v13768_v63 = vpop.permute.xlu1 %9688  ;;  %v13776_v52 = vpack.c.bf16 %v2536_v16, %v2533_v32  ;;  %v17545_v16 = vunpack.i.l.bf16 %v13625_v0  ;;  %v10199_v0 = vld [vmem:[%s16787_s3 + $0x944] ss:$16 sps:$4 sm:$0xff]   ;;  %v13807_v9 = vpack.c.bf16 %v2595_v53, %v2594_v62 }
 0x2d2   : > { %v9674_v29 = vpop.permute.xlu0 %9673  ;;  %5080 = vmatpush2.bf16.msra.mxu0 %v10194_v25  ;;  %v10205_v62 = vld [vmem:[%s16787_s3 + $0x924] ss:$16 sps:$4 sm:$0xff]   ;;  %v9690_v53 = vunpack.i.l.bf16 %v13768_v63 }
 0x2d3   : > { %17544 = vst [vmem:[#allocation22_spill] sm:$0xff] %v13776_v52  ;;  %v9676_v50 = vunpack.i.h.bf16 %v9674_v29  ;;  %v9675_v42 = vunpack.i.l.bf16 %v9674_v29  ;;  %5024 = vmatprep.mubr.bf16.mxu1 %v13776_v52  ;;  %17550 = vst [vmem:[#allocation58_spill] sm:$0xff] %v13807_v9  ;;  %5081 = vmatprep.subr.bf16.mxu0 %v10199_v0  ;;  %v17552_v0 = vunpack.i.l.bf16 %v13285_v10  ;;  %v10211_v25 = vld [vmem:[%s16787_s3 + $0x904] ss:$16 sps:$4 sm:$0xff]  }
 0x2d5   : > { %v9699_v32 = vpop.permute.xlu1 %9698  ;;  %v2156_v47 = vsel %vm2136_vm3, %v9675_v42, %v17545_v16  ;;  %v2398_v55 = vsel %vm2136_vm3, %v9676_v50, %v9635_v4  ;;  %v2155_v29 = vsel %vm2136_vm3, %v17546_v33, %v9675_v42  ;;  %v2397_v52 = vsel %vm2136_vm3, %v17547_v12, %v9676_v50  ;;  %v10197_v50 = vld [vmem:[%s16787_s3 + $0x940] ss:$16 sps:$4 sm:$0xff]  }
 0x2d6   : > { %v9701_v20 = vunpack.i.h.bf16 %v9699_v32  ;;  %v9700_v37 = vunpack.i.l.bf16 %v9699_v32  ;;  %v13796_v49 = vpop.permute.xlu0 %9683  ;;  %v13798_v30 = vpack.c.bf16 %v2398_v55, %v2156_v47  ;;  %v13800_v24 = vpack.c.bf16 %v2397_v52, %v2155_v29  ;;  %5082 = vmatpush2.bf16.msra.mxu0 %v10197_v50  ;;  %v10203_v33 = vld [vmem:[%s16787_s3 + $0x920] ss:$16 sps:$4 sm:$0xff]  }
 0x2d7   : > { %v9681_v4 = vunpack.i.h.bf16 %v13742_v56  ;;  %v17031_v42 = vunpack.i.l.bf16 %v13742_v56  ;;  %v9686_v36 = vunpack.i.h.bf16 %v13796_v49  ;;  %v17032_v12 = vunpack.i.l.bf16 %v13796_v49  ;;  %5083 = vmatprep.subr.bf16.mxu0 %v10205_v62 }
 0x2d8   : > { %17548 = vst [vmem:[#allocation24_spill] sm:$0xff] %v13798_v30  ;;  %17549 = vst [vmem:[#allocation28_spill] sm:$0xff] %v13800_v24  ;;  %4911 = vmatprep.mubr.bf16.mxu0 %v13798_v30  ;;  %v2401_v52 = vsel %vm2136_vm3, %v9700_v37, %v9650_v22  ;;  %v2404_v32 = vsel %vm2136_vm3, %v9701_v20, %v9655_v58  ;;  %5025 = vmatmul.mubr.bf16.gmra.mxu1 %v13807_v9  ;;  %v17553_v22 = vunpack.i.h.bf16 %v13285_v10  ;;  %v4780_v45 = vpop.f32.mrf.mxu1 }
 0x2d9   : > { %4912 = vmatmul.mubr.bf16.gmra.mxu0 %v13800_v24  ;;  %v13824_v16 = vpop.permute.xlu1 %9713  ;;  %v13826_v47 = vpack.c.bf16 %v2404_v32, %v2401_v52  ;;  %v2408_v29 = vsel %vm2136_vm3, %v17031_v42, %v9681_v4  ;;  %v2411_v52 = vsel %vm2136_vm3, %v17032_v12, %v9686_v36  ;;  %v2400_v32 = vsel %vm2136_vm3, %v17552_v0, %v9700_v37 }
 0x2da   : > { %v13828_v55 = vpop.permute.xlu0 %9693  ;;  %v2403_v50 = vsel %vm2136_vm3, %v17553_v22, %v9701_v20  ;;  %v17554_v4 = vunpack.i.h.bf16 %v13768_v63  ;;  %v2596_v37 = vsel %vm2270_vm1, %v2408_v29, %v9690_v53  ;;  %5084 = vmatpush2.bf16.msra.mxu0 %v10203_v33  ;;  %v9716_v35 = vunpack.i.h.bf16 %v13824_v16 }
 0x2db   : > { %17551 = vst [vmem:[#allocation63_spill] sm:$0xff] %v13826_v47  ;;  %v9695_v58 = vunpack.i.l.bf16 %v13828_v55  ;;  %4921 = vmatprep.mubr.bf16.mxu0 %v13826_v47  ;;  %v17555_v36 = vunpack.i.h.bf16 %v13828_v55  ;;  %v13867_v0 = vpack.c.bf16 %v2403_v50, %v2400_v32  ;;  %5085 = vmatprep.subr.bf16.mxu0 %v10211_v25  ;;  %v4677_v32 = vpop.f32.mrf.mxu0  ;;  %v17566_v30 = vunpack.i.h.bf16 %v13405_v41 }
 0x2dc   : > { %v2539_v42 = vsel %vm2270_vm1, %v9690_v53, %v17554_v4  ;;  %v10209_v4 = vld [vmem:[%s16787_s3 + $0x900] ss:$16 sps:$4 sm:$0xff]  }
 0x2dd   : > { %v13851_v9 = vpop.permute.xlu1 %9718  ;;  %v2542_v12 = vsel %vm2270_vm1, %v9695_v58, %v17555_v36  ;;  %v2597_v10 = vsel %vm2270_vm1, %v2411_v52, %v9695_v58  ;;  %17558 = vst [vmem:[#allocation41_spill] sm:$0xff] %v13867_v0  ;;  %v17039_v36 = vunpack.i.l.bf16 %v13824_v16 }
 0x2de   : > { %v13861_v20 = vpop.permute.xlu0 %9703  ;;  %v13863_v62 = vpack.c.bf16 %v2542_v12, %v2539_v42  ;;  %v13865_v22 = vpack.c.bf16 %v2597_v10, %v2596_v37  ;;  %v10220_v42 = vld [vmem:[%s16787_s3 + $0x2ec] ss:$16 sps:$4 sm:$0xff]   ;;  %v9720_v33 = vunpack.i.l.bf16 %v13851_v9  ;;  %5086 = vmatpush2.bf16.msra.mxu0 %v10209_v4 }
 0x2df   : > { %v9706_v53 = vunpack.i.h.bf16 %v13861_v20  ;;  %v9705_v58 = vunpack.i.l.bf16 %v13861_v20  ;;  %v2417_v37 = vsel %vm2136_vm3, %v17039_v36, %v9716_v35  ;;  %5364 = vmatprep.subr.bf16.mxu0 %v10220_v42 }
 0x2e0   : > { %17556 = vst [vmem:[#allocation17_spill] sm:$0xff] %v13863_v62  ;;  %17557 = vst [vmem:[#allocation40_spill] sm:$0xff] %v13865_v22  ;;  %5034 = vmatprep.mubr.bf16.mxu1 %v13863_v62  ;;  %v2599_v4 = vsel %vm2270_vm1, %v2417_v37, %v9720_v33  ;;  %v17564_v37 = vunpack.i.l.bf16 %v13405_v41 }
 0x2e1   : > { %4922 = vmatmul.mubr.bf16.gmra.mxu0 %v13867_v0  ;;  %5035 = vmatmul.mubr.bf16.gmra.mxu1 %v13865_v22  ;;  %v13884_v29 = vpop.permute.xlu1 %9728  ;;  %v2414_v10 = vsel %vm2136_vm3, %v9705_v58, %v9706_v53  ;;  %v17559_v22 = vunpack.i.h.bf16 %v13851_v9  ;;  %v4679_v53 = vpop.f32.mrf.mxu0 }
 0x2e2   : > { %v13886_v52 = vpop.permute.xlu0 %9708 }
 0x2e3   : > { %v17041_v50 = vunpack.i.h.bf16 %v13886_v52  ;;  %v9710_v25 = vunpack.i.l.bf16 %v13886_v52  ;;  %v2548_v62 = vsel %vm2270_vm1, %v9720_v33, %v17559_v22  ;;  %v9731_v22 = vunpack.i.h.bf16 %v13884_v29  ;;  %v4782_v33 = vpop.f32.mrf.mxu1 }
 0x2e5   : > { %v13894_v20 = vpop.permute.xlu1 %9738  ;;  %v2545_v12 = vsel %vm2270_vm1, %v9710_v25, %v17041_v50  ;;  %v2598_v0 = vsel %vm2270_vm1, %v2414_v10, %v9710_v25  ;;  %v13909_v50 = vadd.f32 %v4780_v45, %v4677_v32  ;;  %v17567_v10 = vunpack.i.h.bf16 %v13560_v46 }
 0x2e6   : > { %v9724_v47 = vpop.permute.xlu0 %9723  ;;  %v13904_v24 = vpack.c.bf16 %v2548_v62, %v2545_v12  ;;  %v13906_v35 = vpack.c.bf16 %v2599_v4, %v2598_v0  ;;  %v17562_v62 = vunpack.i.l.bf16 %v13742_v56  ;;  %v17563_v12 = vunpack.i.l.bf16 %v13796_v49 }
 0x2e7   : > { %v9726_v42 = vunpack.i.h.bf16 %v9724_v47  ;;  %v9725_v36 = vunpack.i.l.bf16 %v9724_v47  ;;  %v17565_v56 = vmov 0   ;;  %v9730_v49 = vunpack.i.l.bf16 %v13884_v29 }
 0x2e8   : > { %17560 = vst [vmem:[#allocation42_spill] sm:$0xff] %v13904_v24  ;;  %17561 = vst [vmem:[#allocation66_spill] sm:$0xff] %v13906_v35  ;;  %5044 = vmatprep.mubr.bf16.mxu1 %v13904_v24  ;;  %v13928_v24 = vadd.f32 %v4782_v33, %v4679_v53 }
 0x2e9   : > { %5045 = vmatmul.mubr.bf16.gmra.mxu1 %v13906_v35  ;;  %v13913_v25 = vpop.permute.xlu1 %9748  ;;  %v2407_v0 = vsel %vm2136_vm3, %v9725_v36, %v17562_v62  ;;  %v2410_v47 = vsel %vm2136_vm3, %v9726_v42, %v17563_v12  ;;  %v2406_v45 = vsel %vm2136_vm3, %v17564_v37, %v9725_v36  ;;  %v4681_v62 = vpop.f32.mrf.mxu0  ;;  %v2409_v36 = vsel %vm2136_vm3, %v17566_v30, %v9726_v42 }
 0x2ea   : > { %v17048_v32 = vunpack.i.h.bf16 %v13913_v25  ;;  %v9734_v4 = vpop.permute.xlu0 %9733  ;;  %v13926_v35 = vpack.c.bf16 %v2410_v47, %v2407_v0  ;;  %5190 = vmatprep.mubr.bf16.mxu1 %v17565_v56  ;;  %v4784_v37 = vpop.f32.mrf.mxu1  ;;  %v17568_v53 = vunpack.i.l.bf16 %v13913_v25  ;;  %v17569_v47 = vunpack.i.h.bf16 %v13580_v5 }
 0x2eb   : > { %v9736_v12 = vunpack.i.h.bf16 %v9734_v4  ;;  %v9735_v60 = vunpack.i.l.bf16 %v9734_v4  ;;  %v13946_v29 = vpack.c.bf16 %v2409_v36, %v2406_v45  ;;  %v13948_v41 = vadd.f32 %v4784_v37, %v4681_v62  ;;  %v10200_v37 = vld [vmem:[%s16787_s3 + $0xe8] ss:$16 sps:$4 sm:$0xff]  }
 0x2ec   : > { %v2281_v0 = vsel %vm2270_vm1, %v17567_v10, %v17048_v32  ;;  %v2278_v33 = vsel %vm2270_vm1, %v17569_v47, %v17568_v53  ;;  %4931 = vmatprep.mubr.bf16.mxu0 %v13926_v35  ;;  %v9741_v30 = vunpack.i.h.bf16 %v13894_v20  ;;  %v17571_v10 = vunpack.i.l.bf16 %v13824_v16  ;;  %v10208_v16 = vld [vmem:[%s16787_s3 + $0xcc] ss:$16 sps:$4 sm:$0xff]  }
 0x2ed   : > { %v13951_v42 = vpack.c.bf16 %v2281_v0, %v2278_v33  ;;  %v13953_v4 = vpop.permute.xlu1 %9758  ;;  %v2413_v46 = vsel %vm2136_vm3, %v9735_v60, %v9705_v58  ;;  %v9740_v53 = vunpack.i.l.bf16 %v13894_v20  ;;  %4932 = vmatmul.mubr.bf16.gmra.mxu0 %v13946_v29  ;;  %v13968_v0 = vpack.c.bf16 %v9731_v22, %v9730_v49 }
 0x2ee   : > { %v2416_v5 = vsel %vm2136_vm3, %v9736_v12, %v17571_v10  ;;  %v17046_v45 = vunpack.i.h.bf16 %v13953_v4  ;;  %v17047_v62 = vunpack.i.l.bf16 %v13953_v4  ;;  %v17573_v58 = vunpack.i.h.bf16 %v13606_v3 }
 0x2ef   : > { %17570 = vst [vmem:[#allocation34_spill] sm:$0xff] %v13951_v42  ;;  %v13963_v36 = vpack.c.bf16 %v2416_v5, %v2413_v46  ;;  %17572 = vst [vmem:[#allocation64_spill] sm:$0xff] %v13968_v0  ;;  %v17574_v47 = vunpack.i.h.bf16 %v13628_v17  ;;  %v9744_v46 = vpop.permute.xlu0 %9743  ;;  %v17576_v3 = vunpack.i.l.bf16 %v13523_v34  ;;  %v2276_v32 = vsel %vm2270_vm1, %v9741_v30, %v9731_v22 }
 0x2f0   : > { %v2287_v20 = vsel %vm2270_vm1, %v17573_v58, %v17046_v45  ;;  %v17577_v45 = vunpack.i.h.bf16 %v13523_v34  ;;  %v10214_v34 = vld [vmem:[%s16787_s3 + $0xac] ss:$16 sps:$4 sm:$0xff]  }
 0x2f1   : > { %v2284_v33 = vsel %vm2270_vm1, %v17574_v47, %v17047_v62  ;;  %4941 = vmatprep.mubr.bf16.mxu0 %v13963_v36  ;;  %8919 = vmatmul.mubr.msk.bf16.vlgmr.msra.gmra.mxu1 %vm4621_vm7, %v13968_v0  ;;  %v13988_v5 = vpop.permute.xlu1 %9768  ;;  %v2412_v58 = vsel %vm2136_vm3, %v17576_v3, %v9735_v60  ;;  %v9746_v60 = vunpack.i.h.bf16 %v9744_v46  ;;  %v9745_v3 = vunpack.i.l.bf16 %v9744_v46 }
 0x2f2   : > { %v13984_v10 = vpack.c.bf16 %v2287_v20, %v2284_v33  ;;  %v2415_v17 = vsel %vm2136_vm3, %v17577_v45, %v9736_v12  ;;  %5262 = vmatpush1.bf16.msra.mxu1 %v10200_v37  ;;  %v17050_v47 = vunpack.i.h.bf16 %v13988_v5  ;;  %v17051_v62 = vunpack.i.l.bf16 %v13988_v5  ;;  %v10206_v20 = vld [vmem:[%s16787_s3 + $0xc8] ss:$16 sps:$4 sm:$0xff]   ;;  %5200 = vmatprep.mubr.bf16.mxu1 %v17565_v56 }
 0x2f3   : > { %v2273_v33 = vsel %vm2270_vm1, %v9740_v53, %v9730_v49  ;;  %5263 = vmatprep.subr.bf16.mxu1 %v10208_v16  ;;  %v17578_v12 = vunpack.i.h.bf16 %v13719_v48  ;;  %v17579_v49 = vunpack.i.h.bf16 %v13669_v28  ;;  %v14017_v37 = vpack.c.bf16 %v2415_v17, %v2412_v58  ;;  %v10212_v28 = vld [vmem:[%s16787_s3 + $0xa8] ss:$16 sps:$4 sm:$0xff]   ;;  %v9754_v58 = vpop.permute.xlu0 %9753 }
 0x2f4   : > { %17575 = vst [vmem:[#allocation48_spill] sm:$0xff] %v13984_v10  ;;  %v14023_v0 = vpack.c.bf16 %v2276_v32, %v2273_v33  ;;  %v10217_v32 = vld [vmem:[%s16787_s3 + $0x8c] ss:$16 sps:$4 sm:$0xff]   ;;  %v17584_v17 = vunpack.i.h.bf16 %v13717_v14  ;;  %v17585_v33 = vunpack.i.h.bf16 %v13750_v15  ;;  %vm7306_vm3 = vcmask 261120  }
 0x2f5   : > { %v2290_v45 = vsel %vm2270_vm1, %v17578_v12, %v17051_v62  ;;  %v2531_v22 = vsel %vm2270_vm1, %v17579_v49, %v17050_v47  ;;  %17580 = vst [vmem:[#allocation65_spill] sm:$0xff] %v14017_v37  ;;  %v14021_v16 = vpop.permute.xlu1 %9778  ;;  %4942 = vmatmul.mubr.bf16.gmra.mxu0 %v14017_v37  ;;  %v14031_v49 = vpack.c.bf16 %v9746_v60, %v9745_v3  ;;  %v17587_v47 = vunpack.i.h.bf16 %v13494_v13 }
 0x2f6   : > { %v14019_v46 = vpack.c.bf16 %v2531_v22, %v2290_v45  ;;  %17582 = vst [vmem:[#allocation57_spill] sm:$0xff] %v14023_v0  ;;  %5264 = vmatpush1.bf16.msra.mxu1 %v10206_v20  ;;  %v17053_v48 = vunpack.i.h.bf16 %v14021_v16  ;;  %v17056_v12 = vunpack.i.l.bf16 %v14021_v16  ;;  %5087 = vmatprep.mubr.bf16.mxu0 %v14023_v0  ;;  %v17586_v22 = vunpack.i.h.bf16 %v13507_v11  ;;  %v10215_v11 = vld [vmem:[%s16787_s3 + $0x88] ss:$16 sps:$4 sm:$0xff]  }
 0x2f7   : > { %17583 = vst [vmem:[#allocation11_spill] sm:$0xff] %v14031_v49  ;;  %5265 = vmatprep.subr.bf16.mxu1 %v10214_v34  ;;  %v2272_v62 = vsel %vm2270_vm1, %v17587_v47, %v9740_v53  ;;  %v17589_v13 = vunpack.i.l.bf16 %v13913_v25  ;;  %v17590_v53 = vunpack.i.h.bf16 %v13913_v25  ;;  %v17594_v25 = vunpack.i.h.bf16 %v13768_v63 }
 0x2f8   : > { %17581 = vst [vmem:[#allocation50_spill] sm:$0xff] %v14019_v46  ;;  %v2537_v20 = vsel %vm2270_vm1, %v17584_v17, %v17053_v48  ;;  %v2534_v45 = vsel %vm2270_vm1, %v17585_v33, %v17056_v12  ;;  %v2275_v34 = vsel %vm2270_vm1, %v17586_v22, %v9741_v30  ;;  %v10218_v33 = vld [vmem:[%s16787_s3 + $0x2e8] ss:$16 sps:$4 sm:$0xff]   ;;  %v14078_v48 = vpop.f32.mrf.mxu1  ;;  %v17599_v12 = vunpack.i.h.bf16 %v13886_v52 }
 0x2f9   : > { %v14053_v0 = vpack.c.bf16 %v2537_v20, %v2534_v45  ;;  %8920 = vmatmul.mubr.msk.bf16.gmra.mxu1 %vm4621_vm7, %v14031_v49  ;;  %v14057_v14 = vpop.permute.xlu1 %9788  ;;  %v2279_v30 = vsel %vm2270_vm1, %v17589_v13, %v9745_v3  ;;  %v2282_v47 = vsel %vm2270_vm1, %v17590_v53, %v9746_v60  ;;  %v9756_v20 = vunpack.i.h.bf16 %v9754_v58  ;;  %v14074_v45 = vpop.f32.mrf.mxu0  ;;  %17593 = vst [vmem:[#allocation35_spill] sm:$0xff] %v14078_v48 }
 0x2fa   : > { %5266 = vmatpush1.bf16.msra.mxu1 %v10212_v28  ;;  %v17054_v15 = vunpack.i.h.bf16 %v14057_v14  ;;  %v17055_v17 = vunpack.i.l.bf16 %v14057_v14  ;;  %5210 = vmatprep.mubr.bf16.mxu1 %v17565_v56  ;;  %v9755_v28 = vunpack.i.l.bf16 %v9754_v58  ;;  %17591 = vst [vmem:[#allocation26_spill] sm:$0xff] %v14074_v45  ;;  %v14076_v22 = vpack.c.bf16 %v2275_v34, %v2272_v62  ;;  %v10223_v58 = vld [vmem:[%s16787_s3 + $0x6c] ss:$16 sps:$4 sm:$0xff]   ;;  %v4790_v53 = vpop.f32.mrf.mxu1 }
 0x2fb   : > { %17588 = vst [vmem:[#allocation31_spill] sm:$0xff] %v14053_v0  ;;  %5267 = vmatprep.subr.bf16.mxu1 %v10217_v32  ;;  %v17595_v3 = vunpack.i.h.bf16 %v13828_v55  ;;  %v10226_v62 = vld [vmem:[%s16787_s3 + $0x2cc] ss:$16 sps:$4 sm:$0xff]   ;;  %v14100_v63 = vpack.c.bf16 %v2282_v47, %v2279_v30 }
 0x2fc   : > { %17592 = vst [vmem:[#allocation49_spill] sm:$0xff] %v14076_v22  ;;  %v2540_v60 = vsel %vm2270_vm1, %v17594_v25, %v17055_v17  ;;  %v4687_v25 = vpop.f32.mrf.mxu0  ;;  %v14108_v17 = vpack.c.bf16 %v9756_v20, %v9755_v28  ;;  %v10229_v30 = vld [vmem:[%s16787_s3 + $0x4c] ss:$16 sps:$4 sm:$0xff]   ;;  %v4792_v47 = vpop.f32.mrf.mxu1 }
 0x2fd   : > { %v2543_v32 = vsel %vm2270_vm1, %v17595_v3, %v17054_v15  ;;  %v14098_v13 = vpop.permute.xlu1 %9798  ;;  %17597 = vst [vmem:[#allocation36_spill] sm:$0xff] %v14100_v63  ;;  %5088 = vmatmul.mubr.bf16.vlgmr.msra.gmra.mxu0 %v14076_v22  ;;  %v10221_v15 = vld [vmem:[%s16787_s3 + $0x68] ss:$16 sps:$4 sm:$0xff]   ;;  %v10232_v45 = vld [vmem:[%s16787_s3 + $0x2ac] ss:$16 sps:$4 sm:$0xff]  }
 0x2fe   : > { %v14096_v34 = vpack.c.bf16 %v2543_v32, %v2540_v60  ;;  %5268 = vmatpush1.bf16.msra.mxu1 %v10215_v11  ;;  %v17059_v3 = vunpack.i.l.bf16 %v14098_v13  ;;  %17598 = vst [vmem:[#allocation51_spill] sm:$0xff] %v14108_v17  ;;  %v9764_v60 = vpop.permute.xlu0 %9763  ;;  %v14110_v32 = vadd.f32 %v4790_v53, %v4687_v25  ;;  %5365 = vmatpush1.bf16.msra.mxu0 %v10218_v33  ;;  %v10224_v11 = vld [vmem:[%s16787_s3 + $0x2c8] ss:$16 sps:$4 sm:$0xff]   ;;  %v17600_v53 = vunpack.i.h.bf16 %v14098_v13  ;;  %v4689_v48 = vpop.f32.mrf.mxu0 }
 0x2ff   : > { %5097 = vmatprep.mubr.bf16.mxu0 %v14100_v63  ;;  %v17601_v33 = vunpack.i.h.bf16 %v13851_v9  ;;  %5269 = vmatprep.subr.bf16.mxu1 %v10223_v58  ;;  %v14134_v63 = vadd.f32 %v4792_v47, %v4689_v48  ;;  %v4794_v52 = vpop.f32.mrf.mxu1  ;;  %v10227_v9 = vld [vmem:[%s16787_s3 + $0x48] ss:$16 sps:$4 sm:$0xff]   ;;  %v17603_v58 = vunpack.i.l.bf16 %v13953_v4  ;;  %v9766_v48 = vunpack.i.h.bf16 %v9764_v60 }
 0x300   : > { %17596 = vst [vmem:[#allocation39_spill] sm:$0xff] %v14096_v34  ;;  %v2546_v55 = vsel %vm2270_vm1, %v17599_v12, %v17059_v3  ;;  %5366 = vmatprep.subr.bf16.mxu0 %v10226_v62  ;;  %v4691_v12 = vpop.f32.mrf.mxu0  ;;  %v9765_v47 = vunpack.i.l.bf16 %v9764_v60 }
 0x301   : > { %v2549_v25 = vsel %vm2270_vm1, %v17601_v33, %v17600_v53  ;;  %8921 = vmatmul.mubr.msk.bf16.gmra.mxu1 %vm4621_vm7, %v14108_v17  ;;  %v2285_v62 = vsel %vm2270_vm1, %v17603_v58, %v9755_v28  ;;  %v17604_v53 = vunpack.i.h.bf16 %v13953_v4  ;;  %v14148_v33 = vadd.f32 %v4794_v52, %v4691_v12  ;;  %v10235_v4 = vld [vmem:[%s16787_s3 + $0x2c] ss:$16 sps:$4 sm:$0xff]   ;;  %v10236_v58 = vld [vmem:[%s16787_s3 + $0x288] ss:$16 sps:$4 sm:$0xff]  }
 0x302   : > { %v14132_v49 = vpack.c.bf16 %v2549_v25, %v2546_v55  ;;  %5270 = vmatpush1.bf16.msra.mxu1 %v10221_v15  ;;  %5220 = vmatprep.mubr.bf16.mxu1 %v17565_v56  ;;  %v10230_v15 = vld [vmem:[%s16787_s3 + $0x2a8] ss:$16 sps:$4 sm:$0xff]   ;;  %v14153_v25 = vpop.f32.mrf.mxu1  ;;  %v14155_v3 = vpop.f32.mrf.mxu0 }
 0x303   : > { %v2288_v55 = vsel %vm2270_vm1, %v17604_v53, %v9756_v20  ;;  %5367 = vmatpush1.bf16.msra.mxu0 %v10224_v11  ;;  %5271 = vmatprep.subr.bf16.mxu1 %v10229_v30  ;;  %v10238_v20 = vld [vmem:[%s16787_s3 + $0x28c] ss:$16 sps:$4 sm:$0xff]   ;;  %v10233_v30 = vld [vmem:[%s16787_s3 + $0x28] ss:$16 sps:$4 sm:$0xff]   ;;  %v9774_v52 = vpop.permute.xlu0 %9773 }
 0x304   : > { %17602 = vst [vmem:[#allocation30_spill] sm:$0xff] %v14132_v49  ;;  %5368 = vmatprep.subr.bf16.mxu0 %v10232_v45  ;;  %v14163_v28 = vpack.c.bf16 %v2288_v55, %v2285_v62  ;;  %v4800_v60 = vpop.f32.mrf.mxu1  ;;  %v14169_v45 = vpack.c.bf16 %v9766_v48, %v9765_v47  ;;  %v10244_v55 = vld [vmem:[%s16787_s3 + $0x26c] ss:$16 sps:$4 sm:$0xff]   ;;  %v10239_v17 = vld [vmem:[%s16787_s3 + $0x8] ss:$16 sps:$4 sm:$0xff]  }
 0x305   : > { %5098 = vmatmul.mubr.bf16.gmra.mxu0 %v13951_v42 }
 0x306   : > { %17605 = vst [vmem:[#allocation52_spill] sm:$0xff] %v14163_v28  ;;  %v4697_v11 = vpop.f32.mrf.mxu0  ;;  %5272 = vmatpush1.bf16.msra.mxu1 %v10227_v9  ;;  %17606 = vst [vmem:[#allocation53_spill] sm:$0xff] %v14169_v45  ;;  %5107 = vmatprep.mubr.bf16.mxu0 %v14163_v28  ;;  %v10241_v9 = vld [vmem:[%s16787_s3 + $0xc] ss:$16 sps:$4 sm:$0xff]   ;;  %v4802_v62 = vpop.f32.mrf.mxu1  ;;  %v17607_v28 = vunpack.i.l.bf16 %v13988_v5 }
 0x307   : > { %v14171_v12 = vadd.f32 %v4800_v60, %v4697_v11  ;;  %5369 = vmatpush1.bf16.msra.mxu0 %v10230_v15  ;;  %5273 = vmatprep.subr.bf16.mxu1 %v10235_v4 }
 0x308   : > { %v4699_v53 = vpop.f32.mrf.mxu0  ;;  %5370 = vmatprep.subr.bf16.mxu0 %v10238_v20  ;;  %v4804_v15 = vpop.f32.mrf.mxu1  ;;  %v2291_v4 = vsel %vm2270_vm1, %v17607_v28, %v9765_v47  ;;  %v17608_v20 = vunpack.i.h.bf16 %v13988_v5  ;;  %v10247_v5 = vld [vmem:[%s16787_s3 + $0x1ec] ss:$16 sps:$4 sm:$0xff]   ;;  %v10245_v28 = vld [vmem:[%s16787_s3 + $0x1e8] ss:$16 sps:$4 sm:$0xff]  }
 0x309   : > { %v14183_v60 = vadd.f32 %v4802_v62, %v4699_v53  ;;  %8922 = vmatmul.mubr.msk.bf16.gmra.mxu1 %vm4621_vm7, %v14169_v45  ;;  %v9776_v62 = vunpack.i.h.bf16 %v9774_v52  ;;  %v9775_v53 = vunpack.i.l.bf16 %v9774_v52 }
 0x30a   : > { %v4701_v11 = vpop.f32.mrf.mxu0  ;;  %5274 = vmatpush1.bf16.msra.mxu1 %v10233_v30  ;;  %v2532_v42 = vsel %vm2270_vm1, %v17608_v20, %v9766_v48  ;;  %5230 = vmatprep.mubr.bf16.mxu1 %v17565_v56  ;;  %v10242_v30 = vld [vmem:[%s16787_s3 + $0x268] ss:$16 sps:$4 sm:$0xff]   ;;  %v10250_v48 = vld [vmem:[%s16787_s3 + $0x24c] ss:$16 sps:$4 sm:$0xff]   ;;  %v17612_v20 = vunpack.i.h.bf16 %v14021_v16 }
 0x30b   : > { %v14197_v45 = vadd.f32 %v4804_v15, %v4701_v11  ;;  %5371 = vmatpush1.bf16.msra.mxu0 %v10236_v58  ;;  %5275 = vmatprep.subr.bf16.mxu1 %v10241_v9  ;;  %v14210_v47 = vpack.c.bf16 %v2532_v42, %v2291_v4  ;;  %v14216_v52 = vpack.c.bf16 %v9776_v62, %v9775_v53  ;;  %v10248_v9 = vld [vmem:[%s16787_s3 + $0x248] ss:$16 sps:$4 sm:$0xff]   ;;  %v10253_v42 = vld [vmem:[%s16787_s3 + $0x1cc] ss:$16 sps:$4 sm:$0xff]   ;;  %v17611_v11 = vunpack.i.l.bf16 %v14021_v16 }
 0x30c   : > { %v14202_v22 = vpop.f32.mrf.mxu0  ;;  %5372 = vmatprep.subr.bf16.mxu0 %v10244_v55  ;;  %v9784_v55 = vpop.permute.xlu0 %9783  ;;  %v10251_v15 = vld [vmem:[%s16787_s3 + $0x1c8] ss:$16 sps:$4 sm:$0xff]   ;;  %v10262_v16 = vld [vmem:[%s16787_s3 + $0x20c] ss:$16 sps:$4 sm:$0xff]  }
 0x30d   : > { %17609 = vst [vmem:[#allocation61_spill] sm:$0xff] %v14210_v47  ;;  %5108 = vmatmul.mubr.bf16.gmra.mxu0 %v13984_v10  ;;  %17610 = vst [vmem:[#allocation45_spill] sm:$0xff] %v14216_v52  ;;  %v2535_v4 = vsel %vm2270_vm1, %v17611_v11, %v9775_v53  ;;  %v10259_v53 = vld [vmem:[%s16787_s3 + $0x1ac] ss:$16 sps:$4 sm:$0xff]  }
 0x30e   : > { %5276 = vmatpush1.bf16.msra.mxu1 %v10239_v17  ;;  %v4707_v58 = vpop.f32.mrf.mxu0  ;;  %5117 = vmatprep.mubr.bf16.mxu0 %v14210_v47  ;;  %v10256_v17 = vld [vmem:[%s16787_s3 + $0x22c] ss:$16 sps:$4 sm:$0xff]  }
 0x30f   : > { %5373 = vmatpush1.bf16.msra.mxu0 %v10242_v30  ;;  %5277 = vmatprep.subr.bf16.mxu1 %v10247_v5  ;;  %v2538_v30 = vsel %vm2270_vm1, %v17612_v20, %v9776_v62  ;;  %v9786_v5 = vunpack.i.h.bf16 %v9784_v55  ;;  %v10265_v11 = vld [vmem:[%s16787_s3 + $0x18c] ss:$16 sps:$4 sm:$0xff]   ;;  %v14267_v20 = vpop.f32.mrf.mxu1 }
 0x310   : > { %5374 = vmatprep.subr.bf16.mxu0 %v10250_v48  ;;  %v9785_v48 = vunpack.i.l.bf16 %v9784_v55  ;;  %v4709_v47 = vpop.f32.mrf.mxu0  ;;  %v14249_v62 = vpack.c.bf16 %v2538_v30, %v2535_v4  ;;  %v9794_v4 = vpop.permute.xlu0 %9793  ;;  %v10263_v30 = vld [vmem:[%s16787_s3 + $0x188] ss:$16 sps:$4 sm:$0xff]  }
 0x311   : > { %8923 = vmatmul.mubr.msk.bf16.gmra.mxu1 %vm4621_vm7, %v14216_v52 }
 0x312   : > { %5278 = vmatpush2.bf16.msra.mxu1 %v10245_v28  ;;  %5240 = vmatprep.mubr.bf16.mxu1 %v17565_v56  ;;  %v10254_v28 = vld [vmem:[%s16787_s3 + $0x228] ss:$16 sps:$4 sm:$0xff]   ;;  %17613 = vst [vmem:[#allocation23_spill] sm:$0xff] %v14249_v62  ;;  %v4711_v55 = vpop.f32.mrf.mxu0 }
 0x313   : > { %5375 = vmatpush1.bf16.msra.mxu0 %v10248_v9  ;;  %5279 = vmatprep.subr.bf16.mxu1 %v10253_v42  ;;  %v10257_v9 = vld [vmem:[%s16787_s3 + $0x1a8] ss:$16 sps:$4 sm:$0xff]   ;;  %v14255_v42 = vpack.c.bf16 %v9786_v5, %v9785_v48 }
 0x314   : > { %5376 = vmatprep.subr.bf16.mxu0 %v10256_v17  ;;  %v10260_v17 = vld [vmem:[%s16787_s3 + $0x208] ss:$16 sps:$4 sm:$0xff]   ;;  %v14281_v10 = vpop.f32.mrf.mxu0 }
 0x315   : > { %5118 = vmatmul.mubr.bf16.gmra.mxu0 %v14019_v46  ;;  %17614 = vst [vmem:[#allocation18_spill] sm:$0xff] %v14255_v42  ;;  %v9795_v46 = vunpack.i.l.bf16 %v9794_v4 }
 0x316   : > { %5280 = vmatpush2.bf16.msra.mxu1 %v10251_v15  ;;  %5127 = vmatprep.mubr.bf16.mxu0 %v14249_v62  ;;  %v10268_v15 = vld [vmem:[%s16787_s3 + $0x3ec] ss:$16 sps:$4 sm:$0xff]   ;;  %v9796_v62 = vunpack.i.h.bf16 %v9794_v4  ;;  %v4717_v4 = vpop.f32.mrf.mxu0 }
 0x317   : > { %5377 = vmatpush1.bf16.msra.mxu0 %v10254_v28  ;;  %5281 = vmatprep.subr.bf16.mxu1 %v10259_v53  ;;  %v17615_v28 = vunpack.i.l.bf16 %v14057_v14  ;;  %v17616_v53 = vunpack.i.h.bf16 %v14057_v14  ;;  %v10271_v14 = vld [vmem:[%s16787_s3 + $0x16c] ss:$16 sps:$4 sm:$0xff]  }
 0x318   : > { %5378 = vmatprep.subr.bf16.mxu0 %v10262_v16 }
 0x319   : > { %8924 = vmatmul.mubr.msk.bf16.gmra.mxu1 %vm4621_vm7, %v14255_v42  ;;  %v2541_v52 = vsel %vm2270_vm1, %v17615_v28, %v9785_v48  ;;  %v2544_v16 = vsel %vm2270_vm1, %v17616_v53, %v9786_v5  ;;  %v10274_v5 = vld [vmem:[%s16787_s3 + $0x3cc] ss:$16 sps:$4 sm:$0xff]  }
 0x31a   : > { %5282 = vmatpush2.bf16.msra.mxu1 %v10257_v9  ;;  %5250 = vmatprep.mubr.bf16.mxu1 %v17565_v56  ;;  %v10266_v9 = vld [vmem:[%s16787_s3 + $0x3e8] ss:$16 sps:$4 sm:$0xff]   ;;  %v14294_v48 = vpack.c.bf16 %v2544_v16, %v2541_v52  ;;  %v17619_v16 = vld [vmem:[#allocation62_spill] sm:$0xff] }
 0x31b   : > { %5379 = vmatpush1.bf16.msra.mxu0 %v10260_v17  ;;  %5283 = vmatprep.subr.bf16.mxu1 %v10265_v11  ;;  %v10269_v11 = vld [vmem:[%s16787_s3 + $0x168] ss:$16 sps:$4 sm:$0xff]  }
 0x31c   : > { %5380 = vmatprep.subr.bf16.mxu0 %v10268_v15  ;;  %17617 = vst [vmem:[#allocation10_spill] sm:$0xff] %v14294_v48  ;;  %v10272_v52 = vld [vmem:[%s16787_s3 + $0x3c8] ss:$16 sps:$4 sm:$0xff]  }
 0x31d   : > { %v4810_v42 = vpop.f32.mrf.mxu1  ;;  %5128 = vmatmul.mubr.bf16.gmra.mxu0 %v14053_v0  ;;  %v10283_v0 = vld [vmem:[%s16787_s3 + $0x12c] ss:$16 sps:$4 sm:$0xff]  }
 0x31e   : > { %v14286_v37 = vadd.f32 %v4810_v42, %v4707_v58  ;;  %5284 = vmatpush2.bf16.msra.mxu1 %v10263_v30  ;;  %v14302_v42 = vpack.c.bf16 %v9796_v62, %v9795_v46  ;;  %5137 = vmatprep.mubr.bf16.mxu0 %v14294_v48  ;;  %v10277_v30 = vld [vmem:[%s16787_s3 + $0x14c] ss:$16 sps:$4 sm:$0xff]  }
 0x31f   : > { %v4812_v17 = vpop.f32.mrf.mxu1  ;;  %5381 = vmatpush2.bf16.msra.mxu0 %v10266_v9  ;;  %5285 = vmatprep.subr.bf16.mxu1 %v10271_v14  ;;  %v10275_v14 = vld [vmem:[%s16787_s3 + $0x148] ss:$16 sps:$4 sm:$0xff]   ;;  %v10325_v9 = vld [vmem:[%s16787_s3 + $0x44c] ss:$16 sps:$4 sm:$0xff]  }
 0x320   : > { %v14300_v58 = vadd.f32 %v4812_v17, %v4709_v47  ;;  %17618 = vst [vmem:[#allocation32_spill] sm:$0xff] %v14302_v42  ;;  %5382 = vmatprep.subr.bf16.mxu0 %v10274_v5  ;;  %v10280_v47 = vld [vmem:[%s16787_s3 + $0x3ac] ss:$16 sps:$4 sm:$0xff]   ;;  %v17622_v17 = vunpack.i.h.bf16 %v14098_v13 }
 0x321   : > { %v4814_v15 = vpop.f32.mrf.mxu1  ;;  %8925 = vmatmul.mubr.msk.bf16.gmra.mxu1 %vm4621_vm7, %v14302_v42  ;;  %v4719_v42 = vpop.f32.mrf.mxu0  ;;  %v17633_v56 = vld [vmem:[#allocation29_spill] sm:$0xff] }
 0x322   : > { %v14311_v28 = vadd.f32 %v4814_v15, %v4711_v55  ;;  %5286 = vmatpush2.bf16.msra.mxu1 %v10269_v11  ;;  %8928 = vmatprep.mubr.msk.bf16.mxu1 %vm12200_vm15, %v17619_v16  ;;  %v17621_v55 = vunpack.i.l.bf16 %v14098_v13  ;;  %v2550_v15 = vsel %vm2270_vm1, %v17622_v17, %v9796_v62  ;;  %v10278_v11 = vld [vmem:[%s16787_s3 + $0x3a8] ss:$16 sps:$4 sm:$0xff]  }
 0x323   : > { %v14318_v53 = vpop.f32.mrf.mxu1  ;;  %5383 = vmatpush2.bf16.msra.mxu0 %v10272_v52  ;;  %5287 = vmatprep.subr.bf16.mxu1 %v10277_v30  ;;  %v10281_v52 = vld [vmem:[%s16787_s3 + $0x128] ss:$16 sps:$4 sm:$0xff]   ;;  %v4721_v30 = vpop.f32.mrf.mxu0 }
 0x324   : > { %v2547_v5 = vsel %vm2270_vm1, %v17621_v55, %v9795_v46  ;;  %5384 = vmatprep.subr.bf16.mxu0 %v10280_v47  ;;  %v10286_v46 = vld [vmem:[%s16787_s3 + $0x38c] ss:$16 sps:$4 sm:$0xff]   ;;  %v10284_v47 = vld [vmem:[%s16787_s3 + $0x388] ss:$16 sps:$4 sm:$0xff]  }
 0x325   : > { %v4820_v16 = vpop.f32.mrf.mxu1  ;;  %v14343_v13 = vpack.c.bf16 %v2550_v15, %v2547_v5  ;;  %5138 = vmatmul.mubr.bf16.gmra.mxu0 %v14096_v34  ;;  %v10289_v5 = vld [vmem:[%s16787_s3 + $0x10c] ss:$16 sps:$4 sm:$0xff]   ;;  %v10287_v17 = vld [vmem:[%s16787_s3 + $0x108] ss:$16 sps:$4 sm:$0xff]  }
 0x326   : > { %v14335_v48 = vadd.f32 %v4820_v16, %v4717_v4  ;;  %5288 = vmatpush2.bf16.msra.mxu1 %v10275_v14  ;;  %v10290_v15 = vld [vmem:[%s16787_s3 + $0x368] ss:$16 sps:$4 sm:$0xff]  }
 0x327   : > { %17623 = vst [vmem:[#allocation67_spill] sm:$0xff] %v14343_v13  ;;  %v4822_v62 = vpop.f32.mrf.mxu1  ;;  %5385 = vmatpush2.bf16.msra.mxu0 %v10278_v11  ;;  %5147 = vmatprep.mubr.bf16.mxu0 %v14343_v13  ;;  %v10298_v11 = vld [vmem:[%s16787_s3 + $0x4ec] ss:$16 sps:$4 sm:$0xff]   ;;  %v10296_v16 = vld [vmem:[%s16787_s3 + $0x4e8] ss:$16 sps:$4 sm:$0xff]  }
 0x328   : > { %v14349_v4 = vadd.f32 %v4822_v62, %v4719_v42  ;;  %5289 = vmatprep.subr.bf16.mxu1 %v10283_v0  ;;  %5386 = vmatprep.subr.bf16.mxu0 %v10286_v46  ;;  %v10292_v42 = vld [vmem:[%s16787_s3 + $0x36c] ss:$16 sps:$4 sm:$0xff]   ;;  %v10293_v62 = vld [vmem:[%s16787_s3 + $0x348] ss:$16 sps:$4 sm:$0xff]  }
 0x329   : > { %v4824_v55 = vpop.f32.mrf.mxu1  ;;  %v10295_v0 = vld [vmem:[%s16787_s3 + $0x34c] ss:$16 sps:$4 sm:$0xff]   ;;  %v10320_v13 = vld [vmem:[%s16787_s3 + $0x6c8] ss:$16 sps:$4 sm:$0xff]  }
 0x32a   : > { %v14358_v14 = vadd.f32 %v4824_v55, %v4721_v30  ;;  %5290 = vmatpush2.bf16.msra.mxu1 %v10281_v52  ;;  %v17624_v46 = vld [vmem:[#allocation69_spill] sm:$0xff]  ;;  %v17626_v55 = vld [vmem:[#allocation56_spill] sm:$0xff] }
 0x32b   : > { %5387 = vmatpush2.bf16.msra.mxu0 %v10284_v47  ;;  %5291 = vmatprep.subr.bf16.mxu1 %v10289_v5  ;;  %v10304_v52 = vld [vmem:[%s16787_s3 + $0x4cc] ss:$16 sps:$4 sm:$0xff]  }
 0x32c   : > { %5388 = vmatprep.subr.bf16.mxu0 %v10292_v42  ;;  %v10301_v30 = vld [vmem:[%s16787_s3 + $0x32c] ss:$16 sps:$4 sm:$0xff]   ;;  %v10302_v42 = vld [vmem:[%s16787_s3 + $0x4c8] ss:$16 sps:$4 sm:$0xff]  }
 0x32d   : > { %5148 = vmatmul.mubr.bf16.gmra.mxu0 %v14132_v49  ;;  %v17625_v47 = vld [vmem:[#allocation59_spill] sm:$0xff]  ;;  %v17631_v49 = vld [vmem:[#allocation72_spill] sm:$0xff] }
 0x32e   : > { %5292 = vmatpush2.bf16.msra.mxu1 %v10287_v17  ;;  %5396 = vmatprep.mubr.bf16.mxu0 %v17624_v46  ;;  %v10299_v17 = vld [vmem:[%s16787_s3 + $0x328] ss:$16 sps:$4 sm:$0xff]   ;;  %v10340_v5 = vld [vmem:[%s16787_s3 + $0x66c] ss:$16 sps:$4 sm:$0xff]  }
 0x32f   : > { %5389 = vmatpush2.bf16.msra.mxu0 %v10290_v15  ;;  %5467 = vmatprep.subr.bf16.mxu1 %v10298_v11  ;;  %v10310_v15 = vld [vmem:[%s16787_s3 + $0x4ac] ss:$16 sps:$4 sm:$0xff]   ;;  %v14407_v11 = vpop.f32.mrf.mxu0  ;;  %v10305_v46 = vld [vmem:[%s16787_s3 + $0x308] ss:$16 sps:$4 sm:$0xff]  }
 0x330   : > { %5390 = vmatprep.subr.bf16.mxu0 %v10295_v0  ;;  %v10307_v0 = vld [vmem:[%s16787_s3 + $0x30c] ss:$16 sps:$4 sm:$0xff]  }
 0x331   : > { %8931 = vmatmul.mubr.msk.bf16.vlgmr.msra.gmra.mxu1 %vm12200_vm15, %v17625_v47  ;;  %v4727_v47 = vpop.f32.mrf.mxu0 }
 0x332   : > { %8934 = vmatprep.mubr.msk.bf16.mxu1 %vm12817_vm4, %v17626_v55  ;;  %5468 = vmatpush1.bf16.msra.mxu1 %v10296_v16  ;;  %v10308_v16 = vld [vmem:[%s16787_s3 + $0x4a8] ss:$16 sps:$4 sm:$0xff]   ;;  %v17629_v55 = vld [vmem:[#allocation44_spill] sm:$0xff] }
 0x333   : > { %5391 = vmatpush2.bf16.msra.mxu0 %v10293_v62  ;;  %5469 = vmatprep.subr.bf16.mxu1 %v10304_v52  ;;  %v10313_v62 = vld [vmem:[%s16787_s3 + $0x48c] ss:$16 sps:$4 sm:$0xff]  }
 0x334   : > { %5392 = vmatprep.subr.bf16.mxu0 %v10301_v30  ;;  %v10316_v52 = vld [vmem:[%s16787_s3 + $0x6ec] ss:$16 sps:$4 sm:$0xff]  }
 0x335   : > { %v17628_v30 = vld [vmem:[#allocation75_spill] sm:$0xff] }
 0x336   : > { %5470 = vmatpush1.bf16.msra.mxu1 %v10302_v42  ;;  %v10352_v42 = vld [vmem:[%s16787_s3 + $0x62c] ss:$16 sps:$4 sm:$0xff]  }
 0x337   : > { %5393 = vmatpush2.bf16.msra.mxu0 %v10299_v17  ;;  %5471 = vmatprep.subr.bf16.mxu1 %v10310_v15  ;;  %v10311_v17 = vld [vmem:[%s16787_s3 + $0x488] ss:$16 sps:$4 sm:$0xff]  }
 0x338   : > { %5394 = vmatprep.subr.bf16.mxu0 %v10307_v0  ;;  %v10314_v15 = vld [vmem:[%s16787_s3 + $0x6e8] ss:$16 sps:$4 sm:$0xff]   ;;  %v14433_v0 = vpop.f32.mrf.mxu1 }
 0x339   : > { %8937 = vmatmul.mubr.msk.bf16.gmra.mxu1 %vm12817_vm4, %v17628_v30  ;;  %v10319_v30 = vld [vmem:[%s16787_s3 + $0x46c] ss:$16 sps:$4 sm:$0xff]  }
 0x33a   : > { %8940 = vmatprep.mubr.msk.bf16.mxu1 %vm12856_vm5, %v17629_v55  ;;  %5472 = vmatpush1.bf16.msra.mxu1 %v10308_v16  ;;  %v10322_v16 = vld [vmem:[%s16787_s3 + $0x6cc] ss:$16 sps:$4 sm:$0xff]   ;;  %v4729_v55 = vpop.f32.mrf.mxu0 }
 0x33b   : > { %5395 = vmatpush2.bf16.msra.mxu0 %v10305_v46  ;;  %5473 = vmatprep.subr.bf16.mxu1 %v10313_v62  ;;  %v10317_v46 = vld [vmem:[%s16787_s3 + $0x468] ss:$16 sps:$4 sm:$0xff]   ;;  %v4830_v62 = vpop.f32.mrf.mxu1 }
 0x33c   : > { %5570 = vmatprep.subr.bf16.mxu0 %v10316_v52  ;;  %v17632_v52 = vld [vmem:[#allocation76_spill] sm:$0xff]  ;;  %v14451_v34 = vadd.f32 %v4830_v62, %v4727_v47  ;;  %v17634_v47 = vld [vmem:[#allocation27_spill] sm:$0xff] }
 0x33d   : > { %v10326_v62 = vld [vmem:[%s16787_s3 + $0x6a8] ss:$16 sps:$4 sm:$0xff]  }
 0x33e   : > { %8952 = vmatmul.mubr.msk.bf16.vlgmr.msra.gmra.mxu0 %vm12200_vm15, %v17631_v49  ;;  %5474 = vmatpush1.bf16.msra.mxu1 %v10311_v17  ;;  %v4832_v49 = vpop.f32.mrf.mxu1  ;;  %v10328_v17 = vld [vmem:[%s16787_s3 + $0x6ac] ss:$16 sps:$4 sm:$0xff]  }
 0x33f   : > { %5406 = vmatprep.mubr.bf16.mxu0 %v17632_v52  ;;  %5571 = vmatpush1.bf16.msra.mxu0 %v10314_v15  ;;  %v14462_v15 = vadd.f32 %v4832_v49, %v4729_v55  ;;  %v4731_v52 = vpop.f32.mrf.mxu0  ;;  %v10331_v55 = vld [vmem:[%s16787_s3 + $0x42c] ss:$16 sps:$4 sm:$0xff]   ;;  %v17635_v49 = vld [vmem:[#allocation46_spill] sm:$0xff] }
 0x340   : > { %5475 = vmatprep.subr.bf16.mxu1 %v10319_v30  ;;  %5572 = vmatprep.subr.bf16.mxu0 %v10322_v16  ;;  %v10323_v30 = vld [vmem:[%s16787_s3 + $0x448] ss:$16 sps:$4 sm:$0xff]   ;;  %v4834_v16 = vpop.f32.mrf.mxu1 }
 0x341   : > { %8943 = vmatmul.mubr.msk.bf16.gmra.mxu1 %vm12856_vm5, %v17633_v56  ;;  %v14473_v56 = vadd.f32 %v4834_v16, %v4731_v52  ;;  %v10337_v52 = vld [vmem:[%s16787_s3 + $0x40c] ss:$16 sps:$4 sm:$0xff]   ;;  %v10335_v16 = vld [vmem:[%s16787_s3 + $0x408] ss:$16 sps:$4 sm:$0xff]  }
 0x342   : > { %8946 = vmatprep.mubr.msk.bf16.mxu1 %vm12998_vm13, %v17634_v47  ;;  %5476 = vmatpush1.bf16.msra.mxu1 %v10317_v46  ;;  %v10334_v46 = vld [vmem:[%s16787_s3 + $0x68c] ss:$16 sps:$4 sm:$0xff]   ;;  %v17637_v47 = vld [vmem:[#allocation12_spill] sm:$0xff] }
 0x343   : > { %5573 = vmatpush1.bf16.msra.mxu0 %v10320_v13  ;;  %5477 = vmatprep.subr.bf16.mxu1 %v10325_v9  ;;  %v10329_v13 = vld [vmem:[%s16787_s3 + $0x428] ss:$16 sps:$4 sm:$0xff]  }
 0x344   : > { %5574 = vmatprep.subr.bf16.mxu0 %v10328_v17  ;;  %v17636_v9 = vld [vmem:[#allocation43_spill] sm:$0xff] }
 0x345   : > { %v10332_v17 = vld [vmem:[%s16787_s3 + $0x688] ss:$16 sps:$4 sm:$0xff]  }
 0x346   : > { %8955 = vmatmul.mubr.msk.bf16.gmra.mxu0 %vm12817_vm4, %v17635_v49  ;;  %5478 = vmatpush1.bf16.msra.mxu1 %v10323_v30  ;;  %v17638_v30 = vld [vmem:[#allocation8_spill] sm:$0xff] }
 0x347   : > { %5416 = vmatprep.mubr.bf16.mxu0 %v17636_v9  ;;  %5575 = vmatpush1.bf16.msra.mxu0 %v10326_v62  ;;  %v10338_v62 = vld [vmem:[%s16787_s3 + $0x668] ss:$16 sps:$4 sm:$0xff]   ;;  %v17639_v49 = vld [vmem:[#allocation20_spill] sm:$0xff] }
 0x348   : > { %5479 = vmatprep.subr.bf16.mxu1 %v10331_v55  ;;  %5576 = vmatprep.subr.bf16.mxu0 %v10334_v46  ;;  %v10343_v55 = vld [vmem:[%s16787_s3 + $0x5ec] ss:$16 sps:$4 sm:$0xff]   ;;  %v10344_v9 = vld [vmem:[%s16787_s3 + $0x648] ss:$16 sps:$4 sm:$0xff]  }
 0x349   : > { %8949 = vmatmul.mubr.msk.bf16.gmra.mxu1 %vm12998_vm13, %v17637_v47  ;;  %v10346_v46 = vld [vmem:[%s16787_s3 + $0x64c] ss:$16 sps:$4 sm:$0xff]   ;;  %v14537_v47 = vpop.f32.mrf.mxu0 }
 0x34a   : > { %5333 = vmatprep.mubr.bf16.mxu1 %v17638_v30  ;;  %5480 = vmatpush1.bf16.msra.mxu1 %v10329_v13  ;;  %v10341_v13 = vld [vmem:[%s16787_s3 + $0x5e8] ss:$16 sps:$4 sm:$0xff]   ;;  %v10355_v30 = vld [vmem:[%s16787_s3 + $0x5ac] ss:$16 sps:$4 sm:$0xff]  }
 0x34b   : > { %5577 = vmatpush1.bf16.msra.mxu0 %v10332_v17  ;;  %5481 = vmatprep.subr.bf16.mxu1 %v10337_v52  ;;  %v10349_v17 = vld [vmem:[%s16787_s3 + $0x5cc] ss:$16 sps:$4 sm:$0xff]   ;;  %v17640_v52 = vld [vmem:[#allocation38_spill] sm:$0xff] }
 0x34c   : > { %5578 = vmatprep.subr.bf16.mxu0 %v10340_v5  ;;  %v10350_v5 = vld [vmem:[%s16787_s3 + $0x628] ss:$16 sps:$4 sm:$0xff]  }
 0x34e   : > { %8958 = vmatmul.mubr.msk.bf16.gmra.mxu0 %vm12856_vm5, %v17639_v49  ;;  %5482 = vmatpush1.bf16.msra.mxu1 %v10335_v16  ;;  %v10353_v16 = vld [vmem:[%s16787_s3 + $0x5a8] ss:$16 sps:$4 sm:$0xff]  }
 0x34f   : > { %5426 = vmatprep.mubr.bf16.mxu0 %v13259_v6  ;;  %5579 = vmatpush1.bf16.msra.mxu0 %v10338_v62  ;;  %v10347_v6 = vld [vmem:[%s16787_s3 + $0x5c8] ss:$16 sps:$4 sm:$0xff]  }
 0x350   : > { %5483 = vmatprep.subr.bf16.mxu1 %v10343_v55  ;;  %5580 = vmatprep.subr.bf16.mxu0 %v10346_v46  ;;  %v10356_v62 = vld [vmem:[%s16787_s3 + $0x608] ss:$16 sps:$4 sm:$0xff]   ;;  %v10361_v55 = vld [vmem:[%s16787_s3 + $0x58c] ss:$16 sps:$4 sm:$0xff]   ;;  %v14558_v46 = vpop.f32.mrf.mxu0 }
 0x351   : > { %5334 = vmatmul.mubr.bf16.gmra.mxu1 %v17640_v52  ;;  %v10374_v52 = vld [vmem:[%s16787_s3 + $0x7a8] ss:$16 sps:$4 sm:$0xff]  }
 0x352   : > { %5343 = vmatprep.mubr.bf16.mxu1 %v13218_v18  ;;  %5484 = vmatpush2.bf16.msra.mxu1 %v10341_v13  ;;  %v10358_v18 = vld [vmem:[%s16787_s3 + $0x60c] ss:$16 sps:$4 sm:$0xff]   ;;  %v14571_v49 = vpop.f32.mrf.mxu0  ;;  %v10365_v13 = vld [vmem:[%s16787_s3 + $0x568] ss:$16 sps:$4 sm:$0xff]  }
 0x353   : > { %5581 = vmatpush1.bf16.msra.mxu0 %v10344_v9  ;;  %5485 = vmatprep.subr.bf16.mxu1 %v10349_v17  ;;  %v10368_v9 = vld [vmem:[%s16787_s3 + $0x7c8] ss:$16 sps:$4 sm:$0xff]   ;;  %v10373_v17 = vld [vmem:[%s16787_s3 + $0x54c] ss:$16 sps:$4 sm:$0xff]  }
 0x354   : > { %5582 = vmatprep.subr.bf16.mxu0 %v10352_v42  ;;  %v14590_v42 = vpop.f32.mrf.mxu0 }
 0x356   : > { %8961 = vmatmul.mubr.msk.bf16.gmra.mxu0 %vm12998_vm13, %v13270_v31  ;;  %5486 = vmatpush2.bf16.msra.mxu1 %v10347_v6  ;;  %v10359_v31 = vld [vmem:[%s16787_s3 + $0x588] ss:$16 sps:$4 sm:$0xff]   ;;  %v14603_v6 = vpop.f32.mrf.mxu0 }
 0x357   : > { %5436 = vmatprep.mubr.bf16.mxu0 %v13315_v59  ;;  %5583 = vmatpush1.bf16.msra.mxu0 %v10350_v5  ;;  %v10362_v59 = vld [vmem:[%s16787_s3 + $0x7e8] ss:$16 sps:$4 sm:$0xff]  }
 0x358   : > { %5487 = vmatprep.subr.bf16.mxu1 %v10355_v30  ;;  %5584 = vmatprep.subr.bf16.mxu0 %v10358_v18  ;;  %v10377_v5 = vld [vmem:[%s16787_s3 + $0x528] ss:$16 sps:$4 sm:$0xff]   ;;  %v4883_v30 = vpop.f32.mrf.mxu0 }
 0x359   : > { %5344 = vmatmul.mubr.bf16.gmra.mxu1 %v17487_v2  ;;  %v10367_v2 = vld [vmem:[%s16787_s3 + $0x56c] ss:$16 sps:$4 sm:$0xff]   ;;  %v10380_v18 = vld [vmem:[%s16787_s3 + $0x788] ss:$16 sps:$4 sm:$0xff]  }
 0x35a   : > { %5353 = vmatprep.mubr.bf16.mxu1 %v13295_v23  ;;  %5488 = vmatpush2.bf16.msra.mxu1 %v10353_v16  ;;  %v10370_v23 = vld [vmem:[%s16787_s3 + $0x7cc] ss:$16 sps:$4 sm:$0xff]   ;;  %v4884_v16 = vadd.f32 %v4883_v30, %v13909_v50  ;;  %v10386_v50 = vld [vmem:[%s16787_s3 + $0x768] ss:$16 sps:$4 sm:$0xff]  }
 0x35b   : > { %5585 = vmatpush1.bf16.msra.mxu0 %v10356_v62  ;;  %5489 = vmatprep.subr.bf16.mxu1 %v10361_v55  ;;  %v10385_v62 = vld [vmem:[%s16787_s3 + $0x50c] ss:$16 sps:$4 sm:$0xff]   ;;  %v10401_v30 = vld [vmem:[%s16787_s3 + $0x708] ss:$16 sps:$4 sm:$0xff]  }
 0x35c   : > { %5586 = vmatprep.subr.bf16.mxu0 %v10364_v54  ;;  %v10388_v55 = vld [vmem:[%s16787_s3 + $0x76c] ss:$16 sps:$4 sm:$0xff]   ;;  %v10383_v54 = vld [vmem:[%s16787_s3 + $0x508] ss:$16 sps:$4 sm:$0xff]  }
 0x35e   : > { %5437 = vmatmul.mubr.bf16.gmra.mxu0 %v13328_v43  ;;  %5490 = vmatpush2.bf16.msra.mxu1 %v10359_v31  ;;  %v10376_v43 = vld [vmem:[%s16787_s3 + $0x7ac] ss:$16 sps:$4 sm:$0xff]  }
 0x35f   : > { %5446 = vmatprep.mubr.bf16.mxu0 %v13432_v1  ;;  %5587 = vmatpush2.bf16.msra.mxu0 %v10362_v59  ;;  %v10371_v1 = vld [vmem:[%s16787_s3 + $0x548] ss:$16 sps:$4 sm:$0xff]  }
 0x360   : > { %5491 = vmatprep.subr.bf16.mxu1 %v10367_v2  ;;  %5588 = vmatprep.subr.bf16.mxu0 %v10370_v23  ;;  %v14634_v2 = vpop.f32.mrf.mxu1  ;;  %v10394_v23 = vld [vmem:[%s16787_s3 + $0x8ec] ss:$16 sps:$4 sm:$0xff]  }
 0x361   : > { %5354 = vmatmul.mubr.bf16.gmra.mxu1 %v17499_v40  ;;  %v10379_v40 = vld [vmem:[%s16787_s3 + $0x52c] ss:$16 sps:$4 sm:$0xff]  }
 0x362   : > { %5492 = vmatpush2.bf16.msra.mxu1 %v10365_v13  ;;  %5499 = vmatprep.mubr.bf16.mxu1 %v13509_v21  ;;  %v10382_v21 = vld [vmem:[%s16787_s3 + $0x78c] ss:$16 sps:$4 sm:$0xff]   ;;  %v10392_v13 = vld [vmem:[%s16787_s3 + $0x8e8] ss:$16 sps:$4 sm:$0xff]  }
 0x363   : > { %5589 = vmatpush2.bf16.msra.mxu0 %v10368_v9  ;;  %5493 = vmatprep.subr.bf16.mxu1 %v10373_v17  ;;  %v14646_v9 = vpop.f32.mrf.mxu1  ;;  %v10400_v17 = vld [vmem:[%s16787_s3 + $0x8cc] ss:$16 sps:$4 sm:$0xff]  }
 0x364   : > { %5590 = vmatprep.subr.bf16.mxu0 %v10376_v43  ;;  %v10397_v43 = vld [vmem:[%s16787_s3 + $0x72c] ss:$16 sps:$4 sm:$0xff]  }
 0x366   : > { %5447 = vmatmul.mubr.bf16.gmra.mxu0 %v13437_v27  ;;  %5494 = vmatpush2.bf16.msra.mxu1 %v10371_v1  ;;  %v4885_v27 = vpop.f32.mrf.mxu0 }
 0x367   : > { %5456 = vmatprep.mubr.bf16.mxu0 %v13546_v38  ;;  %5591 = vmatpush2.bf16.msra.mxu0 %v10374_v52  ;;  %v4886_v38 = vadd.f32 %v4885_v27, %v13928_v24  ;;  %v10391_v24 = vld [vmem:[%s16787_s3 + $0x74c] ss:$16 sps:$4 sm:$0xff]   ;;  %v10395_v52 = vld [vmem:[%s16787_s3 + $0x728] ss:$16 sps:$4 sm:$0xff]  }
 0x368   : > { %5495 = vmatprep.subr.bf16.mxu1 %v10379_v40  ;;  %5592 = vmatprep.subr.bf16.mxu0 %v10382_v21  ;;  %v4887_v31 = vpop.f32.mrf.mxu0  ;;  %v10406_v40 = vld [vmem:[%s16787_s3 + $0x8ac] ss:$16 sps:$4 sm:$0xff]   ;;  %v10404_v21 = vld [vmem:[%s16787_s3 + $0x8a8] ss:$16 sps:$4 sm:$0xff]  }
 0x369   : > { %v4888_v59 = vadd.f32 %v4887_v31, %v13948_v41  ;;  %v10389_v41 = vld [vmem:[%s16787_s3 + $0x748] ss:$16 sps:$4 sm:$0xff]  }
 0x36a   : > { %5496 = vmatpush2.bf16.msra.mxu1 %v10377_v5 }
 0x36b   : > { %5593 = vmatpush2.bf16.msra.mxu0 %v10380_v18  ;;  %5497 = vmatprep.subr.bf16.mxu1 %v10385_v62  ;;  %v10409_v62 = vld [vmem:[%s16787_s3 + $0x88c] ss:$16 sps:$4 sm:$0xff]  }
 0x36c   : > { %5594 = vmatprep.subr.bf16.mxu0 %v10388_v55  ;;  %v10424_v55 = vld [vmem:[%s16787_s3 + $0xa0c] ss:$16 sps:$4 sm:$0xff]  }
 0x36e   : > { %5457 = vmatmul.mubr.bf16.gmra.mxu0 %v17530_v51  ;;  %5498 = vmatpush2.bf16.msra.mxu1 %v10383_v54  ;;  %v14655_v51 = vpop.f32.mrf.mxu1 }
 0x36f   : > { %5595 = vmatpush2.bf16.msra.mxu0 %v10386_v50  ;;  %5602 = vmatprep.mubr.bf16.mxu0 %v13563_v61  ;;  %v10398_v61 = vld [vmem:[%s16787_s3 + $0x8c8] ss:$16 sps:$4 sm:$0xff]  }
 0x370   : > { %5596 = vmatprep.subr.bf16.mxu0 %v10391_v24  ;;  %5673 = vmatprep.subr.bf16.mxu1 %v10394_v23  ;;  %v14665_v1 = vpop.f32.mrf.mxu1  ;;  %v10412_v24 = vld [vmem:[%s16787_s3 + $0x86c] ss:$16 sps:$4 sm:$0xff]  }
 0x371   : > { %5500 = vmatmul.mubr.bf16.vlgmr.msra.gmra.mxu1 %v13504_v57 }
 0x372   : > { %5509 = vmatprep.mubr.bf16.mxu1 %v13671_v39  ;;  %5674 = vmatpush1.bf16.msra.mxu1 %v10392_v13  ;;  %v14673_v57 = vpop.f32.mrf.mxu1  ;;  %v10403_v39 = vld [vmem:[%s16787_s3 + $0x70c] ss:$16 sps:$4 sm:$0xff]  }
 0x373   : > { %5597 = vmatpush2.bf16.msra.mxu0 %v10389_v41  ;;  %5675 = vmatprep.subr.bf16.mxu1 %v10400_v17  ;;  %v17641_v41 = vld [vmem:[#allocation24_spill] sm:$0xff] }
 0x374   : > { %5598 = vmatprep.subr.bf16.mxu0 %v10397_v43  ;;  %v4986_v5 = vpop.f32.mrf.mxu1  ;;  %v14722_v43 = vpop.f32.mrf.mxu0 }
 0x375   : > { %v14684_v18 = vadd.f32 %v4986_v5, %v4884_v16  ;;  %v10407_v16 = vld [vmem:[%s16787_s3 + $0x888] ss:$16 sps:$4 sm:$0xff]  }
 0x376   : > { %5676 = vmatpush1.bf16.msra.mxu1 %v10398_v61  ;;  %v4988_v27 = vpop.f32.mrf.mxu1  ;;  %v17643_v5 = vld [vmem:[#allocation47_spill] sm:$0xff] }
 0x377   : > { %5599 = vmatpush2.bf16.msra.mxu0 %v10395_v52  ;;  %5677 = vmatprep.subr.bf16.mxu1 %v10406_v40  ;;  %v14693_v54 = vadd.f32 %v4988_v27, %v4886_v38  ;;  %v17642_v40 = vld [vmem:[#allocation15_spill] sm:$0xff] }
 0x378   : > { %5600 = vmatprep.subr.bf16.mxu0 %v10403_v39  ;;  %v4990_v31 = vpop.f32.mrf.mxu1  ;;  %v10416_v39 = vld [vmem:[%s16787_s3 + $0x828] ss:$16 sps:$4 sm:$0xff]  }
 0x379   : > { %5510 = vmatmul.mubr.bf16.gmra.mxu1 %v13673_v8  ;;  %v14699_v50 = vadd.f32 %v4990_v31, %v4888_v59  ;;  %v10422_v8 = vld [vmem:[%s16787_s3 + $0xa08] ss:$16 sps:$4 sm:$0xff]   ;;  %v10415_v59 = vld [vmem:[%s16787_s3 + $0x84c] ss:$16 sps:$4 sm:$0xff]  }
 0x37a   : > { %5519 = vmatprep.mubr.bf16.mxu1 %v13693_v19  ;;  %5678 = vmatpush1.bf16.msra.mxu1 %v10404_v21  ;;  %v14704_v23 = vpop.f32.mrf.mxu1  ;;  %v10410_v19 = vld [vmem:[%s16787_s3 + $0x868] ss:$16 sps:$4 sm:$0xff]  }
 0x37b   : > { %5601 = vmatpush2.bf16.msra.mxu0 %v10401_v30  ;;  %5679 = vmatprep.subr.bf16.mxu1 %v10409_v62  ;;  %v10421_v62 = vld [vmem:[%s16787_s3 + $0x80c] ss:$16 sps:$4 sm:$0xff]  }
 0x37c   : > { %5790 = vmatprep.subr.bf16.mxu0 %v10424_v55  ;;  %v4996_v38 = vpop.f32.mrf.mxu1 }
 0x37e   : > { %5603 = vmatmul.mubr.bf16.vlgmr.msra.gmra.mxu0 %v13585_v44  ;;  %5680 = vmatpush1.bf16.msra.mxu1 %v10407_v16  ;;  %v4998_v13 = vpop.f32.mrf.mxu1  ;;  %v10413_v44 = vld [vmem:[%s16787_s3 + $0x848] ss:$16 sps:$4 sm:$0xff]  }
 0x37f   : > { %5612 = vmatprep.mubr.bf16.mxu0 %v13608_v7  ;;  %5681 = vmatprep.subr.bf16.mxu1 %v10412_v24  ;;  %v10418_v7 = vld [vmem:[%s16787_s3 + $0x82c] ss:$16 sps:$4 sm:$0xff]   ;;  %v4797_v24 = vadd.f32 %v14153_v25, %v14155_v3 }
 0x380   : > { %5791 = vmatpush1.bf16.msra.mxu0 %v10422_v8  ;;  %v5000_v17 = vpop.f32.mrf.mxu1 }
 0x381   : > { %5520 = vmatmul.mubr.bf16.gmra.mxu1 %v13724_v26 }
 0x382   : > { %5529 = vmatprep.mubr.bf16.mxu1 %v17641_v41  ;;  %5682 = vmatpush1.bf16.msra.mxu1 %v10410_v19  ;;  %v5002_v61 = vpop.f32.mrf.mxu1  ;;  %v17645_v19 = vld [vmem:[#allocation63_spill] sm:$0xff] }
 0x383   : > { %5683 = vmatprep.subr.bf16.mxu1 %v10415_v59  ;;  %v10419_v59 = vld [vmem:[%s16787_s3 + $0x808] ss:$16 sps:$4 sm:$0xff]  }
 0x384   : > { %v4893_v52 = vpop.f32.mrf.mxu0 }
 0x385   : > { %v4894_v26 = vadd.f32 %v4893_v52, %v14110_v32  ;;  %v5006_v21 = vpop.f32.mrf.mxu1  ;;  %v17644_v32 = vld [vmem:[#allocation28_spill] sm:$0xff]  ;;  %v17646_v52 = vld [vmem:[#allocation21_spill] sm:$0xff] }
 0x386   : > { %5613 = vmatmul.mubr.bf16.gmra.mxu0 %v17642_v40  ;;  %5684 = vmatpush1.bf16.msra.mxu1 %v10413_v44  ;;  %v4895_v30 = vpop.f32.mrf.mxu0  ;;  %v10427_v44 = vld [vmem:[%s16787_s3 + $0x9ec] ss:$16 sps:$4 sm:$0xff]  }
 0x387   : > { %5622 = vmatprep.mubr.bf16.mxu0 %v17643_v5  ;;  %5685 = vmatprep.subr.bf16.mxu1 %v10418_v7  ;;  %v4896_v27 = vadd.f32 %v4895_v30, %v14134_v63  ;;  %v5008_v55 = vpop.f32.mrf.mxu1  ;;  %v14737_v16 = vadd.f32 %v4996_v38, %v4894_v26 }
 0x388   : > { %v4897_v31 = vpop.f32.mrf.mxu0 }
 0x389   : > { %5530 = vmatmul.mubr.bf16.gmra.mxu1 %v17644_v32  ;;  %v4898_v8 = vadd.f32 %v4897_v31, %v14148_v33  ;;  %v5010_v41 = vpop.f32.mrf.mxu1  ;;  %v14747_v63 = vadd.f32 %v4998_v13, %v4896_v27  ;;  %v10425_v13 = vld [vmem:[%s16787_s3 + $0x9e8] ss:$16 sps:$4 sm:$0xff]  }
 0x38a   : > { %5539 = vmatprep.mubr.bf16.mxu1 %v17645_v19  ;;  %5686 = vmatpush1.bf16.msra.mxu1 %v10416_v39  ;;  %v4899_v38 = vpop.f32.mrf.mxu0  ;;  %v17647_v39 = vld [vmem:[#allocation33_spill] sm:$0xff] }
 0x38b   : > { %5687 = vmatprep.subr.bf16.mxu1 %v10421_v62  ;;  %v4900_v7 = vadd.f32 %v4899_v38, %v4797_v24  ;;  %v14752_v3 = vadd.f32 %v5000_v17, %v4898_v8  ;;  %v5012_v25 = vpop.f32.mrf.mxu1  ;;  %v10430_v17 = vld [vmem:[%s16787_s3 + $0x9cc] ss:$16 sps:$4 sm:$0xff]   ;;  %v10428_v24 = vld [vmem:[%s16787_s3 + $0x9c8] ss:$16 sps:$4 sm:$0xff]   ;;  %v17650_v38 = vld [vmem:[#allocation22_spill] sm:$0xff] }
 0x38c   : > { %v4903_v33 = vpop.f32.mrf.mxu0  ;;  %v10433_v19 = vld [vmem:[%s16787_s3 + $0x9ac] ss:$16 sps:$4 sm:$0xff]  }
 0x38d   : > { %v4904_v40 = vadd.f32 %v4903_v33, %v14171_v12  ;;  %v14759_v26 = vadd.f32 %v5002_v61, %v4900_v7  ;;  %v17648_v12 = vld [vmem:[#allocation41_spill] sm:$0xff]  ;;  %v4807_v61 = vadd.f32 %v14267_v20, %v14202_v22  ;;  %v17649_v20 = vld [vmem:[#allocation19_spill] sm:$0xff] }
 0x38e   : > { %5623 = vmatmul.mubr.bf16.gmra.mxu0 %v17646_v52  ;;  %5688 = vmatpush1.bf16.msra.mxu1 %v10419_v59  ;;  %v4905_v5 = vpop.f32.mrf.mxu0  ;;  %v10436_v7 = vld [vmem:[%s16787_s3 + $0x98c] ss:$16 sps:$4 sm:$0xff]  }
 0x38f   : > { %5632 = vmatprep.mubr.bf16.mxu0 %v17647_v39  ;;  %5689 = vmatprep.subr.bf16.mxu1 %v10427_v44  ;;  %v4906_v30 = vadd.f32 %v4905_v5, %v14183_v60  ;;  %v14766_v62 = vadd.f32 %v5006_v21, %v4904_v40  ;;  %v10439_v39 = vld [vmem:[%s16787_s3 + $0x96c] ss:$16 sps:$4 sm:$0xff]  }
 0x390   : > { %v4907_v27 = vpop.f32.mrf.mxu0  ;;  %v5016_v32 = vpop.f32.mrf.mxu1 }
 0x391   : > { %5540 = vmatmul.mubr.bf16.gmra.mxu1 %v17648_v12  ;;  %v4908_v31 = vadd.f32 %v4907_v27, %v14197_v45  ;;  %v14776_v8 = vadd.f32 %v5008_v55, %v4906_v30  ;;  %v17651_v30 = vld [vmem:[#allocation58_spill] sm:$0xff]  ;;  %v10437_v27 = vld [vmem:[%s16787_s3 + $0x968] ss:$16 sps:$4 sm:$0xff]  }
 0x392   : > { %5549 = vmatprep.mubr.bf16.mxu1 %v13926_v35  ;;  %5690 = vmatpush2.bf16.msra.mxu1 %v10425_v13  ;;  %v4909_v60 = vpop.f32.mrf.mxu0  ;;  %v5018_v21 = vpop.f32.mrf.mxu1  ;;  %v10431_v35 = vld [vmem:[%s16787_s3 + $0x9a8] ss:$16 sps:$4 sm:$0xff]  }
 0x393   : > { %5691 = vmatprep.subr.bf16.mxu1 %v10430_v17  ;;  %v4910_v59 = vadd.f32 %v4909_v60, %v4807_v61  ;;  %v14781_v22 = vadd.f32 %v5010_v41, %v4908_v31  ;;  %v17652_v31 = vld [vmem:[#allocation17_spill] sm:$0xff] }
 0x394   : > { %v5020_v45 = vpop.f32.mrf.mxu1 }
 0x395   : > { %v14787_v55 = vadd.f32 %v5012_v25, %v4910_v59  ;;  %v10434_v25 = vld [vmem:[%s16787_s3 + $0x988] ss:$16 sps:$4 sm:$0xff]  }
 0x396   : > { %5633 = vmatmul.mubr.bf16.gmra.mxu0 %v17649_v20  ;;  %5692 = vmatpush2.bf16.msra.mxu1 %v10428_v24  ;;  %v5022_v44 = vpop.f32.mrf.mxu1  ;;  %v10440_v20 = vld [vmem:[%s16787_s3 + $0x948] ss:$16 sps:$4 sm:$0xff]  }
 0x397   : > { %5642 = vmatprep.mubr.bf16.mxu0 %v17650_v38  ;;  %5693 = vmatprep.subr.bf16.mxu1 %v10433_v19 }
 0x398   : > { %v5026_v33 = vpop.f32.mrf.mxu1 }
 0x399   : > { %5550 = vmatmul.mubr.bf16.gmra.mxu1 %v13946_v29  ;;  %v4913_v41 = vpop.f32.mrf.mxu0 }
 0x39a   : > { %v4914_v52 = vadd.f32 %v4913_v41, %v14286_v37  ;;  %5559 = vmatprep.mubr.bf16.mxu1 %v13963_v36  ;;  %5694 = vmatpush2.bf16.msra.mxu1 %v10431_v35  ;;  %v5028_v13 = vpop.f32.mrf.mxu1  ;;  %v4817_v36 = vadd.f32 %v14318_v53, %v14281_v10  ;;  %v10442_v10 = vld [vmem:[%s16787_s3 + $0x94c] ss:$16 sps:$4 sm:$0xff]  }
 0x39b   : > { %v4915_v40 = vpop.f32.mrf.mxu0  ;;  %5695 = vmatprep.subr.bf16.mxu1 %v10436_v7 }
 0x39c   : > { %v4916_v29 = vadd.f32 %v4915_v40, %v14300_v58  ;;  %v14803_v5 = vadd.f32 %v5016_v32, %v4914_v52  ;;  %v5030_v37 = vpop.f32.mrf.mxu1  ;;  %v4827_v40 = vadd.f32 %v14433_v0, %v14407_v11  ;;  %v10448_v11 = vld [vmem:[%s16787_s3 + $0x90c] ss:$16 sps:$4 sm:$0xff]  }
 0x39d   : > { %v4917_v17 = vpop.f32.mrf.mxu0 }
 0x39e   : > { %5643 = vmatmul.mubr.bf16.gmra.mxu0 %v17651_v30  ;;  %v4918_v12 = vadd.f32 %v4917_v17, %v14311_v28  ;;  %5696 = vmatpush2.bf16.msra.mxu1 %v10434_v25  ;;  %v14812_v61 = vadd.f32 %v5018_v21, %v4916_v29  ;;  %v5032_v32 = vpop.f32.mrf.mxu1  ;;  %v17653_v28 = vld [vmem:[#allocation65_spill] sm:$0xff] }
 0x39f   : > { %5652 = vmatprep.mubr.bf16.mxu0 %v17652_v31  ;;  %v4919_v58 = vpop.f32.mrf.mxu0  ;;  %5697 = vmatprep.subr.bf16.mxu1 %v10439_v39  ;;  %v17654_v21 = vld [vmem:[#allocation57_spill] sm:$0xff]  ;;  %v17655_v39 = vld [vmem:[#allocation40_spill] sm:$0xff] }
 0x3a0   : > { %v4920_v53 = vadd.f32 %v4919_v58, %v4817_v36  ;;  %v14818_v24 = vadd.f32 %v5020_v45, %v4918_v12  ;;  %v10445_v45 = vld [vmem:[%s16787_s3 + $0x92c] ss:$16 sps:$4 sm:$0xff]   ;;  %v10443_v29 = vld [vmem:[%s16787_s3 + $0x928] ss:$16 sps:$4 sm:$0xff]   ;;  %v17656_v36 = vld [vmem:[#allocation42_spill] sm:$0xff] }
 0x3a1   : > { %5560 = vmatmul.mubr.bf16.gmra.mxu1 %v17653_v28  ;;  %v4923_v60 = vpop.f32.mrf.mxu0  ;;  %v5036_v19 = vpop.f32.mrf.mxu1  ;;  %v10446_v12 = vld [vmem:[%s16787_s3 + $0x908] ss:$16 sps:$4 sm:$0xff]   ;;  %v17657_v58 = vld [vmem:[#allocation66_spill] sm:$0xff] }
 0x3a2   : > { %v4924_v59 = vadd.f32 %v4923_v60, %v14335_v48  ;;  %5698 = vmatpush2.bf16.msra.mxu1 %v10437_v27  ;;  %5705 = vmatprep.mubr.bf16.mxu1 %v17654_v21  ;;  %v14826_v35 = vadd.f32 %v5022_v44, %v4920_v53  ;;  %v17659_v21 = vld [vmem:[#allocation49_spill] sm:$0xff] }
 0x3a3   : > { %v4925_v38 = vpop.f32.mrf.mxu0  ;;  %v5038_v7 = vpop.f32.mrf.mxu1  ;;  %5699 = vmatprep.subr.bf16.mxu1 %v10442_v10 }
 0x3a4   : > { %v4926_v41 = vadd.f32 %v4925_v38, %v14349_v4  ;;  %v14832_v52 = vadd.f32 %v5026_v33, %v4924_v59 }
 0x3a5   : > { %v4927_v48 = vpop.f32.mrf.mxu0  ;;  %v5040_v25 = vpop.f32.mrf.mxu1 }
 0x3a6   : > { %5653 = vmatmul.mubr.bf16.gmra.mxu0 %v17655_v39  ;;  %v4928_v44 = vadd.f32 %v4927_v48, %v14358_v14  ;;  %5700 = vmatpush2.bf16.msra.mxu1 %v10440_v20  ;;  %v14841_v17 = vadd.f32 %v5028_v13, %v4926_v41  ;;  %v4837_v41 = vadd.f32 %v14634_v2, %v14537_v47 }
 0x3a7   : > { %5662 = vmatprep.mubr.bf16.mxu0 %v17656_v36  ;;  %v4929_v4 = vpop.f32.mrf.mxu0  ;;  %v5042_v33 = vpop.f32.mrf.mxu1  ;;  %5701 = vmatprep.subr.bf16.mxu1 %v10445_v45  ;;  %v17660_v45 = vld [vmem:[#allocation36_spill] sm:$0xff]  ;;  %v4843_v47 = vadd.f32 %v14655_v51, %v14571_v49  ;;  %v4847_v49 = vadd.f32 %v14673_v57, %v14603_v6 }
 0x3a8   : > { %v4930_v0 = vadd.f32 %v4929_v4, %v4827_v40  ;;  %v14847_v30 = vadd.f32 %v5030_v37, %v4928_v44  ;;  %v17658_v37 = vmov 0  }
 0x3a9   : > { %v5046_v14 = vpop.f32.mrf.mxu1 }
 0x3aa   : > { %5702 = vmatpush2.bf16.msra.mxu1 %v10443_v29  ;;  %v14852_v13 = vadd.f32 %v5032_v32, %v4930_v0 }
 0x3ab   : > { %v5048_v27 = vpop.f32.mrf.mxu1  ;;  %5703 = vmatprep.subr.bf16.mxu1 %v10448_v11 }
 0x3ad   : > { %v5050_v31 = vpop.f32.mrf.mxu1  ;;  %v4933_v10 = vpop.f32.mrf.mxu0 }
 0x3ae   : > { %5663 = vmatmul.mubr.bf16.gmra.mxu0 %v17657_v58  ;;  %5704 = vmatpush2.bf16.msra.mxu1 %v10446_v12  ;;  %v4934_v53 = vadd.f32 %v4933_v10, %v14451_v34  ;;  %v17663_v10 = vld [vmem:[#allocation52_spill] sm:$0xff] }
 0x3af   : > { %v5052_v28 = vpop.f32.mrf.mxu1  ;;  %5808 = vmatprep.mubr.bf16.mxu0 %v17658_v37  ;;  %v4935_v60 = vpop.f32.mrf.mxu0 }
 0x3b0   : > { %v4936_v59 = vadd.f32 %v4935_v60, %v14462_v15  ;;  %v14859_v32 = vadd.f32 %v5036_v19, %v4934_v53  ;;  %v4841_v15 = vadd.f32 %v14646_v9, %v14558_v46  ;;  %v17661_v19 = vld [vmem:[#allocation64_spill] sm:$0xff]  ;;  %v4845_v46 = vadd.f32 %v14665_v1, %v14590_v42  ;;  %v17664_v1 = vld [vmem:[#allocation11_spill] sm:$0xff] }
 0x3b1   : > { %5706 = vmatmul.mubr.bf16.vlgmr.msra.gmra.mxu1 %v17659_v21  ;;  %v5192_v20 = vpop.f32.mrf.mxu1  ;;  %v4937_v38 = vpop.f32.mrf.mxu0 }
 0x3b2   : > { %5715 = vmatprep.mubr.bf16.mxu1 %v17660_v45  ;;  %v4938_v48 = vadd.f32 %v4937_v38, %v14473_v56  ;;  %v14865_v40 = vadd.f32 %v5038_v7, %v4936_v59 }
 0x3b3   : > { %v5194_v34 = vpop.f32.mrf.mxu1  ;;  %v4939_v39 = vpop.f32.mrf.mxu0 }
 0x3b4   : > { %v4940_v44 = vadd.f32 %v4939_v39, %v4837_v41  ;;  %v14869_v36 = vadd.f32 %v5040_v25, %v4938_v48  ;;  %v17662_v25 = vld [vmem:[#allocation34_spill] sm:$0xff]  ;;  %v17665_v48 = vld [vmem:[#allocation48_spill] sm:$0xff] }
 0x3b5   : > { %v5196_v29 = vpop.f32.mrf.mxu1  ;;  %v4943_v4 = vpop.f32.mrf.mxu0 }
 0x3b6   : > { %8962 = vmatmul.mubr.msk.bf16.vlgmr.msra.gmra.mxu0 %vm4621_vm7, %v17661_v19  ;;  %v4944_v2 = vadd.f32 %v4943_v4, %v4841_v15  ;;  %v14878_v7 = vadd.f32 %v5042_v33, %v4940_v44  ;;  %v17666_v15 = vld [vmem:[#allocation61_spill] sm:$0xff] }
 0x3b7   : > { %v14875_v56 = vpop.f32.mrf.mxu1  ;;  %5818 = vmatprep.mubr.bf16.mxu0 %v17658_v37  ;;  %v4945_v11 = vpop.f32.mrf.mxu0 }
 0x3b8   : > { %v4946_v9 = vadd.f32 %v4945_v11, %v4843_v47  ;;  %v14883_v12 = vadd.f32 %v5046_v14, %v4944_v2 }
 0x3b9   : > { %5716 = vmatmul.mubr.bf16.gmra.mxu1 %v17662_v25  ;;  %v5202_v0 = vpop.f32.mrf.mxu1  ;;  %v4947_v58 = vpop.f32.mrf.mxu0 }
 0x3ba   : > { %5725 = vmatprep.mubr.bf16.mxu1 %v17663_v10  ;;  %v4948_v51 = vadd.f32 %v4947_v58, %v4845_v46  ;;  %v14888_v33 = vadd.f32 %v5048_v27, %v4946_v9  ;;  %v17668_v9 = vld [vmem:[#allocation50_spill] sm:$0xff]  ;;  %v17669_v58 = vld [vmem:[#allocation23_spill] sm:$0xff] }
 0x3bb   : > { %v5204_v53 = vpop.f32.mrf.mxu1  ;;  %v4949_v60 = vpop.f32.mrf.mxu0 }
 0x3bc   : > { %v4950_v59 = vadd.f32 %v4949_v60, %v4847_v49  ;;  %v14890_v42 = vadd.f32 %v5050_v31, %v4948_v51 }
 0x3bd   : > { %v5206_v21 = vpop.f32.mrf.mxu1  ;;  %v5089_v14 = vpop.f32.mrf.mxu0 }
 0x3be   : > { %8963 = vmatmul.mubr.msk.bf16.gmra.mxu0 %vm4621_vm7, %v17664_v1  ;;  %v5090_v38 = vadd.f32 %v5089_v14, %v14684_v18  ;;  %v14898_v6 = vadd.f32 %v5052_v28, %v4950_v59 }
 0x3bf   : > { %v14895_v45 = vpop.f32.mrf.mxu1  ;;  %5828 = vmatprep.mubr.bf16.mxu0 %v17658_v37  ;;  %v5091_v57 = vpop.f32.mrf.mxu0 }
 0x3c0   : > { %v14900_v27 = vadd.f32 %v5192_v20, %v5090_v38  ;;  %v5092_v41 = vadd.f32 %v5091_v57, %v14693_v54  ;;  %v17667_v20 = vld [vmem:[#allocation51_spill] sm:$0xff] }
 0x3c1   : > { %5726 = vmatmul.mubr.bf16.gmra.mxu1 %v17665_v48  ;;  %v5212_v31 = vpop.f32.mrf.mxu1  ;;  %v5093_v39 = vpop.f32.mrf.mxu0  ;;  %v17671_v57 = vld [vmem:[#allocation31_spill] sm:$0xff]  ;;  %v17672_v48 = vld [vmem:[#allocation10_spill] sm:$0xff] }
 0x3c2   : > { %5735 = vmatprep.mubr.bf16.mxu1 %v17666_v15  ;;  %v14905_v44 = vadd.f32 %v5194_v34, %v5092_v41  ;;  %v5094_v18 = vadd.f32 %v5093_v39, %v14699_v50 }
 0x3c3   : > { %v5214_v19 = vpop.f32.mrf.mxu1  ;;  %v14908_v4 = vpop.f32.mrf.mxu0 }
 0x3c4   : > { %v14910_v28 = vadd.f32 %v5196_v29, %v5094_v18 }
 0x3c5   : > { %v5216_v47 = vpop.f32.mrf.mxu1  ;;  %v5099_v54 = vpop.f32.mrf.mxu0 }
 0x3c6   : > { %8964 = vmatmul.mubr.msk.bf16.gmra.mxu0 %vm4621_vm7, %v17667_v20  ;;  %v5100_v2 = vadd.f32 %v5099_v54, %v14737_v16 }
 0x3c7   : > { %v14915_v11 = vpop.f32.mrf.mxu1  ;;  %5838 = vmatprep.mubr.bf16.mxu0 %v17658_v37  ;;  %v5101_v34 = vpop.f32.mrf.mxu0 }
 0x3c8   : > { %v14918_v46 = vadd.f32 %v5202_v0, %v5100_v2  ;;  %v5102_v50 = vadd.f32 %v5101_v34, %v14747_v63  ;;  %v17670_v0 = vld [vmem:[#allocation53_spill] sm:$0xff] }
 0x3c9   : > { %5736 = vmatmul.mubr.bf16.gmra.mxu1 %v17668_v9  ;;  %v5222_v29 = vpop.f32.mrf.mxu1  ;;  %v5103_v25 = vpop.f32.mrf.mxu0  ;;  %v17675_v9 = vld [vmem:[#allocation35_spill] sm:$0xff] }
 0x3ca   : > { %5745 = vmatprep.mubr.bf16.mxu1 %v17669_v58  ;;  %v14923_v10 = vadd.f32 %v5204_v53, %v5102_v50  ;;  %v5104_v49 = vadd.f32 %v5103_v25, %v14752_v3 }
 0x3cb   : > { %v5224_v16 = vpop.f32.mrf.mxu1  ;;  %v14926_v51 = vpop.f32.mrf.mxu0 }
 0x3cc   : > { %v14928_v60 = vadd.f32 %v5206_v21, %v5104_v49 }
 0x3cd   : > { %v5226_v59 = vpop.f32.mrf.mxu1  ;;  %v5109_v63 = vpop.f32.mrf.mxu0 }
 0x3ce   : > { %8965 = vmatmul.mubr.msk.bf16.gmra.mxu0 %vm4621_vm7, %v17670_v0  ;;  %v5110_v1 = vadd.f32 %v5109_v63, %v14766_v62  ;;  %v17678_v63 = vld [vmem:[#allocation67_spill] sm:$0xff] }
 0x3cf   : > { %v5228_v14 = vpop.f32.mrf.mxu1  ;;  %5848 = vmatprep.mubr.bf16.mxu0 %v17658_v37  ;;  %v5111_v38 = vpop.f32.mrf.mxu0 }
 0x3d0   : > { %v14934_v53 = vadd.f32 %v5212_v31, %v5110_v1  ;;  %v5112_v3 = vadd.f32 %v5111_v38, %v14776_v8  ;;  %v17673_v31 = vld [vmem:[#allocation45_spill] sm:$0xff] }
 0x3d1   : > { %5746 = vmatmul.mubr.bf16.gmra.mxu1 %v17671_v57  ;;  %v5232_v41 = vpop.f32.mrf.mxu1  ;;  %v5113_v21 = vpop.f32.mrf.mxu0 }
 0x3d2   : > { %5755 = vmatprep.mubr.bf16.mxu1 %v17672_v48  ;;  %v14939_v39 = vadd.f32 %v5214_v19, %v5112_v3  ;;  %v5114_v15 = vadd.f32 %v5113_v21, %v14781_v22  ;;  %v17674_v19 = vld [vmem:[#allocation26_spill] sm:$0xff] }
 0x3d3   : > { %v5234_v18 = vpop.f32.mrf.mxu1  ;;  %v14942_v62 = vpop.f32.mrf.mxu0  ;;  %v4787_v25 = vadd.f32 %v17675_v9, %v17674_v19  ;;  %v17681_v19 = vld [vmem:[#allocation30_spill] sm:$0xff] }
 0x3d4   : > { %v14944_v20 = vadd.f32 %v5216_v47, %v5114_v15  ;;  %v17677_v47 = vld [vmem:[#allocation39_spill] sm:$0xff]  ;;  %v17680_v15 = vld [vmem:[#allocation18_spill] sm:$0xff] }
 0x3d5   : > { %v5236_v54 = vpop.f32.mrf.mxu1  ;;  %v5119_v8 = vpop.f32.mrf.mxu0  ;;  %v4890_v1 = vadd.f32 %v14722_v43, %v4787_v25 }
 0x3d6   : > { %8966 = vmatmul.mubr.msk.bf16.gmra.mxu0 %vm4621_vm7, %v17673_v31  ;;  %v5120_v2 = vadd.f32 %v5119_v8, %v14803_v5 }
 0x3d7   : > { %v5238_v34 = vpop.f32.mrf.mxu1  ;;  %5858 = vmatprep.mubr.bf16.mxu0 %v17658_v37  ;;  %v5121_v50 = vpop.f32.mrf.mxu0  ;;  %v4993_v21 = vadd.f32 %v14704_v23, %v4890_v1  ;;  %v5106_v1 = vadd.f32 %v14926_v51, %v14759_v26 }
 0x3d8   : > { %v14952_v22 = vadd.f32 %v5222_v29, %v5120_v2  ;;  %v5122_v58 = vadd.f32 %v5121_v50, %v14812_v61 }
 0x3d9   : > { %5756 = vmatmul.mubr.bf16.gmra.mxu1 %v17677_v47  ;;  %v5242_v49 = vpop.f32.mrf.mxu1  ;;  %v5123_v0 = vpop.f32.mrf.mxu0  ;;  %v5096_v8 = vadd.f32 %v14908_v4, %v4993_v21 }
 0x3da   : > { %17676 = vst [vmem:[#allocation55_spill] sm:$0xff] %v14952_v22  ;;  %5765 = vmatprep.mubr.bf16.mxu1 %v17678_v63  ;;  %v14958_v5 = vadd.f32 %v5224_v16, %v5122_v58  ;;  %v5124_v38 = vadd.f32 %v5123_v0, %v14818_v24  ;;  %v17682_v63 = vld [vmem:[#allocation32_spill] sm:$0xff] }
 0x3db   : > { %v5244_v3 = vpop.f32.mrf.mxu1  ;;  %v5125_v57 = vpop.f32.mrf.mxu0  ;;  %v14981_v9 = vadd.f32 %v14875_v56, %v5096_v8 }
 0x3dc   : > { %17679 = vst [vmem:[#allocation74_spill] sm:$0xff] %v14958_v5  ;;  %v14962_v29 = vadd.f32 %v5226_v59, %v5124_v38  ;;  %v5126_v61 = vadd.f32 %v5125_v57, %v14826_v35 }
 0x3dd   : > { %v5246_v48 = vpop.f32.mrf.mxu1  ;;  %v5129_v31 = vpop.f32.mrf.mxu0 }
 0x3de   : > { %8967 = vmatmul.mubr.msk.bf16.gmra.mxu0 %vm4621_vm7, %v17680_v15  ;;  %v14970_v16 = vadd.f32 %v5228_v14, %v5126_v61  ;;  %v5130_v24 = vadd.f32 %v5129_v31, %v14832_v52  ;;  %v15008_v31 = vadd.f32 %v14895_v45, %v5106_v1  ;;  %v5116_v45 = vadd.f32 %v14942_v62, %v14787_v55 }
 0x3df   : > { %v5248_v2 = vpop.f32.mrf.mxu1  ;;  %5868 = vmatprep.mubr.bf16.mxu0 %v17658_v37  ;;  %v5131_v23 = vpop.f32.mrf.mxu0 }
 0x3e0   : > { %v14976_v59 = vadd.f32 %v5232_v41, %v5130_v24  ;;  %v5132_v50 = vadd.f32 %v5131_v23, %v14841_v17  ;;  %v15033_v55 = vadd.f32 %v14915_v11, %v5116_v45 }
 0x3e1   : > { %5766 = vmatmul.mubr.bf16.gmra.mxu1 %v17681_v19  ;;  %v5133_v4 = vpop.f32.mrf.mxu0  ;;  %v5252_v58 = vpop.f32.mrf.mxu1 }
 0x3e2   : > { %v14985_v14 = vadd.f32 %v5234_v18, %v5132_v50  ;;  %v5134_v25 = vadd.f32 %v5133_v4, %v14847_v30 }
 0x3e3   : > { %v5135_v47 = vpop.f32.mrf.mxu0  ;;  %v5254_v38 = vpop.f32.mrf.mxu1 }
 0x3e4   : > { %v14990_v0 = vadd.f32 %v5236_v54, %v5134_v25  ;;  %v5136_v17 = vadd.f32 %v5135_v47, %v14852_v13 }
 0x3e5   : > { %v5139_v56 = vpop.f32.mrf.mxu0  ;;  %v5256_v51 = vpop.f32.mrf.mxu1 }
 0x3e6   : > { %8968 = vmatmul.mubr.msk.bf16.gmra.mxu0 %vm4621_vm7, %v17682_v63  ;;  %v14999_v30 = vadd.f32 %v5238_v34, %v5136_v17  ;;  %v5140_v57 = vadd.f32 %v5139_v56, %v14859_v32  ;;  %vm10777_vm7 = vmmov 0  }
 0x3e7   : > { %v5141_v21 = vpop.f32.mrf.mxu0  ;;  %v5258_v50 = vpop.f32.mrf.mxu1 }
 0x3e8   : > { %v15004_v13 = vadd.f32 %v5242_v49, %v5140_v57  ;;  %v5142_v61 = vadd.f32 %v5141_v21, %v14865_v40 }
 0x3e9   : > { %v5143_v15 = vpop.f32.mrf.mxu0 }
 0x3ea   : > { %v15012_v34 = vadd.f32 %v5244_v3, %v5142_v61  ;;  %v5144_v32 = vadd.f32 %v5143_v15, %v14869_v36 }
 0x3eb   : > { %v5145_v8 = vpop.f32.mrf.mxu0 }
 0x3ec   : > { %v15017_v49 = vadd.f32 %v5246_v48, %v5144_v32  ;;  %v5146_v40 = vadd.f32 %v5145_v8, %v14878_v7 }
 0x3ed   : > { %v5149_v23 = vpop.f32.mrf.mxu0 }
 0x3ee   : > { %v15024_v3 = vadd.f32 %v5248_v2, %v5146_v40  ;;  %v5150_v36 = vadd.f32 %v5149_v23, %v14883_v12 }
 0x3ef   : > { %v5151_v4 = vpop.f32.mrf.mxu0 }
 0x3f0   : > { %v15029_v48 = vadd.f32 %v5252_v58, %v5150_v36  ;;  %v5152_v7 = vadd.f32 %v5151_v4, %v14888_v33 }
 0x3f1   : > { %v5295_v47 = vpop.f32.mrf.mxu1  ;;  %v5153_v17 = vpop.f32.mrf.mxu0 }
 0x3f2   : > { %v15037_v2 = vadd.f32 %v5254_v38, %v5152_v7  ;;  %v5154_v12 = vadd.f32 %v5153_v17, %v14890_v42 }
 0x3f3   : > { %v5297_v63 = vpop.f32.mrf.mxu1  ;;  %v5155_v56 = vpop.f32.mrf.mxu0 }
 0x3f4   : > { %v15042_v1 = vadd.f32 %v5256_v51, %v5154_v12  ;;  %v5156_v33 = vadd.f32 %v5155_v56, %v14898_v6 }
 0x3f5   : > { %v5299_v57 = vpop.f32.mrf.mxu1 }
 0x3f6   : > { %17683 = vst [vmem:[#allocation13_spill] sm:$0xff] %v15042_v1  ;;  %v15047_v21 = vadd.f32 %v5258_v50, %v5156_v33 }
 0x3f7   : > { %v15049_v61 = vpop.f32.mrf.mxu1 }
 0x3f8   : > { %17684 = vst [vmem:[#allocation62_spill] sm:$0xff] %v15047_v21 }
 0x3f9   : > { %v5305_v38 = vpop.f32.mrf.mxu1 }
 0x3fb   : > { %v5307_v15 = vpop.f32.mrf.mxu1 }
 0x3fd   : > { %v5309_v32 = vpop.f32.mrf.mxu1 }
 0x3fe   : > { %v5398_v8 = vpop.f32.mrf.mxu0 }
 0x3ff   : > { %v15053_v40 = vadd.f32 %v5398_v8, %v5295_v47  ;;  %v15055_v51 = vpop.f32.mrf.mxu1 }
 0x400   : > { %v5400_v6 = vpop.f32.mrf.mxu0 }
 0x401   : > { %v15057_v23 = vadd.f32 %v5400_v6, %v5297_v63  ;;  %v5315_v45 = vpop.f32.mrf.mxu1 }
 0x402   : > { %v5402_v36 = vpop.f32.mrf.mxu0 }
 0x403   : > { %v15059_v50 = vadd.f32 %v5402_v36, %v5299_v57  ;;  %v5317_v4 = vpop.f32.mrf.mxu1 }
 0x404   : > { %v15061_v7 = vpop.f32.mrf.mxu0 }
 0x405   : > { %v5319_v17 = vpop.f32.mrf.mxu1 }
 0x406   : > { %v5408_v12 = vpop.f32.mrf.mxu0 }
 0x407   : > { %v15063_v56 = vadd.f32 %v5408_v12, %v5305_v38  ;;  %v15065_v33 = vpop.f32.mrf.mxu1 }
 0x408   : > { %v5410_v47 = vpop.f32.mrf.mxu0 }
 0x409   : > { %v15067_v8 = vadd.f32 %v5410_v47, %v5307_v15  ;;  %v5325_v11 = vpop.f32.mrf.mxu1 }
 0x40a   : > { %v5412_v42 = vpop.f32.mrf.mxu0 }
 0x40b   : > { %v15069_v63 = vadd.f32 %v5412_v42, %v5309_v32  ;;  %v5327_v6 = vpop.f32.mrf.mxu1 }
 0x40c   : > { %v15071_v58 = vpop.f32.mrf.mxu0 }
 0x40d   : > { %v5329_v57 = vpop.f32.mrf.mxu1 }
 0x40e   : > { %v5418_v36 = vpop.f32.mrf.mxu0 }
 0x40f   : > { %v15073_v62 = vadd.f32 %v5418_v36, %v5315_v45  ;;  %v15075_v25 = vpop.f32.mrf.mxu1 }
 0x410   : > { %v5420_v38 = vpop.f32.mrf.mxu0 }
 0x411   : > { %v15077_v12 = vadd.f32 %v5420_v38, %v5317_v4  ;;  %v5335_v19 = vpop.f32.mrf.mxu1 }
 0x412   : > { %v5422_v24 = vpop.f32.mrf.mxu0 }
 0x413   : > { %17685 = vst [vmem:[#allocation60_spill] sm:$0xff] %v15077_v12  ;;  %v15079_v15 = vadd.f32 %v5422_v24, %v5319_v17  ;;  %v5337_v47 = vpop.f32.mrf.mxu1 }
 0x414   : > { %v15081_v54 = vpop.f32.mrf.mxu0 }
 0x415   : > { %v5339_v42 = vpop.f32.mrf.mxu1 }
 0x416   : > { %v5428_v32 = vpop.f32.mrf.mxu0 }
 0x417   : > { %v15083_v41 = vadd.f32 %v5428_v32, %v5325_v11  ;;  %v15085_v35 = vpop.f32.mrf.mxu1 }
 0x418   : > { %v5430_v45 = vpop.f32.mrf.mxu0 }
 0x419   : > { %v15087_v36 = vadd.f32 %v5430_v45, %v5327_v6  ;;  %v5345_v18 = vpop.f32.mrf.mxu1 }
 0x41a   : > { %v5432_v43 = vpop.f32.mrf.mxu0 }
 0x41b   : > { %v15089_v4 = vadd.f32 %v5432_v43, %v5329_v57  ;;  %v5347_v38 = vpop.f32.mrf.mxu1 }
 0x41c   : > { %v15091_v26 = vpop.f32.mrf.mxu0 }
 0x41d   : > { %v5349_v24 = vpop.f32.mrf.mxu1 }
 0x41e   : > { %v5438_v17 = vpop.f32.mrf.mxu0 }
 0x41f   : > { %v15093_v52 = vadd.f32 %v5438_v17, %v5335_v19  ;;  %v15095_v37 = vpop.f32.mrf.mxu1 }
 0x420   : > { %17687 = vst [vmem:[#allocation59_spill] sm:$0xff] %v15095_v37  ;;  %v5440_v11 = vpop.f32.mrf.mxu0 }
 0x421   : > { %17686 = vst [vmem:[#allocation69_spill] sm:$0xff] %v15093_v52  ;;  %v15097_v32 = vadd.f32 %v5440_v11, %v5337_v47  ;;  %v5355_v22 = vpop.f32.mrf.mxu1 }
 0x422   : > { %v5442_v1 = vpop.f32.mrf.mxu0 }
 0x423   : > { %17688 = vst [vmem:[#allocation56_spill] sm:$0xff] %v15097_v32  ;;  %v15099_v6 = vadd.f32 %v5442_v1, %v5339_v42  ;;  %v5357_v57 = vpop.f32.mrf.mxu1 }
 0x424   : > { %v15101_v45 = vpop.f32.mrf.mxu0 }
 0x425   : > { %17689 = vst [vmem:[#allocation25_spill] sm:$0xff] %v15099_v6  ;;  %v5359_v17 = vpop.f32.mrf.mxu1 }
 0x426   : > { %v5448_v43 = vpop.f32.mrf.mxu0 }
 0x427   : > { %v15103_v21 = vadd.f32 %v5448_v43, %v5345_v18  ;;  %v15111_v11 = vpop.f32.mrf.mxu1 }
 0x428   : > { %v5450_v5 = vpop.f32.mrf.mxu0  ;;  %17692 = vst [vmem:[#allocation16_spill] sm:$0xff] %v15111_v11 }
 0x429   : > { %17690 = vst [vmem:[#allocation75_spill] sm:$0xff] %v15103_v21  ;;  %v15105_v12 = vadd.f32 %v5450_v5, %v5347_v38 }
 0x42a   : > { %v5452_v19 = vpop.f32.mrf.mxu0 }
 0x42b   : > { %v15107_v52 = vadd.f32 %v5452_v19, %v5349_v24 }
 0x42c   : > { %v15109_v37 = vpop.f32.mrf.mxu0 }
 0x42d   : > { %17691 = vst [vmem:[#allocation44_spill] sm:$0xff] %v15107_v52 }
 0x42e   : > { %v5458_v47 = vpop.f32.mrf.mxu0 }
 0x42f   : > { %v15113_v1 = vadd.f32 %v5458_v47, %v5355_v22 }
 0x430   : > { %v5460_v42 = vpop.f32.mrf.mxu0 }
 0x431   : > { %17693 = vst [vmem:[#allocation72_spill] sm:$0xff] %v15113_v1  ;;  %v15115_v6 = vadd.f32 %v5460_v42, %v5357_v57  ;;  %v5501_v32 = vpop.f32.mrf.mxu1 }
 0x432   : > { %v5462_v18 = vpop.f32.mrf.mxu0  ;;  %v5502_v43 = vadd.f32 %v5501_v32, %v15053_v40  ;;  %v10449_v40 = vld [vmem:[%s16789_s5 + $0x188] ss:$28 sps:$4 sm:$0xff]  }
 0x433   : > { %17694 = vst [vmem:[#allocation76_spill] sm:$0xff] %v15115_v6  ;;  %v15118_v5 = vadd.f32 %v5462_v18, %v5359_v17  ;;  %v5503_v38 = vpop.f32.mrf.mxu1  ;;  %v10452_v18 = vld [vmem:[%s16789_s5 + $0x150] ss:$28 sps:$4 sm:$0xff]  }
 0x434   : > { %v5504_v24 = vadd.f32 %v5503_v38, %v15057_v23  ;;  %v15125_v57 = vpop.f32.mrf.mxu0  ;;  %v10451_v23 = vld [vmem:[%s16789_s5 + $0x18c] ss:$28 sps:$4 sm:$0xff]  }
 0x435   : > { %17695 = vst [vmem:[#allocation29_spill] sm:$0xff] %v15118_v5  ;;  %v5505_v19 = vpop.f32.mrf.mxu1  ;;  %7319 = vmatprep.subr.bf16.mxu0 %v10451_v23 }
 0x436   : > { %v5506_v52 = vadd.f32 %v5505_v19, %v15059_v50  ;;  %7320 = vmatpush1.bf16.msra.mxu0 %v10449_v40  ;;  %v10472_v40 = vld [vmem:[%s16789_s5 + $0x50c] ss:$28 sps:$4 sm:$0xff]  }
 0x437   : > { %v15122_v21 = vpop.f32.mrf.mxu1  ;;  %7390 = vmatprep.subr.bf16.mxu1 %v10472_v40 }
 0x439   : > { %v5511_v11 = vpop.f32.mrf.mxu1 }
 0x43a   : > { %v5512_v22 = vadd.f32 %v5511_v11, %v15063_v56  ;;  %v10454_v56 = vld [vmem:[%s16789_s5 + $0x154] ss:$28 sps:$4 sm:$0xff]  }
 0x43b   : > { %v5513_v47 = vpop.f32.mrf.mxu1  ;;  %7321 = vmatprep.subr.bf16.mxu0 %v10454_v56 }
 0x43c   : > { %v5514_v42 = vadd.f32 %v5513_v47, %v15067_v8  ;;  %7322 = vmatpush1.bf16.msra.mxu0 %v10452_v18  ;;  %v10484_v18 = vld [vmem:[%s16789_s5 + $0x49c] ss:$28 sps:$4 sm:$0xff]  }
 0x43d   : > { %v5515_v6 = vpop.f32.mrf.mxu1 }
 0x43e   : > { %v5516_v50 = vadd.f32 %v5515_v6, %v15069_v63  ;;  %v5604_v32 = vpop.f32.mrf.mxu0  ;;  %v10457_v63 = vld [vmem:[%s16789_s5 + $0x11c] ss:$28 sps:$4 sm:$0xff]   ;;  %v10470_v6 = vld [vmem:[%s16789_s5 + $0x508] ss:$28 sps:$4 sm:$0xff]  }
 0x43f   : > { %v15138_v17 = vadd.f32 %v5604_v32, %v5502_v43  ;;  %v15140_v11 = vpop.f32.mrf.mxu1  ;;  %v10478_v32 = vld [vmem:[%s16789_s5 + $0x4d4] ss:$28 sps:$4 sm:$0xff]   ;;  %7323 = vmatprep.subr.bf16.mxu0 %v10457_v63  ;;  %7391 = vmatpush1.bf16.msra.mxu1 %v10470_v6  ;;  %v10458_v6 = vld [vmem:[%s16789_s5 + $0xe0] ss:$28 sps:$4 sm:$0xff]  }
 0x440   : > { %v5606_v8 = vpop.f32.mrf.mxu0  ;;  %7392 = vmatprep.subr.bf16.mxu1 %v10478_v32 }
 0x441   : > { %v15145_v38 = vadd.f32 %v5606_v8, %v5504_v24  ;;  %v5521_v19 = vpop.f32.mrf.mxu1 }
 0x442   : > { %v5522_v43 = vadd.f32 %v5521_v19, %v15073_v62  ;;  %v5608_v47 = vpop.f32.mrf.mxu0  ;;  %v10455_v62 = vld [vmem:[%s16789_s5 + $0x118] ss:$28 sps:$4 sm:$0xff]   ;;  %v10476_v19 = vld [vmem:[%s16789_s5 + $0x4d0] ss:$28 sps:$4 sm:$0xff]  }
 0x443   : > { %17696 = vst [vmem:[#allocation27_spill] sm:$0xff] %v15145_v38  ;;  %v15157_v23 = vadd.f32 %v5608_v47, %v5506_v52  ;;  %v15159_v24 = vpop.f32.mrf.mxu1  ;;  %v10460_v52 = vld [vmem:[%s16789_s5 + $0xe4] ss:$28 sps:$4 sm:$0xff]   ;;  %7324 = vmatpush1.bf16.msra.mxu0 %v10455_v62  ;;  %7393 = vmatpush1.bf16.msra.mxu1 %v10476_v19 }
 0x444   : > { %v15164_v56 = vpop.f32.mrf.mxu0  ;;  %7325 = vmatprep.subr.bf16.mxu0 %v10460_v52  ;;  %7394 = vmatprep.subr.bf16.mxu1 %v10484_v18  ;;  %v10461_v19 = vld [vmem:[%s16789_s5 + $0xa8] ss:$28 sps:$4 sm:$0xff]  }
 0x445   : > { %17697 = vst [vmem:[#allocation46_spill] sm:$0xff] %v15157_v23  ;;  %v5525_v8 = vpop.f32.mrf.mxu1 }
 0x446   : > { %v5526_v47 = vadd.f32 %v5525_v8, %v15079_v15  ;;  %v5614_v5 = vpop.f32.mrf.mxu0  ;;  %v10463_v15 = vld [vmem:[%s16789_s5 + $0xac] ss:$28 sps:$4 sm:$0xff]  }
 0x447   : > { %v15179_v40 = vadd.f32 %v5614_v5, %v5512_v22  ;;  %v15181_v63 = vpop.f32.mrf.mxu1  ;;  %v10482_v5 = vld [vmem:[%s16789_s5 + $0x498] ss:$28 sps:$4 sm:$0xff]   ;;  %7326 = vmatpush1.bf16.msra.mxu0 %v10458_v6 }
 0x448   : > { %v5616_v38 = vpop.f32.mrf.mxu0  ;;  %7327 = vmatprep.subr.bf16.mxu0 %v10463_v15  ;;  %7395 = vmatpush1.bf16.msra.mxu1 %v10482_v5  ;;  %v10464_v5 = vld [vmem:[%s16789_s5 + $0x70] ss:$28 sps:$4 sm:$0xff]  }
 0x449   : > { %17698 = vst [vmem:[#allocation43_spill] sm:$0xff] %v15179_v40  ;;  %v15186_v1 = vadd.f32 %v5616_v38, %v5514_v42  ;;  %v5531_v23 = vpop.f32.mrf.mxu1  ;;  %v10490_v42 = vld [vmem:[%s16789_s5 + $0x464] ss:$28 sps:$4 sm:$0xff]  }
 0x44a   : > { %v5532_v22 = vadd.f32 %v5531_v23, %v15083_v41  ;;  %v5618_v32 = vpop.f32.mrf.mxu0  ;;  %v10466_v41 = vld [vmem:[%s16789_s5 + $0x74] ss:$28 sps:$4 sm:$0xff]   ;;  %7396 = vmatprep.subr.bf16.mxu1 %v10490_v42  ;;  %v10496_v23 = vld [vmem:[%s16789_s5 + $0x42c] ss:$28 sps:$4 sm:$0xff]   ;;  %v10469_v42 = vld [vmem:[%s16789_s5 + $0x3c] ss:$28 sps:$4 sm:$0xff]  }
 0x44b   : > { %17699 = vst [vmem:[#allocation12_spill] sm:$0xff] %v15186_v1  ;;  %v15198_v38 = vadd.f32 %v5618_v32, %v5516_v50  ;;  %v5533_v62 = vpop.f32.mrf.mxu1  ;;  %v10488_v50 = vld [vmem:[%s16789_s5 + $0x460] ss:$28 sps:$4 sm:$0xff]   ;;  %7328 = vmatpush1.bf16.msra.mxu0 %v10461_v19  ;;  %v10502_v19 = vld [vmem:[%s16789_s5 + $0x3f4] ss:$28 sps:$4 sm:$0xff]  }
 0x44c   : > { %v5534_v8 = vadd.f32 %v5533_v62, %v15087_v36  ;;  %v15201_v52 = vpop.f32.mrf.mxu0  ;;  %7329 = vmatprep.subr.bf16.mxu0 %v10466_v41  ;;  %7397 = vmatpush1.bf16.msra.mxu1 %v10488_v50  ;;  %v10467_v50 = vld [vmem:[%s16789_s5 + $0x38] ss:$28 sps:$4 sm:$0xff]  }
 0x44d   : > { %17700 = vst [vmem:[#allocation8_spill] sm:$0xff] %v15198_v38  ;;  %v15206_v1 = vpop.f32.mrf.mxu1  ;;  %7398 = vmatprep.subr.bf16.mxu1 %v10496_v23  ;;  %v10475_v23 = vld [vmem:[%s16789_s5 + $0x4] ss:$28 sps:$4 sm:$0xff]  }
 0x44e   : > { %v5624_v36 = vpop.f32.mrf.mxu0 }
 0x44f   : > { %v15217_v18 = vadd.f32 %v5624_v36, %v5522_v43  ;;  %v15219_v6 = vpop.f32.mrf.mxu1  ;;  %v10494_v43 = vld [vmem:[%s16789_s5 + $0x428] ss:$28 sps:$4 sm:$0xff]   ;;  %7330 = vmatpush1.bf16.msra.mxu0 %v10464_v5  ;;  %v10508_v5 = vld [vmem:[%s16789_s5 + $0x3bc] ss:$28 sps:$4 sm:$0xff]  }
 0x450   : > { %v15221_v15 = vpop.f32.mrf.mxu0  ;;  %7331 = vmatprep.subr.bf16.mxu0 %v10469_v42  ;;  %7399 = vmatpush1.bf16.msra.mxu1 %v10494_v43  ;;  %v10473_v42 = vld [vmem:[%s16789_s5] ss:$28 sps:$4 sm:$0xff]  }
 0x451   : > { %17701 = vst [vmem:[#allocation20_spill] sm:$0xff] %v15217_v18  ;;  %v15226_v32 = vpop.f32.mrf.mxu1  ;;  %7400 = vmatprep.subr.bf16.mxu1 %v10502_v19  ;;  %v10481_v19 = vld [vmem:[%s16789_s5 + $0x34c] ss:$28 sps:$4 sm:$0xff]  }
 0x452   : > { %v5628_v62 = vpop.f32.mrf.mxu0 }
 0x453   : > { %v15237_v36 = vadd.f32 %v5628_v62, %v5526_v47  ;;  %v15239_v18 = vpop.f32.mrf.mxu1  ;;  %v10500_v47 = vld [vmem:[%s16789_s5 + $0x3f0] ss:$28 sps:$4 sm:$0xff]   ;;  %7332 = vmatpush1.bf16.msra.mxu0 %v10467_v50 }
 0x454   : > { %v15241_v41 = vpop.f32.mrf.mxu0  ;;  %7333 = vmatprep.subr.bf16.mxu0 %v10475_v23  ;;  %7401 = vmatpush1.bf16.msra.mxu1 %v10500_v47  ;;  %v10487_v47 = vld [vmem:[%s16789_s5 + $0x314] ss:$28 sps:$4 sm:$0xff]  }
 0x455   : > { %17702 = vst [vmem:[#allocation38_spill] sm:$0xff] %v15237_v36  ;;  %17703 = vst [vmem:[#allocation24_spill] sm:$0xff] %v15241_v41  ;;  %v15246_v38 = vpop.f32.mrf.mxu1  ;;  %7402 = vmatprep.subr.bf16.mxu1 %v10508_v5 }
 0x456   : > { %17704 = vst [vmem:[#allocation15_spill] sm:$0xff] %v15246_v38  ;;  %v5634_v62 = vpop.f32.mrf.mxu0 }
 0x457   : > { %v15257_v36 = vadd.f32 %v5634_v62, %v5532_v22  ;;  %v5547_v40 = vpop.f32.mrf.mxu1  ;;  %v10506_v22 = vld [vmem:[%s16789_s5 + $0x3b8] ss:$28 sps:$4 sm:$0xff]   ;;  %7334 = vmatpush1.bf16.msra.mxu0 %v10473_v42  ;;  %v10485_v42 = vld [vmem:[%s16789_s5 + $0x310] ss:$28 sps:$4 sm:$0xff]  }
 0x458   : > { %v5636_v38 = vpop.f32.mrf.mxu0  ;;  %7335 = vmatprep.subr.bf16.mxu0 %v10481_v19  ;;  %7403 = vmatpush1.bf16.msra.mxu1 %v10506_v22  ;;  %v10493_v19 = vld [vmem:[%s16789_s5 + $0x2dc] ss:$28 sps:$4 sm:$0xff]  }
 0x459   : > { %17705 = vst [vmem:[#allocation47_spill] sm:$0xff] %v15257_v36  ;;  %v15262_v43 = vadd.f32 %v5636_v38, %v5534_v8  ;;  %v15264_v41 = vpop.f32.mrf.mxu1  ;;  %v10479_v8 = vld [vmem:[%s16789_s5 + $0x348] ss:$28 sps:$4 sm:$0xff]  }
 0x45a   : > { %v15272_v62 = vpop.f32.mrf.mxu0 }
 0x45b   : > { %17706 = vst [vmem:[#allocation28_spill] sm:$0xff] %v15262_v43  ;;  %v5553_v50 = vpop.f32.mrf.mxu1  ;;  %7336 = vmatpush2.bf16.msra.mxu0 %v10479_v8  ;;  %v10491_v8 = vld [vmem:[%s16789_s5 + $0x2d8] ss:$28 sps:$4 sm:$0xff]  }
 0x45c   : > { %v5554_v36 = vadd.f32 %v5553_v50, %v15105_v12  ;;  %v15275_v38 = vpop.f32.mrf.mxu0  ;;  %v5445_v50 = vadd.f32 %v15101_v45, %v15085_v35  ;;  %7337 = vmatprep.subr.bf16.mxu0 %v10487_v47  ;;  %v10499_v35 = vld [vmem:[%s16789_s5 + $0x2a4] ss:$28 sps:$4 sm:$0xff]  }
 0x45d   : > { %v15280_v23 = vpop.f32.mrf.mxu1 }
 0x45e   : > { %17707 = vst [vmem:[#allocation63_spill] sm:$0xff] %v15280_v23  ;;  %v15285_v43 = vpop.f32.mrf.mxu0 }
 0x45f   : > { %17708 = vst [vmem:[#allocation21_spill] sm:$0xff] %v15285_v43  ;;  %v15287_v5 = vpop.f32.mrf.mxu1  ;;  %v5548_v43 = vadd.f32 %v5547_v40, %v5445_v50  ;;  %7338 = vmatpush2.bf16.msra.mxu0 %v10485_v42  ;;  %v10497_v42 = vld [vmem:[%s16789_s5 + $0x2a0] ss:$28 sps:$4 sm:$0xff]  }
 0x460   : > { %17709 = vst [vmem:[#allocation33_spill] sm:$0xff] %v15287_v5  ;;  %v15289_v12 = vpop.f32.mrf.mxu0  ;;  %7339 = vmatprep.subr.bf16.mxu0 %v10493_v19 }
 0x461   : > { %17710 = vst [vmem:[#allocation41_spill] sm:$0xff] %v15289_v12  ;;  %v15301_v23 = vpop.f32.mrf.mxu1 }
 0x462   : > { %v15299_v22 = vpop.f32.mrf.mxu0  ;;  %17712 = vst [vmem:[#allocation22_spill] sm:$0xff] %v15301_v23 }
 0x463   : > { %17711 = vst [vmem:[#allocation19_spill] sm:$0xff] %v15299_v22  ;;  %v15313_v47 = vpop.f32.mrf.mxu1  ;;  %7340 = vmatpush2.bf16.msra.mxu0 %v10491_v8  ;;  %v10503_v8 = vld [vmem:[%s16789_s5 + $0x268] ss:$28 sps:$4 sm:$0xff]  }
 0x464   : > { %v5650_v5 = vpop.f32.mrf.mxu0  ;;  %17715 = vst [vmem:[#allocation65_spill] sm:$0xff] %v15313_v47  ;;  %7341 = vmatprep.subr.bf16.mxu0 %v10499_v35 }
 0x465   : > { %v15306_v12 = vadd.f32 %v5650_v5, %v5548_v43  ;;  %v10505_v43 = vld [vmem:[%s16789_s5 + $0x26c] ss:$28 sps:$4 sm:$0xff]   ;;  %v15325_v19 = vpop.f32.mrf.mxu1 }
 0x466   : > { %v15311_v45 = vpop.f32.mrf.mxu0  ;;  %17718 = vst [vmem:[#allocation42_spill] sm:$0xff] %v15325_v19 }
 0x467   : > { %17713 = vst [vmem:[#allocation58_spill] sm:$0xff] %v15306_v12  ;;  %17714 = vst [vmem:[#allocation17_spill] sm:$0xff] %v15311_v45  ;;  %7342 = vmatpush2.bf16.msra.mxu0 %v10497_v42  ;;  %v10509_v42 = vld [vmem:[%s16789_s5 + $0x230] ss:$28 sps:$4 sm:$0xff]  }
 0x468   : > { %v5656_v40 = vpop.f32.mrf.mxu0  ;;  %7343 = vmatprep.subr.bf16.mxu0 %v10505_v43 }
 0x469   : > { %v15318_v50 = vadd.f32 %v5656_v40, %v5554_v36  ;;  %v10511_v36 = vld [vmem:[%s16789_s5 + $0x234] ss:$28 sps:$4 sm:$0xff]   ;;  %v15337_v40 = vpop.f32.mrf.mxu1 }
 0x46a   : > { %v15323_v5 = vpop.f32.mrf.mxu0  ;;  %17721 = vst [vmem:[#allocation36_spill] sm:$0xff] %v15337_v40 }
 0x46b   : > { %17716 = vst [vmem:[#allocation57_spill] sm:$0xff] %v15318_v50  ;;  %17717 = vst [vmem:[#allocation40_spill] sm:$0xff] %v15323_v5  ;;  %7344 = vmatpush2.bf16.msra.mxu0 %v10503_v8 }
 0x46c   : > { %v15327_v12 = vpop.f32.mrf.mxu0  ;;  %7345 = vmatprep.subr.bf16.mxu0 %v10511_v36 }
 0x46d   : > { %17719 = vst [vmem:[#allocation66_spill] sm:$0xff] %v15327_v12 }
 0x46e   : > { %v15335_v35 = vpop.f32.mrf.mxu0 }
 0x46f   : > { %17720 = vst [vmem:[#allocation49_spill] sm:$0xff] %v15335_v35  ;;  %7346 = vmatpush2.bf16.msra.mxu0 %v10509_v42  ;;  %v5907_v42 = vld [vmem:[%s16788_s4] sm:$0xf] }
 0x470   : > { %v15339_v50 = vpop.f32.mrf.mxu0 }
 0x471   : > { %17722 = vst [vmem:[#allocation64_spill] sm:$0xff] %v15339_v50  ;;  %v15344_v12 = vpop.f32.mrf.mxu1 }
 0x472   : > { %v15346_v5 = vpop.f32.mrf.mxu0 }
 0x473   : > { %17723 = vst [vmem:[#allocation34_spill] sm:$0xff] %v15346_v5  ;;  %v15348_v43 = vpop.f32.mrf.mxu1 }
 0x474   : > { %17724 = vst [vmem:[#allocation52_spill] sm:$0xff] %v15348_v43  ;;  %v15350_v19 = vpop.f32.mrf.mxu0 }
 0x475   : > { %17725 = vst [vmem:[#allocation11_spill] sm:$0xff] %v15350_v19  ;;  %v15352_v35 = vpop.f32.mrf.mxu1 }
 0x476   : > { %17726 = vst [vmem:[#allocation48_spill] sm:$0xff] %v15352_v35  ;;  %v15354_v40 = vpop.f32.mrf.mxu0  ;;  %v17742_v35 = vmax.f32 %v14910_v28, %v14976_v59  ;;  %v17748_v59 = vmax.f32 %v14918_v46, %v14990_v0 }
 0x477   : > { %v15356_v50 = vpop.f32.mrf.mxu1 }
 0x478   : > { %17727 = vst [vmem:[#allocation61_spill] sm:$0xff] %v15356_v50  ;;  %v15358_v8 = vpop.f32.mrf.mxu0 }
 0x479   : > { %17728 = vst [vmem:[#allocation51_spill] sm:$0xff] %v15358_v8  ;;  %v15360_v45 = vpop.f32.mrf.mxu1  ;;  %v17737_v8 = vld [vmem:[#allocation9_spill] sm:$0xff] }
 0x47a   : > { %17729 = vst [vmem:[#allocation50_spill] sm:$0xff] %v15360_v45  ;;  %v15362_v47 = vpop.f32.mrf.mxu0  ;;  %v17738_v45 = vsub.s32 0, %v17737_v8 }
 0x47b   : > { %17730 = vst [vmem:[#allocation23_spill] sm:$0xff] %v15362_v47  ;;  %v15364_v36 = vpop.f32.mrf.mxu1 }
 0x47c   : > { %17731 = vst [vmem:[#allocation53_spill] sm:$0xff] %v15364_v36  ;;  %v15366_v5 = vpop.f32.mrf.mxu0  ;;  %v15381_v23 = vrot.slane %v5907_v42, %v17738_v45  ;;  %v17744_v45 = vmax.f32 %v14928_v60, %v15004_v13  ;;  %v17750_v13 = vmax.f32 %v14905_v44, %v14970_v16  ;;  %v17753_v16 = vmax.f32 %v14981_v9, %v14985_v14 }
 0x47d   : > { %17732 = vst [vmem:[#allocation31_spill] sm:$0xff] %v15366_v5  ;;  %v15368_v43 = vpop.f32.mrf.mxu1  ;;  %v5405_v44 = vadd.f32 %v15061_v7, %v15049_v61  ;;  %v17755_v9 = vmax.f32 %v15008_v31, %v15012_v34  ;;  %v5415_v61 = vadd.f32 %v15071_v58, %v15055_v51  ;;  %v17759_v31 = vmax.f32 %v14939_v39, %v15024_v3 }
 0x47e   : > { %17733 = vst [vmem:[#allocation10_spill] sm:$0xff] %v15368_v43  ;;  %v15373_v19 = vpop.f32.mrf.mxu0  ;;  %v17741_v43 = vsub.s32 1, %v17737_v8  ;;  %v5425_v58 = vadd.f32 %v15081_v54, %v15065_v33  ;;  %v5536_v3 = vadd.f32 %v15206_v1, %v15089_v4  ;;  %v17764_v54 = vsub.s32 3, %v17737_v8  ;;  %v17765_v33 = vld [vmem:[#allocation59_spill] sm:$0xff]  ;;  %v17766_v1 = vld [vmem:[#allocation16_spill] sm:$0xff] }
 0x47f   : > { %17734 = vst [vmem:[#allocation45_spill] sm:$0xff] %v15373_v19  ;;  %v15375_v22 = vpop.f32.mrf.mxu1  ;;  %v15395_v19 = vadd.f32 %v15381_v23, %v17742_v35  ;;  %v15419_v35 = vadd.f32 %v15381_v23, %v17748_v59  ;;  %v5508_v39 = vadd.f32 %v15122_v21, %v5405_v44  ;;  %v5455_v4 = vadd.f32 %v15109_v37, %v17765_v33  ;;  %v17776_v33 = vld [vmem:[#allocation33_spill] sm:$0xff] }
 0x480   : > { %17735 = vst [vmem:[#allocation26_spill] sm:$0xff] %v15375_v22  ;;  %v15377_v50 = vpop.f32.mrf.mxu0  ;;  %v15389_v5 = vrot.slane %v5907_v42, %v17741_v43  ;;  %v17747_v43 = vmax.f32 %v14900_v27, %v14962_v29  ;;  %v15522_v21 = vrot.slane %v5907_v42, %v17764_v54  ;;  %v15528_v44 = vadd.f32 %v15125_v57, %v17766_v1 }
 0x481   : > { %17736 = vst [vmem:[#allocation35_spill] sm:$0xff] %v15377_v50  ;;  %v15383_v47 = vpop.f32.mrf.mxu1  ;;  %v15403_v50 = vadd.f32 %v15381_v23, %v17744_v45  ;;  %17749 = vst [vmem:[#allocation9_spill] sm:$0xff] %v15419_v35  ;;  %v17085_v27 = vmax.f32 %v15395_v19, 0.0  ;;  %v15563_v1 = vadd.f32 %v17776_v33, %v5455_v4  ;;  %v10515_v4 = vld [vmem:[%s16789_s5 + $0x1f8] ss:$28 sps:$4 sm:$0xff]  }
 0x482   : > { %17739 = vst [vmem:[#allocation39_spill] sm:$0xff] %v15383_v47  ;;  %v15385_v36 = vpop.f32.mrf.mxu0  ;;  %v15427_v45 = vadd.f32 %v15389_v5, %v17750_v13  ;;  %v15446_v13 = vadd.f32 %v15389_v5, %v17753_v16  ;;  %v15468_v14 = vadd.f32 %v15389_v5, %v17755_v9  ;;  %v17756_v16 = vmax.f32 %v15419_v35, 0.0 }
 0x483   : > { %17740 = vst [vmem:[#allocation67_spill] sm:$0xff] %v15385_v36  ;;  %v15397_v22 = vpop.f32.mrf.mxu1  ;;  %17745 = vst [vmem:[#allocation30_spill] sm:$0xff] %v15403_v50  ;;  %v15411_v36 = vadd.f32 %v15381_v23, %v17747_v43  ;;  %v15490_v34 = vadd.f32 %v15389_v5, %v17759_v31  ;;  %v5435_v9 = vadd.f32 %v15091_v26, %v15075_v25  ;;  %v17767_v31 = vld [vmem:[#allocation69_spill] sm:$0xff] }
 0x484   : > { %17743 = vst [vmem:[#allocation18_spill] sm:$0xff] %v15397_v22  ;;  %v15405_v47 = vpop.f32.mrf.mxu0  ;;  %v5611_v26 = vadd.f32 %v15164_v56, %v5508_v39  ;;  %v5639_v25 = vadd.f32 %v15272_v62, %v5536_v3  ;;  %v5542_v57 = vadd.f32 %v15226_v32, %v17767_v31  ;;  %v5708_v62 = vadd.f32 %v15344_v12, %v15138_v17  ;;  %v17771_v39 = vld [vmem:[#allocation15_spill] sm:$0xff]  ;;  %v17778_v31 = vld [vmem:[#allocation46_spill] sm:$0xff] }
 0x485   : > { %17746 = vst [vmem:[#allocation32_spill] sm:$0xff] %v15405_v47  ;;  %v15413_v28 = vpop.f32.mrf.mxu1  ;;  %v17084_v46 = vmax.f32 %v15411_v36, 0.0  ;;  %v17772_v3 = vld [vmem:[#allocation75_spill] sm:$0xff] }
 0x486   : > { %v15421_v60 = vpop.f32.mrf.mxu0  ;;  %v5811_v12 = vadd.f32 %v15354_v40, %v5708_v62  ;;  %v10514_v40 = vld [vmem:[%s16789_s5 + $0x384] ss:$28 sps:$4 sm:$0xff]  }
 0x487   : > { %v15430_v29 = vpop.f32.mrf.mxu1  ;;  %v15452_v43 = vpack.i.bf16 %v17085_v27, %v17084_v46  ;;  %v17757_v46 = vmax.f32 %v15403_v50, 0.0  ;;  %v17781_v62 = vld [vmem:[#allocation22_spill] sm:$0xff]  ;;  %7404 = vmatprep.subr.bf16.mxu1 %v10514_v40  ;;  %v17792_v40 = vld [vmem:[#allocation31_spill] sm:$0xff] }
 0x488   : > { %v15433_v22 = vpop.f32.mrf.mxu0 }
 0x489   : > { %17751 = vst [vmem:[#allocation77_spill] sm:$0xff] %v15433_v22  ;;  %v15436_v0 = vpop.f32.mrf.mxu1  ;;  %v17754_v22 = vmax.f32 %v14923_v10, %v14999_v30  ;;  %v15474_v27 = vpack.i.bf16 %v17757_v46, %v17756_v16  ;;  %v17758_v10 = vmax.f32 %v14934_v53, %v15017_v49  ;;  %v17761_v53 = vmax.f32 %v15033_v55, %v15037_v2  ;;  %v17763_v2 = vld [vmem:[#allocation60_spill] sm:$0xff] }
 0x48a   : > { %17752 = vst [vmem:[#allocation78_spill] sm:$0xff] %v15436_v0  ;;  %v15439_v47 = vpop.f32.mrf.mxu0  ;;  %v5518_v55 = vadd.f32 %v15140_v11, %v5415_v61  ;;  %v5524_v16 = vadd.f32 %v15159_v24, %v17763_v2  ;;  %v5528_v24 = vadd.f32 %v15181_v63, %v5425_v58  ;;  %v17774_v2 = vld [vmem:[#allocation63_spill] sm:$0xff] }
 0x48b   : > { %v15458_v59 = vadd.f32 %v15389_v5, %v17754_v22  ;;  %v15462_v0 = vpop.f32.mrf.mxu1  ;;  %v15480_v30 = vadd.f32 %v15381_v23, %v17758_v10  ;;  %v17760_v22 = vmax.f32 %v14944_v20, %v15029_v48  ;;  %v15502_v49 = vadd.f32 %v15389_v5, %v17761_v53 }
 0x48c   : > { %v15484_v7 = vpop.f32.mrf.mxu0  ;;  %v17762_v20 = vsub.s32 2, %v17737_v8  ;;  %v15534_v61 = vadd.f32 %v15201_v52, %v5518_v55  ;;  %v5538_v8 = vadd.f32 %v15219_v6, %v5435_v9  ;;  %v17769_v52 = vld [vmem:[#allocation24_spill] sm:$0xff]  ;;  %v17770_v6 = vld [vmem:[#allocation25_spill] sm:$0xff] }
 0x48d   : > { %v15496_v46 = vadd.f32 %v15381_v23, %v17760_v22  ;;  %v5741_v51 = vpop.f32.mrf.mxu1  ;;  %v17768_v22 = vld [vmem:[#allocation56_spill] sm:$0xff]  ;;  %v15549_v58 = vadd.f32 %v17769_v52, %v5528_v24  ;;  %v10512_v52 = vld [vmem:[%s16789_s5 + $0x380] ss:$28 sps:$4 sm:$0xff]  }
 0x48e   : > { %v15511_v48 = vrot.slane %v5907_v42, %v17762_v20  ;;  %v15518_v10 = vpop.f32.mrf.mxu0  ;;  %v15538_v42 = vadd.f32 %v15221_v15, %v5524_v16  ;;  %v5544_v56 = vadd.f32 %v15239_v18, %v17768_v22  ;;  %v5742_v63 = vadd.f32 %v5741_v51, %v5639_v25  ;;  %v17773_v55 = vld [vmem:[#allocation44_spill] sm:$0xff]  ;;  %v17775_v16 = vld [vmem:[#allocation21_spill] sm:$0xff]  ;;  %7405 = vmatpush1.bf16.msra.mxu1 %v10512_v52 }
 0x48f   : > { %v5743_v11 = vpop.f32.mrf.mxu1  ;;  %v5546_v15 = vadd.f32 %v17771_v39, %v17770_v6  ;;  %v5552_v20 = vadd.f32 %v15264_v41, %v17772_v3  ;;  %v5641_v9 = vadd.f32 %v15275_v38, %v5538_v8  ;;  %v15558_v18 = vadd.f32 %v17774_v2, %v17773_v55  ;;  %v17777_v25 = vld [vmem:[#allocation41_spill] sm:$0xff]  ;;  %v17779_v41 = vld [vmem:[#allocation48_spill] sm:$0xff] }
 0x490   : > { %v15540_v37 = vpop.f32.mrf.mxu0  ;;  %v5645_v17 = vadd.f32 %v17775_v16, %v5542_v57  ;;  %v5647_v24 = vadd.f32 %v17777_v25, %v5544_v56  ;;  %v5712_v22 = vadd.f32 %v17779_v41, %v17778_v31  ;;  %v17780_v57 = vld [vmem:[#allocation72_spill] sm:$0xff]  ;;  %v17785_v16 = vld [vmem:[#allocation61_spill] sm:$0xff]  ;;  %v17786_v25 = vld [vmem:[#allocation23_spill] sm:$0xff] }
 0x491   : > { %v5747_v53 = vpop.f32.mrf.mxu1  ;;  %v5744_v38 = vadd.f32 %v5743_v11, %v5641_v9  ;;  %v15579_v56 = vadd.f32 %v17781_v62, %v17780_v57  ;;  %v10517_v9 = vld [vmem:[%s16789_s5 + $0x1fc] ss:$28 sps:$4 sm:$0xff]   ;;  %v17784_v55 = vld [vmem:[#allocation52_spill] sm:$0xff]  ;;  %v5714_v33 = vadd.f32 %v17785_v16, %v5611_v26  ;;  %v17789_v26 = vld [vmem:[#allocation51_spill] sm:$0xff] }
 0x492   : > { %v5844_v32 = vpop.f32.mrf.mxu0  ;;  %v5748_v11 = vadd.f32 %v5747_v53, %v5645_v17  ;;  %v5815_v31 = vadd.f32 %v17786_v25, %v5712_v22  ;;  %7347 = vmatprep.subr.bf16.mxu0 %v10517_v9  ;;  %v17788_v62 = vld [vmem:[#allocation65_spill] sm:$0xff]  ;;  %v17790_v22 = vld [vmem:[#allocation43_spill] sm:$0xff]  ;;  %v17794_v25 = vld [vmem:[#allocation12_spill] sm:$0xff] }
 0x493   : > { %v5845_v51 = vadd.f32 %v5844_v32, %v5742_v63  ;;  %v5749_v54 = vpop.f32.mrf.mxu1  ;;  %v17782_v63 = vld [vmem:[#allocation19_spill] sm:$0xff]  ;;  %7348 = vmatpush2.bf16.msra.mxu0 %v10515_v4  ;;  %v17793_v52 = vld [vmem:[#allocation17_spill] sm:$0xff] }
 0x494   : > { %v5846_v8 = vpop.f32.mrf.mxu0  ;;  %v5649_v6 = vadd.f32 %v17782_v63, %v5546_v15  ;;  %v17783_v32 = vld [vmem:[#allocation27_spill] sm:$0xff]  ;;  %v5750_v53 = vadd.f32 %v5749_v54, %v5647_v24  ;;  %v5655_v16 = vadd.f32 %v17793_v52, %v5552_v20  ;;  %v10520_v4 = vld [vmem:[%s16789_s5 + $0x57c] ss:$28 sps:$4 sm:$0xff]  }
 0x495   : > { %v5881_v39 = vmax.f32 %v5811_v12, %v5845_v51  ;;  %v5751_v3 = vpop.f32.mrf.mxu1  ;;  %v5710_v2 = vadd.f32 %v17784_v55, %v17783_v32  ;;  %v5847_v41 = vadd.f32 %v5846_v8, %v5744_v38  ;;  %v17787_v51 = vld [vmem:[#allocation76_spill] sm:$0xff]  ;;  %v17791_v38 = vld [vmem:[#allocation50_spill] sm:$0xff]  ;;  %v5817_v55 = vadd.f32 %v17792_v40, %v5714_v33  ;;  %v17796_v12 = vld [vmem:[#allocation45_spill] sm:$0xff]  ;;  %7418 = vmatprep.subr.bf16.mxu1 %v10520_v4 }
 0x496   : > { %v5850_v35 = vpop.f32.mrf.mxu0  ;;  %v15595_v63 = vadd.f32 %v17788_v62, %v17787_v51  ;;  %v5718_v8 = vadd.f32 %v17791_v38, %v17790_v22  ;;  %v5752_v54 = vadd.f32 %v5751_v3, %v5649_v6  ;;  %v17795_v51 = vld [vmem:[#allocation53_spill] sm:$0xff]  ;;  %v17797_v3 = vld [vmem:[#allocation58_spill] sm:$0xff] }
 0x497   : > { %v15590_v57 = vadd.f32 %v15511_v48, %v5881_v39  ;;  %v5851_v15 = vadd.f32 %v5850_v35, %v5748_v11  ;;  %v5753_v17 = vpop.f32.mrf.mxu1  ;;  %v5813_v32 = vadd.f32 %v17789_v26, %v5710_v2  ;;  %v5720_v62 = vadd.f32 %v17795_v51, %v17794_v25  ;;  %v10518_v33 = vld [vmem:[%s16789_s5 + $0x578] ss:$28 sps:$4 sm:$0xff]   ;;  %v10521_v6 = vld [vmem:[%s16789_s5 + $0x1c0] ss:$28 sps:$4 sm:$0xff]  }
 0x498   : > { %v5852_v39 = vpop.f32.mrf.mxu0  ;;  %v5821_v2 = vadd.f32 %v17796_v12, %v5718_v8  ;;  %v10523_v12 = vld [vmem:[%s16789_s5 + $0x1c4] ss:$28 sps:$4 sm:$0xff]   ;;  %v17800_v8 = vld [vmem:[#allocation35_spill] sm:$0xff]  ;;  %7419 = vmatpush2.bf16.msra.mxu1 %v10518_v33  ;;  %v17802_v51 = vld [vmem:[#allocation29_spill] sm:$0xff] }
 0x499   : > { %v17088_v35 = vmax.f32 %v15590_v57, 0.0  ;;  %v5885_v24 = vmax.f32 %v5815_v31, %v5851_v15  ;;  %v5853_v11 = vadd.f32 %v5852_v39, %v5750_v53  ;;  %v5757_v9 = vpop.f32.mrf.mxu1  ;;  %v5882_v26 = vmax.f32 %v5813_v32, %v5847_v41  ;;  %v17798_v32 = vld [vmem:[#allocation8_spill] sm:$0xff]  ;;  %v17799_v22 = vld [vmem:[#allocation10_spill] sm:$0xff]  ;;  %7349 = vmatprep.subr.bf16.mxu0 %v10523_v12 }
 0x49a   : > { %v5854_v50 = vpop.f32.mrf.mxu0  ;;  %v5754_v31 = vadd.f32 %v5753_v17, %v17797_v3  ;;  %v5722_v38 = vadd.f32 %v17799_v22, %v17798_v32  ;;  %v15625_v40 = vadd.f32 %v17800_v8, %v5720_v62  ;;  %v5758_v39 = vadd.f32 %v5757_v9, %v5655_v16  ;;  %v17803_v9 = vld [vmem:[#allocation42_spill] sm:$0xff]  ;;  %v17804_v62 = vld [vmem:[#allocation40_spill] sm:$0xff]  ;;  %7350 = vmatpush2.bf16.msra.mxu0 %v10521_v6 }
 0x49b   : > { %v15616_v20 = vadd.f32 %v15511_v48, %v5885_v24  ;;  %v5886_v53 = vmax.f32 %v5817_v55, %v5853_v11  ;;  %v5855_v41 = vadd.f32 %v5854_v50, %v5752_v54  ;;  %v5759_v15 = vpop.f32.mrf.mxu1  ;;  %v17801_v24 = vmax.f32 %v15427_v45, 0.0  ;;  %v10526_v33 = vld [vmem:[%s16789_s5 + $0x544] ss:$28 sps:$4 sm:$0xff]   ;;  %v10529_v6 = vld [vmem:[%s16789_s5 + $0x514] ss:$28 sps:$4 sm:$0xff]  }
 0x49c   : > { %v5856_v52 = vpop.f32.mrf.mxu0  ;;  %v5566_v16 = vadd.f32 %v17803_v9, %v17802_v51  ;;  %v5659_v3 = vadd.f32 %v17804_v62, %v15558_v18  ;;  %v15642_v32 = vadd.f32 %v15522_v21, %v5882_v26  ;;  %v17806_v8 = vld [vmem:[#allocation36_spill] sm:$0xff]  ;;  %7420 = vmatprep.subr.bf16.mxu1 %v10526_v33  ;;  %v17810_v62 = vld [vmem:[#allocation39_spill] sm:$0xff]  ;;  %7532 = vmatprep.subr.bf16.mxu0 %v10529_v6 }
 0x49d   : > { %v9802_v17 = vpack.i.bf16 %v17088_v35, %v17801_v24  ;;  %v17089_v50 = vmax.f32 %v15616_v20, 0.0  ;;  %v15633_v55 = vadd.f32 %v15522_v21, %v5886_v53  ;;  %v5889_v54 = vmax.f32 %v5821_v2, %v5855_v41  ;;  %v5761_v25 = vpop.f32.mrf.mxu1  ;;  %v10524_v2 = vld [vmem:[%s16789_s5 + $0x540] ss:$28 sps:$4 sm:$0xff]  }
 0x49e   : > { %v15635_v11 = vadd.f32 %v5856_v52, %v5754_v31  ;;  %v5860_v4 = vpop.f32.mrf.mxu0  ;;  %v17805_v31 = vld [vmem:[#allocation67_spill] sm:$0xff]  ;;  %v5568_v52 = vadd.f32 %v17806_v8, %v15528_v44  ;;  %v17807_v24 = vld [vmem:[#allocation66_spill] sm:$0xff]  ;;  %v5762_v35 = vadd.f32 %v5761_v25, %v5659_v3  ;;  %7421 = vmatpush2.bf16.msra.mxu1 %v10524_v2  ;;  %v17811_v8 = vld [vmem:[#allocation49_spill] sm:$0xff] }
 0x49f   : > { %9803 = vrot.lane.b32.xlu0 %v9802_v17, %s10774_s20  ;;  %v5825_v41 = vadd.f32 %v17805_v31, %v5722_v38  ;;  %v15654_v18 = vadd.f32 %v15511_v48, %v5889_v54  ;;  %v5861_v12 = vadd.f32 %v5860_v4, %v5758_v39  ;;  %v5763_v22 = vpop.f32.mrf.mxu1  ;;  %v5661_v17 = vadd.f32 %v17807_v24, %v15563_v1  ;;  %v17809_v39 = vld [vmem:[#allocation20_spill] sm:$0xff]  ;;  %v17814_v3 = vld [vmem:[#allocation11_spill] sm:$0xff] }
 0x4a0   : > { %v5964_v38 = vmax.f32 %v15633_v55, 0.0  ;;  %v5862_v51 = vpop.f32.mrf.mxu0  ;;  %v17808_v54 = vmax.f32 %v15446_v13, 0.0  ;;  %v5728_v4 = vadd.f32 %v17810_v62, %v17809_v39  ;;  %v10532_v1 = vld [vmem:[%s16789_s5 + $0x194] ss:$28 sps:$4 sm:$0xff]   ;;  %v5665_v24 = vadd.f32 %v17811_v8, %v15579_v56 }
 0x4a1   : > { %v5967_v31 = vmax.f32 %v15654_v18, 0.0  ;;  %v5893_v26 = vmax.f32 %v5825_v41, %v5861_v12  ;;  %v5767_v44 = vpop.f32.mrf.mxu1  ;;  %v5960_v39 = vmax.f32 %v15642_v32, 0.0  ;;  %v5671_v2 = vadd.f32 %v17814_v3, %v5568_v52  ;;  %7461 = vmatprep.subr.bf16.mxu1 %v10532_v1  ;;  %v17819_v8 = vld [vmem:[#allocation32_spill] sm:$0xff]  ;;  %v10563_v18 = vld [vmem:[%s16789_s5 + $0x3c0] ss:$28 sps:$4 sm:$0xff]  }
 0x4a2   : > { %v9807_v9 = vpack.i.bf16 %v17089_v50, %v17808_v54  ;;  %v17812_v54 = vld [vmem:[#allocation64_spill] sm:$0xff]  ;;  %v17813_v50 = vld [vmem:[#allocation34_spill] sm:$0xff]  ;;  %v5864_v25 = vpop.f32.mrf.mxu0  ;;  %v5831_v41 = vadd.f32 %v15421_v60, %v5728_v4  ;;  %v17817_v60 = vmax.f32 %v15458_v59, 0.0  ;;  %v5768_v1 = vadd.f32 %v5767_v44, %v5665_v24 }
 0x4a3   : > { %v5667_v33 = vadd.f32 %v17812_v54, %v15595_v63  ;;  %v5669_v53 = vadd.f32 %v17813_v50, %v5566_v16  ;;  %9813 = vrot.lane.b32.xlu0 %v15452_v43, %s10774_s20  ;;  %v15688_v12 = vadd.f32 %v15511_v48, %v5893_v26  ;;  %v5865_v56 = vadd.f32 %v5864_v25, %v5762_v35  ;;  %v5769_v6 = vpop.f32.mrf.mxu1  ;;  %v17815_v63 = vld [vmem:[#allocation26_spill] sm:$0xff]  ;;  %v17818_v35 = vld [vmem:[#allocation57_spill] sm:$0xff] }
 0x4a4   : > { %9808 = vrot.lane.b32.xlu1 %v9807_v9, %s10774_s20  ;;  %v5724_v50 = vadd.f32 %v17815_v63, %v15534_v61  ;;  %v17816_v16 = vld [vmem:[#allocation38_spill] sm:$0xff]  ;;  %v5866_v62 = vpop.f32.mrf.mxu0  ;;  %v9817_v43 = vpack.i.bf16 %v5964_v38, %v5960_v39  ;;  %v9822_v26 = vpack.i.bf16 %v5967_v31, %v17817_v60  ;;  %v5760_v52 = vadd.f32 %v5759_v15, %v17818_v35 }
 0x4a5   : > { %v5732_v9 = vadd.f32 %v15413_v28, %v17816_v16  ;;  %v5971_v4 = vmax.f32 %v15688_v12, 0.0  ;;  %v5897_v61 = vmax.f32 %v5831_v41, %v5865_v56  ;;  %v5734_v28 = vadd.f32 %v15430_v29, %v15549_v58  ;;  %v5771_v3 = vpop.f32.mrf.mxu1  ;;  %v17820_v41 = vld [vmem:[#allocation47_spill] sm:$0xff]  ;;  %v17821_v56 = vld [vmem:[#allocation78_spill] sm:$0xff] }
 0x4a6   : > { %v5827_v54 = vadd.f32 %v17819_v8, %v5724_v50  ;;  %v5870_v63 = vpop.f32.mrf.mxu0  ;;  %v5970_v16 = vmax.f32 %v15468_v14, 0.0  ;;  %v5863_v15 = vadd.f32 %v5862_v51, %v5760_v52  ;;  %v5770_v44 = vadd.f32 %v5769_v6, %v5667_v33  ;;  %v17822_v33 = vld [vmem:[#allocation18_spill] sm:$0xff]  ;;  %v10536_v14 = vld [vmem:[%s16789_s5 + $0x158] ss:$28 sps:$4 sm:$0xff]  }
 0x4a7   : > { %v5835_v25 = vadd.f32 %v15439_v47, %v5732_v9  ;;  %9823 = vrot.lane.b32.xlu0 %v9822_v26, %s10774_s20  ;;  %v15712_v60 = vadd.f32 %v15511_v48, %v5897_v61  ;;  %v5871_v24 = vadd.f32 %v5870_v63, %v5768_v1  ;;  %v5738_v50 = vadd.f32 %v17821_v56, %v17820_v41  ;;  %v5773_v61 = vpop.f32.mrf.mxu1 }
 0x4a8   : > { %9818 = vrot.lane.b32.xlu1 %v9817_v43, %s10774_s20  ;;  %v5837_v29 = vadd.f32 %v15484_v7, %v5734_v28  ;;  %v5764_v47 = vadd.f32 %v5763_v22, %v5661_v17  ;;  %v5872_v58 = vpop.f32.mrf.mxu0  ;;  %v9827_v9 = vpack.i.bf16 %v5971_v4, %v5970_v16  ;;  %v5772_v51 = vadd.f32 %v5771_v3, %v5669_v53 }
 0x4a9   : > { %v5975_v43 = vmax.f32 %v15712_v60, 0.0  ;;  %v5901_v26 = vmax.f32 %v5835_v25, %v5871_v24  ;;  %v5873_v35 = vadd.f32 %v5872_v58, %v5770_v44  ;;  %v5730_v6 = vadd.f32 %v17822_v33, %v15538_v42  ;;  %v17823_v25 = vld [vmem:[#allocation77_spill] sm:$0xff]  ;;  %v17824_v44 = vld [vmem:[#allocation74_spill] sm:$0xff] }
 0x4aa   : > { %v5841_v52 = vadd.f32 %v15518_v10, %v5738_v50  ;;  %v5867_v1 = vadd.f32 %v5866_v62, %v5764_v47  ;;  %v5874_v7 = vpop.f32.mrf.mxu0  ;;  %v5974_v22 = vmax.f32 %v15490_v34, 0.0  ;;  %v5894_v17 = vmax.f32 %v5827_v54, %v5863_v15  ;;  %v17825_v24 = vld [vmem:[#allocation62_spill] sm:$0xff]  ;;  %v17827_v50 = vld [vmem:[#allocation28_spill] sm:$0xff]  ;;  %v17829_v33 = vld [vmem:[#allocation13_spill] sm:$0xff] }
 0x4ab   : > { %9833 = vrot.lane.b32.xlu0 %v15474_v27, %s10774_s20  ;;  %v15730_v53 = vadd.f32 %v15511_v48, %v5901_v26  ;;  %v5902_v8 = vmax.f32 %v5837_v29, %v5873_v35  ;;  %v5875_v28 = vadd.f32 %v5874_v7, %v5772_v51  ;;  %v5833_v42 = vadd.f32 %v17823_v25, %v5730_v6  ;;  %v17828_v35 = vld [vmem:[#allocation55_spill] sm:$0xff]  ;;  %v10577_v60 = vld [vmem:[%s16789_s5 + $0x584] ss:$28 sps:$4 sm:$0xff]  }
 0x4ac   : > { %9828 = vrot.lane.b32.xlu1 %v9827_v9, %s10774_s20  ;;  %v5876_v3 = vpop.f32.mrf.mxu0  ;;  %v9837_v10 = vpack.i.bf16 %v5975_v43, %v5974_v22  ;;  %v5977_v62 = vmax.f32 %v15496_v46, 0.0  ;;  %v5978_v27 = vmax.f32 %v15502_v49, 0.0  ;;  %v5774_v54 = vadd.f32 %v5773_v61, %v5671_v2  ;;  %v10548_v49 = vld [vmem:[%s16789_s5 + $0xe8] ss:$28 sps:$4 sm:$0xff]   ;;  %v10551_v46 = vld [vmem:[%s16789_s5 + $0x430] ss:$28 sps:$4 sm:$0xff]  }
 0x4ad   : > { %v17092_v63 = vmax.f32 %v15730_v53, 0.0  ;;  %v5905_v15 = vmax.f32 %v5841_v52, %v5875_v28  ;;  %v17826_v41 = vmax.f32 %v17824_v44, %v17825_v24  ;;  %v5740_v29 = vadd.f32 %v15462_v0, %v17827_v50 }
 0x4ae   : > { %v5898_v47 = vmax.f32 %v5833_v42, %v5867_v1  ;;  %v5973_v58 = vmax.f32 %v15480_v30, 0.0  ;;  %v15751_v9 = vadd.f32 %v15522_v21, %v5894_v17  ;;  %v5877_v51 = vadd.f32 %v5876_v3, %v5774_v54 }
 0x4af   : > { %v15744_v56 = vadd.f32 %v15389_v5, %v17826_v41  ;;  %v15754_v2 = vadd.f32 %v15511_v48, %v5905_v15  ;;  %v9842_v5 = vpack.i.bf16 %v17092_v63, %v5978_v27  ;;  %v15761_v26 = vadd.f32 %v15522_v21, %v5902_v8 }
 0x4b0   : > { %9838 = vrot.lane.b32.xlu1 %v9837_v10, %s10774_s20  ;;  %v9847_v0 = vpack.i.bf16 %v5977_v62, %v5973_v58  ;;  %v17830_v6 = vmax.f32 %v17828_v35, %v17829_v33  ;;  %v5843_v52 = vadd.f32 %v15540_v37, %v5740_v29  ;;  %v17831_v1 = vmax.f32 %v15625_v40, %v15635_v11 }
 0x4b1   : > { %v17090_v7 = vmax.f32 %v15754_v2, 0.0  ;;  %9843 = vrot.lane.b32.xlu0 %v9842_v5, %s10774_s20  ;;  %v5982_v17 = vmax.f32 %v15744_v56, 0.0  ;;  %v15784_v8 = vadd.f32 %v15522_v21, %v5898_v47  ;;  %v5980_v11 = vmax.f32 %v15761_v26, 0.0  ;;  %v10560_v26 = vld [vmem:[%s16789_s5 + $0x78] ss:$28 sps:$4 sm:$0xff]  }
 0x4b2   : > { %v15771_v48 = vadd.f32 %v15381_v23, %v17830_v6  ;;  %v15778_v61 = vadd.f32 %v15522_v21, %v17831_v1  ;;  %v5972_v23 = vmax.f32 %v15751_v9, 0.0  ;;  %v5906_v37 = vmax.f32 %v5843_v52, %v5877_v51  ;;  %v10562_v9 = vld [vmem:[%s16789_s5 + $0x7c] ss:$28 sps:$4 sm:$0xff]  }
 0x4b3   : > { %v9852_v40 = vpack.i.bf16 %v17090_v7, %v5982_v17  ;;  %v5976_v42 = vmax.f32 %v15784_v8, 0.0  ;;  %v17832_v52 = vmax.f32 %v15427_v45, 0.0 }
 0x4b4   : > { %9848 = vrot.lane.b32.xlu1 %v9847_v0, %s10774_s20  ;;  %v5981_v28 = vmax.f32 %v15771_v48, 0.0  ;;  %v5968_v25 = vmax.f32 %v15778_v61, 0.0  ;;  %v15801_v3 = vadd.f32 %v15522_v21, %v5906_v37  ;;  %v17833_v37 = vmax.f32 %v15446_v13, 0.0  ;;  %v10527_v13 = vld [vmem:[%s16789_s5 + $0x510] ss:$28 sps:$4 sm:$0xff]  }
 0x4b5   : > { %9853 = vrot.lane.b32.xlu0 %v9852_v40, %s10774_s20  ;;  %v9862_v54 = vpack.i.bf16 %v5980_v11, %v5976_v42  ;;  %v10565_v48 = vld [vmem:[%s16789_s5 + $0x3c4] ss:$28 sps:$4 sm:$0xff]  }
 0x4b6   : > { %v9857_v10 = vpack.i.bf16 %v5972_v23, %v5968_v25  ;;  %v17091_v15 = vmax.f32 %v15801_v3, 0.0 }
 0x4b8   : > { %6061 = vrot.lane.b32.xlu1 %v5981_v28, %s10774_s20 }
 0x4b9   : > { %9858 = vrot.lane.b32.xlu0 %v9857_v10, %s10774_s20  ;;  %v17834_v10 = vmax.f32 %v15395_v19, 0.0 }
 0x4bc   : > { %9863 = vrot.lane.b32.xlu1 %v9862_v54, %s10774_s20 }
 0x4bd   : > { %6067 = vrot.lane.b32.xlu0 %v17091_v15, %s10774_s20  ;;  %s10778_s20 = smov [#allocation2]  }
 0x4be   : > { %s10713_s25 = sshll.u32 %s10778_s20, 4  ;;  %s10714_s25 = int_to_ptr.vmem [resolvable:$false] %s10713_s25 }
 0x4bf   : > { %s10715_s30 = scalar_lea.vmem %s10714_s25, 256  ;;  %p10716_p0 = scmp.lt.s32.totalorder %s8400_s23, %s10714_s25 }
 0x4c0   : > { %p10717_p1 = scmp.lt.s32.totalorder %s10715_s30, %s10709_s16 }
 0x4c2   : > { %p10718_p2 = por %p10717_p1, %p10716_p0 }
 0x4c4   : > { %p10719_p3 = pnand %p10718_p2, %p10712_p13 }
 0x511   : > { %v9804_v21 = vpop.permute.xlu0 %9803 }
 0x512   : > { %v9806_v44 = vunpack.i.h.bf16 %v9804_v21  ;;  %v9805_v24 = vunpack.i.l.bf16 %v9804_v21  ;;  %v17835_v21 = vmax.f32 %v15411_v36, 0.0 }
 0x514   : > { %v6070_v41 = vsel %vm2270_vm1, %v9805_v24, %v9806_v44 }
 0x515   : > { %v9814_v29 = vpop.permute.xlu0 %9813  ;;  %v6119_v1 = vmax.f32 %v17832_v52, %v6070_v41 }
 0x516   : > { %v9809_v50 = vpop.permute.xlu1 %9808  ;;  %v9816_v5 = vunpack.i.h.bf16 %v9814_v29  ;;  %v9815_v0 = vunpack.i.l.bf16 %v9814_v29 }
 0x517   : > { %v9811_v47 = vunpack.i.h.bf16 %v9809_v50  ;;  %v9810_v51 = vunpack.i.l.bf16 %v9809_v50 }
 0x518   : > { %v6069_v6 = vsel %vm2270_vm1, %v9815_v0, %v9805_v24  ;;  %v10535_v0 = vld [vmem:[%s16789_s5 + $0x4dc] ss:$28 sps:$4 sm:$0xff]  }
 0x519   : > { %v6073_v35 = vsel %vm2270_vm1, %v9810_v51, %v9811_v47  ;;  %v6072_v33 = vsel %vm2270_vm1, %v9816_v5, %v9810_v51  ;;  %v6118_v50 = vmax.f32 %v17835_v21, %v6069_v6  ;;  %v15829_v29 = vpop.permute.xlu0 %9823  ;;  %v17837_v6 = vmax.f32 %v15616_v20, 0.0  ;;  %v10530_v20 = vld [vmem:[%s16789_s5 + $0x190] ss:$28 sps:$4 sm:$0xff]  }
 0x51a   : > { %v6123_v40 = vmax.f32 %v17833_v37, %v6073_v35  ;;  %v6122_v54 = vmax.f32 %v17834_v10, %v6072_v33  ;;  %v9819_v7 = vpop.permute.xlu1 %9818  ;;  %v9826_v51 = vunpack.i.h.bf16 %v15829_v29  ;;  %v9825_v24 = vunpack.i.l.bf16 %v15829_v29  ;;  %v10538_v37 = vld [vmem:[%s16789_s5 + $0x15c] ss:$28 sps:$4 sm:$0xff]   ;;  %v10541_v10 = vld [vmem:[%s16789_s5 + $0x4a4] ss:$28 sps:$4 sm:$0xff]  }
 0x51b   : > { %v9821_v15 = vunpack.i.h.bf16 %v9819_v7  ;;  %v9820_v63 = vunpack.i.l.bf16 %v9819_v7  ;;  %v17836_v35 = vmax.f32 %v15590_v57, 0.0 }
 0x51c   : > { %v15833_v45 = vpack.c.bf16 %v6122_v54, %v6118_v50  ;;  %v15838_v19 = vpack.c.bf16 %v6123_v40, %v6119_v1  ;;  %v6076_v32 = vsel %vm2270_vm1, %v9825_v24, %v9826_v51  ;;  %v17838_v54 = vmax.f32 %v15458_v59, 0.0 }
 0x51d   : > { %v6125_v36 = vmax.f32 %v5964_v38, %v9821_v15  ;;  %v6071_v41 = vsel %vm2270_vm1, %v9806_v44, %v9820_v63  ;;  %v6074_v5 = vsel %vm2270_vm1, %v9811_v47, %v9821_v15  ;;  %v6121_v7 = vmax.f32 %v5960_v39, %v9820_v63  ;;  %v9834_v55 = vpop.permute.xlu0 %9833  ;;  %v10533_v47 = vld [vmem:[%s16789_s5 + $0x4d8] ss:$28 sps:$4 sm:$0xff]  }
 0x51e   : > { %v6120_v33 = vmax.f32 %v17836_v35, %v6071_v41  ;;  %v6124_v52 = vmax.f32 %v17837_v6, %v6074_v5  ;;  %v15853_v1 = vpop.permute.xlu1 %9828  ;;  %7351 = vmatprep.mubr.bf16.mxu0 %v15838_v19  ;;  %v9836_v15 = vunpack.i.h.bf16 %v9834_v55  ;;  %v9835_v44 = vunpack.i.l.bf16 %v9834_v55  ;;  %v17839_v5 = vld [vmem:[#allocation30_spill] sm:$0xff]  ;;  %v17841_v35 = vld [vmem:[#allocation9_spill] sm:$0xff] }
 0x51f   : > { %v15856_v38 = vpack.c.bf16 %v6125_v36, %v6121_v7  ;;  %v9831_v39 = vunpack.i.h.bf16 %v15853_v1  ;;  %v9830_v57 = vunpack.i.l.bf16 %v15853_v1  ;;  %7352 = vmatmul.mubr.bf16.vlgmr.msra.gmra.mxu0 %v15833_v45  ;;  %v6127_v21 = vmax.f32 %v17838_v54, %v6076_v32  ;;  %v10544_v55 = vld [vmem:[%s16789_s5 + $0x124] ss:$28 sps:$4 sm:$0xff]  }
 0x520   : > { %v15867_v63 = vpack.c.bf16 %v6124_v52, %v6120_v33  ;;  %7533 = vmatpush1.bf16.msra.mxu0 %v10527_v13  ;;  %v6075_v36 = vsel %vm2270_vm1, %v9835_v44, %v9825_v24  ;;  %v17840_v7 = vmax.f32 %v17839_v5, 0.0  ;;  %v17842_v33 = vmax.f32 %v17841_v35, 0.0  ;;  %v10539_v24 = vld [vmem:[%s16789_s5 + $0x4a0] ss:$28 sps:$4 sm:$0xff]  }
 0x521   : > { %v6079_v40 = vsel %vm2270_vm1, %v9830_v57, %v9831_v39  ;;  %9151 = vmatprep.mubr.msk.bf16.mxu1 %vm7306_vm3, %v15856_v38  ;;  %7534 = vmatprep.subr.bf16.mxu0 %v10535_v0  ;;  %v6078_v13 = vsel %vm2270_vm1, %v9836_v15, %v9830_v57 }
 0x522   : > { %v6131_v50 = vmax.f32 %v5970_v16, %v6079_v40  ;;  %v15889_v41 = vpop.permute.xlu1 %9838  ;;  %7423 = vmatmul.mubr.bf16.vlgmr.msra.gmra.mxu1 %v15867_v63  ;;  %v6130_v0 = vmax.f32 %v17840_v7, %v6078_v13  ;;  %v6126_v6 = vmax.f32 %v17842_v33, %v6075_v36  ;;  %v10550_v13 = vld [vmem:[%s16789_s5 + $0xec] ss:$28 sps:$4 sm:$0xff]   ;;  %v10553_v33 = vld [vmem:[%s16789_s5 + $0x434] ss:$28 sps:$4 sm:$0xff]  }
 0x523   : > { %v9841_v59 = vunpack.i.h.bf16 %v15889_v41  ;;  %v9840_v52 = vunpack.i.l.bf16 %v15889_v41  ;;  %7462 = vmatpush1.bf16.msra.mxu1 %v10530_v20  ;;  %v15909_v32 = vpop.permute.xlu0 %9843  ;;  %v10547_v20 = vld [vmem:[%s16789_s5 + $0x46c] ss:$28 sps:$4 sm:$0xff]   ;;  %v10566_v41 = vld [vmem:[%s16789_s5 + $0x40] ss:$28 sps:$4 sm:$0xff]  }
 0x524   : > { %7535 = vmatpush1.bf16.msra.mxu0 %v10533_v47  ;;  %7463 = vmatprep.subr.bf16.mxu1 %v10538_v37  ;;  %v15901_v16 = vpack.c.bf16 %v6131_v50, %v6127_v21  ;;  %v15911_v57 = vpack.c.bf16 %v6130_v0, %v6126_v6  ;;  %v9846_v47 = vunpack.i.h.bf16 %v15909_v32  ;;  %v9845_v37 = vunpack.i.l.bf16 %v15909_v32  ;;  %v10545_v50 = vld [vmem:[%s16789_s5 + $0x468] ss:$28 sps:$4 sm:$0xff]  }
 0x525   : > { %7536 = vmatprep.subr.bf16.mxu0 %v10541_v10  ;;  %v6082_v15 = vsel %vm2270_vm1, %v9840_v52, %v9841_v59  ;;  %v10542_v10 = vld [vmem:[%s16789_s5 + $0x120] ss:$28 sps:$4 sm:$0xff]   ;;  %v17843_v32 = vmax.f32 %v15730_v53, 0.0 }
 0x526   : > { %v9849_v44 = vpop.permute.xlu1 %9848  ;;  %7361 = vmatprep.mubr.bf16.mxu0 %v15901_v16  ;;  %v6085_v21 = vsel %vm2270_vm1, %v9845_v37, %v9846_v47  ;;  %v6135_v36 = vmax.f32 %v5974_v22, %v6082_v15 }
 0x527   : > { %v9851_v40 = vunpack.i.h.bf16 %v9849_v44  ;;  %v9850_v54 = vunpack.i.l.bf16 %v9849_v44  ;;  %7464 = vmatpush1.bf16.msra.mxu1 %v10536_v14  ;;  %7362 = vmatmul.mubr.bf16.gmra.mxu0 %v15911_v57  ;;  %v6139_v0 = vmax.f32 %v5978_v27, %v6085_v21  ;;  %v15941_v35 = vpop.permute.xlu0 %9853 }
 0x528   : > { %7537 = vmatpush1.bf16.msra.mxu0 %v10539_v24  ;;  %7465 = vmatprep.subr.bf16.mxu1 %v10544_v55  ;;  %v9855_v14 = vunpack.i.l.bf16 %v15941_v35  ;;  %v10556_v55 = vld [vmem:[%s16789_s5 + $0xb4] ss:$28 sps:$4 sm:$0xff]  }
 0x529   : > { %v6081_v5 = vsel %vm2270_vm1, %v9850_v54, %v9840_v52  ;;  %v6084_v7 = vsel %vm2270_vm1, %v9851_v40, %v9845_v37  ;;  %7538 = vmatprep.subr.bf16.mxu0 %v10547_v20  ;;  %v9856_v52 = vunpack.i.h.bf16 %v15941_v35  ;;  %v15955_v27 = vpack.c.bf16 %v6139_v0, %v6135_v36  ;;  %v10559_v40 = vld [vmem:[%s16789_s5 + $0x3fc] ss:$28 sps:$4 sm:$0xff]   ;;  %v10574_v0 = vld [vmem:[%s16789_s5 + $0xc] ss:$28 sps:$4 sm:$0xff]  }
 0x52a   : > { %v6134_v6 = vmax.f32 %v5973_v58, %v6081_v5  ;;  %v6138_v34 = vmax.f32 %v5977_v62, %v6084_v7  ;;  %v6062_v22 = vpop.permute.xlu1 %6061  ;;  %v10557_v5 = vld [vmem:[%s16789_s5 + $0x3f8] ss:$28 sps:$4 sm:$0xff]   ;;  %v10569_v7 = vld [vmem:[%s16789_s5 + $0x388] ss:$28 sps:$4 sm:$0xff]   ;;  %v17845_v35 = vmax.f32 %v15754_v2, 0.0 }
 0x52b   : > { %7466 = vmatpush1.bf16.msra.mxu1 %v10542_v10  ;;  %v6088_v30 = vsel %vm2270_vm1, %v9855_v14, %v9856_v52  ;;  %7371 = vmatprep.mubr.bf16.mxu0 %v15955_v27  ;;  %v9859_v24 = vpop.permute.xlu0 %9858  ;;  %v6087_v20 = vsel %vm2270_vm1, %v6062_v22, %v9855_v14  ;;  %v10584_v2 = vld [vmem:[%s16789_s5 + $0x318] ss:$28 sps:$4 sm:$0xff]  }
 0x52c   : > { %7539 = vmatpush1.bf16.msra.mxu0 %v10545_v50  ;;  %7467 = vmatprep.subr.bf16.mxu1 %v10550_v13  ;;  %v15963_v62 = vpack.c.bf16 %v6138_v34, %v6134_v6  ;;  %v6143_v58 = vmax.f32 %v5982_v17, %v6088_v30  ;;  %v9861_v44 = vunpack.i.h.bf16 %v9859_v24  ;;  %v9860_v37 = vunpack.i.l.bf16 %v9859_v24  ;;  %v10554_v17 = vld [vmem:[%s16789_s5 + $0xb0] ss:$28 sps:$4 sm:$0xff]   ;;  %v10589_v24 = vld [vmem:[%s16789_s5 + $0x19c] ss:$28 sps:$4 sm:$0xff]  }
 0x52d   : > { %7540 = vmatprep.subr.bf16.mxu0 %v10553_v33  ;;  %v6142_v1 = vmax.f32 %v5981_v28, %v6087_v20  ;;  %v17844_v33 = vmax.f32 %v15801_v3, 0.0  ;;  %v10575_v3 = vld [vmem:[%s16789_s5 + $0x580] ss:$28 sps:$4 sm:$0xff]   ;;  %v10580_v34 = vld [vmem:[%s16789_s5 + $0x354] ss:$28 sps:$4 sm:$0xff]  }
 0x52e   : > { %v9864_v15 = vpop.permute.xlu1 %9863  ;;  %v15979_v10 = vpack.c.bf16 %v6143_v58, %v6143_v58  ;;  %v6080_v21 = vsel %vm2270_vm1, %v9831_v39, %v9861_v44  ;;  %v6133_v50 = vmax.f32 %v5972_v23, %v9861_v44  ;;  %v6077_v13 = vsel %vm2270_vm1, %v9826_v51, %v9860_v37  ;;  %v10571_v39 = vld [vmem:[%s16789_s5 + $0x38c] ss:$28 sps:$4 sm:$0xff]   ;;  %v10586_v58 = vld [vmem:[%s16789_s5 + $0x31c] ss:$28 sps:$4 sm:$0xff]   ;;  %v10595_v44 = vld [vmem:[%s16789_s5 + $0x164] ss:$28 sps:$4 sm:$0xff]  }
 0x52f   : > { %v9866_v54 = vunpack.i.h.bf16 %v9864_v15  ;;  %v9865_v56 = vunpack.i.l.bf16 %v9864_v15  ;;  %7468 = vmatpush1.bf16.msra.mxu1 %v10548_v49  ;;  %7372 = vmatmul.mubr.bf16.gmra.mxu0 %v15963_v62  ;;  %v6129_v36 = vmax.f32 %v5968_v25, %v9860_v37  ;;  %v6132_v25 = vmax.f32 %v5971_v4, %v6080_v21  ;;  %v6068_v51 = vpop.permute.xlu0 %6067  ;;  %v10583_v49 = vld [vmem:[%s16789_s5 + $0x54c] ss:$28 sps:$4 sm:$0xff]   ;;  %v10587_v20 = vld [vmem:[%s16789_s5 + $0x198] ss:$28 sps:$4 sm:$0xff]   ;;  %v10592_v15 = vld [vmem:[%s16789_s5 + $0x2e4] ss:$28 sps:$4 sm:$0xff]  }
 0x530   : > { %7541 = vmatpush1.bf16.msra.mxu0 %v10551_v46  ;;  %7469 = vmatprep.subr.bf16.mxu1 %v10556_v55  ;;  %v6128_v29 = vmax.f32 %v5967_v31, %v6077_v13  ;;  %v16029_v8 = vpack.c.bf16 %v6142_v1, %v6142_v1  ;;  %v6145_v6 = vmax.f32 %v17844_v33, %v6068_v51  ;;  %v10578_v30 = vld [vmem:[%s16789_s5 + $0x350] ss:$28 sps:$4 sm:$0xff]   ;;  %v10581_v46 = vld [vmem:[%s16789_s5 + $0x548] ss:$28 sps:$4 sm:$0xff]   ;;  %v10590_v37 = vld [vmem:[%s16789_s5 + $0x2e0] ss:$28 sps:$4 sm:$0xff]  }
 0x531   : > { %v6141_v23 = vmax.f32 %v5980_v11, %v9866_v54  ;;  %v6137_v61 = vmax.f32 %v5976_v42, %v9865_v56  ;;  %7542 = vmatprep.subr.bf16.mxu0 %v10559_v40  ;;  %v16010_v28 = vpack.c.bf16 %v6133_v50, %v6129_v36  ;;  %7381 = vmatprep.mubr.bf16.mxu0 %v15979_v10  ;;  %v10568_v11 = vld [vmem:[%s16789_s5 + $0x44] ss:$28 sps:$4 sm:$0xff]   ;;  %v10598_v40 = vld [vmem:[%s16789_s5 + $0x2ac] ss:$28 sps:$4 sm:$0xff]   ;;  %v10604_v21 = vld [vmem:[%s16789_s5 + $0x274] ss:$28 sps:$4 sm:$0xff]  }
 0x532   : > { %v16016_v12 = vpack.c.bf16 %v6132_v25, %v6128_v29  ;;  %v6083_v31 = vsel %vm2270_vm1, %v9841_v59, %v9865_v56  ;;  %v6086_v4 = vsel %vm2270_vm1, %v9846_v47, %v9866_v54  ;;  %v6089_v22 = vsel %vm2270_vm1, %v9856_v52, %v6068_v51  ;;  %v10593_v54 = vld [vmem:[%s16789_s5 + $0x160] ss:$28 sps:$4 sm:$0xff]   ;;  %v10601_v56 = vld [vmem:[%s16789_s5 + $0x12c] ss:$28 sps:$4 sm:$0xff]   ;;  %v10607_v13 = vld [vmem:[%s16789_s5 + $0xf4] ss:$28 sps:$4 sm:$0xff]  }
 0x533   : > { %7470 = vmatpush1.bf16.msra.mxu1 %v10554_v17  ;;  %9152 = vmatprep.mubr.msk.bf16.mxu1 %vm7306_vm3, %v16010_v28  ;;  %v16034_v42 = vpack.c.bf16 %v6141_v23, %v6137_v61  ;;  %v6136_v59 = vmax.f32 %v5975_v43, %v6083_v31  ;;  %v6140_v47 = vmax.f32 %v17843_v32, %v6086_v4  ;;  %v10572_v43 = vld [vmem:[%s16789_s5 + $0x8] ss:$28 sps:$4 sm:$0xff]   ;;  %v10602_v36 = vld [vmem:[%s16789_s5 + $0x270] ss:$28 sps:$4 sm:$0xff]   ;;  %v10608_v23 = vld [vmem:[%s16789_s5 + $0x238] ss:$28 sps:$4 sm:$0xff]  }
 0x534   : > { %7543 = vmatpush1.bf16.msra.mxu0 %v10557_v5  ;;  %7471 = vmatprep.subr.bf16.mxu1 %v10562_v9  ;;  %v16077_v14 = vpack.c.bf16 %v6145_v6, %v6145_v6  ;;  %v6144_v52 = vmax.f32 %v17845_v35, %v6089_v22  ;;  %v10596_v17 = vld [vmem:[%s16789_s5 + $0x2a8] ss:$28 sps:$4 sm:$0xff]   ;;  %v10610_v5 = vld [vmem:[%s16789_s5 + $0x23c] ss:$28 sps:$4 sm:$0xff]   ;;  %v10605_v1 = vld [vmem:[%s16789_s5 + $0xf0] ss:$28 sps:$4 sm:$0xff]  }
 0x535   : > { %7433 = vmatmul.mubr.bf16.gmra.mxu1 %v16016_v12  ;;  %7544 = vmatprep.subr.bf16.mxu0 %v10565_v48  ;;  %v16066_v53 = vpack.c.bf16 %v6140_v47, %v6136_v59  ;;  %v10599_v50 = vld [vmem:[%s16789_s5 + $0x128] ss:$28 sps:$4 sm:$0xff]   ;;  %v10613_v9 = vld [vmem:[%s16789_s5 + $0xbc] ss:$28 sps:$4 sm:$0xff]   ;;  %v10629_v32 = vld [vmem:[%s16789_s5 + $0x10] ss:$28 sps:$4 sm:$0xff]  }
 0x536   : > { %9153 = vmatprep.mubr.msk.bf16.mxu1 %vm7306_vm3, %v16034_v42  ;;  %v16102_v55 = vpack.c.bf16 %v6144_v52, %v6144_v52  ;;  %v10616_v61 = vld [vmem:[%s16789_s5 + $0x204] ss:$28 sps:$4 sm:$0xff]   ;;  %v10611_v25 = vld [vmem:[%s16789_s5 + $0xb8] ss:$28 sps:$4 sm:$0xff]   ;;  %v10625_v31 = vld [vmem:[%s16789_s5 + $0x4c] ss:$28 sps:$4 sm:$0xff]  }
 0x537   : > { %7472 = vmatpush1.bf16.msra.mxu1 %v10560_v26  ;;  %7382 = vmatmul.mubr.bf16.gmra.mxu0 %v16029_v8  ;;  %v10619_v29 = vld [vmem:[%s16789_s5 + $0x84] ss:$28 sps:$4 sm:$0xff]   ;;  %v10622_v26 = vld [vmem:[%s16789_s5 + $0x1cc] ss:$28 sps:$4 sm:$0xff]   ;;  %v10637_v47 = vld [vmem:[%s16789_s5 + $0x35c] ss:$28 sps:$4 sm:$0xff]  }
 0x538   : > { %7545 = vmatpush1.bf16.msra.mxu0 %v10563_v18  ;;  %9155 = vmatprep.mubr.msk.bf16.mxu0 %vm7306_vm3, %v15856_v38  ;;  %v10614_v48 = vld [vmem:[%s16789_s5 + $0x200] ss:$28 sps:$4 sm:$0xff]   ;;  %v10620_v4 = vld [vmem:[%s16789_s5 + $0x1c8] ss:$28 sps:$4 sm:$0xff]   ;;  %v10635_v33 = vld [vmem:[%s16789_s5 + $0x358] ss:$28 sps:$4 sm:$0xff]  }
 0x539   : > { %7473 = vmatprep.subr.bf16.mxu1 %v10568_v11  ;;  %7546 = vmatprep.subr.bf16.mxu0 %v10571_v39  ;;  %v10617_v18 = vld [vmem:[%s16789_s5 + $0x80] ss:$28 sps:$4 sm:$0xff]   ;;  %v10623_v51 = vld [vmem:[%s16789_s5 + $0x48] ss:$28 sps:$4 sm:$0xff]   ;;  %v10631_v39 = vld [vmem:[%s16789_s5 + $0x14] ss:$28 sps:$4 sm:$0xff]  }
 0x53a   : > { %v10628_v11 = vld [vmem:[%s16789_s5 + $0x51c] ss:$28 sps:$4 sm:$0xff]   ;;  %v10634_v59 = vld [vmem:[%s16789_s5 + $0x4e4] ss:$28 sps:$4 sm:$0xff]   ;;  %v10644_v22 = vld [vmem:[%s16789_s5 + $0x470] ss:$28 sps:$4 sm:$0xff]  }
 0x53b   : > { %7474 = vmatpush1.bf16.msra.mxu1 %v10566_v41  ;;  %v10626_v41 = vld [vmem:[%s16789_s5 + $0x518] ss:$28 sps:$4 sm:$0xff]   ;;  %v10643_v6 = vld [vmem:[%s16789_s5 + $0x324] ss:$28 sps:$4 sm:$0xff]  }
 0x53c   : > { %7547 = vmatpush1.bf16.msra.mxu0 %v10569_v7  ;;  %7475 = vmatprep.subr.bf16.mxu1 %v10574_v0  ;;  %v10632_v7 = vld [vmem:[%s16789_s5 + $0x4e0] ss:$28 sps:$4 sm:$0xff]   ;;  %v10640_v0 = vld [vmem:[%s16789_s5 + $0x4ac] ss:$28 sps:$4 sm:$0xff]   ;;  %v10655_v35 = vld [vmem:[%s16789_s5 + $0x2b4] ss:$28 sps:$4 sm:$0xff]  }
 0x53d   : > { %7560 = vmatprep.subr.bf16.mxu0 %v10577_v60  ;;  %7443 = vmatmul.mubr.bf16.gmra.mxu1 %v16066_v53  ;;  %v10638_v60 = vld [vmem:[%s16789_s5 + $0x4a8] ss:$28 sps:$4 sm:$0xff]   ;;  %v10650_v52 = vld [vmem:[%s16789_s5 + $0x438] ss:$28 sps:$4 sm:$0xff]  }
 0x53e   : > { %9154 = vmatprep.mubr.msk.bf16.mxu1 %vm7306_vm3, %v16077_v14 }
 0x53f   : > { %7476 = vmatpush1.bf16.msra.mxu1 %v10572_v43  ;;  %v10646_v43 = vld [vmem:[%s16789_s5 + $0x474] ss:$28 sps:$4 sm:$0xff]  }
 0x540   : > { %7561 = vmatpush2.bf16.msra.mxu0 %v10575_v3  ;;  %7477 = vmatprep.subr.bf16.mxu1 %v10580_v34  ;;  %v10641_v3 = vld [vmem:[%s16789_s5 + $0x320] ss:$28 sps:$4 sm:$0xff]   ;;  %v10649_v34 = vld [vmem:[%s16789_s5 + $0x2ec] ss:$28 sps:$4 sm:$0xff]  }
 0x541   : > { %7562 = vmatprep.subr.bf16.mxu0 %v10583_v49  ;;  %v10652_v49 = vld [vmem:[%s16789_s5 + $0x43c] ss:$28 sps:$4 sm:$0xff]  }
 0x543   : > { %7478 = vmatpush2.bf16.msra.mxu1 %v10578_v30  ;;  %v10647_v30 = vld [vmem:[%s16789_s5 + $0x2e8] ss:$28 sps:$4 sm:$0xff]  }
 0x544   : > { %7563 = vmatpush2.bf16.msra.mxu0 %v10581_v46  ;;  %7479 = vmatprep.subr.bf16.mxu1 %v10586_v58  ;;  %v10658_v46 = vld [vmem:[%s16789_s5 + $0x404] ss:$28 sps:$4 sm:$0xff]   ;;  %v10653_v58 = vld [vmem:[%s16789_s5 + $0x2b0] ss:$28 sps:$4 sm:$0xff]  }
 0x545   : > { %7603 = vmatprep.subr.bf16.mxu0 %v10589_v24  ;;  %7453 = vmatmul.mubr.bf16.gmra.mxu1 %v16102_v55  ;;  %v10661_v24 = vld [vmem:[%s16789_s5 + $0x27c] ss:$28 sps:$4 sm:$0xff]  }
 0x546   : > { %7493 = vmatprep.mubr.bf16.mxu1 %v15838_v19 }
 0x547   : > { %7480 = vmatpush2.bf16.msra.mxu1 %v10584_v2  ;;  %7565 = vmatmul.mubr.bf16.vlgmr.msra.gmra.mxu0 %v15867_v63  ;;  %v10656_v2 = vld [vmem:[%s16789_s5 + $0x400] ss:$28 sps:$4 sm:$0xff]  }
 0x548   : > { %9156 = vmatprep.mubr.msk.bf16.mxu0 %vm7306_vm3, %v16010_v28  ;;  %7604 = vmatpush1.bf16.msra.mxu0 %v10587_v20  ;;  %v10664_v20 = vld [vmem:[%s16789_s5 + $0x3cc] ss:$28 sps:$4 sm:$0xff]  }
 0x549   : > { %7481 = vmatprep.subr.bf16.mxu1 %v10592_v15  ;;  %7605 = vmatprep.subr.bf16.mxu0 %v10595_v44  ;;  %v10659_v15 = vld [vmem:[%s16789_s5 + $0x278] ss:$28 sps:$4 sm:$0xff]   ;;  %v10667_v44 = vld [vmem:[%s16789_s5 + $0x244] ss:$28 sps:$4 sm:$0xff]  }
 0x54b   : > { %7482 = vmatpush2.bf16.msra.mxu1 %v10590_v37  ;;  %v10662_v37 = vld [vmem:[%s16789_s5 + $0x3c8] ss:$28 sps:$4 sm:$0xff]  }
 0x54c   : > { %7483 = vmatprep.subr.bf16.mxu1 %v10598_v40  ;;  %7606 = vmatpush1.bf16.msra.mxu0 %v10593_v54  ;;  %v10670_v40 = vld [vmem:[%s16789_s5 + $0x394] ss:$28 sps:$4 sm:$0xff]   ;;  %v10665_v54 = vld [vmem:[%s16789_s5 + $0x240] ss:$28 sps:$4 sm:$0xff]  }
 0x54d   : > { %7607 = vmatprep.subr.bf16.mxu0 %v10601_v56  ;;  %v10673_v56 = vld [vmem:[%s16789_s5 + $0x20c] ss:$28 sps:$4 sm:$0xff]  }
 0x54f   : > { %7484 = vmatpush2.bf16.msra.mxu1 %v10596_v17  ;;  %7575 = vmatmul.mubr.bf16.gmra.mxu0 %v16016_v12  ;;  %v10668_v17 = vld [vmem:[%s16789_s5 + $0x390] ss:$28 sps:$4 sm:$0xff]  }
 0x550   : > { %9157 = vmatprep.mubr.msk.bf16.mxu0 %vm7306_vm3, %v16034_v42  ;;  %7485 = vmatprep.subr.bf16.mxu1 %v10604_v21  ;;  %v10676_v21 = vld [vmem:[%s16789_s5 + $0x58c] ss:$28 sps:$4 sm:$0xff]  }
 0x551   : > { %7608 = vmatpush1.bf16.msra.mxu0 %v10599_v50  ;;  %v10671_v50 = vld [vmem:[%s16789_s5 + $0x208] ss:$28 sps:$4 sm:$0xff]  }
 0x552   : > { %7609 = vmatprep.subr.bf16.mxu0 %v10607_v13  ;;  %v10679_v13 = vld [vmem:[%s16789_s5 + $0x1d4] ss:$28 sps:$4 sm:$0xff]  }
 0x553   : > { %7486 = vmatpush2.bf16.msra.mxu1 %v10602_v36  ;;  %v10674_v36 = vld [vmem:[%s16789_s5 + $0x588] ss:$28 sps:$4 sm:$0xff]  }
 0x554   : > { %7487 = vmatprep.subr.bf16.mxu1 %v10610_v5  ;;  %v10682_v5 = vld [vmem:[%s16789_s5 + $0x554] ss:$28 sps:$4 sm:$0xff]  }
 0x555   : > { %7610 = vmatpush1.bf16.msra.mxu0 %v10605_v1  ;;  %v10677_v1 = vld [vmem:[%s16789_s5 + $0x1d0] ss:$28 sps:$4 sm:$0xff]  }
 0x556   : > { %7611 = vmatprep.subr.bf16.mxu0 %v10613_v9  ;;  %v10680_v9 = vld [vmem:[%s16789_s5 + $0x550] ss:$28 sps:$4 sm:$0xff]  }
 0x557   : > { %7488 = vmatpush2.bf16.msra.mxu1 %v10608_v23  ;;  %7585 = vmatmul.mubr.bf16.gmra.mxu0 %v16066_v53  ;;  %v10684_v23 = vld [vmem:[%s16789_s5 + $0x360] ss:$28 sps:$4 sm:$0xff]  }
 0x558   : > { %9158 = vmatprep.mubr.msk.bf16.mxu0 %vm7306_vm3, %v16077_v14  ;;  %7489 = vmatprep.subr.bf16.mxu1 %v10616_v61  ;;  %v10683_v61 = vld [vmem:[%s16789_s5 + $0x520] ss:$28 sps:$4 sm:$0xff]  }
 0x559   : > { %7612 = vmatpush1.bf16.msra.mxu0 %v10611_v25  ;;  %v17846_v25 = vmov 0  }
 0x55a   : > { %7613 = vmatprep.subr.bf16.mxu0 %v10619_v29  ;;  %v10685_v29 = vld [vmem:[%s16789_s5 + $0x1a0] ss:$28 sps:$4 sm:$0xff]  }
 0x55b   : > { %7490 = vmatpush2.bf16.msra.mxu1 %v10614_v48  ;;  %v10687_v48 = vld [vmem:[%s16789_s5 + $0x328] ss:$28 sps:$4 sm:$0xff]  }
 0x55c   : > { %7491 = vmatprep.subr.bf16.mxu1 %v10622_v26  ;;  %v10686_v26 = vld [vmem:[%s16789_s5 + $0x4e8] ss:$28 sps:$4 sm:$0xff]  }
 0x55d   : > { %7614 = vmatpush1.bf16.msra.mxu0 %v10617_v18  ;;  %v10688_v18 = vld [vmem:[%s16789_s5 + $0x168] ss:$28 sps:$4 sm:$0xff]  }
 0x55e   : > { %7615 = vmatprep.subr.bf16.mxu0 %v10625_v31  ;;  %v10690_v31 = vld [vmem:[%s16789_s5 + $0x2f0] ss:$28 sps:$4 sm:$0xff]  }
 0x55f   : > { %7492 = vmatpush2.bf16.msra.mxu1 %v10620_v4  ;;  %7595 = vmatmul.mubr.bf16.gmra.mxu0 %v16102_v55  ;;  %v10689_v4 = vld [vmem:[%s16789_s5 + $0x4b0] ss:$28 sps:$4 sm:$0xff]  }
 0x560   : > { %7635 = vmatprep.mubr.bf16.mxu0 %v15838_v19  ;;  %7674 = vmatprep.subr.bf16.mxu1 %v10628_v11  ;;  %v10691_v11 = vld [vmem:[%s16789_s5 + $0x130] ss:$28 sps:$4 sm:$0xff]  }
 0x561   : > { %7616 = vmatpush1.bf16.msra.mxu0 %v10623_v51  ;;  %v10693_v51 = vld [vmem:[%s16789_s5 + $0x2b8] ss:$28 sps:$4 sm:$0xff]  }
 0x562   : > { %7494 = vmatmul.mubr.bf16.vlgmr.msra.gmra.mxu1 %v15833_v45  ;;  %7617 = vmatprep.subr.bf16.mxu0 %v10631_v39  ;;  %v10692_v39 = vld [vmem:[%s16789_s5 + $0x478] ss:$28 sps:$4 sm:$0xff]  }
 0x563   : > { %7503 = vmatprep.mubr.bf16.mxu1 %v15901_v16  ;;  %7675 = vmatpush1.bf16.msra.mxu1 %v10626_v41  ;;  %v10694_v41 = vld [vmem:[%s16789_s5 + $0xf8] ss:$28 sps:$4 sm:$0xff]  }
 0x564   : > { %7676 = vmatprep.subr.bf16.mxu1 %v10634_v59  ;;  %v10696_v59 = vld [vmem:[%s16789_s5 + $0x280] ss:$28 sps:$4 sm:$0xff]  }
 0x565   : > { %7618 = vmatpush1.bf16.msra.mxu0 %v10629_v32  ;;  %v10695_v32 = vld [vmem:[%s16789_s5 + $0x440] ss:$28 sps:$4 sm:$0xff]  }
 0x566   : > { %7619 = vmatprep.subr.bf16.mxu0 %v10637_v47  ;;  %v10697_v47 = vld [vmem:[%s16789_s5 + $0xc0] ss:$28 sps:$4 sm:$0xff]  }
 0x567   : > { %7677 = vmatpush1.bf16.msra.mxu1 %v10632_v7  ;;  %v10699_v7 = vld [vmem:[%s16789_s5 + $0x248] ss:$28 sps:$4 sm:$0xff]  }
 0x568   : > { %7678 = vmatprep.subr.bf16.mxu1 %v10640_v0  ;;  %v10698_v0 = vld [vmem:[%s16789_s5 + $0x408] ss:$28 sps:$4 sm:$0xff]  }
 0x569   : > { %7620 = vmatpush2.bf16.msra.mxu0 %v10635_v33  ;;  %v10700_v33 = vld [vmem:[%s16789_s5 + $0x88] ss:$28 sps:$4 sm:$0xff]  }
 0x56a   : > { %7504 = vmatmul.mubr.bf16.gmra.mxu1 %v15911_v57  ;;  %7621 = vmatprep.subr.bf16.mxu0 %v10643_v6  ;;  %v10702_v6 = vld [vmem:[%s16789_s5 + $0x210] ss:$28 sps:$4 sm:$0xff]  }
 0x56b   : > { %7513 = vmatprep.mubr.bf16.mxu1 %v15955_v27  ;;  %7679 = vmatpush1.bf16.msra.mxu1 %v10638_v60  ;;  %v10701_v60 = vld [vmem:[%s16789_s5 + $0x3d0] ss:$28 sps:$4 sm:$0xff]  }
 0x56c   : > { %7680 = vmatprep.subr.bf16.mxu1 %v10646_v43  ;;  %v10703_v43 = vld [vmem:[%s16789_s5 + $0x50] ss:$28 sps:$4 sm:$0xff]  }
 0x56d   : > { %7622 = vmatpush2.bf16.msra.mxu0 %v10641_v3  ;;  %v10705_v3 = vld [vmem:[%s16789_s5 + $0x1d8] ss:$28 sps:$4 sm:$0xff]  }
 0x56e   : > { %7623 = vmatprep.subr.bf16.mxu0 %v10649_v34  ;;  %v10704_v34 = vld [vmem:[%s16789_s5 + $0x398] ss:$28 sps:$4 sm:$0xff]  }
 0x56f   : > { %7681 = vmatpush1.bf16.msra.mxu1 %v10644_v22  ;;  %v10706_v22 = vld [vmem:[%s16789_s5 + $0x18] ss:$28 sps:$4 sm:$0xff]  }
 0x570   : > { %7682 = vmatprep.subr.bf16.mxu1 %v10652_v49  ;;  %v10708_v49 = vld [vmem:[%s16789_s5 + $0x558] ss:$28 sps:$4 sm:$0xff]  }
 0x571   : > { %7624 = vmatpush2.bf16.msra.mxu0 %v10647_v30 }
 0x572   : > { %7514 = vmatmul.mubr.bf16.gmra.mxu1 %v15963_v62  ;;  %7625 = vmatprep.subr.bf16.mxu0 %v10655_v35 }
 0x573   : > { %7523 = vmatprep.mubr.bf16.mxu1 %v15979_v10  ;;  %7683 = vmatpush1.bf16.msra.mxu1 %v10650_v52 }
 0x574   : > { %7684 = vmatprep.subr.bf16.mxu1 %v10658_v46 }
 0x575   : > { %7626 = vmatpush2.bf16.msra.mxu0 %v10653_v58 }
 0x576   : > { %7627 = vmatprep.subr.bf16.mxu0 %v10661_v24 }
 0x577   : > { %7685 = vmatpush1.bf16.msra.mxu1 %v10656_v2 }
 0x578   : > { %7686 = vmatprep.subr.bf16.mxu1 %v10664_v20 }
 0x579   : > { %7628 = vmatpush2.bf16.msra.mxu0 %v10659_v15 }
 0x57a   : > { %7524 = vmatmul.mubr.bf16.gmra.mxu1 %v16029_v8  ;;  %7629 = vmatprep.subr.bf16.mxu0 %v10667_v44 }
 0x57b   : > { %7687 = vmatpush1.bf16.msra.mxu1 %v10662_v37  ;;  %9159 = vmatprep.mubr.msk.bf16.mxu1 %vm7306_vm3, %v15856_v38 }
 0x57c   : > { %7688 = vmatprep.subr.bf16.mxu1 %v10670_v40 }
 0x57d   : > { %7630 = vmatpush2.bf16.msra.mxu0 %v10665_v54 }
 0x57e   : > { %7631 = vmatprep.subr.bf16.mxu0 %v10673_v56 }
 0x57f   : > { %7689 = vmatpush1.bf16.msra.mxu1 %v10668_v17 }
 0x580   : > { %7702 = vmatprep.subr.bf16.mxu1 %v10676_v21 }
 0x581   : > { %7632 = vmatpush2.bf16.msra.mxu0 %v10671_v50  ;;  %v17849_v50 = vld [vmem:[#allocation68_spill] sm:$0xff] }
 0x582   : > { %7633 = vmatprep.subr.bf16.mxu0 %v10679_v13  ;;  %vm7875_vm9 = vcmp.eq.s32.totalorder %v17849_v50, 0  ;;  %vm7910_vm10 = vcmp.eq.s32.totalorder %v17849_v50, 1 }
 0x583   : > { %7703 = vmatpush2.bf16.msra.mxu1 %v10674_v36 }
 0x584   : > { %7704 = vmatprep.subr.bf16.mxu1 %v10682_v5 }
 0x585   : > { %7634 = vmatpush2.bf16.msra.mxu0 %v10677_v1 }
 0x586   : > { %7809 = vmatprep.subr.bf16.mxu0 %v17846_v25 }
 0x587   : > { %7705 = vmatpush2.bf16.msra.mxu1 %v10680_v9 }
 0x588   : > { %7636 = vmatmul.mubr.bf16.vlgmr.msra.gmra.mxu0 %v15833_v45  ;;  %9177 = vmatprep.subr.bf16.mxu1 %v10684_v23 }
 0x589   : > { %7645 = vmatprep.mubr.bf16.mxu0 %v15901_v16  ;;  %7810 = vmatpush1.bf16.msra.mxu0 %v10683_v61 }
 0x58a   : > { %7707 = vmatmul.mubr.bf16.vlgmr.msra.gmra.mxu1 %v15867_v63  ;;  %7811 = vmatprep.subr.bf16.mxu0 %v17846_v25 }
 0x58b   : > { %9160 = vmatprep.mubr.msk.bf16.mxu1 %vm7306_vm3, %v16010_v28  ;;  %9178 = vmatpush3.bf16.msra.mxu1 %v10685_v29 }
 0x58c   : > { %9179 = vmatprep.subr.bf16.mxu1 %v10687_v48  ;;  %v17850_v48 = vld [vmem:[#allocation70_spill] sm:$0xff] }
 0x58d   : > { %7812 = vmatpush1.bf16.msra.mxu0 %v10686_v26  ;;  %vm7876_vm2 = vcmp.eq.s32.totalorder %v17850_v48, 0  ;;  %vm7911_vm12 = vcmp.eq.s32.totalorder %v17850_v48, 1 }
 0x58e   : > { %7813 = vmatprep.subr.bf16.mxu0 %v17846_v25 }
 0x58f   : > { %9180 = vmatpush3.bf16.msra.mxu1 %v10688_v18 }
 0x590   : > { %7646 = vmatmul.mubr.bf16.gmra.mxu0 %v15911_v57  ;;  %9181 = vmatprep.subr.bf16.mxu1 %v10690_v31 }
 0x591   : > { %7655 = vmatprep.mubr.bf16.mxu0 %v15955_v27  ;;  %7814 = vmatpush1.bf16.msra.mxu0 %v10689_v4 }
 0x592   : > { %7717 = vmatmul.mubr.bf16.gmra.mxu1 %v16016_v12  ;;  %7815 = vmatprep.subr.bf16.mxu0 %v17846_v25 }
 0x593   : > { %9161 = vmatprep.mubr.msk.bf16.mxu1 %vm7306_vm3, %v16034_v42  ;;  %9182 = vmatpush3.bf16.msra.mxu1 %v10691_v11 }
 0x594   : > { %9183 = vmatprep.subr.bf16.mxu1 %v10693_v51 }
 0x595   : > { %7816 = vmatpush1.bf16.msra.mxu0 %v10692_v39 }
 0x596   : > { %7817 = vmatprep.subr.bf16.mxu0 %v17846_v25 }
 0x597   : > { %9184 = vmatpush3.bf16.msra.mxu1 %v10694_v41 }
 0x598   : > { %7656 = vmatmul.mubr.bf16.gmra.mxu0 %v15963_v62  ;;  %9185 = vmatprep.subr.bf16.mxu1 %v10696_v59  ;;  %v17851_v59 = vld [vmem:[#allocation71_spill] sm:$0xff] }
 0x599   : > { %7665 = vmatprep.mubr.bf16.mxu0 %v15979_v10  ;;  %7818 = vmatpush1.bf16.msra.mxu0 %v10695_v32  ;;  %vm7877_vm6 = vcmp.eq.s32.totalorder %v17851_v59, 0  ;;  %vm7912_vm11 = vcmp.eq.s32.totalorder %v17851_v59, 1 }
 0x59a   : > { %7727 = vmatmul.mubr.bf16.gmra.mxu1 %v16066_v53  ;;  %7819 = vmatprep.subr.bf16.mxu0 %v17846_v25 }
 0x59b   : > { %9162 = vmatprep.mubr.msk.bf16.mxu1 %vm7306_vm3, %v16077_v14  ;;  %9186 = vmatpush3.bf16.msra.mxu1 %v10697_v47 }
 0x59c   : > { %9187 = vmatprep.subr.bf16.mxu1 %v10699_v7 }
 0x59d   : > { %7820 = vmatpush1.bf16.msra.mxu0 %v10698_v0 }
 0x59e   : > { %7821 = vmatprep.subr.bf16.mxu0 %v17846_v25 }
 0x59f   : > { %9188 = vmatpush3.bf16.msra.mxu1 %v10700_v33 }
 0x5a0   : > { %7666 = vmatmul.mubr.bf16.gmra.mxu0 %v16029_v8  ;;  %9189 = vmatprep.subr.bf16.mxu1 %v10702_v6 }
 0x5a1   : > { %7822 = vmatpush1.bf16.msra.mxu0 %v10701_v60  ;;  %9163 = vmatprep.mubr.msk.bf16.mxu0 %vm7306_vm3, %v15856_v38  ;;  %v10707_v38 = vld [vmem:[%s16789_s5 + $0x590] ss:$28 sps:$4 sm:$0xff]  }
 0x5a2   : > { %7737 = vmatmul.mubr.bf16.gmra.mxu1 %v16102_v55  ;;  %7823 = vmatprep.subr.bf16.mxu0 %v17846_v25 }
 0x5a3   : > { %9190 = vmatpush3.bf16.msra.mxu1 %v10703_v43  ;;  %7777 = vmatprep.mubr.bf16.mxu1 %v15838_v19  ;;  %v17852_v43 = vld [vmem:[#allocation73_spill] sm:$0xff] }
 0x5a4   : > { %9191 = vmatprep.subr.bf16.mxu1 %v10705_v3  ;;  %vm7878_vm0 = vcmp.eq.s32.totalorder %v17852_v43, 0  ;;  %vm7913_vm8 = vcmp.eq.s32.totalorder %v17852_v43, 1 }
 0x5a5   : > { %7824 = vmatpush1.bf16.msra.mxu0 %v10704_v34 }
 0x5a6   : > { %7837 = vmatprep.subr.bf16.mxu0 %v17846_v25 }
 0x5a7   : > { %9192 = vmatpush3.bf16.msra.mxu1 %v10706_v22 }
 0x5a9   : > { %7838 = vmatpush2.bf16.msra.mxu0 %v10707_v38 }
 0x5aa   : > { %7778 = vmatmul.mubr.bf16.vlgmr.msra.gmra.mxu1 %v15833_v45  ;;  %7839 = vmatprep.subr.bf16.mxu0 %v17846_v25 }
 0x5ab   : > { %7785 = vmatprep.mubr.bf16.mxu1 %v15901_v16 }
 0x5ad   : > { %7840 = vmatpush2.bf16.msra.mxu0 %v10708_v49 }
 0x5b0   : > { %7842 = vmatmul.mubr.bf16.vlgmr.msra.gmra.mxu0 %v15867_v63 }
 0x5b1   : > { %9164 = vmatprep.mubr.msk.bf16.mxu0 %vm7306_vm3, %v16010_v28 }
 0x5b2   : > { %7786 = vmatmul.mubr.bf16.gmra.mxu1 %v15911_v57 }
 0x5b3   : > { %7793 = vmatprep.mubr.bf16.mxu1 %v15955_v27  ;;  %v17847_v27 = vld [vmem:[#allocation37_spill] sm:$0xff] }
 0x5b4   : > { %vm7873_vm15 = vcmp.eq.s32.totalorder %v17847_v27, 0  ;;  %vm7908_vm4 = vcmp.eq.s32.totalorder %v17847_v27, 1 }
 0x5b8   : > { %7850 = vmatmul.mubr.bf16.gmra.mxu0 %v16016_v12 }
 0x5b9   : > { %9165 = vmatprep.mubr.msk.bf16.mxu0 %vm7306_vm3, %v16034_v42 }
 0x5ba   : > { %7794 = vmatmul.mubr.bf16.gmra.mxu1 %v15963_v62 }
 0x5bb   : > { %7801 = vmatprep.mubr.bf16.mxu1 %v15979_v10 }
 0x5c0   : > { %7858 = vmatmul.mubr.bf16.gmra.mxu0 %v16066_v53 }
 0x5c1   : > { %9166 = vmatprep.mubr.msk.bf16.mxu0 %vm7306_vm3, %v16077_v14  ;;  %vm7943_vm3 = vcmp.eq.s32.totalorder %v17847_v27, 2 }
 0x5c2   : > { %7802 = vmatmul.mubr.bf16.gmra.mxu1 %v16029_v8 }
 0x5c8   : > { %7866 = vmatmul.mubr.bf16.gmra.mxu0 %v16102_v55  ;;  %v17848_v55 = vld [vmem:[#allocation54_spill] sm:$0xff] }
 0x5c9   : > { %vm7874_vm5 = vcmp.eq.s32.totalorder %v17848_v55, 0  ;;  %vm7909_vm13 = vcmp.eq.s32.totalorder %v17848_v55, 1 }
 0x5df   : > { %v7353_v45 = vpop.f32.mrf.mxu0 }
 0x5e1   : > { %v7355_v19 = vpop.f32.mrf.mxu0 }
 0x5e2   : > { %v7424_v63 = vpop.f32.mrf.mxu1 }
 0x5e3   : > { %v7425_v16 = vadd.f32 %v7424_v63, %v7353_v45  ;;  %v7357_v57 = vpop.f32.mrf.mxu0 }
 0x5e4   : > { %v7426_v28 = vpop.f32.mrf.mxu1 }
 0x5e5   : > { %v7427_v62 = vadd.f32 %v7426_v28, %v7355_v19  ;;  %v7359_v10 = vpop.f32.mrf.mxu0  ;;  %v7894_v42 = vsel %vm7873_vm15, %v7425_v16, 0.0  ;;  %v17853_v16 = vld [vmem:[#allocation14_spill] sm:$0xff]  ;;  %vm7978_vm15 = vcmp.eq.s32.totalorder %v17847_v27, 3 }
 0x5e6   : > { %v7428_v12 = vpop.f32.mrf.mxu1  ;;  %vm7879_vm14 = vcmp.eq.s32.totalorder %v17853_v16, 0  ;;  %vm7914_vm1 = vcmp.eq.s32.totalorder %v17853_v16, 1 }
 0x5e7   : > { %v7929_v53 = vsel %vm7908_vm4, %v7427_v62, 0.0  ;;  %v7429_v14 = vadd.f32 %v7428_v12, %v7357_v57  ;;  %v7363_v30 = vpop.f32.mrf.mxu0  ;;  %vm7944_vm4 = vcmp.eq.s32.totalorder %v17848_v55, 2 }
 0x5e8   : > { %v16442_v8 = vadd.f32 %v7929_v53, %v7894_v42  ;;  %v7430_v35 = vpop.f32.mrf.mxu1 }
 0x5e9   : > { %v7431_v52 = vadd.f32 %v7430_v35, %v7359_v10  ;;  %v7365_v46 = vpop.f32.mrf.mxu0  ;;  %v7895_v58 = vsel %vm7874_vm5, %v7429_v14, 0.0  ;;  %vm7979_vm5 = vcmp.eq.s32.totalorder %v17848_v55, 3 }
 0x5eb   : > { %v7930_v24 = vsel %vm7909_vm13, %v7431_v52, 0.0  ;;  %v7367_v2 = vpop.f32.mrf.mxu0  ;;  %v10776_v52 = vmov 0.0   ;;  %vm7945_vm13 = vcmp.eq.s32.totalorder %v17849_v50, 2 }
 0x5ec   : > { %v16446_v20 = vadd.f32 %v7930_v24, %v7895_v58  ;;  %9251 = vmatprep.subr.mxu1 %v10776_v52  ;;  %9268 = vmatprep.subr.mxu0 %v10776_v52 }
 0x5ed   : > { %v7369_v15 = vpop.f32.mrf.mxu0  ;;  %9265 = vmatprep.mubr.msk.f32.mxu1 %vm10777_vm7, %v10776_v52  ;;  %9300 = vmatprep.mubr.msk.f32.mxu0 %vm10777_vm7, %v10776_v52 }
 0x5ef   : > { %v7373_v44 = vpop.f32.mrf.mxu0 }
 0x5f1   : > { %v7375_v37 = vpop.f32.mrf.mxu0 }
 0x5f3   : > { %v7377_v40 = vpop.f32.mrf.mxu0 }
 0x5f5   : > { %v7379_v54 = vpop.f32.mrf.mxu0  ;;  %v7434_v56 = vpop.f32.mrf.mxu1 }
 0x5f6   : > { %v7435_v17 = vadd.f32 %v7434_v56, %v7363_v30 }
 0x5f7   : > { %v7383_v21 = vpop.f32.mrf.mxu0  ;;  %v7436_v13 = vpop.f32.mrf.mxu1 }
 0x5f8   : > { %v7437_v36 = vadd.f32 %v7436_v13, %v7365_v46  ;;  %v7896_v9 = vsel %vm7875_vm9, %v7435_v17, 0.0  ;;  %v8214_v17 = vld [vmem:[%s16792_s8 + $0x68] sm:$0xff]  ;;  %v8213_v13 = vld [vmem:[%s16792_s8 + $0x60] sm:$0xff]  ;;  %vm7980_vm9 = vcmp.eq.s32.totalorder %v17849_v50, 3 }
 0x5f9   : > { %v7385_v5 = vpop.f32.mrf.mxu0  ;;  %v7438_v1 = vpop.f32.mrf.mxu1 }
 0x5fa   : > { %v7931_v23 = vsel %vm7910_vm10, %v7437_v36, 0.0  ;;  %v7439_v61 = vadd.f32 %v7438_v1, %v7367_v2  ;;  %vm7946_vm10 = vcmp.eq.s32.totalorder %v17850_v48, 2 }
 0x5fb   : > { %v7387_v25 = vpop.f32.mrf.mxu0  ;;  %v16450_v29 = vadd.f32 %v7931_v23, %v7896_v9  ;;  %v7440_v26 = vpop.f32.mrf.mxu1 }
 0x5fc   : > { %v7441_v18 = vadd.f32 %v7440_v26, %v7369_v15  ;;  %v7897_v11 = vsel %vm7876_vm2, %v7439_v61, 0.0  ;;  %v8211_v61 = vld [vmem:[%s16792_s8 + $0x50] sm:$0xff]  ;;  %vm7981_vm2 = vcmp.eq.s32.totalorder %v17850_v48, 3 }
 0x5fd   : > { %v7388_v31 = vpop.f32.mrf.mxu0  ;;  %v7444_v4 = vpop.f32.mrf.mxu1 }
 0x5fe   : > { %v7932_v51 = vsel %vm7911_vm12, %v7441_v18, 0.0  ;;  %v7445_v39 = vadd.f32 %v7444_v4, %v7373_v44  ;;  %v8210_v4 = vld [vmem:[%s16792_s8 + $0x48] sm:$0xff]  ;;  %vm7947_vm12 = vcmp.eq.s32.totalorder %v17851_v59, 2 }
 0x5ff   : > { %v16454_v41 = vadd.f32 %v7932_v51, %v7897_v11  ;;  %v7446_v32 = vpop.f32.mrf.mxu1 }
 0x600   : > { %v7447_v47 = vadd.f32 %v7446_v32, %v7375_v37  ;;  %v7898_v0 = vsel %vm7877_vm6, %v7445_v39, 0.0  ;;  %vm7982_vm6 = vcmp.eq.s32.totalorder %v17851_v59, 3 }
 0x601   : > { %v7448_v7 = vpop.f32.mrf.mxu1 }
 0x602   : > { %v7933_v33 = vsel %vm7912_vm11, %v7447_v47, 0.0  ;;  %v7449_v6 = vadd.f32 %v7448_v7, %v7377_v40  ;;  %v8216_v40 = vld [vmem:[%s16792_s8 + $0x78] sm:$0xff]  ;;  %v8209_v47 = vld [vmem:[%s16792_s8 + $0x40] sm:$0xff]  ;;  %vm7948_vm11 = vcmp.eq.s32.totalorder %v17852_v43, 2 }
 0x603   : > { %v16458_v60 = vadd.f32 %v7933_v33, %v7898_v0  ;;  %v7450_v3 = vpop.f32.mrf.mxu1  ;;  %9269 = vmatpush3.msra.mxu0 %v8216_v40 }
 0x604   : > { %v7451_v34 = vadd.f32 %v7450_v3, %v7379_v54  ;;  %v7899_v38 = vsel %vm7878_vm0, %v7449_v6, 0.0  ;;  %v8215_v54 = vld [vmem:[%s16792_s8 + $0x70] sm:$0xff]  ;;  %9270 = vmatprep.subr.mxu0 %v10776_v52  ;;  %v8208_v6 = vld [vmem:[%s16792_s8 + $0x38] sm:$0xff]  ;;  %vm7983_vm0 = vcmp.eq.s32.totalorder %v17852_v43, 3 }
 0x605   : > { %v7454_v22 = vpop.f32.mrf.mxu1  ;;  %9271 = vmatpush3.msra.mxu0 %v8215_v54 }
 0x606   : > { %v7934_v49 = vsel %vm7913_vm8, %v7451_v34, 0.0  ;;  %v7455_v45 = vadd.f32 %v7454_v22, %v7383_v21  ;;  %9272 = vmatprep.subr.mxu0 %v10776_v52  ;;  %vm7949_vm8 = vcmp.eq.s32.totalorder %v17853_v16, 2 }
 0x607   : > { %v7566_v19 = vpop.f32.mrf.mxu0  ;;  %v16462_v63 = vadd.f32 %v7934_v49, %v7899_v38  ;;  %v7456_v57 = vpop.f32.mrf.mxu1  ;;  %9273 = vmatpush3.msra.mxu0 %v8214_v17  ;;  %v8207_v49 = vld [vmem:[%s16792_s8 + $0x30] sm:$0xff] }
 0x608   : > { %v7457_v28 = vadd.f32 %v7456_v57, %v7385_v5  ;;  %v7900_v12 = vsel %vm7879_vm14, %v7455_v45, 0.0  ;;  %9274 = vmatprep.subr.mxu0 %v10776_v52  ;;  %v8212_v5 = vld [vmem:[%s16792_s8 + $0x58] sm:$0xff]  ;;  %vm7984_vm14 = vcmp.eq.s32.totalorder %v17853_v16, 3 }
 0x609   : > { %v7568_v62 = vpop.f32.mrf.mxu0  ;;  %v7458_v10 = vpop.f32.mrf.mxu1  ;;  %9275 = vmatpush3.msra.mxu0 %v8213_v13 }
 0x60a   : > { %v7935_v42 = vsel %vm7914_vm1, %v7457_v28, 0.0  ;;  %9276 = vmatprep.subr.mxu0 %v10776_v52  ;;  %v8206_v28 = vld [vmem:[%s16792_s8 + $0x28] sm:$0xff]  ;;  %vm8013_vm1 = vcmp.eq.s32.totalorder %v17847_v27, 4 }
 0x60b   : > { %v7570_v53 = vpop.f32.mrf.mxu0  ;;  %v16466_v14 = vadd.f32 %v7935_v42, %v7900_v12  ;;  %v7459_v30 = vpop.f32.mrf.mxu1  ;;  %9277 = vmatpush3.msra.mxu0 %v8212_v5 }
 0x60c   : > { %9278 = vmatprep.subr.mxu0 %v10776_v52 }
 0x60d   : > { %v7572_v35 = vpop.f32.mrf.mxu0  ;;  %9279 = vmatpush3.msra.mxu0 %v8211_v61 }
 0x60e   : > { %9280 = vmatprep.subr.mxu0 %v10776_v52 }
 0x60f   : > { %v7576_v46 = vpop.f32.mrf.mxu0  ;;  %9281 = vmatpush3.msra.mxu0 %v8210_v4 }
 0x610   : > { %9282 = vmatprep.subr.mxu0 %v10776_v52 }
 0x611   : > { %v16470_v58 = vpop.f32.mrf.mxu0  ;;  %9283 = vmatpush3.msra.mxu0 %v8209_v47 }
 0x612   : > { %9284 = vmatprep.subr.mxu0 %v10776_v52 }
 0x613   : > { %v16472_v24 = vpop.f32.mrf.mxu0  ;;  %9285 = vmatpush3.msra.mxu0 %v8208_v6 }
 0x614   : > { %9286 = vmatprep.subr.mxu0 %v10776_v52 }
 0x615   : > { %v16474_v2 = vpop.f32.mrf.mxu0  ;;  %9287 = vmatpush3.msra.mxu0 %v8207_v49 }
 0x616   : > { %9288 = vmatprep.subr.mxu0 %v10776_v52 }
 0x617   : > { %v16476_v15 = vpop.f32.mrf.mxu0  ;;  %9289 = vmatpush3.msra.mxu0 %v8206_v28 }
 0x618   : > { %9290 = vmatprep.subr.mxu0 %v10776_v52 }
 0x619   : > { %v16478_v44 = vpop.f32.mrf.mxu0 }
 0x61b   : > { %v16480_v37 = vpop.f32.mrf.mxu0 }
 0x61d   : > { %v16492_v56 = vpop.f32.mrf.mxu0 }
 0x61f   : > { %v16498_v21 = vpop.f32.mrf.mxu0 }
 0x621   : > { %v16504_v36 = vpop.f32.mrf.mxu0 }
 0x622   : > { %v7495_v1 = vpop.f32.mrf.mxu1 }
 0x623   : > { %v7567_v9 = vadd.f32 %v7566_v19, %v7495_v1  ;;  %v7600_v23 = vpop.f32.mrf.mxu0 }
 0x624   : > { %v7497_v25 = vpop.f32.mrf.mxu1 }
 0x625   : > { %v7964_v26 = vsel %vm7943_vm3, %v7567_v9, 0.0  ;;  %v7569_v18 = vadd.f32 %v7568_v62, %v7497_v25  ;;  %v7601_v31 = vpop.f32.mrf.mxu0  ;;  %vm8048_vm3 = vcmp.eq.s32.totalorder %v17847_v27, 5 }
 0x626   : > { %v7971_v11 = vadd.f32 %v7964_v26, %v16442_v8  ;;  %v7499_v51 = vpop.f32.mrf.mxu1 }
 0x627   : > { %v7999_v39 = vsel %vm7978_vm15, %v7569_v18, 0.0  ;;  %v7571_v32 = vadd.f32 %v7570_v53, %v7499_v51  ;;  %v8205_v53 = vld [vmem:[%s16792_s8 + $0x20] sm:$0xff]  ;;  %vm8014_vm15 = vcmp.eq.s32.totalorder %v17848_v55, 4 }
 0x628   : > { %v16526_v7 = vadd.f32 %v7999_v39, %v7971_v11  ;;  %v7501_v0 = vpop.f32.mrf.mxu1  ;;  %9291 = vmatpush3.msra.mxu0 %v8205_v53 }
 0x629   : > { %v7965_v33 = vsel %vm7944_vm4, %v7571_v32, 0.0  ;;  %v7573_v8 = vadd.f32 %v7572_v35, %v7501_v0  ;;  %9292 = vmatprep.subr.mxu0 %v10776_v52  ;;  %vm8049_vm4 = vcmp.eq.s32.totalorder %v17848_v55, 5 }
 0x62a   : > { %v7972_v3 = vadd.f32 %v7965_v33, %v16446_v20  ;;  %v7505_v34 = vpop.f32.mrf.mxu1 }
 0x62b   : > { %v8000_v22 = vsel %vm7979_vm5, %v7573_v8, 0.0  ;;  %v7577_v38 = vadd.f32 %v7576_v46, %v7505_v34  ;;  %vm8019_vm5 = vcmp.eq.s32.totalorder %v17853_v16, 4 }
 0x62c   : > { %v16539_v45 = vadd.f32 %v8000_v22, %v7972_v3  ;;  %v7507_v19 = vpop.f32.mrf.mxu1 }
 0x62d   : > { %v7966_v57 = vsel %vm7945_vm13, %v7577_v38, 0.0  ;;  %v7579_v20 = vadd.f32 %v16470_v58, %v7507_v19  ;;  %v8204_v58 = vld [vmem:[%s16792_s8 + $0x18] sm:$0xff]  ;;  %vm8015_vm13 = vcmp.eq.s32.totalorder %v17849_v50, 4 }
 0x62e   : > { %v7973_v62 = vadd.f32 %v7966_v57, %v16450_v29  ;;  %v7509_v10 = vpop.f32.mrf.mxu1  ;;  %9293 = vmatpush3.msra.mxu0 %v8204_v58 }
 0x62f   : > { %v8001_v12 = vsel %vm7980_vm9, %v7579_v20, 0.0  ;;  %v7581_v42 = vadd.f32 %v16472_v24, %v7509_v10  ;;  %9294 = vmatprep.subr.mxu0 %v10776_v52  ;;  %vm8016_vm9 = vcmp.eq.s32.totalorder %v17850_v48, 4 }
 0x630   : > { %v16554_v30 = vadd.f32 %v8001_v12, %v7973_v62  ;;  %v7511_v35 = vpop.f32.mrf.mxu1 }
 0x631   : > { %v7967_v29 = vsel %vm7946_vm10, %v7581_v42, 0.0  ;;  %v7583_v46 = vadd.f32 %v16474_v2, %v7511_v35  ;;  %vm8051_vm10 = vcmp.eq.s32.totalorder %v17850_v48, 5 }
 0x632   : > { %v7974_v24 = vadd.f32 %v7967_v29, %v16454_v41  ;;  %v7515_v40 = vpop.f32.mrf.mxu1 }
 0x633   : > { %v8002_v54 = vsel %vm7981_vm2, %v7583_v46, 0.0  ;;  %v7587_v17 = vadd.f32 %v16476_v15, %v7515_v40  ;;  %vm8017_vm2 = vcmp.eq.s32.totalorder %v17851_v59, 4 }
 0x634   : > { %v16566_v13 = vadd.f32 %v8002_v54, %v7974_v24  ;;  %v7517_v2 = vpop.f32.mrf.mxu1 }
 0x635   : > { %v7968_v5 = vsel %vm7947_vm12, %v7587_v17, 0.0  ;;  %v7589_v1 = vadd.f32 %v16478_v44, %v7517_v2  ;;  %vm8052_vm12 = vcmp.eq.s32.totalorder %v17851_v59, 5 }
 0x636   : > { %v7975_v41 = vadd.f32 %v7968_v5, %v16458_v60  ;;  %v7519_v9 = vpop.f32.mrf.mxu1 }
 0x637   : > { %v8003_v23 = vsel %vm7982_vm6, %v7589_v1, 0.0  ;;  %v7591_v15 = vadd.f32 %v16480_v37, %v7519_v9  ;;  %vm8018_vm6 = vcmp.eq.s32.totalorder %v17852_v43, 4 }
 0x638   : > { %v16574_v61 = vadd.f32 %v8003_v23, %v7975_v41  ;;  %v7521_v25 = vpop.f32.mrf.mxu1 }
 0x639   : > { %v7969_v26 = vsel %vm7948_vm11, %v7591_v15, 0.0  ;;  %v7593_v18 = vadd.f32 %v16492_v56, %v7521_v25  ;;  %vm8053_vm11 = vcmp.eq.s32.totalorder %v17852_v43, 5 }
 0x63a   : > { %v7976_v44 = vadd.f32 %v7969_v26, %v16462_v63  ;;  %v7525_v31 = vpop.f32.mrf.mxu1 }
 0x63b   : > { %v8004_v60 = vsel %vm7983_vm0, %v7593_v18, 0.0  ;;  %v7597_v4 = vadd.f32 %v16498_v21, %v7525_v31  ;;  %vm8050_vm0 = vcmp.eq.s32.totalorder %v17849_v50, 5 }
 0x63c   : > { %v16581_v11 = vadd.f32 %v8004_v60, %v7976_v44  ;;  %v7527_v51 = vpop.f32.mrf.mxu1 }
 0x63d   : > { %v7970_v37 = vsel %vm7949_vm8, %v7597_v4, 0.0  ;;  %v7599_v39 = vadd.f32 %v16504_v36, %v7527_v51  ;;  %vm8054_vm8 = vcmp.eq.s32.totalorder %v17853_v16, 5 }
 0x63e   : > { %v7977_v32 = vadd.f32 %v7970_v37, %v16466_v14  ;;  %v7529_v47 = vpop.f32.mrf.mxu1 }
 0x63f   : > { %v8005_v56 = vsel %vm7984_vm14, %v7599_v39, 0.0  ;;  %vm8087_vm14 = vcmp.eq.s32.totalorder %v17851_v59, 6 }
 0x640   : > { %v16586_v0 = vadd.f32 %v8005_v56, %v7977_v32  ;;  %v7530_v63 = vpop.f32.mrf.mxu1 }
 0x648   : > { %v7637_v33 = vpop.f32.mrf.mxu0 }
 0x64a   : > { %v7639_v8 = vpop.f32.mrf.mxu0  ;;  %v7708_v6 = vpop.f32.mrf.mxu1 }
 0x64b   : > { %v7709_v21 = vadd.f32 %v7708_v6, %v7637_v33 }
 0x64c   : > { %v7641_v3 = vpop.f32.mrf.mxu0  ;;  %v7710_v34 = vpop.f32.mrf.mxu1 }
 0x64d   : > { %v8034_v22 = vsel %vm8013_vm1, %v7709_v21, 0.0  ;;  %v7711_v38 = vadd.f32 %v7710_v34, %v7639_v8  ;;  %vm8088_vm1 = vcmp.eq.s32.totalorder %v17852_v43, 6 }
 0x64e   : > { %v8041_v36 = vadd.f32 %v8034_v22, %v16526_v7  ;;  %v7643_v14 = vpop.f32.mrf.mxu0  ;;  %v7712_v49 = vpop.f32.mrf.mxu1 }
 0x64f   : > { %v8069_v19 = vsel %vm8048_vm3, %v7711_v38, 0.0  ;;  %v7713_v57 = vadd.f32 %v7712_v49, %v7641_v3  ;;  %vm8089_vm3 = vcmp.eq.s32.totalorder %v17853_v16, 6 }
 0x650   : > { %v16592_v20 = vadd.f32 %v8069_v19, %v8041_v36  ;;  %v16594_v28 = vpop.f32.mrf.mxu0  ;;  %v7714_v62 = vpop.f32.mrf.mxu1 }
 0x651   : > { %v8035_v10 = vsel %vm8014_vm15, %v7713_v57, 0.0  ;;  %v7715_v12 = vadd.f32 %v7714_v62, %v7643_v14  ;;  %vm8086_vm15 = vcmp.eq.s32.totalorder %v17850_v48, 6 }
 0x652   : > { %v8042_v42 = vadd.f32 %v8035_v10, %v16539_v45  ;;  %v16598_v53 = vpop.f32.mrf.mxu0  ;;  %v7718_v7 = vpop.f32.mrf.mxu1 }
 0x653   : > { %v8070_v35 = vsel %vm8049_vm4, %v7715_v12, 0.0  ;;  %vm8085_vm4 = vcmp.eq.s32.totalorder %v17849_v50, 6 }
 0x654   : > { %v16600_v29 = vadd.f32 %v8070_v35, %v8042_v42  ;;  %v7651_v46 = vpop.f32.mrf.mxu0  ;;  %v16602_v58 = vpop.f32.mrf.mxu1 }
 0x656   : > { %v16604_v24 = vpop.f32.mrf.mxu0  ;;  %v7722_v40 = vpop.f32.mrf.mxu1 }
 0x658   : > { %v7657_v54 = vpop.f32.mrf.mxu0  ;;  %v16606_v17 = vpop.f32.mrf.mxu1 }
 0x65a   : > { %v16608_v2 = vpop.f32.mrf.mxu0  ;;  %v7728_v5 = vpop.f32.mrf.mxu1 }
 0x65c   : > { %v7661_v1 = vpop.f32.mrf.mxu0  ;;  %v7730_v45 = vpop.f32.mrf.mxu1 }
 0x65e   : > { %v7663_v41 = vpop.f32.mrf.mxu0  ;;  %v7732_v9 = vpop.f32.mrf.mxu1 }
 0x65f   : > { %v7733_v12 = vadd.f32 %v7732_v9, %v7661_v1  ;;  %v7723_v1 = vadd.f32 %v7722_v40, %v7651_v46 }
 0x660   : > { %v7667_v23 = vpop.f32.mrf.mxu0  ;;  %v7734_v15 = vpop.f32.mrf.mxu1 }
 0x662   : > { %v7669_v25 = vpop.f32.mrf.mxu0  ;;  %v7738_v26 = vpop.f32.mrf.mxu1 }
 0x663   : > { %v7739_v57 = vadd.f32 %v7738_v26, %v7667_v23  ;;  %v7729_v23 = vadd.f32 %v7728_v5, %v7657_v54  ;;  %v7731_v54 = vadd.f32 %v7730_v45, %v16608_v2  ;;  %v8037_v2 = vsel %vm8016_vm9, %v7723_v1, 0.0  ;;  %v8201_v1 = vld [vmem:[%s16792_s8] sm:$0xff] }
 0x664   : > { %v7671_v18 = vpop.f32.mrf.mxu0  ;;  %v7740_v44 = vpop.f32.mrf.mxu1  ;;  %vm8126_vm9 = vcmask 457728  }
 0x665   : > { %v8040_v26 = vsel %vm8019_vm5, %v7739_v57, 0.0  ;;  %v7741_v18 = vadd.f32 %v7740_v44, %v7669_v25  ;;  %v8038_v46 = vsel %vm8017_vm2, %v7729_v23, 0.0  ;;  %vm8084_vm5 = vcmp.eq.s32.totalorder %v17848_v55, 6 }
 0x666   : > { %v7672_v31 = vpop.f32.mrf.mxu0  ;;  %v7742_v60 = vpop.f32.mrf.mxu1  ;;  %v8047_v5 = vadd.f32 %v8040_v26, %v16586_v0  ;;  %v7725_v0 = vadd.f32 %v16606_v17, %v16604_v24 }
 0x667   : > { %v7719_v60 = vadd.f32 %v7718_v7, %v16594_v28  ;;  %v8075_v40 = vsel %vm8054_vm8, %v7741_v18, 0.0 }
 0x668   : > { %v7743_v4 = vpop.f32.mrf.mxu1 }
 0x66a   : > { %v16610_v51 = vpop.f32.mrf.mxu1 }
 0x66c   : > { %v16612_v37 = vpop.f32.mrf.mxu1 }
 0x66e   : > { %v16614_v39 = vpop.f32.mrf.mxu1 }
 0x670   : > { %v16616_v32 = vpop.f32.mrf.mxu0  ;;  %v16618_v47 = vpop.f32.mrf.mxu1 }
 0x672   : > { %v7845_v56 = vpop.f32.mrf.mxu0  ;;  %v9199_v63 = vpop.f32.mrf.mxu1 }
 0x673   : > { %v8039_v56 = vsel %vm8018_vm6, %v7733_v12, 0.0  ;;  %v8073_v12 = vsel %vm8052_vm12, %v7731_v54, 0.0 }
 0x674   : > { %v16620_v33 = vpop.f32.mrf.mxu0  ;;  %v9200_v8 = vpop.f32.mrf.mxu1  ;;  %v8046_v45 = vadd.f32 %v8039_v56, %v16581_v11  ;;  %v9198_v11 = vadd.f32 %v16618_v47, %v16614_v39  ;;  %v9195_v39 = vadd.f32 %v16612_v37, %v16610_v51  ;;  %v8300_v56 = vld [vmem:[%s16794_s10 + $0x28] sm:$0xff] }
 0x676   : > { %v7848_v6 = vpop.f32.mrf.mxu0  ;;  %v9202_v21 = vpop.f32.mrf.mxu1  ;;  %v7847_v26 = vadd.f32 %v9198_v11, %v16620_v33 }
 0x677   : > { %v7735_v6 = vadd.f32 %v7734_v15, %v7663_v41  ;;  %v8036_v41 = vsel %vm8015_vm13, %v7719_v60, 0.0  ;;  %vm8083_vm13 = vcmp.eq.s32.totalorder %v17847_v27, 6  ;;  %v8118_v27 = vld [vmem:[%s16790_s6] sm:$0xff] }
 0x678   : > { %v16622_v3 = vpop.f32.mrf.mxu0  ;;  %v9203_v34 = vpop.f32.mrf.mxu1  ;;  %v8043_v16 = vadd.f32 %v8036_v41, %v16554_v30  ;;  %v7844_v30 = vadd.f32 %v9195_v39, %v16616_v32 }
 0x679   : > { %v9204_v25 = vadd.f32 %v9203_v34, %v9202_v21  ;;  %v7721_v34 = vadd.f32 %v16602_v58, %v16598_v53 }
 0x67a   : > { %v7853_v22 = vpop.f32.mrf.mxu0  ;;  %v9205_v38 = vpop.f32.mrf.mxu1  ;;  %v8104_v60 = vsel %vm8083_vm13, %v7844_v30, 0.0 }
 0x67b   : > { %v8071_v48 = vsel %vm8050_vm0, %v7721_v34, 0.0  ;;  %v8111_v32 = vadd.f32 %v8104_v60, %v16592_v20  ;;  %v8202_v20 = vld [vmem:[%s16792_s8 + $0x8] sm:$0xff] }
 0x67c   : > { %v7854_v36 = vpop.f32.mrf.mxu0  ;;  %v9206_v14 = vpop.f32.mrf.mxu1 }
 0x67d   : > { %v9207_v22 = vadd.f32 %v9206_v14, %v9205_v38  ;;  %v8074_v14 = vsel %vm8053_vm11, %v7735_v6, 0.0  ;;  %v7855_v17 = vadd.f32 %v9204_v25, %v7854_v36  ;;  %v8299_v6 = vld [vmem:[%s16794_s10 + $0x20] sm:$0xff] }
 0x67e   : > { %v7856_v49 = vpop.f32.mrf.mxu0  ;;  %v9208_v19 = vpop.f32.mrf.mxu1  ;;  %v8081_v53 = vadd.f32 %v8074_v14, %v8046_v45  ;;  %v8295_v25 = vld [vmem:[%s16794_s10] sm:$0xff] }
 0x67f   : > { %v8107_v18 = vsel %vm8086_vm15, %v7855_v17, 0.0 }
 0x680   : > { %v7859_v62 = vpop.f32.mrf.mxu0  ;;  %v9209_v10 = vpop.f32.mrf.mxu1 }
 0x681   : > { %v9210_v31 = vadd.f32 %v9209_v10, %v9208_v19  ;;  %v9201_v19 = vadd.f32 %v9200_v8, %v9199_v63  ;;  %v7860_v57 = vadd.f32 %v9207_v22, %v7859_v62  ;;  %v8045_v10 = vadd.f32 %v8038_v46, %v16574_v61  ;;  %v8298_v22 = vld [vmem:[%s16794_s10 + $0x18] sm:$0xff]  ;;  %v8297_v46 = vld [vmem:[%s16794_s10 + $0x10] sm:$0xff] }
 0x682   : > { %v7861_v42 = vpop.f32.mrf.mxu0  ;;  %v9211_v35 = vpop.f32.mrf.mxu1  ;;  %v8044_v8 = vadd.f32 %v8037_v2, %v16566_v13  ;;  %v8072_v62 = vsel %vm8051_vm10, %v7725_v0, 0.0 }
 0x683   : > { %v8082_v42 = vadd.f32 %v8075_v40, %v8047_v5  ;;  %v7852_v47 = vadd.f32 %v9201_v19, %v16622_v3  ;;  %v8108_v43 = vsel %vm8087_vm14, %v7860_v57, 0.0  ;;  %v8080_v36 = vadd.f32 %v8073_v12, %v8045_v10  ;;  %v8296_v40 = vld [vmem:[%s16794_s10 + $0x8] sm:$0xff] }
 0x684   : > { %v7862_v9 = vpop.f32.mrf.mxu0  ;;  %v9212_v4 = vpop.f32.mrf.mxu1  ;;  %v8079_v51 = vadd.f32 %v8072_v62, %v8044_v8  ;;  %v8078_v3 = vadd.f32 %v8071_v48, %v8043_v16 }
 0x685   : > { %v9213_v49 = vadd.f32 %v9212_v4, %v9211_v35  ;;  %v7863_v44 = vadd.f32 %v9210_v31, %v7862_v9  ;;  %v8115_v59 = vadd.f32 %v8108_v43, %v8080_v36  ;;  %v8106_v37 = vsel %vm8085_vm4, %v7852_v47, 0.0  ;;  %v8302_v9 = vld [vmem:[%s16794_s10 + $0x38] sm:$0xff]  ;;  %v8301_v4 = vld [vmem:[%s16794_s10 + $0x30] sm:$0xff] }
 0x686   : > { %v7864_v28 = vpop.f32.mrf.mxu0  ;;  %v9214_v7 = vpop.f32.mrf.mxu1  ;;  %v8114_v50 = vadd.f32 %v8107_v18, %v8079_v51  ;;  %v8105_v31 = vsel %vm8084_vm5, %v7847_v26, 0.0  ;;  %v8113_v33 = vadd.f32 %v8106_v37, %v8078_v3 }
 0x687   : > { %v8109_v35 = vsel %vm8088_vm1, %v7863_v44, 0.0  ;;  %v8112_v55 = vadd.f32 %v8105_v31, %v16600_v29  ;;  %v8203_v29 = vld [vmem:[%s16792_s8 + $0x10] sm:$0xff]  ;;  %v9169_v44 = vld [vmem:[%s16793_s9] ss:$0 sm:$0xff] }
 0x688   : > { %v7867_v15 = vpop.f32.mrf.mxu0  ;;  %v9215_v38 = vpop.f32.mrf.mxu1  ;;  %v8116_v13 = vadd.f32 %v8109_v35, %v8081_v53  ;;  %9295 = vmatpush3.msra.mxu0 %v8203_v29 }
 0x689   : > { %v7868_v21 = vadd.f32 %v9213_v49, %v7867_v15  ;;  %9296 = vmatprep.subr.mxu0 %v10776_v52  ;;  %v9167_v49 = vld [vmem:[%s16791_s7] ss:$0 sm:$0xff] }
 0x68a   : > { %v7869_v24 = vpop.f32.mrf.mxu0  ;;  %9297 = vmatpush3.msra.mxu0 %v8202_v20  ;;  %v9170_v15 = vld [vmem:[%s16795_s11] ss:$0 sm:$0xff] }
 0x68b   : > { %v8110_v63 = vsel %vm8089_vm3, %v7868_v21, 0.0  ;;  %9298 = vmatprep.subr.mxu0 %v10776_v52 }
 0x68c   : > { %v8117_v61 = vadd.f32 %v8110_v63, %v8082_v42  ;;  %v7870_v58 = vpop.f32.mrf.mxu0  ;;  %9299 = vmatpush3.msra.mxu0 %v8201_v1 }
 0x68e   : > { %v7871_v23 = vpop.f32.mrf.mxu0  ;;  %9252 = vmatpush3.msra.mxu1 %v8117_v61 }
 0x68f   : > { %9253 = vmatprep.subr.mxu1 %v10776_v52 }
 0x690   : > { %9254 = vmatpush3.msra.mxu1 %v8116_v13 }
 0x691   : > { %9255 = vmatprep.subr.mxu1 %v10776_v52 }
 0x692   : > { %9256 = vmatpush3.msra.mxu1 %v8115_v59 }
 0x693   : > { %9257 = vmatprep.subr.mxu1 %v10776_v52 }
 0x694   : > { %9258 = vmatpush3.msra.mxu1 %v8114_v50 }
 0x695   : > { %9259 = vmatprep.subr.mxu1 %v10776_v52 }
 0x696   : > { %9260 = vmatpush3.msra.mxu1 %v8113_v33 }
 0x697   : > { %9261 = vmatprep.subr.mxu1 %v10776_v52 }
 0x698   : > { %9262 = vmatpush3.msra.mxu1 %v8112_v55 }
 0x699   : > { %9263 = vmatprep.subr.mxu1 %v10776_v52 }
 0x69a   : > { %9264 = vmatpush3.msra.mxu1 %v8111_v32 }
 0x69b   : > { %9266 = vmatmul.mubr.msk.f32.vlgmr.msra.gmra.mxu1 %vm8126_vm9, %v8118_v27  ;;  %9303 = vmatprep.subr.mxu1 %v10776_v52 }
 0x69c   : > { %9319 = vmatprep.mubr.msk.f32.mxu1 %vm10777_vm7, %v10776_v52  ;;  %9304 = vmatpush3.msra.mxu1 %v8302_v9  ;;  %vm8310_vm7 = vcmask 523264  }
 0x69d   : > { %9305 = vmatprep.subr.mxu1 %v10776_v52 }
 0x69e   : > { %9306 = vmatpush3.msra.mxu1 %v8301_v4 }
 0x69f   : > { %9307 = vmatprep.subr.mxu1 %v10776_v52 }
 0x6a0   : > { %9308 = vmatpush3.msra.mxu1 %v8300_v56 }
 0x6a1   : > { %9309 = vmatprep.subr.mxu1 %v10776_v52 }
 0x6a2   : > { %9310 = vmatpush3.msra.mxu1 %v8299_v6 }
 0x6a3   : > { %9311 = vmatprep.subr.mxu1 %v10776_v52 }
 0x6a4   : > { %9312 = vmatpush3.msra.mxu1 %v8298_v22 }
 0x6a5   : > { %9313 = vmatprep.subr.mxu1 %v10776_v52 }
 0x6a6   : > { %9314 = vmatpush3.msra.mxu1 %v8297_v46 }
 0x6a7   : > { %9315 = vmatprep.subr.mxu1 %v10776_v52 }
 0x6a8   : > { %9316 = vmatpush3.msra.mxu1 %v8296_v40 }
 0x6a9   : > { %9317 = vmatprep.subr.mxu1 %v10776_v52 }
 0x6aa   : > { %9318 = vmatpush3.msra.mxu1 %v8295_v25 }
 0x75b   : > { %v8196_v54 = vpop.f32.mrf.mxu1 }
 0x75c   : > { %v8197_v5 = vadd.f32 %v9167_v49, %v8196_v54 }
 0x75d   : > { %v9267_v28 = vpop.f32.mrf.mxu1 }
 0x75e   : > { %v8200_v7 = vmax.f32 %v8197_v5, 0.0 }
 0x760   : > { %9301 = vmatmul.mubr.f32.vlgmr.msra.gmra.mxu0 %v8200_v7 }
 0x820   : > { %v8290_v41 = vpop.f32.mrf.mxu0 }
 0x821   : > { %v8291_v2 = vadd.f32 %v9169_v44, %v8290_v41 }
 0x822   : > { %v9302_v0 = vpop.f32.mrf.mxu0 }
 0x823   : > { %v8294_v45 = vmax.f32 %v8291_v2, 0.0 }
 0x825   : > { %9320 = vmatmul.mubr.msk.f32.vlgmr.msra.gmra.mxu1 %vm8310_vm7, %v8294_v45 }
 0x8e5   : > { %v8380_v52 = vpop.f32.mrf.mxu1 }
 0x8e6   : > { %v8381_v38 = vadd.f32 %v9170_v15, %v8380_v52 }
 0x8e7   : > { %v9321_v14 = vpop.f32.mrf.mxu1 }
 0x8e8   : > { %8384 = vst [vmem:[%s409_s28] sm:$0xff] %v8381_v38 }
 0x8e9   : > { %10722 = shalt.err (!%p10719_p3)
}
 0x8ea   : > { %s10723_s17 = scalar_lea.hbm %s16749_s26, 128  ;;  %s10727_s28 = scalar_lea.hbm %s16796_s12, 256 }
 0x8eb   : > { %p10724_p4 = scmp.ne.s32.totalorder %s16749_s26, %s10723_s17  ;;  %p10728_p9 = scmp.lt.s32.totalorder %s16749_s26, %s16796_s12 }
 0x8ec   : > { %p10729_p10 = scmp.lt.s32.totalorder %s10727_s28, %s10723_s17 }
 0x8ed   : > { %p10725_p7 = pnand %p10724_p4, %p10882_p5 }
 0x8ee   : > { %p10730_p11 = por %p10729_p10, %p10728_p9 }
 0x8ef   : > { %p10726_p8 = pneg %p10725_p7 }
 0x8f1   : > { %p10731_p12 = pnand %p10730_p11, %p10726_p8 }
 0x8f3   : > { %10734 = shalt.err (!%p10731_p12)
}
 0x8f4   : > { %9336 = dma.vmem_to_hbm [thread:$0]  (%p10882_p5), %s8400_s23, 128, %s16749_s26, %s8386_s18  }
 0x8f5 PF: > { %p9342_p13 = scmp.ge.s32.totalorder %s10769_s24, 2  ;;  %s8411_s16 = sand.u32 1, %s10757_s21  }
 0x8f6   : > { %s8412_s20 = scalar_lea.sflag [#allocation3], %s8411_s16 }
 0x8f7   : > { %p9339_p0 = pnand %p9342_p13, %p10886_p6 }
 0x8f9   : > { %p9340_p1 = pneg %p9339_p0 }
 0x8fb   : > { %10752 = dma.done.wait (%p9340_p1), %s8412_s20, 128  }
 0x8fc   : > { %10754 = vsyncadd (%p9340_p1), %s8412_s20, 4294967168  ;;  %s17854_s24 = sld [smem:[#allocation6_spill]]  ;;  %s17857_s21 = smov %s10761_s22 }
 0x8fd   : > { %s17855_s25 = sld [smem:[#allocation5_spill]] }
 0x8fe   : > { %s17856_s23 = sld [smem:[#allocation7_spill]] }
 0x902   : > { %p22_p2 = scmp.ge.s32.totalorder %s17854_s24, 4  }
 0x903   : > { %s17858_s22 = smov %s17855_s25 }
 0x904   :  { %24 = sbr.rel (!%p22_p2) target bundleno = 3 (0x3), region = 103 }
 0x909   :  { %8417 = vsyncpa [#allocation3], 1 }
 0x90a   :  { %8419 = vsyncpa [#allocation3 + $0x1], 1 }

</bundles_post_ra>
